<compile_context>
chip_gen: v7x
topology: tpu7x:2x2x1
jax: 0.10.0
libtpu: 0.0.40
codegen_flags: <defaults>
</compile_context>

<pallas_src>
import functools
from types import SimpleNamespace

import jax
import jax.numpy as jnp
import numpy as np
from jax.experimental import pallas as pl
from jax.experimental.pallas import tpu as pltpu


# --------------------------------------------------------------------------- #
# In-kernel helpers
# --------------------------------------------------------------------------- #
def _channel_layernorm(x, g, b, eps):
    """The spec's BCHW LayerNorm: torch.var_mean over channels (unbiased var)."""
    c = x.shape[-1]
    mean = jnp.mean(x, axis=-1, keepdims=True)
    d = x - mean
    var = jnp.sum(d * d, axis=-1, keepdims=True) * (1.0 / (c - 1))
    return d * jax.lax.rsqrt(var + eps) * g + b


def _gelu_tanh(x):
    # tanh-approx GELU: the transcendental goes to the EUP slot instead of a long
    # VALU polynomial; abs error ~1e-3, far inside the test tolerance.
    c0 = 0.7978845608028654  # sqrt(2/pi)
    return 0.5 * x * (1.0 + jnp.tanh(c0 * (x + 0.044715 * x * x * x)))


# --------------------------------------------------------------------------- #
# Kernel 1: fused channel-LayerNorm + linear (the 1x1 qkv conv), bf16 output
# --------------------------------------------------------------------------- #
def _ln_linear_kernel(x_ref, g_ref, b_ref, w_ref, pb_ref, o_ref, *, eps):
    xn = _channel_layernorm(x_ref[...], g_ref[...], b_ref[...], eps)
    acc = jnp.dot(xn.astype(w_ref.dtype), w_ref[...],
                  preferred_element_type=jnp.float32)
    o_ref[...] = (acc + pb_ref[...]).astype(o_ref.dtype)


def ln_linear(x, gamma, beta, w, bias, *, eps, block_m, vmem_limit,
              out_dtype=jnp.bfloat16):
    """out = LayerNorm_C(x) @ w + bias.  x:(M,C) f32, w:(C,E_pad) bf16, bias:(1,E_pad)."""
    m, c = x.shape
    e = w.shape[1]
    tm = min(block_m, m)
    return pl.pallas_call(
        functools.partial(_ln_linear_kernel, eps=eps),
        out_shape=jax.ShapeDtypeStruct((m, e), out_dtype),
        grid_spec=pl.GridSpec(
            grid=(pl.cdiv(m, tm),),
            in_specs=[
                pl.BlockSpec((tm, c), lambda i: (i, 0)),
                pl.BlockSpec((1, c), lambda i: (0, 0)),
                pl.BlockSpec((1, c), lambda i: (0, 0)),
                pl.BlockSpec((c, e), lambda i: (0, 0)),
                pl.BlockSpec((1, e), lambda i: (0, 0)),
            ],
            out_specs=pl.BlockSpec((tm, e), lambda i: (i, 0)),
        ),
        compiler_params=pltpu.CompilerParams(
            dimension_semantics=("parallel",),
            vmem_limit_bytes=vmem_limit),
        cost_estimate=pl.CostEstimate(
            flops=2 * m * c * e, transcendentals=m,
            bytes_accessed=4 * m * c + 2 * c * e + 2 * m * e),
    )(x, gamma, beta, w, bias)


# --------------------------------------------------------------------------- #
# Kernel 2: batched window multi-head attention + output projection
# --------------------------------------------------------------------------- #
def _window_attn_kernel(qkv_ref, bias_ref, wp_ref, o_ref, *, num_heads, head_dim):
    wb, n, _ = qkv_ref.shape
    e = num_heads * head_dim
    qkv = qkv_ref[...]                       # (WB, N, E_pad) bf16 — one dense DMA
    bias = bias_ref[...]                     # (WB, nh, N, N) f32
    ctx = []
    for h in range(num_heads):               # small; unrolled at trace time
        lo = h * head_dim
        q = qkv[:, :, lo:lo + head_dim]                      # (WB, N, hd) bf16
        k = qkv[:, :, e + lo:e + lo + head_dim]              # (WB, N, hd) bf16
        v = qkv[:, :, 2 * e + lo:2 * e + lo + head_dim]      # (WB, N, hd) bf16
        # qk scale is pre-folded into the q/k columns of w_qkv (no per-head VPU mul).
        s = jnp.einsum("wqd,wkd->wqk", q, k,
                       preferred_element_type=jnp.float32)   # (WB, N, N) f32
        s = s + bias[:, h]
        s = s - jnp.max(s, axis=-1, keepdims=True)
        p = jnp.exp(s)
        p = p * pl.reciprocal(jnp.sum(p, axis=-1, keepdims=True), approx=True)
        ctx.append(jnp.einsum("wqk,wkd->wqd", p.astype(qkv.dtype), v,
                              preferred_element_type=jnp.float32))
    # Head-packed context -> single projection matmul with contraction nh*hd.
    ctx = jnp.concatenate(ctx, axis=-1).reshape(wb * n, e)
    out = jnp.dot(ctx.astype(wp_ref.dtype), wp_ref[...],
                  preferred_element_type=jnp.float32)
    o_ref[...] = out.reshape(wb, n, o_ref.shape[-1]).astype(o_ref.dtype)


def window_attention(qkv, bias, w_proj, *, num_heads, head_dim, hn, wn,
                     vmem_limit, max_windows_per_step=16):
    """qkv:(nWin, N, E_pad) bf16 window-ordered; bias:(nWin_per_img, nh, N, N) f32;
    w_proj:(nh*hd, C) bf16."""
    n_win, n, e_pad = qkv.shape
    c = w_proj.shape[1]
    e = num_heads * head_dim
    n_win_img = hn * wn
    if n_win_img <= max_windows_per_step:
        wb = n_win_img                               # all of one image's windows / step
        bias_map = lambda i: (0, 0, 0, 0)
    else:
        wb = wn                                      # one row of windows / step
        bias_map = lambda i: (i % hn, 0, 0, 0)
    n_steps = n_win // wb
    flops = n_win * (4 * num_heads * n * n * head_dim + 2 * n * e * c)
    return pl.pallas_call(
        functools.partial(_window_attn_kernel,
                          num_heads=num_heads, head_dim=head_dim),
        out_shape=jax.ShapeDtypeStruct((n_win, n, c), jnp.float32),
        grid_spec=pl.GridSpec(
            grid=(n_steps,),
            in_specs=[
                pl.BlockSpec((wb, n, e_pad), lambda i: (i, 0, 0)),
                pl.BlockSpec((wb, num_heads, n, n), bias_map),
                pl.BlockSpec((e, c), lambda i: (0, 0)),
            ],
            out_specs=pl.BlockSpec((wb, n, c), lambda i: (i, 0, 0)),
        ),
        compiler_params=pltpu.CompilerParams(
            dimension_semantics=("parallel",),
            vmem_limit_bytes=vmem_limit),
        cost_estimate=pl.CostEstimate(
            flops=flops,
            transcendentals=n_win * num_heads * n * n,
            bytes_accessed=(n_win * n * e_pad * 2
                            + n_steps * wb * num_heads * n * n * 4
                            + n_win * n * c * 4 + e * c * 2)),
    )(qkv, bias, w_proj)


# --------------------------------------------------------------------------- #
# Kernel 3: fused attention-residual + LayerNorm + MLP (fc1->GELU->fc2) + residual
# --------------------------------------------------------------------------- #
def _mlp_block_kernel(s_ref, a_ref, g_ref, b_ref, w1_ref, w2_ref, o_ref, *, eps):
    x = s_ref[...] + a_ref[...]               # fused attention residual (f32)
    xn = _channel_layernorm(x, g_ref[...], b_ref[...], eps)
    h = jnp.dot(xn.astype(w1_ref.dtype), w1_ref[...],
                preferred_element_type=jnp.float32)
    h = _gelu_tanh(h)
    y = jnp.dot(h.astype(w2_ref.dtype), w2_ref[...],
                preferred_element_type=jnp.float32)
    o_ref[...] = (x + y).astype(o_ref.dtype)


def mlp_block(shortcut, attn, gamma, beta, w1, w2, *, eps, block_m, vmem_limit):
    """out = x + GELU(LayerNorm_C(x) @ w1) @ w2, where x = shortcut + attn."""
    m, c = shortcut.shape
    hidden = w1.shape[1]
    tm = min(block_m, m)
    return pl.pallas_call(
        functools.partial(_mlp_block_kernel, eps=eps),
        out_shape=jax.ShapeDtypeStruct((m, c), jnp.float32),
        grid_spec=pl.GridSpec(
            grid=(pl.cdiv(m, tm),),
            in_specs=[
                pl.BlockSpec((tm, c), lambda i: (i, 0)),
                pl.BlockSpec((tm, c), lambda i: (i, 0)),
                pl.BlockSpec((1, c), lambda i: (0, 0)),
                pl.BlockSpec((1, c), lambda i: (0, 0)),
                pl.BlockSpec((c, hidden), lambda i: (0, 0)),
                pl.BlockSpec((hidden, c), lambda i: (0, 0)),
            ],
            out_specs=pl.BlockSpec((tm, c), lambda i: (i, 0)),
        ),
        compiler_params=pltpu.CompilerParams(
            dimension_semantics=("parallel",),
            vmem_limit_bytes=vmem_limit),
        cost_estimate=pl.CostEstimate(
            flops=4 * m * c * hidden, transcendentals=m * hidden,
            bytes_accessed=4 * 3 * m * c + 2 * 2 * c * hidden),
    )(shortcut, attn, gamma, beta, w1, w2)


# --------------------------------------------------------------------------- #
# Static tables (relative-position index, shifted-window attention mask)
# --------------------------------------------------------------------------- #
def _build_rel_index(ws):
    coords = np.stack(np.meshgrid(np.arange(ws), np.arange(ws), indexing="ij"))
    flat = coords.reshape(2, -1)                          # (2, N)
    rel = (flat[:, :, None] - flat[:, None, :]).transpose(1, 2, 0).astype(np.int32)
    rel[..., 0] += ws - 1
    rel[..., 1] += ws - 1
    rel[..., 0] *= 2 * ws - 1
    return rel.sum(-1)                                     # (N, N)


def _build_attn_mask(H, W, ws, shift):
    img = np.zeros((H, W), np.float32)
    cnt = 0
    for hs in (slice(0, -ws), slice(-ws, -shift), slice(-shift, None)):
        for wsl in (slice(0, -ws), slice(-ws, -shift), slice(-shift, None)):
            img[hs, wsl] = cnt
            cnt += 1
    mw = img.reshape(H // ws, ws, W // ws, ws).transpose(0, 2, 1, 3)
    mw = mw.reshape(-1, ws * ws)
    am = mw[:, None, :] - mw[:, :, None]
    return jnp.asarray(np.where(am != 0, -100.0, 0.0), jnp.float32)   # (nW, N, N)


# --------------------------------------------------------------------------- #
# Full Block forward (jit'ed): Pallas kernels + plain-JAX layout glue
# --------------------------------------------------------------------------- #
def block_forward(kparams, x, cfg):
    b, c, hgt, wid = x.shape
    ws, shift = cfg.window_size, cfg.shift_size
    nh, hd = cfg.num_heads, cfg.head_dim
    n = ws * ws
    hn, wn = hgt // ws, wid // ws

    xt = jnp.transpose(x, (0, 2, 3, 1)).astype(jnp.float32)          # (B, H, W, C)
    if shift > 0:
        xt = jnp.roll(xt, (-shift, -shift), axis=(1, 2))
    # Window partition BEFORE the kernels: LN1/qkv/LN2/MLP are per-pixel, so the whole
    # block runs in window-token order; only one permutation pass is paid on the way in
    # (fused with the NCHW->NHWC transpose) and one on the way out.
    xw = xt.reshape(b, hn, ws, wn, ws, c).transpose(0, 1, 3, 2, 4, 5)
    xw = xw.reshape(b * hn * wn * n, c)                               # (M, C) f32

    # Kernel 1: LN1 + 1x1 qkv conv (qk scale pre-folded into the weights), bf16 out.
    qkv = ln_linear(xw, kparams["g1"], kparams["b1"], kparams["w_qkv"],
                    kparams["b_qkv"], eps=cfg.eps, block_m=cfg.block_m,
                    vmem_limit=cfg.vmem_limit_bytes)
    qkv = qkv.reshape(b * hn * wn, n, qkv.shape[-1])                  # free view

    # Kernel 2: batched shifted-window attention + projection.
    attn = window_attention(qkv, kparams["bias"], kparams["w_proj"],
                            num_heads=nh, head_dim=hd, hn=hn, wn=wn,
                            vmem_limit=cfg.vmem_limit_bytes)
    attn = attn.reshape(b * hn * wn * n, c)

    # Kernel 3: attention residual + LN2 + MLP + residual (still window-token order).
    out_w = mlp_block(xw, attn, kparams["g2"], kparams["b2"], kparams["w1"],
                      kparams["w2"], eps=cfg.eps, block_m=cfg.block_m,
                      vmem_limit=cfg.vmem_limit_bytes)

    # Window reverse + un-roll + NHWC->NCHW: one fused XLA permutation pass.
    out = out_w.reshape(b, hn, wn, ws, ws, c).transpose(0, 1, 3, 2, 4, 5)
    out = out.reshape(b, hgt, wid, c)
    if shift > 0:
        out = jnp.roll(out, (shift, shift), axis=(1, 2))
    return jnp.transpose(out, (0, 3, 1, 2))                           # back to NCHW


class BlockPallas:
    """Pallas equivalent of the PyTorch Swin `Block` (eval mode, norm_layer=LayerNorm)."""

    def __init__(self, dim, input_resolution, num_heads, window_size=7,
                 shift_size=0, head_dim_ratio=1.0, mlp_ratio=4.0, qkv_bias=False,
                 qk_scale=None, eps=1e-5, block_m=256,
                 vmem_limit_bytes=48 * 1024 * 1024, key=jax.random.PRNGKey(0)):
        if min(input_resolution) <= window_size:
            shift_size = 0
            window_size = min(input_resolution)
        assert input_resolution[0] % window_size == 0
        assert input_resolution[1] % window_size == 0

        head_dim = int(dim // num_heads * head_dim_ratio)
        hidden = int(dim * mlp_ratio)
        e = num_heads * head_dim
        qkv_out = 3 * e
        # NOTE: the spec uses qk_scale as an EXPONENT (head_dim ** qk_scale) applied to
        # both q and k; reproduced exactly here.
        scale_exp = -0.25 if qk_scale is None else qk_scale
        scale = float(head_dim ** scale_exp)
        ws = window_size
        n = ws * ws
        hn = input_resolution[0] // ws
        wn = input_resolution[1] // ws

        ks = jax.random.split(key, 10)

        def nrm(k, shape, s):
            return jax.random.normal(k, shape, jnp.float32) * s

        params = {
            "g1": 1.0 + 0.1 * nrm(ks[0], (1, dim), 1.0),
            "b1": 0.1 * nrm(ks[1], (1, dim), 1.0),
            "g2": 1.0 + 0.1 * nrm(ks[2], (1, dim), 1.0),
            "b2": 0.1 * nrm(ks[3], (1, dim), 1.0),
            "w_qkv": nrm(ks[4], (dim, qkv_out), 0.1),
            "b_qkv": (0.1 * nrm(ks[5], (1, qkv_out), 1.0) if qkv_bias
                      else jnp.zeros((1, qkv_out), jnp.float32)),
            "w_proj": nrm(ks[6], (e, dim), 0.1),
            "rel_table": nrm(ks[7], ((2 * ws - 1) ** 2, num_heads), 0.02),
            "w1": nrm(ks[8], (dim, hidden), 0.1),
            "w2": nrm(ks[9], (hidden, dim), 0.1),
        }
        rel_index = _build_rel_index(ws)
        if shift_size > 0:
            params["attn_mask"] = _build_attn_mask(
                input_resolution[0], input_resolution[1], ws, shift_size)
        self.params = params          # raw params (used by the reference)

        # --- derive kernel-layout params once (off the hot path) --------------- #
        # Fold the qk scale into the q/k columns of the qkv conv weight & bias.
        col_scale = jnp.concatenate([jnp.full((e,), scale, jnp.float32),
                                     jnp.full((e,), scale, jnp.float32),
                                     jnp.ones((e,), jnp.float32)])
        w_qkv = params["w_qkv"] * col_scale[None, :]
        b_qkv = params["b_qkv"] * col_scale[None, :]
        # Zero-pad qkv output columns to a multiple of 128 so kernel-1 stores and the
        # attention kernel's qkv DMA are lane-dense; padded columns are never read.
        e_pad = ((qkv_out + 127) // 128) * 128
        pad = e_pad - qkv_out
        if pad:
            w_qkv = jnp.pad(w_qkv, ((0, 0), (0, pad)))
            b_qkv = jnp.pad(b_qkv, ((0, 0), (0, pad)))

        # Pre-fold relative-position bias (+ shift mask) into one per-window tensor.
        rel = params["rel_table"][rel_index.reshape(-1)]
        rel = rel.reshape(n, n, num_heads).transpose(2, 0, 1)           # (nh, N, N)
        if shift_size > 0:
            bias = rel[None] + params["attn_mask"][:, None]             # (nW, nh, N, N)
        else:
            bias = jnp.broadcast_to(rel[None], (hn * wn, num_heads, n, n))
        bias = jnp.asarray(bias, jnp.float32)

        self.kparams = {
            "g1": params["g1"], "b1": params["b1"],
            "g2": params["g2"], "b2": params["b2"],
            "w_qkv": w_qkv.astype(jnp.bfloat16), "b_qkv": b_qkv,
            "w_proj": params["w_proj"].astype(jnp.bfloat16),
            "w1": params["w1"].astype(jnp.bfloat16),
            "w2": params["w2"].astype(jnp.bfloat16),
            "bias": bias,
        }

        self.cfg = SimpleNamespace(
            window_size=ws, shift_size=shift_size, num_heads=num_heads,
            head_dim=head_dim, scale=scale, eps=eps, block_m=block_m,
            vmem_limit_bytes=vmem_limit_bytes, rel_index=rel_index)
        self._forward = jax.jit(functools.partial(block_forward, cfg=self.cfg))
        # TODO(synk): attn_disabled=True / spatial_conv=True (grouped 3x3 Mlp) variants
        # and training-mode Dropout/DropPath are not implemented (defaults are identity).

    def __call__(self, x):
        return self._forward(self.kparams, x)


# --------------------------------------------------------------------------- #
# Plain-JAX reference (faithful transcription of the PyTorch forward, f32)
# --------------------------------------------------------------------------- #
def block_reference(x, params, cfg):
    b, c, hgt, wid = x.shape
    ws, shift = cfg.window_size, cfg.shift_size
    nh, hd = cfg.num_heads, cfg.head_dim
    n = ws * ws
    hn, wn = hgt // ws, wid // ws
    n_win = hn * wn
    eps = cfg.eps

    def ln(t, g, b_):
        mean = jnp.mean(t, axis=1, keepdims=True)
        var = jnp.sum((t - mean) ** 2, axis=1, keepdims=True) / (c - 1)
        return ((t - mean) / jnp.sqrt(var + eps) * g.reshape(1, c, 1, 1)
                + b_.reshape(1, c, 1, 1))

    def conv1x1(t, w):                                  # w: (Cin, Cout)
        return jnp.einsum("io,bihw->bohw", w, t)

    out = x.astype(jnp.float32)
    shortcut = out
    t = ln(out, params["g1"], params["b1"])
    if shift > 0:
        t = jnp.roll(t, (-shift, -shift), axis=(2, 3))
    tw = t.reshape(b, c, hn, ws, wn, ws).transpose(0, 2, 4, 1, 3, 5)
    tw = tw.reshape(-1, c, ws, ws)                                   # window_partition
    bw = tw.shape[0]
    qkv = conv1x1(tw, params["w_qkv"]) + params["b_qkv"].reshape(1, -1, 1, 1)
    qkv = qkv.reshape(bw, 3, nh, hd, n).transpose(1, 0, 2, 4, 3)
    q, k, v = qkv[0], qkv[1], qkv[2]
    attn = jnp.einsum("bhnd,bhmd->bhnm", q * cfg.scale, k * cfg.scale)
    rel = params["rel_table"][cfg.rel_index.reshape(-1)]
    rel = rel.reshape(n, n, nh).transpose(2, 0, 1)
    attn = attn + rel[None]
    if shift > 0:
        attn = (attn.reshape(bw // n_win, n_win, nh, n, n)
                + params["attn_mask"][None, :, None])
        attn = attn.reshape(bw, nh, n, n)
    attn = jax.nn.softmax(attn, axis=-1)
    o = jnp.einsum("bhnm,bhmd->bhnd", attn, v)
    o = o.transpose(0, 1, 3, 2).reshape(bw, nh * hd, ws, ws)
    o = conv1x1(o, params["w_proj"])
    o = o.reshape(b, hn, wn, c, ws, ws).transpose(0, 3, 1, 4, 2, 5)
    o = o.reshape(b, c, hgt, wid)                                    # window_reverse
    if shift > 0:
        o = jnp.roll(o, (shift, shift), axis=(2, 3))
    out = shortcut + o

    t = ln(out, params["g2"], params["b2"])
    h = conv1x1(t, params["w1"])
    h = 0.5 * h * (1.0 + jax.scipy.special.erf(h / jnp.sqrt(2.0)))
    y = conv1x1(h, params["w2"])
    return out + y


# ---------------------------------- main ----------------------------------- #
if __name__ == "__main__":
    root = jax.random.PRNGKey(0)
    k_x, k_p1, k_p2 = jax.random.split(root, 3)

    B, C, H, W = 2, 32, 16, 16
    num_heads, window_size = 4, 8
    x = jax.random.normal(k_x, (B, C, H, W), jnp.float32)

    def check(block, inp):
        out = jax.block_until_ready(block(inp))
        ref = block_reference(inp, block.params, block.cfg)
        assert out.shape == inp.shape, out.shape
        err = float(jnp.max(jnp.abs(out - ref)) / (jnp.max(jnp.abs(ref)) + 1e-6))
        assert err < 2e-2, f"mismatch vs reference: rel_err={err}"

    # Plain window-attention block.
    check(BlockPallas(dim=C, input_resolution=(H, W), num_heads=num_heads,
                      window_size=window_size, shift_size=0, mlp_ratio=4.0,
                      qkv_bias=False, key=k_p1), x)
    # Shifted-window block (exercises roll + attention-mask path + qkv bias).
    check(BlockPallas(dim=C, input_resolution=(H, W), num_heads=num_heads,
                      window_size=window_size, shift_size=2, mlp_ratio=4.0,
                      qkv_bias=True, key=k_p2), x)

    print("KERNEL_OK")
</pallas_src>

<mosaic_0001>
module attributes {stable_mosaic.version = 11 : i64} {
  func.func @_ln_linear_kernel(%arg0: i32, %arg1: memref<256x32xf32, #tpu.memory_space<vmem>>, %arg2: memref<1x32xf32, #tpu.memory_space<vmem>>, %arg3: memref<1x32xf32, #tpu.memory_space<vmem>>, %arg4: memref<32x128xbf16, #tpu.memory_space<vmem>>, %arg5: memref<1x128xf32, #tpu.memory_space<vmem>>, %arg6: memref<256x128xbf16, #tpu.memory_space<vmem>>) attributes {dimension_semantics = [#tpu.dimension_semantics<parallel>], iteration_bounds = array<i64: 2>, scalar_prefetch = 0 : i64, scratch_operands = 0 : i64, tpu.core_type = #tpu.core_type<tc>, window_params = [{transform_indices = @transform_0, window_bounds = array<i64: 256, 32>}, {pipeline_mode = #tpu.pipeline_mode<synchronous>, transform_indices = @transform_1, window_bounds = array<i64: 1, 32>}, {pipeline_mode = #tpu.pipeline_mode<synchronous>, transform_indices = @transform_2, window_bounds = array<i64: 1, 32>}, {pipeline_mode = #tpu.pipeline_mode<synchronous>, transform_indices = @transform_3, window_bounds = array<i64: 32, 128>}, {pipeline_mode = #tpu.pipeline_mode<synchronous>, transform_indices = @transform_4, window_bounds = array<i64: 1, 128>}, {transform_indices = @transform_5, window_bounds = array<i64: 256, 128>}]} {
    %c0 = arith.constant 0 : index
    %c0_0 = arith.constant 0 : index
    %0 = vector.load %arg1[%c0, %c0_0] : memref<256x32xf32, #tpu.memory_space<vmem>>, vector<256x32xf32>
    %c0_1 = arith.constant 0 : index
    %c0_2 = arith.constant 0 : index
    %1 = vector.load %arg2[%c0_1, %c0_2] : memref<1x32xf32, #tpu.memory_space<vmem>>, vector<1x32xf32>
    %c0_3 = arith.constant 0 : index
    %c0_4 = arith.constant 0 : index
    %2 = vector.load %arg3[%c0_3, %c0_4] : memref<1x32xf32, #tpu.memory_space<vmem>>, vector<1x32xf32>
    %cst = arith.constant dense<0.000000e+00> : vector<256xf32>
    %3 = vector.multi_reduction <add>, %0, %cst [1] : vector<256x32xf32> to vector<256xf32>
    %4 = vector.shape_cast %3 : vector<256xf32> to vector<256x1xf32>
    %cst_5 = arith.constant 3.200000e+01 : f32
    %5 = vector.broadcast %cst_5 : f32 to vector<256x1xf32>
    %6 = arith.divf %4, %5 : vector<256x1xf32>
    %7 = vector.broadcast %6 : vector<256x1xf32> to vector<256x32xf32>
    %8 = arith.subf %0, %7 : vector<256x32xf32>
    %9 = arith.mulf %8, %8 : vector<256x32xf32>
    %cst_6 = arith.constant dense<0.000000e+00> : vector<256xf32>
    %10 = vector.multi_reduction <add>, %9, %cst_6 [1] : vector<256x32xf32> to vector<256xf32>
    %11 = vector.shape_cast %10 : vector<256xf32> to vector<256x1xf32>
    %cst_7 = arith.constant 0.0322580636 : f32
    %12 = vector.broadcast %cst_7 : f32 to vector<256x1xf32>
    %13 = arith.mulf %11, %12 : vector<256x1xf32>
    %cst_8 = arith.constant 9.99999974E-6 : f32
    %14 = vector.broadcast %cst_8 : f32 to vector<256x1xf32>
    %15 = arith.addf %13, %14 : vector<256x1xf32>
    %16 = math.rsqrt %15 : vector<256x1xf32>
    %17 = vector.broadcast %16 : vector<256x1xf32> to vector<256x32xf32>
    %18 = arith.mulf %8, %17 : vector<256x32xf32>
    %19 = vector.broadcast %1 : vector<1x32xf32> to vector<256x32xf32>
    %20 = arith.mulf %18, %19 : vector<256x32xf32>
    %21 = vector.broadcast %2 : vector<1x32xf32> to vector<256x32xf32>
    %22 = arith.addf %20, %21 : vector<256x32xf32>
    %23 = arith.truncf %22 : vector<256x32xf32> to vector<256x32xbf16>
    %c0_9 = arith.constant 0 : index
    %c0_10 = arith.constant 0 : index
    %24 = vector.load %arg4[%c0_9, %c0_10] : memref<32x128xbf16, #tpu.memory_space<vmem>>, vector<32x128xbf16>
    %cst_11 = arith.constant dense<0.000000e+00> : vector<256x128xf32>
    %25 = tpu.matmul %23, %24, %cst_11 {dimension_numbers = #tpu.dot_dimension_numbers<[1], [0], [0], [1], [0, 0, 1, 1], [], []>} : vector<256x32xbf16>, vector<32x128xbf16>, vector<256x128xf32> -> vector<256x128xf32>
    %c0_12 = arith.constant 0 : index
    %c0_13 = arith.constant 0 : index
    %26 = vector.load %arg5[%c0_12, %c0_13] : memref<1x128xf32, #tpu.memory_space<vmem>>, vector<1x128xf32>
    %27 = vector.broadcast %26 : vector<1x128xf32> to vector<256x128xf32>
    %28 = arith.addf %25, %27 : vector<256x128xf32>
    %29 = arith.truncf %28 : vector<256x128xf32> to vector<256x128xbf16>
    %c0_14 = arith.constant 0 : index
    %c0_15 = arith.constant 0 : index
    %30 = vector.load %arg6[%c0_14, %c0_15] : memref<256x128xbf16, #tpu.memory_space<vmem>>, vector<256x128xbf16>
    tpu.vector_store %arg6[%c0_14, %c0_15], %29 {strides = array<i32>} : memref<256x128xbf16, #tpu.memory_space<vmem>>, vector<256x128xbf16>,
    return
  }
  func.func @transform_0(%arg0: i32) -> (i32, i32) {
    %c0_i32 = arith.constant 0 : i32
    %c0_i32_0 = arith.constant 0 : i32
    return %arg0, %c0_i32 : i32, i32
  }
  func.func @transform_1(%arg0: i32) -> (i32, i32) {
    %c0_i32 = arith.constant 0 : i32
    %c0_i32_0 = arith.constant 0 : i32
    %c0_i32_1 = arith.constant 0 : i32
    return %c0_i32, %c0_i32_0 : i32, i32
  }
  func.func @transform_2(%arg0: i32) -> (i32, i32) {
    %c0_i32 = arith.constant 0 : i32
    %c0_i32_0 = arith.constant 0 : i32
    %c0_i32_1 = arith.constant 0 : i32
    return %c0_i32, %c0_i32_0 : i32, i32
  }
  func.func @transform_3(%arg0: i32) -> (i32, i32) {
    %c0_i32 = arith.constant 0 : i32
    %c0_i32_0 = arith.constant 0 : i32
    %c0_i32_1 = arith.constant 0 : i32
    return %c0_i32, %c0_i32_0 : i32, i32
  }
  func.func @transform_4(%arg0: i32) -> (i32, i32) {
    %c0_i32 = arith.constant 0 : i32
    %c0_i32_0 = arith.constant 0 : i32
    %c0_i32_1 = arith.constant 0 : i32
    return %c0_i32, %c0_i32_0 : i32, i32
  }
  func.func @transform_5(%arg0: i32) -> (i32, i32) {
    %c0_i32 = arith.constant 0 : i32
    %c0_i32_0 = arith.constant 0 : i32
    return %arg0, %c0_i32 : i32, i32
  }
}

module attributes {stable_mosaic.version = 11 : i64} {
  func.func @_window_attn_kernel(%arg0: i32, %arg1: memref<4x64x128xbf16, #tpu.memory_space<vmem>>, %arg2: memref<4x4x64x64xf32, #tpu.memory_space<vmem>>, %arg3: memref<32x32xbf16, #tpu.memory_space<vmem>>, %arg4: memref<4x64x32xf32, #tpu.memory_space<vmem>>) attributes {dimension_semantics = [#tpu.dimension_semantics<parallel>], iteration_bounds = array<i64: 2>, scalar_prefetch = 0 : i64, scratch_operands = 0 : i64, tpu.core_type = #tpu.core_type<tc>, window_params = [{transform_indices = @transform_0, window_bounds = array<i64: 4, 64, 128>}, {pipeline_mode = #tpu.pipeline_mode<synchronous>, transform_indices = @transform_1, window_bounds = array<i64: 4, 4, 64, 64>}, {pipeline_mode = #tpu.pipeline_mode<synchronous>, transform_indices = @transform_2, window_bounds = array<i64: 32, 32>}, {transform_indices = @transform_3, window_bounds = array<i64: 4, 64, 32>}]} {
    %c0 = arith.constant 0 : index
    %c0_0 = arith.constant 0 : index
    %c0_1 = arith.constant 0 : index
    %0 = vector.load %arg1[%c0, %c0_0, %c0_1] : memref<4x64x128xbf16, #tpu.memory_space<vmem>>, vector<4x64x128xbf16>
    %c0_2 = arith.constant 0 : index
    %c0_3 = arith.constant 0 : index
    %c0_4 = arith.constant 0 : index
    %c0_5 = arith.constant 0 : index
    %1 = vector.load %arg2[%c0_2, %c0_3, %c0_4, %c0_5] : memref<4x4x64x64xf32, #tpu.memory_space<vmem>>, vector<4x4x64x64xf32>
    %2 = vector.extract_strided_slice %0 {offsets = [0, 0, 0], sizes = [4, 64, 8], strides = [1, 1, 1]} : vector<4x64x128xbf16> to vector<4x64x8xbf16>
    %3 = vector.extract_strided_slice %0 {offsets = [0, 0, 32], sizes = [4, 64, 8], strides = [1, 1, 1]} : vector<4x64x128xbf16> to vector<4x64x8xbf16>
    %4 = vector.extract_strided_slice %0 {offsets = [0, 0, 64], sizes = [4, 64, 8], strides = [1, 1, 1]} : vector<4x64x128xbf16> to vector<4x64x8xbf16>
    "tpu.trace_start"() <{level = 10 : i32, message = "wqd,wkd->wqk"}> : () -> ()
    %cst = arith.constant dense<0.000000e+00> : vector<4x64x64xf32>
    %5 = tpu.matmul %2, %3, %cst {dimension_numbers = #tpu.dot_dimension_numbers<[2], [2], [1], [1], [0, 0, 0, 1, 1, 1], [0], [0]>} : vector<4x64x8xbf16>, vector<4x64x8xbf16>, vector<4x64x64xf32> -> vector<4x64x64xf32>
    "tpu.trace_stop"() : () -> ()
    %6 = vector.extract_strided_slice %1 {offsets = [0, 0, 0, 0], sizes = [4, 1, 64, 64], strides = [1, 1, 1, 1]} : vector<4x4x64x64xf32> to vector<4x1x64x64xf32>
    %7 = vector.shape_cast %6 : vector<4x1x64x64xf32> to vector<4x64x64xf32>
    %8 = arith.addf %5, %7 : vector<4x64x64xf32>
    %cst_6 = arith.constant dense<0xFF800000> : vector<4x64xf32>
    %9 = vector.multi_reduction <maximumf>, %8, %cst_6 [2] : vector<4x64x64xf32> to vector<4x64xf32>
    %10 = vector.shape_cast %9 : vector<4x64xf32> to vector<4x64x1xf32>
    %11 = vector.broadcast %10 : vector<4x64x1xf32> to vector<4x64x64xf32>
    %12 = arith.subf %8, %11 : vector<4x64x64xf32>
    %13 = math.exp %12 : vector<4x64x64xf32>
    %cst_7 = arith.constant dense<0.000000e+00> : vector<4x64xf32>
    %14 = vector.multi_reduction <add>, %13, %cst_7 [2] : vector<4x64x64xf32> to vector<4x64xf32>
    %15 = vector.shape_cast %14 : vector<4x64xf32> to vector<4x64x1xf32>
    %16 = tpu.reciprocal %15 {approx = true} : vector<4x64x1xf32> -> vector<4x64x1xf32>
    %17 = vector.broadcast %16 : vector<4x64x1xf32> to vector<4x64x64xf32>
    %18 = arith.mulf %13, %17 : vector<4x64x64xf32>
    %19 = arith.truncf %18 : vector<4x64x64xf32> to vector<4x64x64xbf16>
    "tpu.trace_start"() <{level = 10 : i32, message = "wqk,wkd->wqd"}> : () -> ()
    %cst_8 = arith.constant dense<0.000000e+00> : vector<4x64x8xf32>
    %20 = tpu.matmul %19, %4, %cst_8 {dimension_numbers = #tpu.dot_dimension_numbers<[2], [1], [1], [2], [0, 0, 0, 1, 1, 2], [0], [0]>} : vector<4x64x64xbf16>, vector<4x64x8xbf16>, vector<4x64x8xf32> -> vector<4x64x8xf32>
    "tpu.trace_stop"() : () -> ()
    %21 = vector.extract_strided_slice %0 {offsets = [0, 0, 8], sizes = [4, 64, 8], strides = [1, 1, 1]} : vector<4x64x128xbf16> to vector<4x64x8xbf16>
    %22 = vector.extract_strided_slice %0 {offsets = [0, 0, 40], sizes = [4, 64, 8], strides = [1, 1, 1]} : vector<4x64x128xbf16> to vector<4x64x8xbf16>
    %23 = vector.extract_strided_slice %0 {offsets = [0, 0, 72], sizes = [4, 64, 8], strides = [1, 1, 1]} : vector<4x64x128xbf16> to vector<4x64x8xbf16>
    "tpu.trace_start"() <{level = 10 : i32, message = "wqd,wkd->wqk"}> : () -> ()
    %cst_9 = arith.constant dense<0.000000e+00> : vector<4x64x64xf32>
    %24 = tpu.matmul %21, %22, %cst_9 {dimension_numbers = #tpu.dot_dimension_numbers<[2], [2], [1], [1], [0, 0, 0, 1, 1, 1], [0], [0]>} : vector<4x64x8xbf16>, vector<4x64x8xbf16>, vector<4x64x64xf32> -> vector<4x64x64xf32>
    "tpu.trace_stop"() : () -> ()
    %25 = vector.extract_strided_slice %1 {offsets = [0, 1, 0, 0], sizes = [4, 1, 64, 64], strides = [1, 1, 1, 1]} : vector<4x4x64x64xf32> to vector<4x1x64x64xf32>
    %26 = vector.shape_cast %25 : vector<4x1x64x64xf32> to vector<4x64x64xf32>
    %27 = arith.addf %24, %26 : vector<4x64x64xf32>
    %cst_10 = arith.constant dense<0xFF800000> : vector<4x64xf32>
    %28 = vector.multi_reduction <maximumf>, %27, %cst_10 [2] : vector<4x64x64xf32> to vector<4x64xf32>
    %29 = vector.shape_cast %28 : vector<4x64xf32> to vector<4x64x1xf32>
    %30 = vector.broadcast %29 : vector<4x64x1xf32> to vector<4x64x64xf32>
    %31 = arith.subf %27, %30 : vector<4x64x64xf32>
    %32 = math.exp %31 : vector<4x64x64xf32>
    %cst_11 = arith.constant dense<0.000000e+00> : vector<4x64xf32>
    %33 = vector.multi_reduction <add>, %32, %cst_11 [2] : vector<4x64x64xf32> to vector<4x64xf32>
    %34 = vector.shape_cast %33 : vector<4x64xf32> to vector<4x64x1xf32>
    %35 = tpu.reciprocal %34 {approx = true} : vector<4x64x1xf32> -> vector<4x64x1xf32>
    %36 = vector.broadcast %35 : vector<4x64x1xf32> to vector<4x64x64xf32>
    %37 = arith.mulf %32, %36 : vector<4x64x64xf32>
    %38 = arith.truncf %37 : vector<4x64x64xf32> to vector<4x64x64xbf16>
    "tpu.trace_start"() <{level = 10 : i32, message = "wqk,wkd->wqd"}> : () -> ()
    %cst_12 = arith.constant dense<0.000000e+00> : vector<4x64x8xf32>
    %39 = tpu.matmul %38, %23, %cst_12 {dimension_numbers = #tpu.dot_dimension_numbers<[2], [1], [1], [2], [0, 0, 0, 1, 1, 2], [0], [0]>} : vector<4x64x64xbf16>, vector<4x64x8xbf16>, vector<4x64x8xf32> -> vector<4x64x8xf32>
    "tpu.trace_stop"() : () -> ()
    %40 = vector.extract_strided_slice %0 {offsets = [0, 0, 16], sizes = [4, 64, 8], strides = [1, 1, 1]} : vector<4x64x128xbf16> to vector<4x64x8xbf16>
    %41 = vector.extract_strided_slice %0 {offsets = [0, 0, 48], sizes = [4, 64, 8], strides = [1, 1, 1]} : vector<4x64x128xbf16> to vector<4x64x8xbf16>
    %42 = vector.extract_strided_slice %0 {offsets = [0, 0, 80], sizes = [4, 64, 8], strides = [1, 1, 1]} : vector<4x64x128xbf16> to vector<4x64x8xbf16>
    "tpu.trace_start"() <{level = 10 : i32, message = "wqd,wkd->wqk"}> : () -> ()
    %cst_13 = arith.constant dense<0.000000e+00> : vector<4x64x64xf32>
    %43 = tpu.matmul %40, %41, %cst_13 {dimension_numbers = #tpu.dot_dimension_numbers<[2], [2], [1], [1], [0, 0, 0, 1, 1, 1], [0], [0]>} : vector<4x64x8xbf16>, vector<4x64x8xbf16>, vector<4x64x64xf32> -> vector<4x64x64xf32>
    "tpu.trace_stop"() : () -> ()
    %44 = vector.extract_strided_slice %1 {offsets = [0, 2, 0, 0], sizes = [4, 1, 64, 64], strides = [1, 1, 1, 1]} : vector<4x4x64x64xf32> to vector<4x1x64x64xf32>
    %45 = vector.shape_cast %44 : vector<4x1x64x64xf32> to vector<4x64x64xf32>
    %46 = arith.addf %43, %45 : vector<4x64x64xf32>
    %cst_14 = arith.constant dense<0xFF800000> : vector<4x64xf32>
    %47 = vector.multi_reduction <maximumf>, %46, %cst_14 [2] : vector<4x64x64xf32> to vector<4x64xf32>
    %48 = vector.shape_cast %47 : vector<4x64xf32> to vector<4x64x1xf32>
    %49 = vector.broadcast %48 : vector<4x64x1xf32> to vector<4x64x64xf32>
    %50 = arith.subf %46, %49 : vector<4x64x64xf32>
    %51 = math.exp %50 : vector<4x64x64xf32>
    %cst_15 = arith.constant dense<0.000000e+00> : vector<4x64xf32>
    %52 = vector.multi_reduction <add>, %51, %cst_15 [2] : vector<4x64x64xf32> to vector<4x64xf32>
    %53 = vector.shape_cast %52 : vector<4x64xf32> to vector<4x64x1xf32>
    %54 = tpu.reciprocal %53 {approx = true} : vector<4x64x1xf32> -> vector<4x64x1xf32>
    %55 = vector.broadcast %54 : vector<4x64x1xf32> to vector<4x64x64xf32>
    %56 = arith.mulf %51, %55 : vector<4x64x64xf32>
    %57 = arith.truncf %56 : vector<4x64x64xf32> to vector<4x64x64xbf16>
    "tpu.trace_start"() <{level = 10 : i32, message = "wqk,wkd->wqd"}> : () -> ()
    %cst_16 = arith.constant dense<0.000000e+00> : vector<4x64x8xf32>
    %58 = tpu.matmul %57, %42, %cst_16 {dimension_numbers = #tpu.dot_dimension_numbers<[2], [1], [1], [2], [0, 0, 0, 1, 1, 2], [0], [0]>} : vector<4x64x64xbf16>, vector<4x64x8xbf16>, vector<4x64x8xf32> -> vector<4x64x8xf32>
    "tpu.trace_stop"() : () -> ()
    %59 = vector.extract_strided_slice %0 {offsets = [0, 0, 24], sizes = [4, 64, 8], strides = [1, 1, 1]} : vector<4x64x128xbf16> to vector<4x64x8xbf16>
    %60 = vector.extract_strided_slice %0 {offsets = [0, 0, 56], sizes = [4, 64, 8], strides = [1, 1, 1]} : vector<4x64x128xbf16> to vector<4x64x8xbf16>
    %61 = vector.extract_strided_slice %0 {offsets = [0, 0, 88], sizes = [4, 64, 8], strides = [1, 1, 1]} : vector<4x64x128xbf16> to vector<4x64x8xbf16>
    "tpu.trace_start"() <{level = 10 : i32, message = "wqd,wkd->wqk"}> : () -> ()
    %cst_17 = arith.constant dense<0.000000e+00> : vector<4x64x64xf32>
    %62 = tpu.matmul %59, %60, %cst_17 {dimension_numbers = #tpu.dot_dimension_numbers<[2], [2], [1], [1], [0, 0, 0, 1, 1, 1], [0], [0]>} : vector<4x64x8xbf16>, vector<4x64x8xbf16>, vector<4x64x64xf32> -> vector<4x64x64xf32>
    "tpu.trace_stop"() : () -> ()
    %63 = vector.extract_strided_slice %1 {offsets = [0, 3, 0, 0], sizes = [4, 1, 64, 64], strides = [1, 1, 1, 1]} : vector<4x4x64x64xf32> to vector<4x1x64x64xf32>
    %64 = vector.shape_cast %63 : vector<4x1x64x64xf32> to vector<4x64x64xf32>
    %65 = arith.addf %62, %64 : vector<4x64x64xf32>
    %cst_18 = arith.constant dense<0xFF800000> : vector<4x64xf32>
    %66 = vector.multi_reduction <maximumf>, %65, %cst_18 [2] : vector<4x64x64xf32> to vector<4x64xf32>
    %67 = vector.shape_cast %66 : vector<4x64xf32> to vector<4x64x1xf32>
    %68 = vector.broadcast %67 : vector<4x64x1xf32> to vector<4x64x64xf32>
    %69 = arith.subf %65, %68 : vector<4x64x64xf32>
    %70 = math.exp %69 : vector<4x64x64xf32>
    %cst_19 = arith.constant dense<0.000000e+00> : vector<4x64xf32>
    %71 = vector.multi_reduction <add>, %70, %cst_19 [2] : vector<4x64x64xf32> to vector<4x64xf32>
    %72 = vector.shape_cast %71 : vector<4x64xf32> to vector<4x64x1xf32>
    %73 = tpu.reciprocal %72 {approx = true} : vector<4x64x1xf32> -> vector<4x64x1xf32>
    %74 = vector.broadcast %73 : vector<4x64x1xf32> to vector<4x64x64xf32>
    %75 = arith.mulf %70, %74 : vector<4x64x64xf32>
    %76 = arith.truncf %75 : vector<4x64x64xf32> to vector<4x64x64xbf16>
    "tpu.trace_start"() <{level = 10 : i32, message = "wqk,wkd->wqd"}> : () -> ()
    %cst_20 = arith.constant dense<0.000000e+00> : vector<4x64x8xf32>
    %77 = tpu.matmul %76, %61, %cst_20 {dimension_numbers = #tpu.dot_dimension_numbers<[2], [1], [1], [2], [0, 0, 0, 1, 1, 2], [0], [0]>} : vector<4x64x64xbf16>, vector<4x64x8xbf16>, vector<4x64x8xf32> -> vector<4x64x8xf32>
    "tpu.trace_stop"() : () -> ()
    %78 = tpu.concatenate %20, %39, %58, %77 in 2 : vector<4x64x8xf32>, vector<4x64x8xf32>, vector<4x64x8xf32>, vector<4x64x8xf32> -> vector<4x64x32xf32>
    %79 = vector.shape_cast %78 : vector<4x64x32xf32> to vector<256x32xf32>
    %80 = arith.truncf %79 : vector<256x32xf32> to vector<256x32xbf16>
    %c0_21 = arith.constant 0 : index
    %c0_22 = arith.constant 0 : index
    %81 = vector.load %arg3[%c0_21, %c0_22] : memref<32x32xbf16, #tpu.memory_space<vmem>>, vector<32x32xbf16>
    %cst_23 = arith.constant dense<0.000000e+00> : vector<256x32xf32>
    %82 = tpu.matmul %80, %81, %cst_23 {dimension_numbers = #tpu.dot_dimension_numbers<[1], [0], [0], [1], [0, 0, 1, 1], [], []>} : vector<256x32xbf16>, vector<32x32xbf16>, vector<256x32xf32> -> vector<256x32xf32>
    %83 = vector.shape_cast %82 : vector<256x32xf32> to vector<4x64x32xf32>
    %c0_24 = arith.constant 0 : index
    %c0_25 = arith.constant 0 : index
    %c0_26 = arith.constant 0 : index
    %84 = vector.load %arg4[%c0_24, %c0_25, %c0_26] : memref<4x64x32xf32, #tpu.memory_space<vmem>>, vector<4x64x32xf32>
    tpu.vector_store %arg4[%c0_24, %c0_25, %c0_26], %83 {strides = array<i32>} : memref<4x64x32xf32, #tpu.memory_space<vmem>>, vector<4x64x32xf32>,
    return
  }
  func.func @transform_0(%arg0: i32) -> (i32, i32, i32) {
    %c0_i32 = arith.constant 0 : i32
    %c0_i32_0 = arith.constant 0 : i32
    %c0_i32_1 = arith.constant 0 : i32
    return %arg0, %c0_i32, %c0_i32_0 : i32, i32, i32
  }
  func.func @transform_1(%arg0: i32) -> (i32, i32, i32, i32) {
    %c0_i32 = arith.constant 0 : i32
    %c0_i32_0 = arith.constant 0 : i32
    %c0_i32_1 = arith.constant 0 : i32
    %c0_i32_2 = arith.constant 0 : i32
    %c0_i32_3 = arith.constant 0 : i32
    return %c0_i32, %c0_i32_0, %c0_i32_1, %c0_i32_2 : i32, i32, i32, i32
  }
  func.func @transform_2(%arg0: i32) -> (i32, i32) {
    %c0_i32 = arith.constant 0 : i32
    %c0_i32_0 = arith.constant 0 : i32
    %c0_i32_1 = arith.constant 0 : i32
    return %c0_i32, %c0_i32_0 : i32, i32
  }
  func.func @transform_3(%arg0: i32) -> (i32, i32, i32) {
    %c0_i32 = arith.constant 0 : i32
    %c0_i32_0 = arith.constant 0 : i32
    %c0_i32_1 = arith.constant 0 : i32
    return %arg0, %c0_i32, %c0_i32_0 : i32, i32, i32
  }
}

module attributes {stable_mosaic.version = 11 : i64} {
  func.func @_mlp_block_kernel(%arg0: i32, %arg1: memref<256x32xf32, #tpu.memory_space<vmem>>, %arg2: memref<256x32xf32, #tpu.memory_space<vmem>>, %arg3: memref<1x32xf32, #tpu.memory_space<vmem>>, %arg4: memref<1x32xf32, #tpu.memory_space<vmem>>, %arg5: memref<32x128xbf16, #tpu.memory_space<vmem>>, %arg6: memref<128x32xbf16, #tpu.memory_space<vmem>>, %arg7: memref<256x32xf32, #tpu.memory_space<vmem>>) attributes {dimension_semantics = [#tpu.dimension_semantics<parallel>], iteration_bounds = array<i64: 2>, scalar_prefetch = 0 : i64, scratch_operands = 0 : i64, tpu.core_type = #tpu.core_type<tc>, window_params = [{transform_indices = @transform_0, window_bounds = array<i64: 256, 32>}, {transform_indices = @transform_1, window_bounds = array<i64: 256, 32>}, {pipeline_mode = #tpu.pipeline_mode<synchronous>, transform_indices = @transform_2, window_bounds = array<i64: 1, 32>}, {pipeline_mode = #tpu.pipeline_mode<synchronous>, transform_indices = @transform_3, window_bounds = array<i64: 1, 32>}, {pipeline_mode = #tpu.pipeline_mode<synchronous>, transform_indices = @transform_4, window_bounds = array<i64: 32, 128>}, {pipeline_mode = #tpu.pipeline_mode<synchronous>, transform_indices = @transform_5, window_bounds = array<i64: 128, 32>}, {transform_indices = @transform_6, window_bounds = array<i64: 256, 32>}]} {
    %c0 = arith.constant 0 : index
    %c0_0 = arith.constant 0 : index
    %0 = vector.load %arg1[%c0, %c0_0] : memref<256x32xf32, #tpu.memory_space<vmem>>, vector<256x32xf32>
    %c0_1 = arith.constant 0 : index
    %c0_2 = arith.constant 0 : index
    %1 = vector.load %arg2[%c0_1, %c0_2] : memref<256x32xf32, #tpu.memory_space<vmem>>, vector<256x32xf32>
    %2 = arith.addf %0, %1 : vector<256x32xf32>
    %c0_3 = arith.constant 0 : index
    %c0_4 = arith.constant 0 : index
    %3 = vector.load %arg3[%c0_3, %c0_4] : memref<1x32xf32, #tpu.memory_space<vmem>>, vector<1x32xf32>
    %c0_5 = arith.constant 0 : index
    %c0_6 = arith.constant 0 : index
    %4 = vector.load %arg4[%c0_5, %c0_6] : memref<1x32xf32, #tpu.memory_space<vmem>>, vector<1x32xf32>
    %cst = arith.constant dense<0.000000e+00> : vector<256xf32>
    %5 = vector.multi_reduction <add>, %2, %cst [1] : vector<256x32xf32> to vector<256xf32>
    %6 = vector.shape_cast %5 : vector<256xf32> to vector<256x1xf32>
    %cst_7 = arith.constant 3.200000e+01 : f32
    %7 = vector.broadcast %cst_7 : f32 to vector<256x1xf32>
    %8 = arith.divf %6, %7 : vector<256x1xf32>
    %9 = vector.broadcast %8 : vector<256x1xf32> to vector<256x32xf32>
    %10 = arith.subf %2, %9 : vector<256x32xf32>
    %11 = arith.mulf %10, %10 : vector<256x32xf32>
    %cst_8 = arith.constant dense<0.000000e+00> : vector<256xf32>
    %12 = vector.multi_reduction <add>, %11, %cst_8 [1] : vector<256x32xf32> to vector<256xf32>
    %13 = vector.shape_cast %12 : vector<256xf32> to vector<256x1xf32>
    %cst_9 = arith.constant 0.0322580636 : f32
    %14 = vector.broadcast %cst_9 : f32 to vector<256x1xf32>
    %15 = arith.mulf %13, %14 : vector<256x1xf32>
    %cst_10 = arith.constant 9.99999974E-6 : f32
    %16 = vector.broadcast %cst_10 : f32 to vector<256x1xf32>
    %17 = arith.addf %15, %16 : vector<256x1xf32>
    %18 = math.rsqrt %17 : vector<256x1xf32>
    %19 = vector.broadcast %18 : vector<256x1xf32> to vector<256x32xf32>
    %20 = arith.mulf %10, %19 : vector<256x32xf32>
    %21 = vector.broadcast %3 : vector<1x32xf32> to vector<256x32xf32>
    %22 = arith.mulf %20, %21 : vector<256x32xf32>
    %23 = vector.broadcast %4 : vector<1x32xf32> to vector<256x32xf32>
    %24 = arith.addf %22, %23 : vector<256x32xf32>
    %25 = arith.truncf %24 : vector<256x32xf32> to vector<256x32xbf16>
    %c0_11 = arith.constant 0 : index
    %c0_12 = arith.constant 0 : index
    %26 = vector.load %arg5[%c0_11, %c0_12] : memref<32x128xbf16, #tpu.memory_space<vmem>>, vector<32x128xbf16>
    %cst_13 = arith.constant dense<0.000000e+00> : vector<256x128xf32>
    %27 = tpu.matmul %25, %26, %cst_13 {dimension_numbers = #tpu.dot_dimension_numbers<[1], [0], [0], [1], [0, 0, 1, 1], [], []>} : vector<256x32xbf16>, vector<32x128xbf16>, vector<256x128xf32> -> vector<256x128xf32>
    %cst_14 = arith.constant 5.000000e-01 : f32
    %28 = vector.broadcast %cst_14 : f32 to vector<256x128xf32>
    %29 = arith.mulf %28, %27 : vector<256x128xf32>
    %cst_15 = arith.constant 4.471500e-02 : f32
    %30 = vector.broadcast %cst_15 : f32 to vector<256x128xf32>
    %31 = arith.mulf %30, %27 : vector<256x128xf32>
    %32 = arith.mulf %31, %27 : vector<256x128xf32>
    %33 = arith.mulf %32, %27 : vector<256x128xf32>
    %34 = arith.addf %27, %33 : vector<256x128xf32>
    %cst_16 = arith.constant 0.797884583 : f32
    %35 = vector.broadcast %cst_16 : f32 to vector<256x128xf32>
    %36 = arith.mulf %35, %34 : vector<256x128xf32>
    %37 = math.tanh %36 : vector<256x128xf32>
    %cst_17 = arith.constant 1.000000e+00 : f32
    %38 = vector.broadcast %cst_17 : f32 to vector<256x128xf32>
    %39 = arith.addf %38, %37 : vector<256x128xf32>
    %40 = arith.mulf %29, %39 : vector<256x128xf32>
    %41 = arith.truncf %40 : vector<256x128xf32> to vector<256x128xbf16>
    %c0_18 = arith.constant 0 : index
    %c0_19 = arith.constant 0 : index
    %42 = vector.load %arg6[%c0_18, %c0_19] : memref<128x32xbf16, #tpu.memory_space<vmem>>, vector<128x32xbf16>
    %cst_20 = arith.constant dense<0.000000e+00> : vector<256x32xf32>
    %43 = tpu.matmul %41, %42, %cst_20 {dimension_numbers = #tpu.dot_dimension_numbers<[1], [0], [0], [1], [0, 0, 1, 1], [], []>} : vector<256x128xbf16>, vector<128x32xbf16>, vector<256x32xf32> -> vector<256x32xf32>
    %44 = arith.addf %2, %43 : vector<256x32xf32>
    %c0_21 = arith.constant 0 : index
    %c0_22 = arith.constant 0 : index
    %45 = vector.load %arg7[%c0_21, %c0_22] : memref<256x32xf32, #tpu.memory_space<vmem>>, vector<256x32xf32>
    tpu.vector_store %arg7[%c0_21, %c0_22], %44 {strides = array<i32>} : memref<256x32xf32, #tpu.memory_space<vmem>>, vector<256x32xf32>,
    return
  }
  func.func @transform_0(%arg0: i32) -> (i32, i32) {
    %c0_i32 = arith.constant 0 : i32
    %c0_i32_0 = arith.constant 0 : i32
    return %arg0, %c0_i32 : i32, i32
  }
  func.func @transform_1(%arg0: i32) -> (i32, i32) {
    %c0_i32 = arith.constant 0 : i32
    %c0_i32_0 = arith.constant 0 : i32
    return %arg0, %c0_i32 : i32, i32
  }
  func.func @transform_2(%arg0: i32) -> (i32, i32) {
    %c0_i32 = arith.constant 0 : i32
    %c0_i32_0 = arith.constant 0 : i32
    %c0_i32_1 = arith.constant 0 : i32
    return %c0_i32, %c0_i32_0 : i32, i32
  }
  func.func @transform_3(%arg0: i32) -> (i32, i32) {
    %c0_i32 = arith.constant 0 : i32
    %c0_i32_0 = arith.constant 0 : i32
    %c0_i32_1 = arith.constant 0 : i32
    return %c0_i32, %c0_i32_0 : i32, i32
  }
  func.func @transform_4(%arg0: i32) -> (i32, i32) {
    %c0_i32 = arith.constant 0 : i32
    %c0_i32_0 = arith.constant 0 : i32
    %c0_i32_1 = arith.constant 0 : i32
    return %c0_i32, %c0_i32_0 : i32, i32
  }
  func.func @transform_5(%arg0: i32) -> (i32, i32) {
    %c0_i32 = arith.constant 0 : i32
    %c0_i32_0 = arith.constant 0 : i32
    %c0_i32_1 = arith.constant 0 : i32
    return %c0_i32, %c0_i32_0 : i32, i32
  }
  func.func @transform_6(%arg0: i32) -> (i32, i32) {
    %c0_i32 = arith.constant 0 : i32
    %c0_i32_0 = arith.constant 0 : i32
    return %arg0, %c0_i32 : i32, i32
  }
}

</mosaic_0001>

<bundles_post_ra>
// kernel: block_forward.3
= control target key start
LH: loop header
LB: loop body
LE: loop exit
PB: predicated region body
PF: predicated region fallthrough
CT: control target
= control target key end

     0   :  { %s1582_s18 = smov 0   ;;  %s2140_s0 = inlined_call_operand.vmem [shape: f32[512,32], index: 0, kind: input, shape index: {}]   ;;  %s2141_s1 = inlined_call_operand.vmem [shape: f32[1,32], index: 1, kind: input, shape index: {}]   ;;  %s2142_s2 = inlined_call_operand.vmem [shape: f32[1,32], index: 2, kind: input, shape index: {}]   ;;  %s2143_s3 = inlined_call_operand.vmem [shape: bf16[32,128], index: 3, kind: input, shape index: {}]   ;;  %s2144_s4 = inlined_call_operand.vmem [shape: f32[1,128], index: 4, kind: input, shape index: {}]   ;;  %s2145_s5 = inlined_call_operand.vmem [shape: bf16[512,128], index: 5, kind: output, shape index: {}]  }
   0x1 LB: > { %s1221_s19 = sadd.s32 4294967295, %s1550_s18   ;;  %p1225_p0 = scmp.ge.s32.totalorder %s1550_s18, 1  ;;  %s1550_s18 = sphi %s1582_s18, %s15_s18  }
   0x2   : > { %p188_p1 = scmp.lt.s32.totalorder %s1550_s18, 3 }
   0x4   : > { %p189_p2 = pnand %p1225_p0, %p188_p1 }
   0x5   : > { %s1226_s20 = sshll.u32 (!%p189_p2), %s1221_s19, 5  ;;  %vm263_vm0 = vcmask (!%p189_p2), 261120  }
   0x6   : > { %192 = sbr.rel (%p189_p2) target bundleno = 616 (0x268), region = 40  ;;  %p217_p3 = scmp.lt.s32.totalorder (!%p189_p2), %s1226_s20, 63 }
   0xd   : > { %s2147_s20 = smov (!%p217_p3, %s1226_s20), 63 }
   0xe   : > { %s1227_s21 = sshll.u32 %s2147_s20, 3  ;;  %s1229_s10 = sshll.u32 %s2147_s20, 2 }
   0xf   : > { %s1596_s24 = scalar_lea.vmem %s2140_s0, %s1227_s21  ;;  %s2090_s13 = scalar_lea.vmem %s2145_s5, %s1229_s10 }
  0x10   : > { %v1599_v0 = vld [vmem:[%s1596_s24] sm:$0xff]  ;;  %v1605_v2 = vld [vmem:[%s1596_s24 + $0x8] sm:$0xff]  ;;  %v1619_v8 = vld [vmem:[%s1596_s24 + $0x10] sm:$0xff] }
  0x11   : > { %v1602_v1 = vld [vmem:[%s1596_s24 + $0x80] sm:$0xff]  ;;  %v264_v3 = vsel %vm263_vm0, %v1599_v0, 0.0  ;;  %v1612_v5 = vld [vmem:[%s1596_s24 + $0x88] sm:$0xff]  ;;  %v267_v6 = vsel %vm263_vm0, %v1605_v2, 0.0  ;;  %v1622_v9 = vld [vmem:[%s1596_s24 + $0x18] sm:$0xff]  ;;  %v270_v10 = vsel %vm263_vm0, %v1619_v8, 0.0 }
  0x12   : > { %v312_v4 = vsel %vm263_vm0, %v1602_v1, 0.0  ;;  %265 = vadd.xlane.f32.xlu0 %v264_v3  ;;  %v315_v7 = vsel %vm263_vm0, %v1612_v5, 0.0  ;;  %v273_v11 = vsel %vm263_vm0, %v1622_v9, 0.0  ;;  %v1629_v12 = vld [vmem:[%s1596_s24 + $0x90] sm:$0xff]  ;;  %v1632_v13 = vld [vmem:[%s1596_s24 + $0x98] sm:$0xff]  ;;  %v1639_v16 = vld [vmem:[%s1596_s24 + $0x20] sm:$0xff] }
  0x13   : > { %313 = vadd.xlane.f32.xlu1 %v312_v4  ;;  %v318_v14 = vsel %vm263_vm0, %v1629_v12, 0.0  ;;  %v321_v15 = vsel %vm263_vm0, %v1632_v13, 0.0  ;;  %v1642_v17 = vld [vmem:[%s1596_s24 + $0x28] sm:$0xff]  ;;  %v276_v18 = vsel %vm263_vm0, %v1639_v16, 0.0  ;;  %v1649_v20 = vld [vmem:[%s1596_s24 + $0xa0] sm:$0xff]  ;;  %v1659_v24 = vld [vmem:[%s1596_s24 + $0x30] sm:$0xff] }
  0x14   : > { %v279_v19 = vsel %vm263_vm0, %v1642_v17, 0.0  ;;  %v1652_v21 = vld [vmem:[%s1596_s24 + $0xa8] sm:$0xff]  ;;  %v324_v22 = vsel %vm263_vm0, %v1649_v20, 0.0  ;;  %v1662_v25 = vld [vmem:[%s1596_s24 + $0x38] sm:$0xff]  ;;  %v282_v26 = vsel %vm263_vm0, %v1659_v24, 0.0  ;;  %v1669_v28 = vld [vmem:[%s1596_s24 + $0xb0] sm:$0xff] }
  0x15   : > { %v327_v23 = vsel %vm263_vm0, %v1652_v21, 0.0  ;;  %v285_v27 = vsel %vm263_vm0, %v1662_v25, 0.0  ;;  %v1672_v29 = vld [vmem:[%s1596_s24 + $0xb8] sm:$0xff]  ;;  %v330_v30 = vsel %vm263_vm0, %v1669_v28, 0.0  ;;  %v1679_v32 = vld [vmem:[%s1596_s24 + $0x40] sm:$0xff]  ;;  %v1682_v33 = vld [vmem:[%s1596_s24 + $0x48] sm:$0xff] }
  0x16   : > { %268 = vadd.xlane.f32.xlu0 %v267_v6  ;;  %v333_v31 = vsel %vm263_vm0, %v1672_v29, 0.0  ;;  %v288_v34 = vsel %vm263_vm0, %v1679_v32, 0.0  ;;  %v291_v35 = vsel %vm263_vm0, %v1682_v33, 0.0  ;;  %v1689_v36 = vld [vmem:[%s1596_s24 + $0xc0] sm:$0xff]  ;;  %v1692_v37 = vld [vmem:[%s1596_s24 + $0xc8] sm:$0xff]  ;;  %v1699_v40 = vld [vmem:[%s1596_s24 + $0x50] sm:$0xff] }
  0x17   : > { %316 = vadd.xlane.f32.xlu1 %v315_v7  ;;  %v336_v38 = vsel %vm263_vm0, %v1689_v36, 0.0  ;;  %v339_v39 = vsel %vm263_vm0, %v1692_v37, 0.0  ;;  %v1702_v41 = vld [vmem:[%s1596_s24 + $0x58] sm:$0xff]  ;;  %v294_v42 = vsel %vm263_vm0, %v1699_v40, 0.0  ;;  %v1709_v44 = vld [vmem:[%s1596_s24 + $0xd0] sm:$0xff]  ;;  %v1719_v48 = vld [vmem:[%s1596_s24 + $0x60] sm:$0xff] }
  0x18   : > { %v297_v43 = vsel %vm263_vm0, %v1702_v41, 0.0  ;;  %v1712_v45 = vld [vmem:[%s1596_s24 + $0xd8] sm:$0xff]  ;;  %v342_v46 = vsel %vm263_vm0, %v1709_v44, 0.0  ;;  %v1722_v49 = vld [vmem:[%s1596_s24 + $0x68] sm:$0xff]  ;;  %v300_v50 = vsel %vm263_vm0, %v1719_v48, 0.0  ;;  %v1729_v52 = vld [vmem:[%s1596_s24 + $0xe0] sm:$0xff] }
  0x19   : > { %v345_v47 = vsel %vm263_vm0, %v1712_v45, 0.0  ;;  %v303_v51 = vsel %vm263_vm0, %v1722_v49, 0.0  ;;  %v1732_v53 = vld [vmem:[%s1596_s24 + $0xe8] sm:$0xff]  ;;  %v348_v54 = vsel %vm263_vm0, %v1729_v52, 0.0  ;;  %v1739_v56 = vld [vmem:[%s1596_s24 + $0x70] sm:$0xff]  ;;  %v1742_v57 = vld [vmem:[%s1596_s24 + $0x78] sm:$0xff] }
  0x1a   : > { %271 = vadd.xlane.f32.xlu0 %v270_v10  ;;  %v351_v55 = vsel %vm263_vm0, %v1732_v53, 0.0  ;;  %v306_v58 = vsel %vm263_vm0, %v1739_v56, 0.0  ;;  %v309_v59 = vsel %vm263_vm0, %v1742_v57, 0.0  ;;  %v1749_v60 = vld [vmem:[%s1596_s24 + $0xf0] sm:$0xff]  ;;  %v1752_v61 = vld [vmem:[%s1596_s24 + $0xf8] sm:$0xff] }
  0x1b   : > { %274 = vadd.xlane.f32.xlu1 %v273_v11  ;;  %v354_v62 = vsel %vm263_vm0, %v1749_v60, 0.0  ;;  %v357_v63 = vsel %vm263_vm0, %v1752_v61, 0.0 }
  0x1e   : > { %319 = vadd.xlane.f32.xlu0 %v318_v14 }
  0x1f   : > { %322 = vadd.xlane.f32.xlu1 %v321_v15 }
  0x22   : > { %277 = vadd.xlane.f32.xlu0 %v276_v18 }
  0x23   : > { %280 = vadd.xlane.f32.xlu1 %v279_v19 }
  0x26   : > { %325 = vadd.xlane.f32.xlu0 %v324_v22 }
  0x27   : > { %328 = vadd.xlane.f32.xlu1 %v327_v23 }
  0x2a   : > { %283 = vadd.xlane.f32.xlu0 %v282_v26 }
  0x2b   : > { %286 = vadd.xlane.f32.xlu1 %v285_v27 }
  0x2e   : > { %331 = vadd.xlane.f32.xlu0 %v330_v30 }
  0x2f   : > { %334 = vadd.xlane.f32.xlu1 %v333_v31 }
  0x32   : > { %289 = vadd.xlane.f32.xlu0 %v288_v34 }
  0x33   : > { %292 = vadd.xlane.f32.xlu1 %v291_v35 }
  0x36   : > { %337 = vadd.xlane.f32.xlu0 %v336_v38 }
  0x37   : > { %340 = vadd.xlane.f32.xlu1 %v339_v39 }
  0x3a   : > { %295 = vadd.xlane.f32.xlu0 %v294_v42 }
  0x3b   : > { %298 = vadd.xlane.f32.xlu1 %v297_v43 }
  0x3e   : > { %343 = vadd.xlane.f32.xlu0 %v342_v46 }
  0x3f   : > { %346 = vadd.xlane.f32.xlu1 %v345_v47 }
  0x42   : > { %301 = vadd.xlane.f32.xlu0 %v300_v50 }
  0x43   : > { %304 = vadd.xlane.f32.xlu1 %v303_v51 }
  0x46   : > { %349 = vadd.xlane.f32.xlu0 %v348_v54 }
  0x47   : > { %352 = vadd.xlane.f32.xlu1 %v351_v55 }
  0x4a   : > { %307 = vadd.xlane.f32.xlu0 %v306_v58 }
  0x4b   : > { %310 = vadd.xlane.f32.xlu1 %v309_v59 }
  0x4e   : > { %355 = vadd.xlane.f32.xlu0 %v354_v62 }
  0x4f   : > { %358 = vadd.xlane.f32.xlu1 %v357_v63 }
  0x9f   : > { %v266_v3 = vpop.xlane.xlu0 %265 }
  0xa0   : > { %v314_v4 = vpop.xlane.xlu1 %313  ;;  %v361_v6 = vmul.f32 0.03125, %v266_v3 }
  0xa1   : > { %v377_v7 = vmul.f32 0.03125, %v314_v4 }
  0xa2   : > { %v1759_v10 = vsub.f32 %v1599_v0, %v361_v6 }
  0xa3   : > { %v1762_v11 = vsub.f32 %v1602_v1, %v377_v7  ;;  %v269_v14 = vpop.xlane.xlu0 %268 }
  0xa4   : > { %v317_v15 = vpop.xlane.xlu1 %316  ;;  %v362_v18 = vmul.f32 0.03125, %v269_v14  ;;  %v425_v22 = vmul.f32 %v1759_v10, %v1759_v10 }
  0xa5   : > { %v378_v19 = vmul.f32 0.03125, %v317_v15  ;;  %v441_v23 = vmul.f32 %v1762_v11, %v1762_v11 }
  0xa6   : > { %v1769_v26 = vsub.f32 %v1605_v2, %v362_v18  ;;  %v457_v0 = vsel %vm263_vm0, %v425_v22, 0.0 }
  0xa7   : > { %v1772_v27 = vsub.f32 %v1612_v5, %v378_v19  ;;  %458 = vadd.xlane.f32.xlu0 %v457_v0  ;;  %v272_v1 = vpop.xlane.xlu0 %271  ;;  %v505_v31 = vsel %vm263_vm0, %v441_v23, 0.0 }
  0xa8   : > { %v275_v30 = vpop.xlane.xlu1 %274  ;;  %v363_v34 = vmul.f32 0.03125, %v272_v1  ;;  %v426_v38 = vmul.f32 %v1769_v26, %v1769_v26 }
  0xa9   : > { %v364_v35 = vmul.f32 0.03125, %v275_v30  ;;  %v442_v39 = vmul.f32 %v1772_v27, %v1772_v27 }
  0xaa   : > { %v1781_v2 = vsub.f32 %v1619_v8, %v363_v34  ;;  %v460_v42 = vsel %vm263_vm0, %v426_v38, 0.0 }
  0xab   : > { %v1784_v5 = vsub.f32 %v1622_v9, %v364_v35  ;;  %506 = vadd.xlane.f32.xlu0 %v505_v31  ;;  %461 = vadd.xlane.f32.xlu1 %v460_v42  ;;  %v320_v43 = vpop.xlane.xlu0 %319  ;;  %v508_v47 = vsel %vm263_vm0, %v442_v39, 0.0 }
  0xac   : > { %v323_v46 = vpop.xlane.xlu1 %322  ;;  %v379_v50 = vmul.f32 0.03125, %v320_v43  ;;  %v427_v54 = vmul.f32 %v1781_v2, %v1781_v2 }
  0xad   : > { %v380_v51 = vmul.f32 0.03125, %v323_v46  ;;  %v428_v8 = vmul.f32 %v1784_v5, %v1784_v5 }
  0xae   : > { %v1793_v55 = vsub.f32 %v1629_v12, %v379_v50  ;;  %v463_v58 = vsel %vm263_vm0, %v427_v54, 0.0 }
  0xaf   : > { %v1796_v9 = vsub.f32 %v1632_v13, %v380_v51  ;;  %509 = vadd.xlane.f32.xlu1 %v508_v47  ;;  %464 = vadd.xlane.f32.xlu0 %v463_v58  ;;  %v278_v59 = vpop.xlane.xlu0 %277  ;;  %v466_v63 = vsel %vm263_vm0, %v428_v8, 0.0 }
  0xb0   : > { %v281_v62 = vpop.xlane.xlu1 %280  ;;  %v365_v3 = vmul.f32 0.03125, %v278_v59  ;;  %v443_v6 = vmul.f32 %v1793_v55, %v1793_v55 }
  0xb1   : > { %v366_v4 = vmul.f32 0.03125, %v281_v62  ;;  %v444_v12 = vmul.f32 %v1796_v9, %v1796_v9 }
  0xb2   : > { %v1805_v7 = vsub.f32 %v1639_v16, %v365_v3  ;;  %v511_v14 = vsel %vm263_vm0, %v443_v6, 0.0 }
  0xb3   : > { %v1808_v13 = vsub.f32 %v1642_v17, %v366_v4  ;;  %467 = vadd.xlane.f32.xlu1 %v466_v63  ;;  %512 = vadd.xlane.f32.xlu0 %v511_v14  ;;  %v326_v15 = vpop.xlane.xlu0 %325  ;;  %v514_v19 = vsel %vm263_vm0, %v444_v12, 0.0 }
  0xb4   : > { %v329_v18 = vpop.xlane.xlu1 %328  ;;  %v381_v22 = vmul.f32 0.03125, %v326_v15  ;;  %v429_v0 = vmul.f32 %v1805_v7, %v1805_v7 }
  0xb5   : > { %v382_v23 = vmul.f32 0.03125, %v329_v18  ;;  %v430_v16 = vmul.f32 %v1808_v13, %v1808_v13 }
  0xb6   : > { %v1817_v1 = vsub.f32 %v1649_v20, %v381_v22  ;;  %v469_v30 = vsel %vm263_vm0, %v429_v0, 0.0 }
  0xb7   : > { %v1820_v17 = vsub.f32 %v1652_v21, %v382_v23  ;;  %515 = vadd.xlane.f32.xlu1 %v514_v19  ;;  %470 = vadd.xlane.f32.xlu0 %v469_v30  ;;  %v284_v31 = vpop.xlane.xlu0 %283  ;;  %v472_v35 = vsel %vm263_vm0, %v430_v16, 0.0 }
  0xb8   : > { %v287_v34 = vpop.xlane.xlu1 %286  ;;  %v367_v38 = vmul.f32 0.03125, %v284_v31  ;;  %v445_v42 = vmul.f32 %v1817_v1, %v1817_v1 }
  0xb9   : > { %v368_v39 = vmul.f32 0.03125, %v287_v34  ;;  %v446_v20 = vmul.f32 %v1820_v17, %v1820_v17 }
  0xba   : > { %v1829_v43 = vsub.f32 %v1659_v24, %v367_v38  ;;  %v517_v46 = vsel %vm263_vm0, %v445_v42, 0.0 }
  0xbb   : > { %v1832_v21 = vsub.f32 %v1662_v25, %v368_v39  ;;  %473 = vadd.xlane.f32.xlu1 %v472_v35  ;;  %518 = vadd.xlane.f32.xlu0 %v517_v46  ;;  %v332_v47 = vpop.xlane.xlu0 %331  ;;  %v520_v51 = vsel %vm263_vm0, %v446_v20, 0.0 }
  0xbc   : > { %v335_v50 = vpop.xlane.xlu1 %334  ;;  %v383_v54 = vmul.f32 0.03125, %v332_v47  ;;  %v431_v58 = vmul.f32 %v1829_v43, %v1829_v43 }
  0xbd   : > { %v384_v8 = vmul.f32 0.03125, %v335_v50  ;;  %v432_v24 = vmul.f32 %v1832_v21, %v1832_v21 }
  0xbe   : > { %v1841_v59 = vsub.f32 %v1669_v28, %v383_v54  ;;  %v475_v62 = vsel %vm263_vm0, %v431_v58, 0.0 }
  0xbf   : > { %v1844_v25 = vsub.f32 %v1672_v29, %v384_v8  ;;  %521 = vadd.xlane.f32.xlu1 %v520_v51  ;;  %476 = vadd.xlane.f32.xlu0 %v475_v62  ;;  %v290_v63 = vpop.xlane.xlu0 %289  ;;  %v478_v4 = vsel %vm263_vm0, %v432_v24, 0.0 }
  0xc0   : > { %v293_v3 = vpop.xlane.xlu1 %292  ;;  %v369_v6 = vmul.f32 0.03125, %v290_v63  ;;  %v447_v14 = vmul.f32 %v1841_v59, %v1841_v59 }
  0xc1   : > { %v370_v12 = vmul.f32 0.03125, %v293_v3  ;;  %v448_v28 = vmul.f32 %v1844_v25, %v1844_v25 }
  0xc2   : > { %v1853_v15 = vsub.f32 %v1679_v32, %v369_v6  ;;  %v523_v18 = vsel %vm263_vm0, %v447_v14, 0.0  ;;  %v1478_v14 = vld [vmem:[%s2143_s3] sm:$0xff]  }
  0xc3   : > { %v1856_v29 = vsub.f32 %v1682_v33, %v370_v12  ;;  %479 = vadd.xlane.f32.xlu1 %v478_v4  ;;  %524 = vadd.xlane.f32.xlu0 %v523_v18  ;;  %v338_v19 = vpop.xlane.xlu0 %337  ;;  %v526_v23 = vsel %vm263_vm0, %v448_v28, 0.0 }
  0xc4   : > { %v341_v22 = vpop.xlane.xlu1 %340  ;;  %v385_v0 = vmul.f32 0.03125, %v338_v19  ;;  %v433_v30 = vmul.f32 %v1853_v15, %v1853_v15  ;;  %1430 = vmatprep.subr.bf16.mxu0 %v1478_v14  ;;  %1466 = vmatprep.subr.bf16.mxu1 %v1478_v14 }
  0xc5   : > { %v386_v16 = vmul.f32 0.03125, %v341_v22  ;;  %v434_v32 = vmul.f32 %v1856_v29, %v1856_v29  ;;  %1431 = vmatpush3.bf16.msra.mxu0 %v1478_v14  ;;  %1468 = vmatpush3.bf16.msra.mxu1 %v1478_v14 }
  0xc6   : > { %v1865_v31 = vsub.f32 %v1689_v36, %v385_v0  ;;  %v481_v34 = vsel %vm263_vm0, %v433_v30, 0.0 }
  0xc7   : > { %v1868_v33 = vsub.f32 %v1692_v37, %v386_v16  ;;  %527 = vadd.xlane.f32.xlu1 %v526_v23  ;;  %482 = vadd.xlane.f32.xlu0 %v481_v34  ;;  %v296_v35 = vpop.xlane.xlu0 %295  ;;  %v484_v39 = vsel %vm263_vm0, %v434_v32, 0.0  ;;  %v1479_v32 = vld [vmem:[%s2143_s3 + $0x8] sm:$0xff]  }
  0xc8   : > { %v299_v38 = vpop.xlane.xlu1 %298  ;;  %v371_v42 = vmul.f32 0.03125, %v296_v35  ;;  %v449_v46 = vmul.f32 %v1865_v31, %v1865_v31  ;;  %1432 = vmatprep.subr.bf16.mxu0 %v1479_v32  ;;  %1467 = vmatprep.subr.bf16.mxu1 %v1479_v32 }
  0xc9   : > { %v372_v20 = vmul.f32 0.03125, %v299_v38  ;;  %v450_v36 = vmul.f32 %v1868_v33, %v1868_v33  ;;  %1433 = vmatpush3.bf16.msra.mxu0 %v1479_v32  ;;  %1469 = vmatpush3.bf16.msra.mxu1 %v1479_v32 }
  0xca   : > { %v1877_v47 = vsub.f32 %v1699_v40, %v371_v42  ;;  %v529_v50 = vsel %vm263_vm0, %v449_v46, 0.0 }
  0xcb   : > { %v1880_v37 = vsub.f32 %v1702_v41, %v372_v20  ;;  %485 = vadd.xlane.f32.xlu1 %v484_v39  ;;  %530 = vadd.xlane.f32.xlu0 %v529_v50  ;;  %v344_v51 = vpop.xlane.xlu0 %343  ;;  %v532_v8 = vsel %vm263_vm0, %v450_v36, 0.0 }
  0xcc   : > { %v347_v54 = vpop.xlane.xlu1 %346  ;;  %v387_v58 = vmul.f32 0.03125, %v344_v51  ;;  %v435_v62 = vmul.f32 %v1877_v47, %v1877_v47 }
  0xcd   : > { %v388_v24 = vmul.f32 0.03125, %v347_v54  ;;  %v436_v40 = vmul.f32 %v1880_v37, %v1880_v37 }
  0xce   : > { %v1889_v63 = vsub.f32 %v1709_v44, %v387_v58  ;;  %v487_v3 = vsel %vm263_vm0, %v435_v62, 0.0 }
  0xcf   : > { %v1892_v41 = vsub.f32 %v1712_v45, %v388_v24  ;;  %533 = vadd.xlane.f32.xlu1 %v532_v8  ;;  %488 = vadd.xlane.f32.xlu0 %v487_v3  ;;  %v302_v4 = vpop.xlane.xlu0 %301  ;;  %v490_v12 = vsel %vm263_vm0, %v436_v40, 0.0 }
  0xd0   : > { %v305_v6 = vpop.xlane.xlu1 %304  ;;  %v373_v28 = vmul.f32 0.03125, %v302_v4  ;;  %v451_v44 = vmul.f32 %v1889_v63, %v1889_v63 }
  0xd1   : > { %v374_v18 = vmul.f32 0.03125, %v305_v6  ;;  %v452_v45 = vmul.f32 %v1892_v41, %v1892_v41 }
  0xd2   : > { %v1904_v19 = vsub.f32 %v1719_v48, %v373_v28  ;;  %v535_v23 = vsel %vm263_vm0, %v451_v44, 0.0 }
  0xd3   : > { %v1907_v22 = vsub.f32 %v1722_v49, %v374_v18  ;;  %491 = vadd.xlane.f32.xlu1 %v490_v12  ;;  %536 = vadd.xlane.f32.xlu0 %v535_v23  ;;  %v350_v0 = vpop.xlane.xlu0 %349  ;;  %v538_v30 = vsel %vm263_vm0, %v452_v45, 0.0 }
  0xd4   : > { %v353_v16 = vpop.xlane.xlu1 %352  ;;  %v389_v34 = vmul.f32 0.03125, %v350_v0  ;;  %v437_v49 = vmul.f32 %v1904_v19, %v1904_v19 }
  0xd5   : > { %v390_v48 = vmul.f32 0.03125, %v353_v16  ;;  %v438_v35 = vmul.f32 %v1907_v22, %v1907_v22 }
  0xd6   : > { %v1919_v38 = vsub.f32 %v1729_v52, %v389_v34  ;;  %v493_v42 = vsel %vm263_vm0, %v437_v49, 0.0 }
  0xd7   : > { %v1922_v39 = vsub.f32 %v1732_v53, %v390_v48  ;;  %539 = vadd.xlane.f32.xlu1 %v538_v30  ;;  %494 = vadd.xlane.f32.xlu0 %v493_v42  ;;  %v308_v20 = vpop.xlane.xlu0 %307  ;;  %v496_v36 = vsel %vm263_vm0, %v438_v35, 0.0 }
  0xd8   : > { %v311_v46 = vpop.xlane.xlu1 %310  ;;  %v375_v50 = vmul.f32 0.03125, %v308_v20  ;;  %v453_v54 = vmul.f32 %v1919_v38, %v1919_v38 }
  0xd9   : > { %v376_v51 = vmul.f32 0.03125, %v311_v46  ;;  %v454_v52 = vmul.f32 %v1922_v39, %v1922_v39 }
  0xda   : > { %v1931_v53 = vsub.f32 %v1739_v56, %v375_v50  ;;  %v541_v58 = vsel %vm263_vm0, %v453_v54, 0.0 }
  0xdb   : > { %v1934_v8 = vsub.f32 %v1742_v57, %v376_v51  ;;  %497 = vadd.xlane.f32.xlu1 %v496_v36  ;;  %542 = vadd.xlane.f32.xlu0 %v541_v58  ;;  %v356_v24 = vpop.xlane.xlu0 %355  ;;  %v544_v40 = vsel %vm263_vm0, %v454_v52, 0.0 }
  0xdc   : > { %v359_v62 = vpop.xlane.xlu1 %358  ;;  %v391_v3 = vmul.f32 0.03125, %v356_v24  ;;  %v439_v6 = vmul.f32 %v1931_v53, %v1931_v53 }
  0xdd   : > { %v392_v4 = vmul.f32 0.03125, %v359_v62  ;;  %v440_v56 = vmul.f32 %v1934_v8, %v1934_v8 }
  0xde   : > { %v1943_v12 = vsub.f32 %v1749_v60, %v391_v3  ;;  %v499_v14 = vsel %vm263_vm0, %v439_v6, 0.0 }
  0xdf   : > { %v1946_v57 = vsub.f32 %v1752_v61, %v392_v4  ;;  %545 = vadd.xlane.f32.xlu1 %v544_v40  ;;  %500 = vadd.xlane.f32.xlu0 %v499_v14  ;;  %v502_v28 = vsel %vm263_vm0, %v440_v56, 0.0 }
  0xe0   : > { %v455_v18 = vmul.f32 %v1943_v12, %v1943_v12 }
  0xe1   : > { %v456_v44 = vmul.f32 %v1946_v57, %v1946_v57 }
  0xe2   : > { %v547_v45 = vsel %vm263_vm0, %v455_v18, 0.0 }
  0xe3   : > { %503 = vadd.xlane.f32.xlu1 %v502_v28  ;;  %548 = vadd.xlane.f32.xlu0 %v547_v45  ;;  %v550_v60 = vsel %vm263_vm0, %v456_v44, 0.0  ;;  %v1960_v28 = vld [vmem:[%s2141_s1] ss:$0 sm:$0xff] }
  0xe7   : > { %551 = vadd.xlane.f32.xlu1 %v550_v60 }
 0x134   : > { %v459_v61 = vpop.xlane.xlu0 %458 }
 0x135   : > { %v553_v23 = vmul.f32 0.032258064, %v459_v61 }
 0x137   : > { %v585_v0 = vadd.f32 1e-05, %v553_v23 }
 0x138   : > { %v462_v16 = vpop.xlane.xlu1 %461  ;;  %v507_v30 = vpop.xlane.xlu0 %506 }
 0x139   : > { %1480 = vrsqrt.f32 %v585_v0  ;;  %v554_v32 = vmul.f32 0.032258064, %v462_v16  ;;  %v569_v34 = vmul.f32 0.032258064, %v507_v30 }
 0x13b   : > { %v586_v48 = vadd.f32 1e-05, %v554_v32  ;;  %v601_v49 = vadd.f32 1e-05, %v569_v34  ;;  %v1967_v32 = vld [vmem:[%s2142_s2] ss:$0 sm:$0xff] }
 0x13c   : > { %v510_v35 = vpop.xlane.xlu1 %509  ;;  %v465_v42 = vpop.xlane.xlu0 %464 }
 0x13d   : > { %1482 = vrsqrt.f32 %v586_v48  ;;  %v570_v20 = vmul.f32 0.032258064, %v510_v35  ;;  %v555_v46 = vmul.f32 0.032258064, %v465_v42 }
 0x13e   : > { %1484 = vrsqrt.f32 %v601_v49 }
 0x13f   : > { %v602_v36 = vadd.f32 1e-05, %v570_v20  ;;  %v587_v50 = vadd.f32 1e-05, %v555_v46 }
 0x140   : > { %v468_v51 = vpop.xlane.xlu1 %467  ;;  %v513_v54 = vpop.xlane.xlu0 %512 }
 0x141   : > { %1486 = vrsqrt.f32 %v602_v36  ;;  %v556_v52 = vmul.f32 0.032258064, %v468_v51  ;;  %v571_v58 = vmul.f32 0.032258064, %v513_v54 }
 0x142   : > { %1488 = vrsqrt.f32 %v587_v50 }
 0x143   : > { %v1481_v24 = vpop.eup %1480  ;;  %v588_v62 = vadd.f32 1e-05, %v556_v52  ;;  %v603_v40 = vadd.f32 1e-05, %v571_v58 }
 0x144   : > { %v516_v3 = vpop.xlane.xlu1 %515  ;;  %v471_v4 = vpop.xlane.xlu0 %470  ;;  %v649_v6 = vmul.f32 %v1481_v24, %v1759_v10 }
 0x145   : > { %1490 = vrsqrt.f32 %v588_v62  ;;  %v572_v56 = vmul.f32 0.032258064, %v516_v3  ;;  %v557_v14 = vmul.f32 0.032258064, %v471_v4 }
 0x146   : > { %1492 = vrsqrt.f32 %v603_v40  ;;  %v687_v16 = vmul.f32 %v1960_v28, %v649_v6 }
 0x147   : > { %v1483_v18 = vpop.eup %1482  ;;  %v604_v44 = vadd.f32 1e-05, %v572_v56  ;;  %v589_v45 = vadd.f32 1e-05, %v557_v14 }
 0x148   : > { %v1485_v60 = vpop.eup %1484  ;;  %v474_v61 = vpop.xlane.xlu1 %473  ;;  %v650_v0 = vmul.f32 %v1483_v18, %v1769_v26  ;;  %v725_v36 = vadd.f32 %v1967_v32, %v687_v16 }
 0x149   : > { %v519_v23 = vpop.xlane.xlu0 %518  ;;  %1494 = vrsqrt.f32 %v604_v44  ;;  %v558_v10 = vmul.f32 0.032258064, %v474_v61  ;;  %v665_v34 = vmul.f32 %v1485_v60, %v1762_v11 }
 0x14a   : > { %v573_v30 = vmul.f32 0.032258064, %v519_v23  ;;  %1496 = vrsqrt.f32 %v589_v45  ;;  %v688_v48 = vmul.f32 %v1960_v28, %v650_v0 }
 0x14b   : > { %v1487_v49 = vpop.eup %1486  ;;  %v590_v35 = vadd.f32 1e-05, %v558_v10  ;;  %v703_v54 = vmul.f32 %v1960_v28, %v665_v34 }
 0x14c   : > { %v605_v42 = vadd.f32 1e-05, %v573_v30  ;;  %v1489_v20 = vpop.eup %1488  ;;  %v522_v26 = vpop.xlane.xlu1 %521  ;;  %v726_v50 = vadd.f32 %v1967_v32, %v688_v48  ;;  %v666_v51 = vmul.f32 %v1487_v49, %v1772_v27 }
 0x14d   : > { %v477_v46 = vpop.xlane.xlu0 %476  ;;  %v651_v52 = vmul.f32 %v1489_v20, %v1781_v2  ;;  %1498 = vrsqrt.f32 %v590_v35  ;;  %v574_v11 = vmul.f32 0.032258064, %v522_v26  ;;  %v741_v18 = vadd.f32 %v1967_v32, %v703_v54 }
 0x14e   : > { %v559_v58 = vmul.f32 0.032258064, %v477_v46  ;;  %1500 = vrsqrt.f32 %v605_v42  ;;  %v757_v24 = vpack.c.bf16 %v726_v50, %v725_v36  ;;  %v704_v62 = vmul.f32 %v1960_v28, %v666_v51 }
 0x14f   : > { %v1491_v40 = vpop.eup %1490  ;;  %v606_v3 = vadd.f32 1e-05, %v574_v11  ;;  %v689_v44 = vmul.f32 %v1960_v28, %v651_v52 }
 0x150   : > { %v591_v4 = vadd.f32 1e-05, %v559_v58  ;;  %v1493_v6 = vpop.eup %1492  ;;  %v652_v56 = vmul.f32 %v1491_v40, %v1784_v5  ;;  %v480_v14 = vpop.xlane.xlu1 %479  ;;  %1434 = vmatprep.mubr.msk.bf16.mxu0 %vm263_vm0, %v757_v24  ;;  %v742_v2 = vadd.f32 %v1967_v32, %v704_v62 }
 0x151   : > { %v525_v27 = vpop.xlane.xlu0 %524  ;;  %v667_v45 = vmul.f32 %v1493_v6, %v1793_v55  ;;  %1502 = vrsqrt.f32 %v606_v3  ;;  %v560_v60 = vmul.f32 0.032258064, %v480_v14  ;;  %v727_v35 = vadd.f32 %v1967_v32, %v689_v44 }
 0x152   : > { %v575_v61 = vmul.f32 0.032258064, %v525_v27  ;;  %1504 = vrsqrt.f32 %v591_v4  ;;  %v765_v23 = vpack.c.bf16 %v742_v2, %v741_v18  ;;  %v690_v0 = vmul.f32 %v1960_v28, %v652_v56 }
 0x153   : > { %v1495_v5 = vpop.eup %1494  ;;  %v592_v16 = vadd.f32 1e-05, %v560_v60  ;;  %v705_v42 = vmul.f32 %v1960_v28, %v667_v45 }
 0x154   : > { %v607_v10 = vadd.f32 1e-05, %v575_v61  ;;  %v1497_v30 = vpop.eup %1496  ;;  %v668_v34 = vmul.f32 %v1495_v5, %v1796_v9  ;;  %v528_v48 = vpop.xlane.xlu1 %527  ;;  %1450 = vmatprep.mubr.msk.bf16.mxu1 %vm263_vm0, %v765_v23  ;;  %v728_v55 = vadd.f32 %v1967_v32, %v690_v0 }
 0x155   : > { %v483_v49 = vpop.xlane.xlu0 %482  ;;  %v653_v20 = vmul.f32 %v1497_v30, %v1805_v7  ;;  %1506 = vrsqrt.f32 %v592_v16  ;;  %v576_v26 = vmul.f32 0.032258064, %v528_v48  ;;  %v743_v62 = vadd.f32 %v1967_v32, %v705_v42 }
 0x156   : > { %v561_v46 = vmul.f32 0.032258064, %v483_v49  ;;  %1508 = vrsqrt.f32 %v607_v10  ;;  %v758_v36 = vpack.c.bf16 %v728_v55, %v727_v35  ;;  %v706_v50 = vmul.f32 %v1960_v28, %v668_v34 }
 0x157   : > { %v1499_v9 = vpop.eup %1498  ;;  %v608_v51 = vadd.f32 1e-05, %v576_v26  ;;  %v691_v40 = vmul.f32 %v1960_v28, %v653_v20 }
 0x158   : > { %v593_v54 = vadd.f32 1e-05, %v561_v46  ;;  %v1501_v52 = vpop.eup %1500  ;;  %v654_v11 = vmul.f32 %v1499_v9, %v1808_v13  ;;  %v486_v58 = vpop.xlane.xlu1 %485  ;;  %1435 = vmatmul.mubr.msk.bf16.vlgmr.msra.gmra.mrb[0].mxu0 %vm263_vm0, %v758_v36  ;;  %v744_v7 = vadd.f32 %v1967_v32, %v706_v50 }
 0x159   : > { %v531_v24 = vpop.xlane.xlu0 %530  ;;  %v669_v3 = vmul.f32 %v1501_v52, %v1817_v1  ;;  %1510 = vrsqrt.f32 %v608_v51  ;;  %v562_v4 = vmul.f32 0.032258064, %v486_v58  ;;  %v729_v61 = vadd.f32 %v1967_v32, %v691_v40 }
 0x15a   : > { %v577_v6 = vmul.f32 0.032258064, %v531_v24  ;;  %1512 = vrsqrt.f32 %v593_v54  ;;  %v766_v56 = vpack.c.bf16 %v744_v7, %v743_v62  ;;  %v692_v14 = vmul.f32 %v1960_v28, %v654_v11 }
 0x15b   : > { %v1503_v13 = vpop.eup %1502  ;;  %v594_v27 = vadd.f32 1e-05, %v562_v4  ;;  %v707_v23 = vmul.f32 %v1960_v28, %v669_v3 }
 0x15c   : > { %v609_v18 = vadd.f32 1e-05, %v577_v6  ;;  %v1505_v2 = vpop.eup %1504  ;;  %v670_v44 = vmul.f32 %v1503_v13, %v1820_v17  ;;  %v534_v45 = vpop.xlane.xlu1 %533  ;;  %1451 = vmatmul.mubr.msk.bf16.vlgmr.msra.gmra.mrb[0].mxu1 %vm263_vm0, %v766_v56  ;;  %v730_v1 = vadd.f32 %v1967_v32, %v692_v14 }
 0x15d   : > { %v489_v60 = vpop.xlane.xlu0 %488  ;;  %v655_v0 = vmul.f32 %v1505_v2, %v1829_v43  ;;  %1514 = vrsqrt.f32 %v594_v27  ;;  %v578_v5 = vmul.f32 0.032258064, %v534_v45  ;;  %v745_v20 = vadd.f32 %v1967_v32, %v707_v23 }
 0x15e   : > { %v563_v16 = vmul.f32 0.032258064, %v489_v60  ;;  %1516 = vrsqrt.f32 %v609_v18  ;;  %v759_v10 = vpack.c.bf16 %v730_v1, %v729_v61  ;;  %v708_v30 = vmul.f32 %v1960_v28, %v670_v44 }
 0x15f   : > { %v1507_v17 = vpop.eup %1506  ;;  %v610_v34 = vadd.f32 1e-05, %v578_v5  ;;  %v693_v26 = vmul.f32 %v1960_v28, %v655_v0 }
 0x160   : > { %v595_v48 = vadd.f32 1e-05, %v563_v16  ;;  %v1509_v49 = vpop.eup %1508  ;;  %v656_v35 = vmul.f32 %v1507_v17, %v1832_v21  ;;  %v492_v55 = vpop.xlane.xlu1 %491  ;;  %1438 = vmatprep.mubr.msk.bf16.mxu0 %vm263_vm0, %v759_v10  ;;  %v746_v43 = vadd.f32 %v1967_v32, %v708_v30 }
 0x161   : > { %v537_v42 = vpop.xlane.xlu0 %536  ;;  %v671_v46 = vmul.f32 %v1509_v49, %v1841_v59  ;;  %1518 = vrsqrt.f32 %v610_v34  ;;  %v564_v36 = vmul.f32 0.032258064, %v492_v55  ;;  %v731_v7 = vadd.f32 %v1967_v32, %v693_v26 }
 0x162   : > { %v579_v50 = vmul.f32 0.032258064, %v537_v42  ;;  %1520 = vrsqrt.f32 %v595_v48  ;;  %v767_v9 = vpack.c.bf16 %v746_v43, %v745_v20  ;;  %v694_v51 = vmul.f32 %v1960_v28, %v656_v35 }
 0x163   : > { %v1511_v21 = vpop.eup %1510  ;;  %v596_v54 = vadd.f32 1e-05, %v564_v36  ;;  %v709_v40 = vmul.f32 %v1960_v28, %v671_v46 }
 0x164   : > { %v611_v52 = vadd.f32 1e-05, %v579_v50  ;;  %v1513_v11 = vpop.eup %1512  ;;  %v672_v58 = vmul.f32 %v1511_v21, %v1844_v25  ;;  %v540_v24 = vpop.xlane.xlu1 %539  ;;  %1454 = vmatprep.mubr.msk.bf16.mxu1 %vm263_vm0, %v767_v9  ;;  %v732_v59 = vadd.f32 %v1967_v32, %v694_v51 }
 0x165   : > { %v495_v62 = vpop.xlane.xlu0 %494  ;;  %v657_v3 = vmul.f32 %v1513_v11, %v1853_v15  ;;  %1522 = vrsqrt.f32 %v596_v54  ;;  %v580_v4 = vmul.f32 0.032258064, %v540_v24  ;;  %v747_v60 = vadd.f32 %v1967_v32, %v709_v40 }
 0x166   : > { %v565_v6 = vmul.f32 0.032258064, %v495_v62  ;;  %1524 = vrsqrt.f32 %v611_v52  ;;  %v760_v56 = vpack.c.bf16 %v732_v59, %v731_v7  ;;  %v710_v14 = vmul.f32 %v1960_v28, %v672_v58 }
 0x167   : > { %v1515_v25 = vpop.eup %1514  ;;  %v612_v13 = vadd.f32 1e-05, %v580_v4  ;;  %v695_v61 = vmul.f32 %v1960_v28, %v657_v3 }
 0x168   : > { %v597_v27 = vadd.f32 1e-05, %v565_v6  ;;  %v1517_v18 = vpop.eup %1516  ;;  %v658_v2 = vmul.f32 %v1515_v25, %v1856_v29  ;;  %v498_v44 = vpop.xlane.xlu1 %497  ;;  %1439 = vmatmul.mubr.msk.bf16.gmra.mrb[4].mxu0 %vm263_vm0, %v760_v56  ;;  %v748_v15 = vadd.f32 %v1967_v32, %v710_v14 }
 0x169   : > { %v543_v45 = vpop.xlane.xlu0 %542  ;;  %v673_v1 = vmul.f32 %v1517_v18, %v1865_v31  ;;  %1526 = vrsqrt.f32 %v612_v13  ;;  %v566_v23 = vmul.f32 0.032258064, %v498_v44  ;;  %v733_v35 = vadd.f32 %v1967_v32, %v695_v61 }
 0x16a   : > { %v581_v0 = vmul.f32 0.032258064, %v543_v45  ;;  %1528 = vrsqrt.f32 %v597_v27  ;;  %v768_v5 = vpack.c.bf16 %v748_v15, %v747_v60  ;;  %v696_v16 = vmul.f32 %v1960_v28, %v658_v2 }
 0x16b   : > { %v1519_v29 = vpop.eup %1518  ;;  %v598_v10 = vadd.f32 1e-05, %v566_v23  ;;  %v711_v55 = vmul.f32 %v1960_v28, %v673_v1 }
 0x16c   : > { %v613_v30 = vadd.f32 1e-05, %v581_v0  ;;  %v1521_v17 = vpop.eup %1520  ;;  %v674_v34 = vmul.f32 %v1519_v29, %v1868_v33  ;;  %v546_v48 = vpop.xlane.xlu1 %545  ;;  %1455 = vmatmul.mubr.msk.bf16.gmra.mrb[4].mxu1 %vm263_vm0, %v768_v5  ;;  %v734_v31 = vadd.f32 %v1967_v32, %v696_v16 }
 0x16d   : > { %v501_v49 = vpop.xlane.xlu0 %500  ;;  %v659_v42 = vmul.f32 %v1521_v17, %v1877_v47  ;;  %1530 = vrsqrt.f32 %v598_v10  ;;  %v582_v20 = vmul.f32 0.032258064, %v546_v48  ;;  %v749_v52 = vadd.f32 %v1967_v32, %v711_v55 }
 0x16e   : > { %v567_v43 = vmul.f32 0.032258064, %v501_v49  ;;  %1532 = vrsqrt.f32 %v613_v30  ;;  %v761_v26 = vpack.c.bf16 %v734_v31, %v733_v35  ;;  %v712_v46 = vmul.f32 %v1960_v28, %v674_v34 }
 0x16f   : > { %v1523_v33 = vpop.eup %1522  ;;  %v614_v36 = vadd.f32 1e-05, %v582_v20  ;;  %v697_v11 = vmul.f32 %v1960_v28, %v659_v42 }
 0x170   : > { %v599_v50 = vadd.f32 1e-05, %v567_v43  ;;  %v1525_v9 = vpop.eup %1524  ;;  %v660_v51 = vmul.f32 %v1523_v33, %v1880_v37  ;;  %v504_v21 = vpop.xlane.xlu1 %503  ;;  %1442 = vmatprep.mubr.msk.bf16.mxu0 %vm263_vm0, %v761_v26  ;;  %v750_v47 = vadd.f32 %v1967_v32, %v712_v46 }
 0x171   : > { %v549_v54 = vpop.xlane.xlu0 %548  ;;  %v675_v58 = vmul.f32 %v1525_v9, %v1889_v63  ;;  %1534 = vrsqrt.f32 %v614_v36  ;;  %v568_v24 = vmul.f32 0.032258064, %v504_v21  ;;  %v735_v14 = vadd.f32 %v1967_v32, %v697_v11  ;;  %v2081_v21 = vld [vmem:[%s2144_s4] ss:$0 sm:$0xff] }
 0x172   : > { %v583_v62 = vmul.f32 0.032258064, %v549_v54  ;;  %1536 = vrsqrt.f32 %v599_v50  ;;  %v769_v7 = vpack.c.bf16 %v750_v47, %v749_v52  ;;  %v698_v59 = vmul.f32 %v1960_v28, %v660_v51 }
 0x173   : > { %v1527_v37 = vpop.eup %1526  ;;  %v600_v40 = vadd.f32 1e-05, %v568_v24  ;;  %v713_v25 = vmul.f32 %v1960_v28, %v675_v58 }
 0x174   : > { %v615_v3 = vadd.f32 1e-05, %v583_v62  ;;  %v1529_v4 = vpop.eup %1528  ;;  %v676_v6 = vmul.f32 %v1527_v37, %v1892_v41  ;;  %v552_v56 = vpop.xlane.xlu1 %551  ;;  %1458 = vmatprep.mubr.msk.bf16.mxu1 %vm263_vm0, %v769_v7  ;;  %v736_v63 = vadd.f32 %v1967_v32, %v698_v59 }
 0x175   : > { %v661_v13 = vmul.f32 %v1529_v4, %v1904_v19  ;;  %1538 = vrsqrt.f32 %v600_v40  ;;  %v584_v27 = vmul.f32 0.032258064, %v552_v56  ;;  %v751_v15 = vadd.f32 %v1967_v32, %v713_v25 }
 0x176   : > { %1540 = vrsqrt.f32 %v615_v3  ;;  %v762_v18 = vpack.c.bf16 %v736_v63, %v735_v14  ;;  %v714_v2 = vmul.f32 %v1960_v28, %v676_v6 }
 0x177   : > { %v1531_v44 = vpop.eup %1530  ;;  %v616_v45 = vadd.f32 1e-05, %v584_v27  ;;  %v699_v1 = vmul.f32 %v1960_v28, %v661_v13 }
 0x178   : > { %v1533_v41 = vpop.eup %1532  ;;  %v662_v60 = vmul.f32 %v1531_v44, %v1907_v22  ;;  %1443 = vmatmul.mubr.msk.bf16.gmra.mrb[8].mxu0 %vm263_vm0, %v762_v18  ;;  %v752_v61 = vadd.f32 %v1967_v32, %v714_v2 }
 0x179   : > { %v677_v19 = vmul.f32 %v1533_v41, %v1919_v38  ;;  %1542 = vrsqrt.f32 %v616_v45  ;;  %v737_v22 = vadd.f32 %v1967_v32, %v699_v1 }
 0x17a   : > { %v770_v23 = vpack.c.bf16 %v752_v61, %v751_v15  ;;  %v700_v0 = vmul.f32 %v1960_v28, %v662_v60 }
 0x17b   : > { %v1535_v5 = vpop.eup %1534  ;;  %v715_v30 = vmul.f32 %v1960_v28, %v677_v19 }
 0x17c   : > { %v1537_v16 = vpop.eup %1536  ;;  %v678_v29 = vmul.f32 %v1535_v5, %v1922_v39  ;;  %1459 = vmatmul.mubr.msk.bf16.gmra.mrb[8].mxu1 %vm263_vm0, %v770_v23  ;;  %v738_v10 = vadd.f32 %v1967_v32, %v700_v0 }
 0x17d   : > { %v663_v17 = vmul.f32 %v1537_v16, %v1931_v53  ;;  %v753_v39 = vadd.f32 %v1967_v32, %v715_v30 }
 0x17e   : > { %v763_v34 = vpack.c.bf16 %v738_v10, %v737_v22  ;;  %v716_v38 = vmul.f32 %v1960_v28, %v678_v29 }
 0x17f   : > { %v1539_v48 = vpop.eup %1538  ;;  %v701_v55 = vmul.f32 %v1960_v28, %v663_v17 }
 0x180   : > { %v1541_v49 = vpop.eup %1540  ;;  %v664_v35 = vmul.f32 %v1539_v48, %v1934_v8  ;;  %1446 = vmatprep.mubr.msk.bf16.mxu0 %vm263_vm0, %v763_v34  ;;  %v754_v31 = vadd.f32 %v1967_v32, %v716_v38 }
 0x181   : > { %v679_v42 = vmul.f32 %v1541_v49, %v1943_v12  ;;  %v739_v8 = vadd.f32 %v1967_v32, %v701_v55 }
 0x182   : > { %v771_v20 = vpack.c.bf16 %v754_v31, %v753_v39  ;;  %v702_v53 = vmul.f32 %v1960_v28, %v664_v35 }
 0x183   : > { %v1543_v43 = vpop.eup %1542  ;;  %v717_v33 = vmul.f32 %v1960_v28, %v679_v42 }
 0x184   : > { %v680_v26 = vmul.f32 %v1543_v43, %v1946_v57  ;;  %1462 = vmatprep.mubr.msk.bf16.mxu1 %vm263_vm0, %v771_v20  ;;  %v740_v46 = vadd.f32 %v1967_v32, %v702_v53 }
 0x185   : > { %v755_v12 = vadd.f32 %v1967_v32, %v717_v33 }
 0x186   : > { %v764_v36 = vpack.c.bf16 %v740_v46, %v739_v8  ;;  %v718_v50 = vmul.f32 %v1960_v28, %v680_v26 }
 0x188   : > { %1447 = vmatmul.mubr.msk.bf16.gmra.mrb[12].mxu0 %vm263_vm0, %v764_v36  ;;  %v756_v9 = vadd.f32 %v1967_v32, %v718_v50 }
 0x18a   : > { %v772_v51 = vpack.c.bf16 %v756_v9, %v755_v12 }
 0x18c   : > { %1463 = vmatmul.mubr.msk.bf16.gmra.mrb[12].mxu1 %vm263_vm0, %v772_v51 }
 0x22b   : > { %v1436_v57 = vpop.f32.mrb[0].mxu0 }
 0x22c   : > { %v878_v54 = vpop.f32.mrb[1].mxu0  ;;  %v887_v28 = vadd.f32 %v1436_v57, %v2081_v21 }
 0x22d   : > { %v1437_v52 = vpop.f32.mrb[2].mxu0  ;;  %v879_v58 = vadd.f32 %v2081_v21, %v878_v54 }
 0x22e   : > { %v890_v47 = vadd.f32 %v1437_v52, %v2081_v21  ;;  %v881_v11 = vpop.f32.mrb[3].mxu0 }
 0x22f   : > { %v882_v32 = vadd.f32 %v2081_v21, %v881_v11  ;;  %v1452_v24 = vpop.f32.mrb[0].mxu1 }
 0x230   : > { %v1325_v62 = vpack.c.bf16 %v890_v47, %v887_v28  ;;  %v942_v7 = vpop.f32.mrb[1].mxu1  ;;  %v951_v40 = vadd.f32 %v1452_v24, %v2081_v21 }
 0x231   : > { %v1320_v59 = vpack.c.bf16 %v882_v32, %v879_v58  ;;  %v1453_v37 = vpop.f32.mrb[2].mxu1  ;;  %v943_v6 = vadd.f32 %v2081_v21, %v942_v7 }
 0x232   : > { %1397 = vst [vmem:[%s2090_s13 + $0x8] sm:$0xff] %v1325_v62   ;;  %v954_v3 = vadd.f32 %v1453_v37, %v2081_v21  ;;  %v945_v4 = vpop.f32.mrb[3].mxu1 }
 0x233   : > { %1321 = vst [vmem:[%s2090_s13] sm:$0xff] %v1320_v59   ;;  %v946_v56 = vadd.f32 %v2081_v21, %v945_v4 }
 0x234   : > { %v1365_v14 = vpack.c.bf16 %v954_v3, %v951_v40 }
 0x235   : > { %v1360_v63 = vpack.c.bf16 %v946_v56, %v943_v6 }
 0x236   : > { %1405 = vst [vmem:[%s2090_s13 + $0x48] sm:$0xff] %v1365_v14  }
 0x237   : > { %1404 = vst [vmem:[%s2090_s13 + $0x40] sm:$0xff] %v1360_v63  }
 0x23b   : > { %v1440_v25 = vpop.f32.mrb[4].mxu0 }
 0x23c   : > { %v894_v13 = vpop.f32.mrb[5].mxu0  ;;  %v903_v18 = vadd.f32 %v1440_v25, %v2081_v21 }
 0x23d   : > { %v1441_v27 = vpop.f32.mrb[6].mxu0  ;;  %v895_v45 = vadd.f32 %v2081_v21, %v894_v13 }
 0x23e   : > { %v906_v2 = vadd.f32 %v1441_v27, %v2081_v21  ;;  %v897_v44 = vpop.f32.mrb[7].mxu0 }
 0x23f   : > { %v898_v41 = vadd.f32 %v2081_v21, %v897_v44  ;;  %v1456_v60 = vpop.f32.mrb[4].mxu1 }
 0x240   : > { %v1335_v15 = vpack.c.bf16 %v906_v2, %v903_v18  ;;  %v958_v61 = vpop.f32.mrb[5].mxu1  ;;  %v967_v23 = vadd.f32 %v1456_v60, %v2081_v21 }
 0x241   : > { %v1330_v1 = vpack.c.bf16 %v898_v41, %v895_v45  ;;  %v1457_v19 = vpop.f32.mrb[6].mxu1  ;;  %v959_v16 = vadd.f32 %v2081_v21, %v958_v61 }
 0x242   : > { %1399 = vst [vmem:[%s2090_s13 + $0x18] sm:$0xff] %v1335_v15   ;;  %v970_v0 = vadd.f32 %v1457_v19, %v2081_v21  ;;  %v961_v5 = vpop.f32.mrb[7].mxu1 }
 0x243   : > { %1398 = vst [vmem:[%s2090_s13 + $0x10] sm:$0xff] %v1330_v1   ;;  %v962_v29 = vadd.f32 %v2081_v21, %v961_v5 }
 0x244   : > { %v1375_v22 = vpack.c.bf16 %v970_v0, %v967_v23 }
 0x245   : > { %v1370_v10 = vpack.c.bf16 %v962_v29, %v959_v16 }
 0x246   : > { %1407 = vst [vmem:[%s2090_s13 + $0x58] sm:$0xff] %v1375_v22  }
 0x247   : > { %1406 = vst [vmem:[%s2090_s13 + $0x50] sm:$0xff] %v1370_v10  }
 0x24b   : > { %v1444_v30 = vpop.f32.mrb[8].mxu0 }
 0x24c   : > { %v910_v17 = vpop.f32.mrb[9].mxu0  ;;  %v919_v38 = vadd.f32 %v1444_v30, %v2081_v21 }
 0x24d   : > { %v1445_v34 = vpop.f32.mrb[10].mxu0  ;;  %v911_v35 = vadd.f32 %v2081_v21, %v910_v17 }
 0x24e   : > { %v922_v48 = vadd.f32 %v1445_v34, %v2081_v21  ;;  %v913_v49 = vpop.f32.mrb[11].mxu0 }
 0x24f   : > { %v914_v39 = vadd.f32 %v2081_v21, %v913_v49  ;;  %v1460_v31 = vpop.f32.mrb[8].mxu1 }
 0x250   : > { %v1345_v55 = vpack.c.bf16 %v922_v48, %v919_v38  ;;  %v974_v42 = vpop.f32.mrb[9].mxu1  ;;  %v983_v43 = vadd.f32 %v1460_v31, %v2081_v21 }
 0x251   : > { %v1340_v20 = vpack.c.bf16 %v914_v39, %v911_v35  ;;  %v1461_v53 = vpop.f32.mrb[10].mxu1  ;;  %v975_v46 = vadd.f32 %v2081_v21, %v974_v42 }
 0x252   : > { %1401 = vst [vmem:[%s2090_s13 + $0x28] sm:$0xff] %v1345_v55   ;;  %v986_v26 = vadd.f32 %v1461_v53, %v2081_v21  ;;  %v977_v8 = vpop.f32.mrb[11].mxu1 }
 0x253   : > { %1400 = vst [vmem:[%s2090_s13 + $0x20] sm:$0xff] %v1340_v20   ;;  %v978_v33 = vadd.f32 %v2081_v21, %v977_v8 }
 0x254   : > { %v1385_v36 = vpack.c.bf16 %v986_v26, %v983_v43 }
 0x255   : > { %v1380_v50 = vpack.c.bf16 %v978_v33, %v975_v46 }
 0x256   : > { %1409 = vst [vmem:[%s2090_s13 + $0x68] sm:$0xff] %v1385_v36  }
 0x257   : > { %1408 = vst [vmem:[%s2090_s13 + $0x60] sm:$0xff] %v1380_v50  }
 0x25b   : > { %v1448_v12 = vpop.f32.mrb[12].mxu0 }
 0x25c   : > { %v926_v9 = vpop.f32.mrb[13].mxu0  ;;  %v935_v57 = vadd.f32 %v1448_v12, %v2081_v21 }
 0x25d   : > { %v1449_v51 = vpop.f32.mrb[14].mxu0  ;;  %v927_v28 = vadd.f32 %v2081_v21, %v926_v9 }
 0x25e   : > { %v938_v54 = vadd.f32 %v1449_v51, %v2081_v21  ;;  %v929_v52 = vpop.f32.mrb[15].mxu0 }
 0x25f   : > { %v930_v47 = vadd.f32 %v2081_v21, %v929_v52  ;;  %v1464_v11 = vpop.f32.mrb[12].mxu1 }
 0x260   : > { %v1355_v58 = vpack.c.bf16 %v938_v54, %v935_v57  ;;  %v990_v32 = vpop.f32.mrb[13].mxu1  ;;  %v999_v7 = vadd.f32 %v1464_v11, %v2081_v21 }
 0x261   : > { %v1350_v24 = vpack.c.bf16 %v930_v47, %v927_v28  ;;  %v1465_v62 = vpop.f32.mrb[14].mxu1  ;;  %v991_v40 = vadd.f32 %v2081_v21, %v990_v32 }
 0x262   : > { %1403 = vst [vmem:[%s2090_s13 + $0x38] sm:$0xff] %v1355_v58   ;;  %v1002_v59 = vadd.f32 %v1465_v62, %v2081_v21  ;;  %v993_v37 = vpop.f32.mrb[15].mxu1 }
 0x263   : > { %1402 = vst [vmem:[%s2090_s13 + $0x30] sm:$0xff] %v1350_v24   ;;  %v994_v3 = vadd.f32 %v2081_v21, %v993_v37 }
 0x264   : > { %v1395_v4 = vpack.c.bf16 %v1002_v59, %v999_v7 }
 0x265   : > { %v1390_v6 = vpack.c.bf16 %v994_v3, %v991_v40 }
 0x266   : > { %1411 = vst [vmem:[%s2090_s13 + $0x78] sm:$0xff] %v1395_v4  }
 0x267   : > { %1410 = vst [vmem:[%s2090_s13 + $0x70] sm:$0xff] %v1390_v6  }
 0x268 PF: > { %s15_s18 = sadd.s32 1, %s1550_s18  }
 0x269   : > { %p12_p4 = scmp.ge.s32.totalorder %s15_s18, 4  }
 0x26b   :  { %14 = sbr.rel (!%p12_p4) target bundleno = 1 (0x1), region = 70 }

// kernel: block_forward.5
= control target key start
LH: loop header
LB: loop body
LE: loop exit
PB: predicated region body
PF: predicated region fallthrough
CT: control target
= control target key end

     0   :  { %s2144_s21 = smov 0   ;;  %s2986_s0 = inlined_call_operand.vmem [shape: f32[512,32], index: 0, kind: input, shape index: {}]   ;;  %s2987_s1 = inlined_call_operand.vmem [shape: f32[512,32], index: 1, kind: input, shape index: {}]   ;;  %s2988_s2 = inlined_call_operand.vmem [shape: f32[1,32], index: 2, kind: input, shape index: {}]   ;;  %s2989_s3 = inlined_call_operand.vmem [shape: f32[1,32], index: 3, kind: input, shape index: {}]   ;;  %s2990_s4 = inlined_call_operand.vmem [shape: bf16[32,128], index: 4, kind: input, shape index: {}]   ;;  %s2991_s5 = inlined_call_operand.vmem [shape: bf16[128,32], index: 5, kind: input, shape index: {}]   ;;  %s2992_s6 = inlined_call_operand.vmem [shape: f32[512,32], index: 6, kind: output, shape index: {}]  }
   0x1 LB: > { %s1772_s22 = sadd.s32 4294967295, %s2107_s21   ;;  %p1776_p0 = scmp.ge.s32.totalorder %s2107_s21, 1  ;;  %s2107_s21 = sphi %s2144_s21, %s16_s21  }
   0x2   : > { %p224_p1 = scmp.lt.s32.totalorder %s2107_s21, 3 }
   0x4   : > { %p225_p2 = pnand %p1776_p0, %p224_p1 }
   0x6   : > { %228 = sbr.rel (%p225_p2) target bundleno = 872 (0x368), region = 44 }
   0xd   : > { %s1777_s23 = sshll.u32 %s1772_s22, 5  ;;  %vm376_vm0 = vcmask 261120  }
   0xe   : > { %p260_p3 = scmp.lt.s32.totalorder %s1777_s23, 63 }
  0x10   : > { %s3054_s23 = smov (!%p260_p3, %s1777_s23), 63 }
  0x11   : > { %s2152_s24 = sshll.u32 %s3054_s23, 3 }
  0x12   : > { %s2158_s27 = scalar_lea.vmem %s2986_s0, %s2152_s24  ;;  %s2164_s30 = scalar_lea.vmem %s2987_s1, %s2152_s24 }
  0x13   : > { %v278_v0 = vld [vmem:[%s2158_s27] sm:$0xff]  ;;  %v280_v2 = vld [vmem:[%s2158_s27 + $0x10] sm:$0xff]  ;;  %v279_v5 = vld [vmem:[%s2158_s27 + $0x8] sm:$0xff]  ;;  %s2885_s11 = scalar_lea.vmem %s2992_s6, %s2152_s24 }
  0x14   : > { %v310_v1 = vld [vmem:[%s2164_s30] sm:$0xff]  ;;  %v312_v4 = vld [vmem:[%s2164_s30 + $0x10] sm:$0xff]  ;;  %v311_v6 = vld [vmem:[%s2164_s30 + $0x8] sm:$0xff] }
  0x15   : > { %v2169_v3 = vadd.f32 %v310_v1, %v278_v0  ;;  %v2174_v7 = vadd.f32 %v312_v4, %v280_v2  ;;  %v2176_v8 = vadd.f32 %v311_v6, %v279_v5  ;;  %v281_v9 = vld [vmem:[%s2158_s27 + $0x18] sm:$0xff]  ;;  %v282_v11 = vld [vmem:[%s2158_s27 + $0x20] sm:$0xff]  ;;  %v283_v15 = vld [vmem:[%s2158_s27 + $0x28] sm:$0xff] }
  0x16   : > { %v313_v10 = vld [vmem:[%s2164_s30 + $0x18] sm:$0xff]  ;;  %v314_v14 = vld [vmem:[%s2164_s30 + $0x20] sm:$0xff]  ;;  %v315_v16 = vld [vmem:[%s2164_s30 + $0x28] sm:$0xff] }
  0x17   : > { %v377_v12 = vsel %vm376_vm0, %v2169_v3, 0.0  ;;  %v2183_v13 = vadd.f32 %v313_v10, %v281_v9  ;;  %v383_v17 = vsel %vm376_vm0, %v2174_v7, 0.0  ;;  %v380_v18 = vsel %vm376_vm0, %v2176_v8, 0.0  ;;  %v284_v22 = vld [vmem:[%s2158_s27 + $0x30] sm:$0xff]  ;;  %v285_v24 = vld [vmem:[%s2158_s27 + $0x38] sm:$0xff]  ;;  %v286_v30 = vld [vmem:[%s2158_s27 + $0x40] sm:$0xff] }
  0x18   : > { %378 = vadd.xlane.f32.xlu0 %v377_v12  ;;  %384 = vadd.xlane.f32.xlu1 %v383_v17  ;;  %v2192_v19 = vadd.f32 %v314_v14, %v282_v11  ;;  %v2196_v21 = vadd.f32 %v315_v16, %v283_v15  ;;  %v316_v23 = vld [vmem:[%s2164_s30 + $0x30] sm:$0xff]  ;;  %v317_v25 = vld [vmem:[%s2164_s30 + $0x38] sm:$0xff]  ;;  %v318_v31 = vld [vmem:[%s2164_s30 + $0x40] sm:$0xff] }
  0x19   : > { %v386_v20 = vsel %vm376_vm0, %v2183_v13, 0.0  ;;  %v2204_v27 = vadd.f32 %v316_v23, %v284_v22  ;;  %v2208_v29 = vadd.f32 %v317_v25, %v285_v24  ;;  %v287_v32 = vld [vmem:[%s2158_s27 + $0x48] sm:$0xff]  ;;  %v2216_v35 = vadd.f32 %v318_v31, %v286_v30  ;;  %v288_v38 = vld [vmem:[%s2158_s27 + $0x50] sm:$0xff]  ;;  %v289_v40 = vld [vmem:[%s2158_s27 + $0x58] sm:$0xff] }
  0x1a   : > { %v389_v26 = vsel %vm376_vm0, %v2192_v19, 0.0  ;;  %v392_v28 = vsel %vm376_vm0, %v2196_v21, 0.0  ;;  %v319_v33 = vld [vmem:[%s2164_s30 + $0x48] sm:$0xff]  ;;  %v320_v39 = vld [vmem:[%s2164_s30 + $0x50] sm:$0xff]  ;;  %v321_v41 = vld [vmem:[%s2164_s30 + $0x58] sm:$0xff] }
  0x1b   : > { %v395_v34 = vsel %vm376_vm0, %v2204_v27, 0.0  ;;  %v398_v36 = vsel %vm376_vm0, %v2208_v29, 0.0  ;;  %v2220_v37 = vadd.f32 %v319_v33, %v287_v32  ;;  %v401_v42 = vsel %vm376_vm0, %v2216_v35, 0.0  ;;  %v290_v46 = vld [vmem:[%s2158_s27 + $0x60] sm:$0xff]  ;;  %v291_v48 = vld [vmem:[%s2158_s27 + $0x68] sm:$0xff]  ;;  %v292_v54 = vld [vmem:[%s2158_s27 + $0x70] sm:$0xff] }
  0x1c   : > { %381 = vadd.xlane.f32.xlu0 %v380_v18  ;;  %387 = vadd.xlane.f32.xlu1 %v386_v20  ;;  %v2228_v43 = vadd.f32 %v320_v39, %v288_v38  ;;  %v2232_v45 = vadd.f32 %v321_v41, %v289_v40  ;;  %v322_v47 = vld [vmem:[%s2164_s30 + $0x60] sm:$0xff]  ;;  %v323_v49 = vld [vmem:[%s2164_s30 + $0x68] sm:$0xff]  ;;  %v324_v55 = vld [vmem:[%s2164_s30 + $0x70] sm:$0xff] }
  0x1d   : > { %v404_v44 = vsel %vm376_vm0, %v2220_v37, 0.0  ;;  %v2240_v51 = vadd.f32 %v322_v47, %v290_v46  ;;  %v2244_v53 = vadd.f32 %v323_v49, %v291_v48  ;;  %v293_v56 = vld [vmem:[%s2158_s27 + $0x78] sm:$0xff]  ;;  %v2252_v59 = vadd.f32 %v324_v55, %v292_v54  ;;  %v294_v62 = vld [vmem:[%s2158_s27 + $0x80] sm:$0xff]  ;;  %v295_v0 = vld [vmem:[%s2158_s27 + $0x88] sm:$0xff] }
  0x1e   : > { %v407_v50 = vsel %vm376_vm0, %v2228_v43, 0.0  ;;  %v410_v52 = vsel %vm376_vm0, %v2232_v45, 0.0  ;;  %v325_v57 = vld [vmem:[%s2164_s30 + $0x78] sm:$0xff]  ;;  %v326_v63 = vld [vmem:[%s2164_s30 + $0x80] sm:$0xff]  ;;  %v327_v1 = vld [vmem:[%s2164_s30 + $0x88] sm:$0xff] }
  0x1f   : > { %3013 = vst [vmem:[#allocation2_spill] sm:$0xff] %v2240_v51  ;;  %3014 = vst [vmem:[#allocation3_spill] sm:$0xff] %v2244_v53  ;;  %v413_v58 = vsel %vm376_vm0, %v2240_v51, 0.0  ;;  %v416_v60 = vsel %vm376_vm0, %v2244_v53, 0.0  ;;  %v2256_v61 = vadd.f32 %v325_v57, %v293_v56  ;;  %v419_v2 = vsel %vm376_vm0, %v2252_v59, 0.0  ;;  %v296_v9 = vld [vmem:[%s2158_s27 + $0x90] sm:$0xff] }
  0x20   : > { %390 = vadd.xlane.f32.xlu0 %v389_v26  ;;  %393 = vadd.xlane.f32.xlu1 %v392_v28  ;;  %3015 = vst [vmem:[#allocation4_spill] sm:$0xff] %v2252_v59  ;;  %v2264_v4 = vadd.f32 %v326_v63, %v294_v62  ;;  %v2268_v6 = vadd.f32 %v327_v1, %v295_v0  ;;  %v328_v10 = vld [vmem:[%s2164_s30 + $0x90] sm:$0xff]  ;;  %v297_v11 = vld [vmem:[%s2158_s27 + $0x98] sm:$0xff]  ;;  %v298_v18 = vld [vmem:[%s2158_s27 + $0xa0] sm:$0xff] }
  0x21   : > { %3016 = vst [vmem:[#allocation5_spill] sm:$0xff] %v2256_v61  ;;  %v422_v5 = vsel %vm376_vm0, %v2256_v61, 0.0  ;;  %v329_v12 = vld [vmem:[%s2164_s30 + $0x98] sm:$0xff]  ;;  %v2276_v15 = vadd.f32 %v328_v10, %v296_v9  ;;  %v330_v20 = vld [vmem:[%s2164_s30 + $0xa0] sm:$0xff]  ;;  %v299_v22 = vld [vmem:[%s2158_s27 + $0xa8] sm:$0xff] }
  0x22   : > { %3017 = vst [vmem:[#allocation6_spill] sm:$0xff] %v2264_v4  ;;  %3018 = vst [vmem:[#allocation7_spill] sm:$0xff] %v2268_v6  ;;  %v425_v14 = vsel %vm376_vm0, %v2264_v4, 0.0  ;;  %v428_v16 = vsel %vm376_vm0, %v2268_v6, 0.0  ;;  %v2280_v17 = vadd.f32 %v329_v12, %v297_v11  ;;  %v331_v23 = vld [vmem:[%s2164_s30 + $0xa8] sm:$0xff]  ;;  %v2288_v25 = vadd.f32 %v330_v20, %v298_v18  ;;  %v300_v30 = vld [vmem:[%s2158_s27 + $0xb0] sm:$0xff] }
  0x23   : > { %3019 = vst [vmem:[#allocation8_spill] sm:$0xff] %v2276_v15  ;;  %v431_v24 = vsel %vm376_vm0, %v2276_v15, 0.0  ;;  %v2292_v28 = vadd.f32 %v331_v23, %v299_v22  ;;  %v332_v31 = vld [vmem:[%s2164_s30 + $0xb0] sm:$0xff]  ;;  %v301_v32 = vld [vmem:[%s2158_s27 + $0xb8] sm:$0xff]  ;;  %v302_v40 = vld [vmem:[%s2158_s27 + $0xc0] sm:$0xff] }
  0x24   : > { %396 = vadd.xlane.f32.xlu0 %v395_v34  ;;  %399 = vadd.xlane.f32.xlu1 %v398_v36  ;;  %3020 = vst [vmem:[#allocation9_spill] sm:$0xff] %v2280_v17  ;;  %3021 = vst [vmem:[#allocation10_spill] sm:$0xff] %v2288_v25  ;;  %v434_v26 = vsel %vm376_vm0, %v2280_v17, 0.0  ;;  %v333_v33 = vld [vmem:[%s2164_s30 + $0xb8] sm:$0xff]  ;;  %v437_v34 = vsel %vm376_vm0, %v2288_v25, 0.0  ;;  %v2300_v36 = vadd.f32 %v332_v31, %v300_v30  ;;  %v334_v41 = vld [vmem:[%s2164_s30 + $0xc0] sm:$0xff] }
  0x25   : > { %3022 = vst [vmem:[#allocation11_spill] sm:$0xff] %v2292_v28  ;;  %v440_v38 = vsel %vm376_vm0, %v2292_v28, 0.0  ;;  %v2304_v39 = vadd.f32 %v333_v33, %v301_v32  ;;  %v2312_v47 = vadd.f32 %v334_v41, %v302_v40  ;;  %v305_v54 = vld [vmem:[%s2158_s27 + $0xd8] sm:$0xff]  ;;  %v306_v62 = vld [vmem:[%s2158_s27 + $0xe0] sm:$0xff]  ;;  %v307_v0 = vld [vmem:[%s2158_s27 + $0xe8] sm:$0xff] }
  0x26   : > { %3023 = vst [vmem:[#allocation12_spill] sm:$0xff] %v2300_v36  ;;  %v443_v46 = vsel %vm376_vm0, %v2300_v36, 0.0  ;;  %v337_v55 = vld [vmem:[%s2164_s30 + $0xd8] sm:$0xff]  ;;  %v338_v63 = vld [vmem:[%s2164_s30 + $0xe0] sm:$0xff]  ;;  %v339_v1 = vld [vmem:[%s2164_s30 + $0xe8] sm:$0xff] }
  0x27   : > { %3024 = vst [vmem:[#allocation13_spill] sm:$0xff] %v2304_v39  ;;  %3025 = vst [vmem:[#allocation14_spill] sm:$0xff] %v2312_v47  ;;  %v446_v48 = vsel %vm376_vm0, %v2304_v39, 0.0  ;;  %v449_v56 = vsel %vm376_vm0, %v2312_v47, 0.0  ;;  %v2340_v10 = vadd.f32 %v339_v1, %v307_v0  ;;  %v308_v11 = vld [vmem:[%s2158_s27 + $0xf0] sm:$0xff] }
  0x28   : > { %402 = vadd.xlane.f32.xlu0 %v401_v42  ;;  %405 = vadd.xlane.f32.xlu1 %v404_v44  ;;  %v303_v42 = vld [vmem:[%s2158_s27 + $0xc8] sm:$0xff]  ;;  %v340_v12 = vld [vmem:[%s2164_s30 + $0xf0] sm:$0xff] }
  0x29   : > { %v335_v44 = vld [vmem:[%s2164_s30 + $0xc8] sm:$0xff]  ;;  %3030 = vst [vmem:[#allocation19_spill] sm:$0xff] %v2340_v10  ;;  %v2348_v20 = vadd.f32 %v340_v12, %v308_v11  ;;  %v464_v22 = vsel %vm376_vm0, %v2340_v10, 0.0 }
  0x2a   : > { %v2316_v49 = vadd.f32 %v335_v44, %v303_v42 }
  0x2b   : > { %3031 = vst [vmem:[#allocation20_spill] sm:$0xff] %v2348_v20 }
  0x2c   : > { %408 = vadd.xlane.f32.xlu0 %v407_v50  ;;  %411 = vadd.xlane.f32.xlu1 %v410_v52  ;;  %3026 = vst [vmem:[#allocation15_spill] sm:$0xff] %v2316_v49  ;;  %v304_v50 = vld [vmem:[%s2158_s27 + $0xd0] sm:$0xff] }
  0x2d   : > { %v336_v52 = vld [vmem:[%s2164_s30 + $0xd0] sm:$0xff] }
  0x2e   : > { %v2324_v57 = vadd.f32 %v336_v52, %v304_v50 }
  0x30   : > { %414 = vadd.xlane.f32.xlu0 %v413_v58  ;;  %417 = vadd.xlane.f32.xlu1 %v416_v60  ;;  %3027 = vst [vmem:[#allocation16_spill] sm:$0xff] %v2324_v57  ;;  %v452_v58 = vsel %vm376_vm0, %v2316_v49, 0.0  ;;  %v2328_v60 = vadd.f32 %v337_v55, %v305_v54 }
  0x32   : > { %3028 = vst [vmem:[#allocation17_spill] sm:$0xff] %v2328_v60  ;;  %v458_v9 = vsel %vm376_vm0, %v2328_v60, 0.0 }
  0x34   : > { %420 = vadd.xlane.f32.xlu0 %v419_v2  ;;  %423 = vadd.xlane.f32.xlu1 %v422_v5  ;;  %v455_v2 = vsel %vm376_vm0, %v2324_v57, 0.0  ;;  %v2336_v5 = vadd.f32 %v338_v63, %v306_v62 }
  0x36   : > { %3029 = vst [vmem:[#allocation18_spill] sm:$0xff] %v2336_v5  ;;  %v461_v18 = vsel %vm376_vm0, %v2336_v5, 0.0 }
  0x38   : > { %426 = vadd.xlane.f32.xlu0 %v425_v14  ;;  %429 = vadd.xlane.f32.xlu1 %v428_v16  ;;  %v309_v14 = vld [vmem:[%s2158_s27 + $0xf8] sm:$0xff] }
  0x39   : > { %v341_v16 = vld [vmem:[%s2164_s30 + $0xf8] sm:$0xff] }
  0x3a   : > { %v2352_v23 = vadd.f32 %v341_v16, %v309_v14 }
  0x3c   : > { %432 = vadd.xlane.f32.xlu0 %v431_v24  ;;  %435 = vadd.xlane.f32.xlu1 %v434_v26  ;;  %3032 = vst [vmem:[#allocation21_spill] sm:$0xff] %v2352_v23  ;;  %v467_v24 = vsel %vm376_vm0, %v2348_v20, 0.0  ;;  %v470_v26 = vsel %vm376_vm0, %v2352_v23, 0.0 }
  0x40   : > { %438 = vadd.xlane.f32.xlu0 %v437_v34  ;;  %441 = vadd.xlane.f32.xlu1 %v440_v38 }
  0x44   : > { %444 = vadd.xlane.f32.xlu0 %v443_v46  ;;  %447 = vadd.xlane.f32.xlu1 %v446_v48 }
  0x48   : > { %450 = vadd.xlane.f32.xlu0 %v449_v56  ;;  %453 = vadd.xlane.f32.xlu1 %v452_v58 }
  0x4c   : > { %456 = vadd.xlane.f32.xlu0 %v455_v2  ;;  %459 = vadd.xlane.f32.xlu1 %v458_v9 }
  0x50   : > { %462 = vadd.xlane.f32.xlu0 %v461_v18  ;;  %465 = vadd.xlane.f32.xlu1 %v464_v22 }
  0x54   : > { %468 = vadd.xlane.f32.xlu0 %v467_v24  ;;  %471 = vadd.xlane.f32.xlu1 %v470_v26 }
  0xa5   : > { %v379_v30 = vpop.xlane.xlu0 %378  ;;  %v385_v32 = vpop.xlane.xlu1 %384 }
  0xa6   : > { %v474_v31 = vmul.f32 0.03125, %v379_v30  ;;  %v476_v33 = vmul.f32 0.03125, %v385_v32 }
  0xa8   : > { %v2359_v34 = vsub.f32 %v2169_v3, %v474_v31  ;;  %v2362_v38 = vsub.f32 %v2174_v7, %v476_v33 }
  0xa9   : > { %v382_v40 = vpop.xlane.xlu0 %381  ;;  %v388_v42 = vpop.xlane.xlu1 %387 }
  0xaa   : > { %v475_v41 = vmul.f32 0.03125, %v382_v40  ;;  %v538_v44 = vmul.f32 %v2359_v34, %v2359_v34  ;;  %v477_v46 = vmul.f32 0.03125, %v388_v42  ;;  %v540_v48 = vmul.f32 %v2362_v38, %v2362_v38 }
  0xac   : > { %v2369_v50 = vsub.f32 %v2176_v8, %v475_v41  ;;  %v570_v52 = vsel %vm376_vm0, %v538_v44, 0.0  ;;  %v2373_v54 = vsub.f32 %v2183_v13, %v477_v46  ;;  %v576_v62 = vsel %vm376_vm0, %v540_v48, 0.0 }
  0xad   : > { %571 = vadd.xlane.f32.xlu0 %v570_v52  ;;  %v391_v55 = vpop.xlane.xlu0 %390  ;;  %v394_v58 = vpop.xlane.xlu1 %393 }
  0xae   : > { %v478_v56 = vmul.f32 0.03125, %v391_v55  ;;  %v539_v63 = vmul.f32 %v2369_v50, %v2369_v50  ;;  %v479_v0 = vmul.f32 0.03125, %v394_v58  ;;  %v541_v1 = vmul.f32 %v2373_v54, %v2373_v54 }
  0xb0   : > { %v2381_v2 = vsub.f32 %v2192_v19, %v478_v56  ;;  %v573_v9 = vsel %vm376_vm0, %v539_v63, 0.0  ;;  %v2385_v11 = vsub.f32 %v2196_v21, %v479_v0  ;;  %v579_v18 = vsel %vm376_vm0, %v541_v1, 0.0 }
  0xb1   : > { %577 = vadd.xlane.f32.xlu0 %v576_v62  ;;  %574 = vadd.xlane.f32.xlu1 %v573_v9  ;;  %v397_v12 = vpop.xlane.xlu0 %396  ;;  %v400_v16 = vpop.xlane.xlu1 %399 }
  0xb2   : > { %v480_v14 = vmul.f32 0.03125, %v397_v12  ;;  %v542_v22 = vmul.f32 %v2381_v2, %v2381_v2  ;;  %v481_v24 = vmul.f32 0.03125, %v400_v16  ;;  %v543_v26 = vmul.f32 %v2385_v11, %v2385_v11 }
  0xb4   : > { %v2393_v30 = vsub.f32 %v2204_v27, %v480_v14  ;;  %v582_v31 = vsel %vm376_vm0, %v542_v22, 0.0  ;;  %v2397_v32 = vsub.f32 %v2208_v29, %v481_v24  ;;  %v585_v42 = vsel %vm376_vm0, %v543_v26, 0.0 }
  0xb5   : > { %580 = vadd.xlane.f32.xlu1 %v579_v18  ;;  %583 = vadd.xlane.f32.xlu0 %v582_v31  ;;  %v403_v33 = vpop.xlane.xlu0 %402  ;;  %v406_v41 = vpop.xlane.xlu1 %405 }
  0xb6   : > { %v482_v40 = vmul.f32 0.03125, %v403_v33  ;;  %v544_v44 = vmul.f32 %v2393_v30, %v2393_v30  ;;  %v483_v46 = vmul.f32 0.03125, %v406_v41  ;;  %v545_v48 = vmul.f32 %v2397_v32, %v2397_v32 }
  0xb8   : > { %v2405_v52 = vsub.f32 %v2216_v35, %v482_v40  ;;  %v588_v55 = vsel %vm376_vm0, %v544_v44, 0.0  ;;  %v2409_v56 = vsub.f32 %v2220_v37, %v483_v46  ;;  %v591_v0 = vsel %vm376_vm0, %v545_v48, 0.0 }
  0xb9   : > { %586 = vadd.xlane.f32.xlu1 %v585_v42  ;;  %589 = vadd.xlane.f32.xlu0 %v588_v55  ;;  %v409_v58 = vpop.xlane.xlu0 %408  ;;  %v412_v63 = vpop.xlane.xlu1 %411 }
  0xba   : > { %v484_v62 = vmul.f32 0.03125, %v409_v58  ;;  %v546_v1 = vmul.f32 %v2405_v52, %v2405_v52  ;;  %v485_v9 = vmul.f32 0.03125, %v412_v63  ;;  %v547_v12 = vmul.f32 %v2409_v56, %v2409_v56 }
  0xbc   : > { %v2417_v14 = vsub.f32 %v2228_v43, %v484_v62  ;;  %v594_v16 = vsel %vm376_vm0, %v546_v1, 0.0  ;;  %v2421_v18 = vsub.f32 %v2232_v45, %v485_v9  ;;  %v597_v31 = vsel %vm376_vm0, %v547_v12, 0.0 }
  0xbd   : > { %592 = vadd.xlane.f32.xlu1 %v591_v0  ;;  %595 = vadd.xlane.f32.xlu0 %v594_v16  ;;  %v415_v22 = vpop.xlane.xlu0 %414  ;;  %v418_v26 = vpop.xlane.xlu1 %417 }
  0xbe   : > { %v486_v24 = vmul.f32 0.03125, %v415_v22  ;;  %v548_v33 = vmul.f32 %v2417_v14, %v2417_v14  ;;  %v487_v40 = vmul.f32 0.03125, %v418_v26  ;;  %v549_v41 = vmul.f32 %v2421_v18, %v2421_v18 }
  0xc0   : > { %v2429_v42 = vsub.f32 %v2240_v51, %v486_v24  ;;  %v600_v44 = vsel %vm376_vm0, %v548_v33, 0.0  ;;  %v2433_v46 = vsub.f32 %v2244_v53, %v487_v40  ;;  %v603_v62 = vsel %vm376_vm0, %v549_v41, 0.0 }
  0xc1   : > { %598 = vadd.xlane.f32.xlu1 %v597_v31  ;;  %601 = vadd.xlane.f32.xlu0 %v600_v44  ;;  %v421_v48 = vpop.xlane.xlu0 %420  ;;  %v424_v58 = vpop.xlane.xlu1 %423 }
  0xc2   : > { %v488_v55 = vmul.f32 0.03125, %v421_v48  ;;  %v550_v63 = vmul.f32 %v2429_v42, %v2429_v42  ;;  %v489_v0 = vmul.f32 0.03125, %v424_v58  ;;  %v551_v1 = vmul.f32 %v2433_v46, %v2433_v46 }
  0xc4   : > { %v2441_v9 = vsub.f32 %v2252_v59, %v488_v55  ;;  %v606_v12 = vsel %vm376_vm0, %v550_v63, 0.0  ;;  %v2445_v16 = vsub.f32 %v2256_v61, %v489_v0  ;;  %v609_v31 = vsel %vm376_vm0, %v551_v1, 0.0 }
  0xc5   : > { %604 = vadd.xlane.f32.xlu1 %v603_v62  ;;  %607 = vadd.xlane.f32.xlu0 %v606_v12  ;;  %v427_v22 = vpop.xlane.xlu0 %426  ;;  %v430_v26 = vpop.xlane.xlu1 %429 }
  0xc6   : > { %v490_v24 = vmul.f32 0.03125, %v427_v22  ;;  %v552_v33 = vmul.f32 %v2441_v9, %v2441_v9  ;;  %v491_v40 = vmul.f32 0.03125, %v430_v26  ;;  %v553_v41 = vmul.f32 %v2445_v16, %v2445_v16 }
  0xc8   : > { %v2453_v44 = vsub.f32 %v2264_v4, %v490_v24  ;;  %v612_v48 = vsel %vm376_vm0, %v552_v33, 0.0  ;;  %v2457_v55 = vsub.f32 %v2268_v6, %v491_v40  ;;  %v615_v0 = vsel %vm376_vm0, %v553_v41, 0.0 }
  0xc9   : > { %610 = vadd.xlane.f32.xlu1 %v609_v31  ;;  %613 = vadd.xlane.f32.xlu0 %v612_v48  ;;  %v433_v58 = vpop.xlane.xlu0 %432  ;;  %v436_v63 = vpop.xlane.xlu1 %435 }
  0xca   : > { %v492_v62 = vmul.f32 0.03125, %v433_v58  ;;  %v554_v1 = vmul.f32 %v2453_v44, %v2453_v44  ;;  %v493_v12 = vmul.f32 0.03125, %v436_v63  ;;  %v555_v22 = vmul.f32 %v2457_v55, %v2457_v55 }
  0xcc   : > { %v2465_v24 = vsub.f32 %v2276_v15, %v492_v62  ;;  %v618_v26 = vsel %vm376_vm0, %v554_v1, 0.0  ;;  %v2469_v31 = vsub.f32 %v2280_v17, %v493_v12  ;;  %v621_v48 = vsel %vm376_vm0, %v555_v22, 0.0  ;;  %v1963_v22 = vld [vmem:[%s2990_s4] sm:$0xff]  }
  0xcd   : > { %616 = vadd.xlane.f32.xlu1 %v615_v0  ;;  %619 = vadd.xlane.f32.xlu0 %v618_v26  ;;  %v439_v33 = vpop.xlane.xlu0 %438  ;;  %v442_v41 = vpop.xlane.xlu1 %441 }
  0xce   : > { %v494_v40 = vmul.f32 0.03125, %v439_v33  ;;  %v556_v58 = vmul.f32 %v2465_v24, %v2465_v24  ;;  %v495_v63 = vmul.f32 0.03125, %v442_v41  ;;  %v557_v62 = vmul.f32 %v2469_v31, %v2469_v31  ;;  %1855 = vmatprep.subr.bf16.mxu0 %v1963_v22 }
  0xcf   : > { %1856 = vmatpush3.bf16.msra.mxu0 %v1963_v22 }
  0xd0   : > { %v2477_v6 = vsub.f32 %v2288_v25, %v494_v40  ;;  %v624_v1 = vsel %vm376_vm0, %v556_v58, 0.0  ;;  %v2481_v0 = vsub.f32 %v2292_v28, %v495_v63  ;;  %v627_v41 = vsel %vm376_vm0, %v557_v62, 0.0 }
  0xd1   : > { %622 = vadd.xlane.f32.xlu1 %v621_v48  ;;  %625 = vadd.xlane.f32.xlu0 %v624_v1  ;;  %v445_v12 = vpop.xlane.xlu0 %444  ;;  %v448_v33 = vpop.xlane.xlu1 %447 }
  0xd2   : > { %v496_v26 = vmul.f32 0.03125, %v445_v12  ;;  %v558_v40 = vmul.f32 %v2477_v6, %v2477_v6  ;;  %v497_v25 = vmul.f32 0.03125, %v448_v33  ;;  %v559_v58 = vmul.f32 %v2481_v0, %v2481_v0  ;;  %v1964_v12 = vld [vmem:[%s2990_s4 + $0x8] sm:$0xff]  }
  0xd3   : > { %1857 = vmatprep.subr.bf16.mxu0 %v1964_v12 }
  0xd4   : > { %v2492_v48 = vsub.f32 %v2300_v36, %v496_v26  ;;  %v630_v63 = vsel %vm376_vm0, %v558_v40, 0.0  ;;  %v2496_v1 = vsub.f32 %v2304_v39, %v497_v25  ;;  %v633_v17 = vsel %vm376_vm0, %v559_v58, 0.0  ;;  %1858 = vmatpush3.bf16.msra.mxu0 %v1964_v12 }
  0xd5   : > { %628 = vadd.xlane.f32.xlu1 %v627_v41  ;;  %631 = vadd.xlane.f32.xlu0 %v630_v63  ;;  %v451_v62 = vpop.xlane.xlu0 %450  ;;  %v454_v28 = vpop.xlane.xlu1 %453 }
  0xd6   : > { %v498_v33 = vmul.f32 0.03125, %v451_v62  ;;  %v560_v26 = vmul.f32 %v2492_v48, %v2492_v48  ;;  %v499_v36 = vmul.f32 0.03125, %v454_v28  ;;  %v561_v22 = vmul.f32 %v2496_v1, %v2496_v1 }
  0xd8   : > { %v2507_v25 = vsub.f32 %v2312_v47, %v498_v33  ;;  %v636_v41 = vsel %vm376_vm0, %v560_v26, 0.0  ;;  %v2511_v40 = vsub.f32 %v2316_v49, %v499_v36  ;;  %v639_v28 = vsel %vm376_vm0, %v561_v22, 0.0 }
  0xd9   : > { %634 = vadd.xlane.f32.xlu1 %v633_v17  ;;  %637 = vadd.xlane.f32.xlu0 %v636_v41  ;;  %v457_v58 = vpop.xlane.xlu0 %456  ;;  %v460_v62 = vpop.xlane.xlu1 %459 }
  0xda   : > { %v500_v63 = vmul.f32 0.03125, %v457_v58  ;;  %v562_v39 = vmul.f32 %v2507_v25, %v2507_v25  ;;  %v501_v4 = vmul.f32 0.03125, %v460_v62  ;;  %v563_v33 = vmul.f32 %v2511_v40, %v2511_v40 }
  0xdc   : > { %v2519_v26 = vsub.f32 %v2324_v57, %v500_v63  ;;  %v642_v36 = vsel %vm376_vm0, %v562_v39, 0.0  ;;  %v2523_v17 = vsub.f32 %v2328_v60, %v501_v4  ;;  %v645_v58 = vsel %vm376_vm0, %v563_v33, 0.0 }
  0xdd   : > { %640 = vadd.xlane.f32.xlu1 %v639_v28  ;;  %643 = vadd.xlane.f32.xlu0 %v642_v36  ;;  %v463_v12 = vpop.xlane.xlu0 %462  ;;  %v466_v22 = vpop.xlane.xlu1 %465 }
  0xde   : > { %v502_v41 = vmul.f32 0.03125, %v463_v12  ;;  %v564_v62 = vmul.f32 %v2519_v26, %v2519_v26  ;;  %v503_v49 = vmul.f32 0.03125, %v466_v22  ;;  %v565_v63 = vmul.f32 %v2523_v17, %v2523_v17 }
  0xe0   : > { %v2531_v47 = vsub.f32 %v2336_v5, %v502_v41  ;;  %v648_v4 = vsel %vm376_vm0, %v564_v62, 0.0  ;;  %v2535_v39 = vsub.f32 %v2340_v10, %v503_v49  ;;  %v651_v12 = vsel %vm376_vm0, %v565_v63, 0.0 }
  0xe1   : > { %646 = vadd.xlane.f32.xlu1 %v645_v58  ;;  %649 = vadd.xlane.f32.xlu0 %v648_v4  ;;  %v469_v28 = vpop.xlane.xlu0 %468  ;;  %v472_v33 = vpop.xlane.xlu1 %471 }
  0xe2   : > { %v504_v36 = vmul.f32 0.03125, %v469_v28  ;;  %v566_v22 = vmul.f32 %v2531_v47, %v2531_v47  ;;  %v505_v60 = vmul.f32 0.03125, %v472_v33  ;;  %v567_v41 = vmul.f32 %v2535_v39, %v2535_v39 }
  0xe4   : > { %v2543_v5 = vsub.f32 %v2348_v20, %v504_v36  ;;  %v654_v49 = vsel %vm376_vm0, %v566_v22, 0.0  ;;  %v2547_v58 = vsub.f32 %v2352_v23, %v505_v60  ;;  %v657_v62 = vsel %vm376_vm0, %v567_v41, 0.0 }
  0xe5   : > { %652 = vadd.xlane.f32.xlu1 %v651_v12  ;;  %655 = vadd.xlane.f32.xlu0 %v654_v49 }
  0xe6   : > { %v568_v63 = vmul.f32 %v2543_v5, %v2543_v5  ;;  %v569_v4 = vmul.f32 %v2547_v58, %v2547_v58 }
  0xe8   : > { %v660_v28 = vsel %vm376_vm0, %v568_v63, 0.0  ;;  %v663_v36 = vsel %vm376_vm0, %v569_v4, 0.0 }
  0xe9   : > { %658 = vadd.xlane.f32.xlu1 %v657_v62  ;;  %661 = vadd.xlane.f32.xlu0 %v660_v28 }
  0xed   : > { %664 = vadd.xlane.f32.xlu1 %v663_v36 }
 0x13a   : > { %v572_v33 = vpop.xlane.xlu0 %571 }
 0x13b   : > { %v666_v60 = vmul.f32 0.032258064, %v572_v33 }
 0x13d   : > { %v698_v22 = vadd.f32 1e-05, %v666_v60 }
 0x13e   : > { %v575_v12 = vpop.xlane.xlu1 %574  ;;  %v578_v49 = vpop.xlane.xlu0 %577 }
 0x13f   : > { %1973 = vrsqrt.f32 %v698_v22  ;;  %v667_v41 = vmul.f32 0.032258064, %v575_v12  ;;  %v668_v10 = vmul.f32 0.032258064, %v578_v49 }
 0x141   : > { %v699_v23 = vadd.f32 1e-05, %v667_v41  ;;  %v700_v20 = vadd.f32 1e-05, %v668_v10 }
 0x142   : > { %v581_v57 = vpop.xlane.xlu1 %580  ;;  %v584_v15 = vpop.xlane.xlu0 %583 }
 0x143   : > { %1975 = vrsqrt.f32 %v699_v23  ;;  %v669_v53 = vmul.f32 0.032258064, %v581_v57  ;;  %v670_v63 = vmul.f32 0.032258064, %v584_v15 }
 0x144   : > { %1977 = vrsqrt.f32 %v700_v20 }
 0x145   : > { %v701_v62 = vadd.f32 1e-05, %v669_v53  ;;  %v702_v28 = vadd.f32 1e-05, %v670_v63  ;;  %v2560_v53 = vld [vmem:[%s2988_s2] ss:$0 sm:$0xff] }
 0x146   : > { %v587_v4 = vpop.xlane.xlu1 %586  ;;  %v590_v36 = vpop.xlane.xlu0 %589 }
 0x147   : > { %1979 = vrsqrt.f32 %v701_v62  ;;  %v671_v33 = vmul.f32 0.032258064, %v587_v4  ;;  %v672_v60 = vmul.f32 0.032258064, %v590_v36 }
 0x148   : > { %1981 = vrsqrt.f32 %v702_v28 }
 0x149   : > { %v1974_v61 = vpop.eup %1973  ;;  %v703_v22 = vadd.f32 1e-05, %v671_v33  ;;  %v704_v12 = vadd.f32 1e-05, %v672_v60 }
 0x14a   : > { %v593_v49 = vpop.xlane.xlu1 %592  ;;  %v596_v41 = vpop.xlane.xlu0 %595  ;;  %v762_v10 = vmul.f32 %v1974_v61, %v2359_v34 }
 0x14b   : > { %1983 = vrsqrt.f32 %v703_v22  ;;  %v673_v23 = vmul.f32 0.032258064, %v593_v49  ;;  %v674_v57 = vmul.f32 0.032258064, %v596_v41  ;;  %v2568_v22 = vld [vmem:[%s2989_s3] ss:$0 sm:$0xff] }
 0x14c   : > { %1985 = vrsqrt.f32 %v704_v12  ;;  %v800_v33 = vmul.f32 %v2560_v53, %v762_v10 }
 0x14d   : > { %v1976_v15 = vpop.eup %1975  ;;  %v705_v20 = vadd.f32 1e-05, %v673_v23  ;;  %v706_v63 = vadd.f32 1e-05, %v674_v57 }
 0x14e   : > { %v1978_v62 = vpop.eup %1977  ;;  %v599_v28 = vpop.xlane.xlu1 %598  ;;  %v763_v36 = vmul.f32 %v1976_v15, %v2369_v50 }
 0x14f   : > { %v602_v4 = vpop.xlane.xlu0 %601  ;;  %v764_v61 = vmul.f32 %v1978_v62, %v2362_v38  ;;  %1987 = vrsqrt.f32 %v705_v20  ;;  %v675_v34 = vmul.f32 0.032258064, %v599_v28  ;;  %v838_v38 = vadd.f32 %v2568_v22, %v800_v33 }
 0x150   : > { %v676_v60 = vmul.f32 0.032258064, %v602_v4  ;;  %1989 = vrsqrt.f32 %v706_v63  ;;  %v801_v12 = vmul.f32 %v2560_v53, %v763_v36 }
 0x151   : > { %v1980_v49 = vpop.eup %1979  ;;  %v707_v41 = vadd.f32 1e-05, %v675_v34  ;;  %v802_v62 = vmul.f32 %v2560_v53, %v764_v61 }
 0x152   : > { %v708_v23 = vadd.f32 1e-05, %v676_v60  ;;  %v1982_v57 = vpop.eup %1981  ;;  %v765_v50 = vmul.f32 %v1980_v49, %v2373_v54  ;;  %v605_v10 = vpop.xlane.xlu1 %604  ;;  %v839_v20 = vadd.f32 %v2568_v22, %v801_v12 }
 0x153   : > { %v608_v15 = vpop.xlane.xlu0 %607  ;;  %v766_v28 = vmul.f32 %v1982_v57, %v2381_v2  ;;  %1991 = vrsqrt.f32 %v707_v41  ;;  %v677_v63 = vmul.f32 0.032258064, %v605_v10  ;;  %v840_v61 = vadd.f32 %v2568_v22, %v802_v62 }
 0x154   : > { %v678_v4 = vmul.f32 0.032258064, %v608_v15  ;;  %1993 = vrsqrt.f32 %v708_v23  ;;  %v870_v36 = vpack.c.bf16 %v839_v20, %v838_v38  ;;  %v803_v34 = vmul.f32 %v2560_v53, %v765_v50 }
 0x155   : > { %v1984_v60 = vpop.eup %1983  ;;  %v709_v51 = vadd.f32 1e-05, %v677_v63  ;;  %v804_v41 = vmul.f32 %v2560_v53, %v766_v28 }
 0x156   : > { %v710_v54 = vadd.f32 1e-05, %v678_v4  ;;  %v1986_v49 = vpop.eup %1985  ;;  %v767_v59 = vmul.f32 %v1984_v60, %v2385_v11  ;;  %v611_v33 = vpop.xlane.xlu1 %610  ;;  %1859 = vmatprep.mubr.msk.bf16.mxu0 %vm376_vm0, %v870_v36  ;;  %v841_v2 = vadd.f32 %v2568_v22, %v803_v34 }
 0x157   : > { %v614_v12 = vpop.xlane.xlu0 %613  ;;  %v768_v23 = vmul.f32 %v1986_v49, %v2393_v30  ;;  %1995 = vrsqrt.f32 %v709_v51  ;;  %v679_v57 = vmul.f32 0.032258064, %v611_v33  ;;  %v842_v28 = vadd.f32 %v2568_v22, %v804_v41 }
 0x158   : > { %v680_v50 = vmul.f32 0.032258064, %v614_v12  ;;  %1997 = vrsqrt.f32 %v710_v54  ;;  %v871_v10 = vpack.c.bf16 %v841_v2, %v840_v61  ;;  %v805_v15 = vmul.f32 %v2560_v53, %v767_v59 }
 0x159   : > { %v1988_v11 = vpop.eup %1987  ;;  %v711_v38 = vadd.f32 1e-05, %v679_v57  ;;  %v806_v30 = vmul.f32 %v2560_v53, %v768_v23 }
 0x15a   : > { %v712_v20 = vadd.f32 1e-05, %v680_v50  ;;  %v1990_v63 = vpop.eup %1989  ;;  %v769_v4 = vmul.f32 %v1988_v11, %v2397_v32  ;;  %v617_v62 = vpop.xlane.xlu1 %616  ;;  %1860 = vmatmul.mubr.msk.bf16.vlgmr.msra.gmra.mrb[0].mxu0 %vm376_vm0, %v871_v10  ;;  %v843_v51 = vadd.f32 %v2568_v22, %v805_v15 }
 0x15b   : > { %v620_v36 = vpop.xlane.xlu0 %619  ;;  %v770_v34 = vmul.f32 %v1990_v63, %v2405_v52  ;;  %1999 = vrsqrt.f32 %v711_v38  ;;  %v681_v59 = vmul.f32 0.032258064, %v617_v62  ;;  %v844_v23 = vadd.f32 %v2568_v22, %v806_v30 }
 0x15c   : > { %v682_v60 = vmul.f32 0.032258064, %v620_v36  ;;  %2001 = vrsqrt.f32 %v712_v20  ;;  %v872_v54 = vpack.c.bf16 %v843_v51, %v842_v28  ;;  %v807_v49 = vmul.f32 %v2560_v53, %v769_v4 }
 0x15d   : > { %v1992_v32 = vpop.eup %1991  ;;  %v713_v33 = vadd.f32 1e-05, %v681_v59  ;;  %v808_v50 = vmul.f32 %v2560_v53, %v770_v34 }
 0x15e   : > { %v714_v12 = vadd.f32 1e-05, %v682_v60  ;;  %v1994_v61 = vpop.eup %1993  ;;  %v771_v2 = vmul.f32 %v1992_v32, %v2409_v56  ;;  %v623_v41 = vpop.xlane.xlu1 %622  ;;  %1863 = vmatprep.mubr.msk.bf16.mxu0 %vm376_vm0, %v872_v54  ;;  %v845_v52 = vadd.f32 %v2568_v22, %v807_v49 }
 0x15f   : > { %v626_v57 = vpop.xlane.xlu0 %625  ;;  %v772_v10 = vmul.f32 %v1994_v61, %v2417_v14  ;;  %2003 = vrsqrt.f32 %v713_v33  ;;  %v683_v15 = vmul.f32 0.032258064, %v623_v41  ;;  %v846_v30 = vadd.f32 %v2568_v22, %v808_v50 }
 0x160   : > { %v684_v11 = vmul.f32 0.032258064, %v626_v57  ;;  %2005 = vrsqrt.f32 %v714_v12  ;;  %v873_v38 = vpack.c.bf16 %v845_v52, %v844_v23  ;;  %v809_v20 = vmul.f32 %v2560_v53, %v771_v2 }
 0x161   : > { %v1996_v56 = vpop.eup %1995  ;;  %v715_v63 = vadd.f32 1e-05, %v683_v15  ;;  %v810_v34 = vmul.f32 %v2560_v53, %v772_v10 }
 0x162   : > { %v716_v4 = vadd.f32 1e-05, %v684_v11  ;;  %v1998_v62 = vpop.eup %1997  ;;  %v773_v36 = vmul.f32 %v1996_v56, %v2421_v18  ;;  %v629_v28 = vpop.xlane.xlu1 %628  ;;  %1864 = vmatmul.mubr.msk.bf16.gmra.mrb[4].mxu0 %vm376_vm0, %v873_v38  ;;  %v847_v14 = vadd.f32 %v2568_v22, %v809_v20 }
 0x163   : > { %v632_v51 = vpop.xlane.xlu0 %631  ;;  %v774_v59 = vmul.f32 %v1998_v62, %v2429_v42  ;;  %2007 = vrsqrt.f32 %v715_v63  ;;  %v685_v60 = vmul.f32 0.032258064, %v629_v28  ;;  %v848_v23 = vadd.f32 %v2568_v22, %v810_v34 }
 0x164   : > { %v686_v54 = vmul.f32 0.032258064, %v632_v51  ;;  %2009 = vrsqrt.f32 %v716_v4  ;;  %v874_v49 = vpack.c.bf16 %v847_v14, %v846_v30  ;;  %v811_v32 = vmul.f32 %v2560_v53, %v773_v36 }
 0x165   : > { %v2000_v18 = vpop.eup %1999  ;;  %v717_v33 = vadd.f32 1e-05, %v685_v60  ;;  %v812_v52 = vmul.f32 %v2560_v53, %v774_v59 }
 0x166   : > { %v718_v12 = vadd.f32 1e-05, %v686_v54  ;;  %v2002_v61 = vpop.eup %2001  ;;  %v775_v2 = vmul.f32 %v2000_v18, %v2433_v46  ;;  %v635_v41 = vpop.xlane.xlu1 %634  ;;  %1867 = vmatprep.mubr.msk.bf16.mxu0 %vm376_vm0, %v874_v49  ;;  %v849_v42 = vadd.f32 %v2568_v22, %v811_v32 }
 0x167   : > { %v638_v57 = vpop.xlane.xlu0 %637  ;;  %v776_v50 = vmul.f32 %v2002_v61, %v2441_v9  ;;  %2011 = vrsqrt.f32 %v717_v33  ;;  %v687_v10 = vmul.f32 0.032258064, %v635_v41  ;;  %v850_v28 = vadd.f32 %v2568_v22, %v812_v52 }
 0x168   : > { %v688_v15 = vmul.f32 0.032258064, %v638_v57  ;;  %2013 = vrsqrt.f32 %v718_v12  ;;  %v875_v11 = vpack.c.bf16 %v849_v42, %v848_v23  ;;  %v813_v38 = vmul.f32 %v2560_v53, %v775_v2 }
 0x169   : > { %v2004_v46 = vpop.eup %2003  ;;  %v719_v20 = vadd.f32 1e-05, %v687_v10  ;;  %v814_v51 = vmul.f32 %v2560_v53, %v776_v50 }
 0x16a   : > { %v720_v56 = vadd.f32 1e-05, %v688_v15  ;;  %v2006_v63 = vpop.eup %2005  ;;  %v777_v4 = vmul.f32 %v2004_v46, %v2445_v16  ;;  %v641_v62 = vpop.xlane.xlu1 %640  ;;  %1868 = vmatmul.mubr.msk.bf16.gmra.mrb[8].mxu0 %vm376_vm0, %v875_v11  ;;  %v851_v9 = vadd.f32 %v2568_v22, %v813_v38 }
 0x16b   : > { %v644_v36 = vpop.xlane.xlu0 %643  ;;  %v778_v30 = vmul.f32 %v2006_v63, %v2453_v44  ;;  %2015 = vrsqrt.f32 %v719_v20  ;;  %v689_v14 = vmul.f32 0.032258064, %v641_v62  ;;  %v852_v61 = vadd.f32 %v2568_v22, %v814_v51 }
 0x16c   : > { %v690_v34 = vmul.f32 0.032258064, %v644_v36  ;;  %2017 = vrsqrt.f32 %v720_v56  ;;  %v876_v59 = vpack.c.bf16 %v851_v9, %v850_v28  ;;  %v815_v60 = vmul.f32 %v2560_v53, %v777_v4 }
 0x16d   : > { %v2008_v16 = vpop.eup %2007  ;;  %v721_v54 = vadd.f32 1e-05, %v689_v14  ;;  %v816_v2 = vmul.f32 %v2560_v53, %v778_v30 }
 0x16e   : > { %v722_v49 = vadd.f32 1e-05, %v690_v34  ;;  %v2010_v32 = vpop.eup %2009  ;;  %v779_v18 = vmul.f32 %v2008_v16, %v2457_v55  ;;  %v647_v33 = vpop.xlane.xlu1 %646  ;;  %1871 = vmatprep.mubr.msk.bf16.mxu0 %vm376_vm0, %v876_v59  ;;  %v853_v44 = vadd.f32 %v2568_v22, %v815_v60 }
 0x16f   : > { %v650_v12 = vpop.xlane.xlu0 %649  ;;  %v780_v41 = vmul.f32 %v2010_v32, %v2465_v24  ;;  %2019 = vrsqrt.f32 %v721_v54  ;;  %v691_v57 = vmul.f32 0.032258064, %v647_v33  ;;  %v854_v20 = vadd.f32 %v2568_v22, %v816_v2 }
 0x170   : > { %v692_v23 = vmul.f32 0.032258064, %v650_v12  ;;  %2021 = vrsqrt.f32 %v722_v49  ;;  %v877_v42 = vpack.c.bf16 %v853_v44, %v852_v61  ;;  %v817_v52 = vmul.f32 %v2560_v53, %v779_v18 }
 0x171   : > { %v2012_v55 = vpop.eup %2011  ;;  %v723_v50 = vadd.f32 1e-05, %v691_v57  ;;  %v818_v56 = vmul.f32 %v2560_v53, %v780_v41 }
 0x172   : > { %v724_v10 = vadd.f32 1e-05, %v692_v23  ;;  %v2014_v15 = vpop.eup %2013  ;;  %v781_v11 = vmul.f32 %v2012_v55, %v2469_v31  ;;  %v653_v38 = vpop.xlane.xlu1 %652  ;;  %1872 = vmatmul.mubr.msk.bf16.gmra.mrb[12].mxu0 %vm376_vm0, %v877_v42  ;;  %v855_v24 = vadd.f32 %v2568_v22, %v817_v52 }
 0x173   : > { %v656_v46 = vpop.xlane.xlu0 %655  ;;  %v782_v63 = vmul.f32 %v2014_v15, %v2477_v6  ;;  %2023 = vrsqrt.f32 %v723_v50  ;;  %v693_v4 = vmul.f32 0.032258064, %v653_v38  ;;  %v856_v60 = vadd.f32 %v2568_v22, %v818_v56 }
 0x174   : > { %v694_v62 = vmul.f32 0.032258064, %v656_v46  ;;  %2025 = vrsqrt.f32 %v724_v10  ;;  %v878_v36 = vpack.c.bf16 %v855_v24, %v854_v20  ;;  %v819_v28 = vmul.f32 %v2560_v53, %v781_v11 }
 0x175   : > { %v2016_v31 = vpop.eup %2015  ;;  %v725_v9 = vadd.f32 1e-05, %v693_v4  ;;  %v820_v16 = vmul.f32 %v2560_v53, %v782_v63 }
 0x176   : > { %v726_v51 = vadd.f32 1e-05, %v694_v62  ;;  %v2018_v30 = vpop.eup %2017  ;;  %v783_v14 = vmul.f32 %v2016_v31, %v2481_v0  ;;  %v659_v34 = vpop.xlane.xlu1 %658  ;;  %1875 = vmatprep.mubr.msk.bf16.mxu0 %vm376_vm0, %v878_v36  ;;  %v857_v6 = vadd.f32 %v2568_v22, %v819_v28 }
 0x177   : > { %v662_v59 = vpop.xlane.xlu0 %661  ;;  %v784_v54 = vmul.f32 %v2018_v30, %v2492_v48  ;;  %2027 = vrsqrt.f32 %v725_v9  ;;  %v695_v49 = vmul.f32 0.032258064, %v659_v34  ;;  %v858_v57 = vadd.f32 %v2568_v22, %v820_v16 }
 0x178   : > { %v696_v32 = vmul.f32 0.032258064, %v662_v59  ;;  %2029 = vrsqrt.f32 %v726_v51  ;;  %v879_v18 = vpack.c.bf16 %v857_v6, %v856_v60  ;;  %v821_v33 = vmul.f32 %v2560_v53, %v783_v14 }
 0x179   : > { %v2020_v0 = vpop.eup %2019  ;;  %v727_v12 = vadd.f32 1e-05, %v695_v49  ;;  %v822_v23 = vmul.f32 %v2560_v53, %v784_v54 }
 0x17a   : > { %v728_v61 = vadd.f32 1e-05, %v696_v32  ;;  %v2022_v44 = vpop.eup %2021  ;;  %v785_v2 = vmul.f32 %v2020_v0, %v2496_v1  ;;  %v665_v41 = vpop.xlane.xlu1 %664  ;;  %1876 = vmatmul.mubr.msk.bf16.gmra.mrb[16].mxu0 %vm376_vm0, %v879_v18  ;;  %v859_v48 = vadd.f32 %v2568_v22, %v821_v33 }
 0x17b   : > { %v786_v42 = vmul.f32 %v2022_v44, %v2507_v25  ;;  %2031 = vrsqrt.f32 %v727_v12  ;;  %v697_v52 = vmul.f32 0.032258064, %v665_v41  ;;  %v860_v38 = vadd.f32 %v2568_v22, %v822_v23  ;;  %v1969_v44 = vld [vmem:[%s2991_s5 + $0x20] sm:$0xff]   ;;  %v1971_v41 = vld [vmem:[%s2991_s5 + $0x30] sm:$0xff]  }
 0x17c   : > { %2033 = vrsqrt.f32 %v728_v61  ;;  %v880_v55 = vpack.c.bf16 %v859_v48, %v858_v57  ;;  %v823_v50 = vmul.f32 %v2560_v53, %v785_v2  ;;  %v1968_v61 = vld [vmem:[%s2991_s5 + $0x18] sm:$0xff]   ;;  %v1970_v2 = vld [vmem:[%s2991_s5 + $0x28] sm:$0xff]  }
 0x17d   : > { %v2024_v10 = vpop.eup %2023  ;;  %v729_v15 = vadd.f32 1e-05, %v697_v52  ;;  %v824_v20 = vmul.f32 %v2560_v53, %v786_v42  ;;  %v1972_v57 = vld [vmem:[%s2991_s5 + $0x38] sm:$0xff]  }
 0x17e   : > { %v2026_v1 = vpop.eup %2025  ;;  %v787_v11 = vmul.f32 %v2024_v10, %v2511_v40  ;;  %1879 = vmatprep.mubr.msk.bf16.mxu0 %vm376_vm0, %v880_v55  ;;  %v861_v46 = vadd.f32 %v2568_v22, %v823_v50 }
 0x17f   : > { %v788_v25 = vmul.f32 %v2026_v1, %v2519_v26  ;;  %2035 = vrsqrt.f32 %v729_v15  ;;  %v862_v40 = vadd.f32 %v2568_v22, %v824_v20 }
 0x180   : > { %v881_v24 = vpack.c.bf16 %v861_v46, %v860_v38  ;;  %v825_v56 = vmul.f32 %v2560_v53, %v787_v11 }
 0x181   : > { %v2028_v63 = vpop.eup %2027  ;;  %v826_v28 = vmul.f32 %v2560_v53, %v788_v25 }
 0x182   : > { %v2030_v4 = vpop.eup %2029  ;;  %v789_v62 = vmul.f32 %v2028_v63, %v2523_v17  ;;  %1880 = vmatmul.mubr.msk.bf16.gmra.mrb[20].mxu0 %vm376_vm0, %v881_v24  ;;  %v863_v36 = vadd.f32 %v2568_v22, %v825_v56 }
 0x183   : > { %v790_v31 = vmul.f32 %v2030_v4, %v2531_v47  ;;  %v864_v17 = vadd.f32 %v2568_v22, %v826_v28 }
 0x184   : > { %v882_v9 = vpack.c.bf16 %v863_v36, %v862_v40  ;;  %v827_v26 = vmul.f32 %v2560_v53, %v789_v62 }
 0x185   : > { %v2032_v51 = vpop.eup %2031  ;;  %v828_v59 = vmul.f32 %v2560_v53, %v790_v31 }
 0x186   : > { %v2034_v30 = vpop.eup %2033  ;;  %v791_v14 = vmul.f32 %v2032_v51, %v2535_v39  ;;  %1883 = vmatprep.mubr.msk.bf16.mxu0 %vm376_vm0, %v882_v9  ;;  %v865_v34 = vadd.f32 %v2568_v22, %v827_v26 }
 0x187   : > { %v792_v60 = vmul.f32 %v2034_v30, %v2543_v5  ;;  %v866_v39 = vadd.f32 %v2568_v22, %v828_v59 }
 0x188   : > { %v883_v6 = vpack.c.bf16 %v865_v34, %v864_v17  ;;  %v829_v47 = vmul.f32 %v2560_v53, %v791_v14 }
 0x189   : > { %v2036_v16 = vpop.eup %2035  ;;  %v830_v32 = vmul.f32 %v2560_v53, %v792_v60 }
 0x18a   : > { %v793_v54 = vmul.f32 %v2036_v16, %v2547_v58  ;;  %1884 = vmatmul.mubr.msk.bf16.gmra.mrb[24].mxu0 %vm376_vm0, %v883_v6  ;;  %v867_v49 = vadd.f32 %v2568_v22, %v829_v47  ;;  %v1965_v58 = vld [vmem:[%s2991_s5] sm:$0xff]  }
 0x18b   : > { %v868_v5 = vadd.f32 %v2568_v22, %v830_v32  ;;  %1891 = vmatprep.subr.bf16.mxu0 %v1965_v58  ;;  %1939 = vmatprep.subr.bf16.mxu1 %v1965_v58 }
 0x18c   : > { %v884_v18 = vpack.c.bf16 %v867_v49, %v866_v39  ;;  %v831_v33 = vmul.f32 %v2560_v53, %v793_v54  ;;  %1892 = vmatpush3.bf16.msra.mxu0 %v1965_v58  ;;  %1947 = vmatpush3.bf16.msra.mxu1 %v1965_v58  ;;  %v1966_v53 = vld [vmem:[%s2991_s5 + $0x8] sm:$0xff]  }
 0x18d   : > { %1893 = vmatprep.subr.bf16.mxu0 %v1966_v53  ;;  %1940 = vmatprep.subr.bf16.mxu1 %v1966_v53 }
 0x18e   : > { %1887 = vmatprep.mubr.msk.bf16.mxu0 %vm376_vm0, %v884_v18  ;;  %v869_v0 = vadd.f32 %v2568_v22, %v831_v33  ;;  %v1967_v22 = vld [vmem:[%s2991_s5 + $0x10] sm:$0xff]  }
 0x190   : > { %v885_v12 = vpack.c.bf16 %v869_v0, %v868_v5  ;;  %1894 = vmatpush3.bf16.msra.mxu0 %v1966_v53  ;;  %1948 = vmatpush3.bf16.msra.mxu1 %v1966_v53 }
 0x191   : > { %1895 = vmatprep.subr.bf16.mxu0 %v1967_v22  ;;  %1941 = vmatprep.subr.bf16.mxu1 %v1967_v22 }
 0x192   : > { %1888 = vmatmul.mubr.msk.bf16.gmra.mrb[28].mxu0 %vm376_vm0, %v885_v12 }
 0x194   : > { %1896 = vmatpush3.bf16.msra.mxu0 %v1967_v22  ;;  %1949 = vmatpush3.bf16.msra.mxu1 %v1967_v22 }
 0x195   : > { %1897 = vmatprep.subr.bf16.mxu0 %v1968_v61  ;;  %1942 = vmatprep.subr.bf16.mxu1 %v1968_v61 }
 0x198   : > { %1898 = vmatpush3.bf16.msra.mxu0 %v1968_v61  ;;  %1950 = vmatpush3.bf16.msra.mxu1 %v1968_v61 }
 0x199   : > { %1899 = vmatprep.subr.bf16.mxu0 %v1969_v44  ;;  %1943 = vmatprep.subr.bf16.mxu1 %v1969_v44 }
 0x19c   : > { %1900 = vmatpush3.bf16.msra.mxu0 %v1969_v44  ;;  %1951 = vmatpush3.bf16.msra.mxu1 %v1969_v44 }
 0x19d   : > { %1901 = vmatprep.subr.bf16.mxu0 %v1970_v2  ;;  %1944 = vmatprep.subr.bf16.mxu1 %v1970_v2 }
 0x1a0   : > { %1902 = vmatpush3.bf16.msra.mxu0 %v1970_v2  ;;  %1952 = vmatpush3.bf16.msra.mxu1 %v1970_v2 }
 0x1a1   : > { %1903 = vmatprep.subr.bf16.mxu0 %v1971_v41  ;;  %1945 = vmatprep.subr.bf16.mxu1 %v1971_v41 }
 0x1a4   : > { %1904 = vmatpush3.bf16.msra.mxu0 %v1971_v41  ;;  %1953 = vmatpush3.bf16.msra.mxu1 %v1971_v41 }
 0x1a5   : > { %1905 = vmatprep.subr.bf16.mxu0 %v1972_v57  ;;  %1946 = vmatprep.subr.bf16.mxu1 %v1972_v57 }
 0x1a8   : > { %1906 = vmatpush3.bf16.msra.mxu0 %v1972_v57  ;;  %1954 = vmatpush3.bf16.msra.mxu1 %v1972_v57 }
 0x22d   : > { %v1861_v48 = vpop.f32.mrb[0].mxu0 }
 0x22e   : > { %v1145_v23 = vmul.f32 0.044715, %v1861_v48  ;;  %v984_v42 = vpop.f32.mrb[1].mxu0  ;;  %v2702_v40 = vmul.f32 0.5, %v1861_v48 }
 0x22f   : > { %v1143_v52 = vmul.f32 0.044715, %v984_v42  ;;  %v1862_v55 = vpop.f32.mrb[2].mxu0  ;;  %v2704_v17 = vmul.f32 0.5, %v984_v42 }
 0x230   : > { %v1177_v50 = vmul.f32 %v1861_v48, %v1145_v23  ;;  %v1146_v10 = vmul.f32 0.044715, %v1862_v55  ;;  %v987_v15 = vpop.f32.mrb[3].mxu0  ;;  %v1114_v39 = vmul.f32 0.5, %v1862_v55 }
 0x231   : > { %v1175_v1 = vmul.f32 %v1143_v52, %v984_v42  ;;  %v1144_v11 = vmul.f32 0.044715, %v987_v15  ;;  %v2706_v5 = vmul.f32 0.5, %v987_v15 }
 0x232   : > { %v1209_v38 = vmul.f32 %v1861_v48, %v1177_v50  ;;  %v1178_v46 = vmul.f32 %v1862_v55, %v1146_v10 }
 0x233   : > { %v1207_v20 = vmul.f32 %v1175_v1, %v984_v42  ;;  %v1176_v25 = vmul.f32 %v1144_v11, %v987_v15 }
 0x234   : > { %v1241_v24 = vadd.f32 %v1861_v48, %v1209_v38  ;;  %v1210_v56 = vmul.f32 %v1862_v55, %v1178_v46 }
 0x235   : > { %v1239_v63 = vadd.f32 %v1207_v20, %v984_v42  ;;  %v1208_v4 = vmul.f32 %v1176_v25, %v987_v15  ;;  %v1865_v62 = vpop.f32.mrb[4].mxu0 }
 0x236   : > { %v1273_v36 = vmul.f32 0.7978846, %v1241_v24  ;;  %v1242_v28 = vadd.f32 %v1862_v55, %v1210_v56  ;;  %v1149_v31 = vmul.f32 0.044715, %v1865_v62  ;;  %v1000_v9 = vpop.f32.mrb[5].mxu0  ;;  %v2710_v53 = vmul.f32 0.5, %v1865_v62 }
 0x237   : > { %v1271_v26 = vmul.f32 0.7978846, %v1239_v63  ;;  %v1240_v51 = vadd.f32 %v1208_v4, %v987_v15  ;;  %v1147_v30 = vmul.f32 0.044715, %v1000_v9  ;;  %v1866_v14 = vpop.f32.mrb[6].mxu0  ;;  %v2708_v58 = vmul.f32 0.5, %v1000_v9 }
 0x238   : > { %2037 = vtanh.f32 %v1273_v36  ;;  %v1274_v34 = vmul.f32 0.7978846, %v1242_v28  ;;  %v1181_v59 = vmul.f32 %v1865_v62, %v1149_v31  ;;  %v1150_v60 = vmul.f32 0.044715, %v1866_v14  ;;  %v1003_v6 = vpop.f32.mrb[7].mxu0 }
 0x239   : > { %2039 = vtanh.f32 %v1271_v26  ;;  %v1272_v47 = vmul.f32 0.7978846, %v1240_v51  ;;  %v1179_v16 = vmul.f32 %v1147_v30, %v1000_v9  ;;  %v1148_v54 = vmul.f32 0.044715, %v1003_v6 }
 0x23a   : > { %2041 = vtanh.f32 %v1274_v34  ;;  %v1213_v49 = vmul.f32 %v1865_v62, %v1181_v59  ;;  %v1182_v32 = vmul.f32 %v1866_v14, %v1150_v60  ;;  %v2712_v44 = vmul.f32 0.5, %v1003_v6 }
 0x23b   : > { %2043 = vtanh.f32 %v1272_v47  ;;  %v1211_v18 = vmul.f32 %v1179_v16, %v1000_v9  ;;  %v1180_v33 = vmul.f32 %v1148_v54, %v1003_v6  ;;  %v2714_v41 = vmul.f32 0.5, %v1866_v14 }
 0x23c   : > { %v1245_v0 = vadd.f32 %v1865_v62, %v1213_v49  ;;  %v1214_v12 = vmul.f32 %v1866_v14, %v1182_v32 }
 0x23d   : > { %v1212_v22 = vmul.f32 %v1180_v33, %v1003_v6  ;;  %v1869_v61 = vpop.f32.mrb[8].mxu0  ;;  %v1243_v2 = vadd.f32 %v1211_v18, %v1000_v9 }
 0x23e   : > { %v1277_v57 = vmul.f32 0.7978846, %v1245_v0  ;;  %v1246_v48 = vadd.f32 %v1866_v14, %v1214_v12  ;;  %v1153_v23 = vmul.f32 0.044715, %v1869_v61  ;;  %v1016_v42 = vpop.f32.mrb[9].mxu0  ;;  %v2716_v52 = vmul.f32 0.5, %v1869_v61 }
 0x23f   : > { %v1151_v55 = vmul.f32 0.044715, %v1016_v42  ;;  %v1870_v50 = vpop.f32.mrb[10].mxu0  ;;  %v1244_v10 = vadd.f32 %v1212_v22, %v1003_v6  ;;  %v1275_v15 = vmul.f32 0.7978846, %v1243_v2  ;;  %v2718_v1 = vmul.f32 0.5, %v1016_v42 }
 0x240   : > { %2045 = vtanh.f32 %v1277_v57  ;;  %v1278_v11 = vmul.f32 0.7978846, %v1246_v48  ;;  %v1185_v38 = vmul.f32 %v1869_v61, %v1153_v23  ;;  %v1154_v46 = vmul.f32 0.044715, %v1870_v50  ;;  %v1019_v20 = vpop.f32.mrb[11].mxu0 }
 0x241   : > { %v1183_v25 = vmul.f32 %v1151_v55, %v1016_v42  ;;  %v1152_v24 = vmul.f32 0.044715, %v1019_v20  ;;  %v1276_v56 = vmul.f32 0.7978846, %v1244_v10  ;;  %2047 = vtanh.f32 %v1275_v15 }
 0x242   : > { %v2038_v63 = vpop.eup %2037  ;;  %2049 = vtanh.f32 %v1278_v11  ;;  %v1217_v4 = vmul.f32 %v1869_v61, %v1185_v38  ;;  %v1186_v62 = vmul.f32 %v1870_v50, %v1154_v46  ;;  %v2720_v36 = vmul.f32 0.5, %v1019_v20 }
 0x243   : > { %v2040_v28 = vpop.eup %2039  ;;  %v1337_v31 = vadd.f32 1.0, %v2038_v63  ;;  %v1215_v9 = vmul.f32 %v1183_v25, %v1016_v42  ;;  %v1184_v26 = vmul.f32 %v1152_v24, %v1019_v20  ;;  %2051 = vtanh.f32 %v1276_v56 }
 0x244   : > { %v2042_v51 = vpop.eup %2041  ;;  %v1249_v30 = vadd.f32 %v1869_v61, %v1217_v4  ;;  %v1218_v14 = vmul.f32 %v1870_v50, %v1186_v62  ;;  %v1335_v34 = vadd.f32 1.0, %v2040_v28  ;;  %v2722_v59 = vmul.f32 0.5, %v1870_v50 }
 0x245   : > { %v2044_v60 = vpop.eup %2043  ;;  %v1369_v6 = vmul.f32 %v1337_v31, %v2702_v40  ;;  %v1338_v47 = vadd.f32 1.0, %v2042_v51  ;;  %v1247_v16 = vadd.f32 %v1215_v9, %v1016_v42  ;;  %v1216_v54 = vmul.f32 %v1184_v26, %v1019_v20  ;;  %v2725_v49 = vpop.f32.mrb[12].mxu0 }
 0x246   : > { %v1281_v32 = vmul.f32 0.7978846, %v1249_v30  ;;  %v1250_v18 = vadd.f32 %v1870_v50, %v1218_v14  ;;  %v1157_v33 = vmul.f32 0.044715, %v2725_v49  ;;  %v2728_v0 = vpop.f32.mrb[13].mxu0  ;;  %v1336_v12 = vadd.f32 1.0, %v2044_v60 }
 0x247   : > { %v1370_v22 = vmul.f32 %v1338_v47, %v1114_v39  ;;  %v1279_v61 = vmul.f32 0.7978846, %v1247_v16  ;;  %v1248_v2 = vadd.f32 %v1216_v54, %v1019_v20  ;;  %v1155_v57 = vmul.f32 0.044715, %v2728_v0  ;;  %v2731_v48 = vpop.f32.mrb[14].mxu0 }
 0x248   : > { %2053 = vtanh.f32 %v1281_v32  ;;  %v1282_v40 = vmul.f32 0.7978846, %v1250_v18  ;;  %v1189_v23 = vmul.f32 %v2725_v49, %v1157_v33  ;;  %v1158_v42 = vmul.f32 0.044715, %v2731_v48  ;;  %v2735_v55 = vpop.f32.mrb[15].mxu0 }
 0x249   : > { %2055 = vtanh.f32 %v1279_v61  ;;  %v1280_v50 = vmul.f32 0.7978846, %v1248_v2  ;;  %v1187_v10 = vmul.f32 %v1155_v57, %v2728_v0  ;;  %v1156_v39 = vmul.f32 0.044715, %v2735_v55 }
 0x24a   : > { %v2046_v15 = vpop.eup %2045  ;;  %2057 = vtanh.f32 %v1282_v40  ;;  %v1221_v11 = vmul.f32 %v2725_v49, %v1189_v23  ;;  %v1190_v38 = vmul.f32 %v2731_v48, %v1158_v42  ;;  %v1367_v46 = vmul.f32 %v1335_v34, %v2704_v17 }
 0x24b   : > { %v2048_v20 = vpop.eup %2047  ;;  %2059 = vtanh.f32 %v1280_v50  ;;  %v1219_v25 = vmul.f32 %v1187_v10, %v2728_v0  ;;  %v1188_v24 = vmul.f32 %v1156_v39, %v2735_v55  ;;  %v1368_v56 = vmul.f32 %v1336_v12, %v2706_v5 }
 0x24c   : > { %v2050_v63 = vpop.eup %2049  ;;  %v1253_v4 = vadd.f32 %v2725_v49, %v1221_v11  ;;  %v1222_v62 = vmul.f32 %v2731_v48, %v1190_v38  ;;  %v1400_v28 = vpack.c.bf16 %v1370_v22, %v1369_v6  ;;  %v1339_v31 = vadd.f32 1.0, %v2048_v20 }
 0x24d   : > { %v2052_v9 = vpop.eup %2051  ;;  %v1251_v26 = vadd.f32 %v1219_v25, %v2728_v0  ;;  %v1220_v17 = vmul.f32 %v1188_v24, %v2735_v55  ;;  %v1399_v51 = vpack.c.bf16 %v1368_v56, %v1367_v46  ;;  %v2749_v30 = vpop.f32.mrb[16].mxu0  ;;  %v1341_v14 = vadd.f32 1.0, %v2046_v15 }
 0x24e   : > { %v1285_v34 = vmul.f32 0.7978846, %v1253_v4  ;;  %v1254_v60 = vadd.f32 %v2731_v48, %v1222_v62  ;;  %v1161_v5 = vmul.f32 0.044715, %v2749_v30  ;;  %v2753_v47 = vpop.f32.mrb[17].mxu0  ;;  %v1340_v16 = vadd.f32 1.0, %v2052_v9 }
 0x24f   : > { %v1283_v54 = vmul.f32 0.7978846, %v1251_v26  ;;  %v1252_v6 = vadd.f32 %v1220_v17, %v2735_v55  ;;  %1907 = vmatprep.mubr.bf16.mxu0 %v1399_v51  ;;  %v1159_v32 = vmul.f32 0.044715, %v2753_v47  ;;  %v2757_v18 = vpop.f32.mrb[18].mxu0  ;;  %v1371_v33 = vmul.f32 %v1339_v31, %v2708_v58 }
 0x250   : > { %2061 = vtanh.f32 %v1285_v34  ;;  %v1286_v12 = vmul.f32 0.7978846, %v1254_v60  ;;  %v1193_v22 = vmul.f32 %v2749_v30, %v1161_v5  ;;  %1908 = vmatmul.mubr.bf16.vlgmr.msra.gmra.mrb[32].mxu0 %v1400_v28  ;;  %v1162_v61 = vmul.f32 0.044715, %v2757_v18  ;;  %v2762_v2 = vpop.f32.mrb[19].mxu0 }
 0x251   : > { %2063 = vtanh.f32 %v1283_v54  ;;  %v1284_v57 = vmul.f32 0.7978846, %v1252_v6  ;;  %v1191_v40 = vmul.f32 %v1159_v32, %v2753_v47  ;;  %v1160_v23 = vmul.f32 0.044715, %v2762_v2 }
 0x252   : > { %v2054_v42 = vpop.eup %2053  ;;  %2065 = vtanh.f32 %v1286_v12  ;;  %v1225_v50 = vmul.f32 %v2749_v30, %v1193_v22  ;;  %v1194_v58 = vmul.f32 %v2757_v18, %v1162_v61  ;;  %v1372_v10 = vmul.f32 %v1340_v16, %v2712_v44 }
 0x253   : > { %v2056_v39 = vpop.eup %2055  ;;  %2067 = vtanh.f32 %v1284_v57  ;;  %v1223_v15 = vmul.f32 %v1191_v40, %v2753_v47  ;;  %v1192_v11 = vmul.f32 %v1160_v23, %v2762_v2  ;;  %v1342_v38 = vadd.f32 1.0, %v2050_v63 }
 0x254   : > { %v2058_v46 = vpop.eup %2057  ;;  %v1257_v20 = vadd.f32 %v2749_v30, %v1225_v50  ;;  %v1226_v25 = vmul.f32 %v2757_v18, %v1194_v58  ;;  %v1401_v24 = vpack.c.bf16 %v1372_v10, %v1371_v33  ;;  %v1373_v56 = vmul.f32 %v1341_v14, %v2710_v53 }
 0x255   : > { %v2060_v4 = vpop.eup %2059  ;;  %v1255_v62 = vadd.f32 %v1223_v15, %v2753_v47  ;;  %v1224_v44 = vmul.f32 %v1192_v11, %v2762_v2  ;;  %v2776_v28 = vpop.f32.mrb[20].mxu0  ;;  %v1374_v31 = vmul.f32 %v1342_v38, %v2714_v41  ;;  %v1343_v9 = vadd.f32 1.0, %v2056_v39 }
 0x256   : > { %v1289_v26 = vmul.f32 0.7978846, %v1257_v20  ;;  %v1258_v63 = vadd.f32 %v2757_v18, %v1226_v25  ;;  %1911 = vmatprep.mubr.bf16.mxu1 %v1401_v24  ;;  %v1165_v17 = vmul.f32 0.044715, %v2776_v28  ;;  %v2781_v51 = vpop.f32.mrb[21].mxu0  ;;  %v1344_v34 = vadd.f32 1.0, %v2060_v4 }
 0x257   : > { %v1287_v53 = vmul.f32 0.7978846, %v1255_v62  ;;  %v1256_v14 = vadd.f32 %v1224_v44, %v2762_v2  ;;  %v1402_v60 = vpack.c.bf16 %v1374_v31, %v1373_v56  ;;  %v1163_v5 = vmul.f32 0.044715, %v2781_v51  ;;  %v2785_v16 = vpop.f32.mrb[22].mxu0 }
 0x258   : > { %2069 = vtanh.f32 %v1289_v26  ;;  %v1290_v41 = vmul.f32 0.7978846, %v1258_v63  ;;  %v1197_v54 = vmul.f32 %v2776_v28, %v1165_v17  ;;  %v1166_v6 = vmul.f32 0.044715, %v2785_v16  ;;  %v2789_v32 = vpop.f32.mrb[23].mxu0 }
 0x259   : > { %2071 = vtanh.f32 %v1287_v53  ;;  %v1288_v33 = vmul.f32 0.7978846, %v1256_v14  ;;  %1912 = vmatmul.mubr.bf16.vlgmr.msra.gmra.mrb[0].mxu1 %v1402_v60  ;;  %v1195_v12 = vmul.f32 %v1163_v5, %v2781_v51  ;;  %v1164_v22 = vmul.f32 0.044715, %v2789_v32 }
 0x25a   : > { %v2793_v61 = vpop.eup %2061  ;;  %2073 = vtanh.f32 %v1290_v41  ;;  %v1229_v57 = vmul.f32 %v2776_v28, %v1197_v54  ;;  %v1198_v40 = vmul.f32 %v2785_v16, %v1166_v6  ;;  %v1375_v23 = vmul.f32 %v1343_v9, %v2718_v1 }
 0x25b   : > { %v2064_v50 = vpop.eup %2063  ;;  %2075 = vtanh.f32 %v1288_v33  ;;  %v1227_v58 = vmul.f32 %v1195_v12, %v2781_v51  ;;  %v1196_v10 = vmul.f32 %v1164_v22, %v2789_v32  ;;  %v1376_v39 = vmul.f32 %v1344_v34, %v2720_v36 }
 0x25c   : > { %v2066_v15 = vpop.eup %2065  ;;  %v1261_v11 = vadd.f32 %v2776_v28, %v1229_v57  ;;  %v1230_v38 = vmul.f32 %v2785_v16, %v1198_v40  ;;  %v1345_v20 = vadd.f32 1.0, %v2054_v42  ;;  %v1346_v25 = vadd.f32 1.0, %v2058_v46 }
 0x25d   : > { %v2068_v24 = vpop.eup %2067  ;;  %v1259_v56 = vadd.f32 %v1227_v58, %v2781_v51  ;;  %v1228_v1 = vmul.f32 %v1196_v10, %v2789_v32  ;;  %v1403_v4 = vpack.c.bf16 %v1376_v39, %v1375_v23  ;;  %v2805_v62 = vpop.f32.mrb[24].mxu0  ;;  %v1123_v44 = vmul.f32 0.5, %v2728_v0 }
 0x25e   : > { %v1293_v31 = vmul.f32 0.7978846, %v1261_v11  ;;  %v1262_v36 = vadd.f32 %v2785_v16, %v1230_v38  ;;  %v1169_v9 = vmul.f32 0.044715, %v2805_v62  ;;  %v1377_v26 = vmul.f32 %v1345_v20, %v2716_v52  ;;  %v2811_v63 = vpop.f32.mrb[25].mxu0 }
 0x25f   : > { %v1291_v42 = vmul.f32 0.7978846, %v1259_v56  ;;  %v1260_v46 = vadd.f32 %v1228_v1, %v2789_v32  ;;  %1915 = vmatprep.mubr.bf16.mxu1 %v1403_v4  ;;  %v1378_v17 = vmul.f32 %v1346_v25, %v2722_v59  ;;  %v1167_v34 = vmul.f32 0.044715, %v2811_v63  ;;  %v2816_v53 = vpop.f32.mrb[26].mxu0 }
 0x260   : > { %2077 = vtanh.f32 %v1293_v31  ;;  %v1294_v0 = vmul.f32 0.7978846, %v1262_v36  ;;  %v1201_v14 = vmul.f32 %v2805_v62, %v1169_v9  ;;  %v1170_v60 = vmul.f32 0.044715, %v2816_v53  ;;  %v2820_v5 = vpop.f32.mrb[27].mxu0 }
 0x261   : > { %2079 = vtanh.f32 %v1291_v42  ;;  %v1292_v52 = vmul.f32 0.7978846, %v1260_v46  ;;  %v1404_v41 = vpack.c.bf16 %v1378_v17, %v1377_v26  ;;  %v1199_v54 = vmul.f32 %v1167_v34, %v2811_v63 }
 0x262   : > { %v2823_v6 = vpop.eup %2069  ;;  %2081 = vtanh.f32 %v1294_v0  ;;  %v1233_v59 = vmul.f32 %v2805_v62, %v1201_v14  ;;  %v1202_v33 = vmul.f32 %v2816_v53, %v1170_v60  ;;  %v1168_v12 = vmul.f32 0.044715, %v2820_v5 }
 0x263   : > { %v2072_v22 = vpop.eup %2071  ;;  %2083 = vtanh.f32 %v1292_v52  ;;  %1916 = vmatmul.mubr.bf16.gmra.mrb[4].mxu1 %v1404_v41  ;;  %v1231_v57 = vmul.f32 %v1199_v54, %v2811_v63  ;;  %v1124_v40 = vmul.f32 0.5, %v2735_v55  ;;  %v1347_v23 = vadd.f32 1.0, %v2064_v50 }
 0x264   : > { %v2074_v58 = vpop.eup %2073  ;;  %v1265_v10 = vadd.f32 %v2805_v62, %v1233_v59  ;;  %v1234_v39 = vmul.f32 %v2816_v53, %v1202_v33  ;;  %v1200_v11 = vmul.f32 %v1168_v12, %v2820_v5  ;;  %v1348_v38 = vadd.f32 1.0, %v2068_v24 }
 0x265   : > { %v2076_v20 = vpop.eup %2075  ;;  %v1263_v25 = vadd.f32 %v1231_v57, %v2811_v63  ;;  %v1379_v56 = vmul.f32 %v1347_v23, %v1123_v44  ;;  %v2834_v1 = vpop.f32.mrb[28].mxu0  ;;  %v1125_v4 = vmul.f32 0.5, %v2725_v49  ;;  %v1126_v31 = vmul.f32 0.5, %v2731_v48 }
 0x266   : > { %v1297_v55 = vmul.f32 0.7978846, %v1265_v10  ;;  %v1266_v50 = vadd.f32 %v2816_v53, %v1234_v39  ;;  %v1232_v36 = vmul.f32 %v1200_v11, %v2820_v5  ;;  %v1380_v9 = vmul.f32 %v1348_v38, %v1124_v40  ;;  %v2840_v26 = vpop.f32.mrb[29].mxu0 }
 0x267   : > { %v1295_v42 = vmul.f32 0.7978846, %v1263_v25  ;;  %v1173_v24 = vmul.f32 0.044715, %v2834_v1  ;;  %v1349_v46 = vadd.f32 1.0, %v2793_v61  ;;  %v1350_v44 = vadd.f32 1.0, %v2066_v15 }
 0x268   : > { %2085 = vtanh.f32 %v1297_v55  ;;  %v1298_v17 = vmul.f32 0.7978846, %v1266_v50  ;;  %v1264_v49 = vadd.f32 %v1232_v36, %v2820_v5  ;;  %v1405_v34 = vpack.c.bf16 %v1380_v9, %v1379_v56  ;;  %v2845_v48 = vpop.f32.mrb[30].mxu0 }
 0x269   : > { %2087 = vtanh.f32 %v1295_v42  ;;  %v1205_v0 = vmul.f32 %v2834_v1, %v1173_v24  ;;  %v1381_v14 = vmul.f32 %v1349_v46, %v1125_v4  ;;  %v1382_v60 = vmul.f32 %v1350_v44, %v1126_v31  ;;  %v2848_v52 = vpop.f32.mrb[31].mxu0 }
 0x26a   : > { %v2078_v41 = vpop.eup %2077  ;;  %2089 = vtanh.f32 %v1298_v17  ;;  %v1296_v54 = vmul.f32 0.7978846, %v1264_v49  ;;  %1919 = vmatprep.mubr.bf16.mxu1 %v1405_v34  ;;  %v1171_v61 = vmul.f32 0.044715, %v2840_v26  ;;  %v1174_v15 = vmul.f32 0.044715, %v2845_v48 }
 0x26b   : > { %v2080_v59 = vpop.eup %2079  ;;  %v1237_v33 = vmul.f32 %v2834_v1, %v1205_v0  ;;  %v1406_v12 = vpack.c.bf16 %v1382_v60, %v1381_v14  ;;  %v1172_v57 = vmul.f32 0.044715, %v2848_v52  ;;  %v1127_v40 = vmul.f32 0.5, %v2753_v47 }
 0x26c   : > { %v2082_v23 = vpop.eup %2081  ;;  %2091 = vtanh.f32 %v1296_v54  ;;  %v1203_v10 = vmul.f32 %v1171_v61, %v2840_v26  ;;  %v1206_v39 = vmul.f32 %v2845_v48, %v1174_v15  ;;  %v1128_v11 = vmul.f32 0.5, %v2762_v2 }
 0x26d   : > { %v2084_v38 = vpop.eup %2083  ;;  %v1269_v25 = vadd.f32 %v2834_v1, %v1237_v33  ;;  %1920 = vmatmul.mubr.bf16.gmra.mrb[8].mxu1 %v1406_v12  ;;  %v1204_v56 = vmul.f32 %v1172_v57, %v2848_v52  ;;  %v1351_v4 = vadd.f32 1.0, %v2072_v22  ;;  %v1352_v31 = vadd.f32 1.0, %v2076_v20 }
 0x26e   : > { %v1235_v55 = vmul.f32 %v1203_v10, %v2840_v26  ;;  %v1238_v47 = vmul.f32 %v2845_v48, %v1206_v39  ;;  %v1129_v50 = vmul.f32 0.5, %v2749_v30  ;;  %v1130_v36 = vmul.f32 0.5, %v2757_v18 }
 0x26f   : > { %v1301_v9 = vmul.f32 0.7978846, %v1269_v25  ;;  %v1236_v42 = vmul.f32 %v1204_v56, %v2848_v52  ;;  %v1383_v2 = vmul.f32 %v1351_v4, %v1127_v40  ;;  %v1384_v24 = vmul.f32 %v1352_v31, %v1128_v11 }
 0x270   : > { %v1267_v46 = vadd.f32 %v1235_v55, %v2840_v26  ;;  %v1270_v44 = vadd.f32 %v2845_v48, %v1238_v47  ;;  %v1353_v22 = vadd.f32 1.0, %v2823_v6  ;;  %v1354_v20 = vadd.f32 1.0, %v2074_v58 }
 0x271   : > { %2093 = vtanh.f32 %v1301_v9  ;;  %v1268_v17 = vadd.f32 %v1236_v42, %v2848_v52  ;;  %v1407_v49 = vpack.c.bf16 %v1384_v24, %v1383_v2  ;;  %v1131_v30 = vmul.f32 0.5, %v2781_v51 }
 0x272   : > { %v2086_v34 = vpop.eup %2085  ;;  %v1299_v18 = vmul.f32 0.7978846, %v1267_v46  ;;  %v1302_v0 = vmul.f32 0.7978846, %v1270_v44  ;;  %v1385_v14 = vmul.f32 %v1353_v22, %v1129_v50  ;;  %v1386_v60 = vmul.f32 %v1354_v20, %v1130_v36 }
 0x273   : > { %v2088_v54 = vpop.eup %2087  ;;  %v1300_v61 = vmul.f32 0.7978846, %v1268_v17  ;;  %1923 = vmatprep.mubr.bf16.mxu1 %v1407_v49  ;;  %v1132_v15 = vmul.f32 0.5, %v2789_v32  ;;  %v1355_v33 = vadd.f32 1.0, %v2080_v59  ;;  %v1356_v12 = vadd.f32 1.0, %v2084_v38 }
 0x274   : > { %v2090_v6 = vpop.eup %2089  ;;  %2095 = vtanh.f32 %v1299_v18  ;;  %v1408_v58 = vpack.c.bf16 %v1386_v60, %v1385_v14  ;;  %v1133_v57 = vmul.f32 0.5, %v2776_v28  ;;  %v1357_v10 = vadd.f32 1.0, %v2078_v41 }
 0x275   : > { %2097 = vtanh.f32 %v1302_v0  ;;  %v1387_v40 = vmul.f32 %v1355_v33, %v1131_v30  ;;  %v1388_v51 = vmul.f32 %v1356_v12, %v1132_v15  ;;  %v1134_v11 = vmul.f32 0.5, %v2785_v16 }
 0x276   : > { %v2092_v39 = vpop.eup %2091  ;;  %2099 = vtanh.f32 %v1300_v61  ;;  %1924 = vmatmul.mubr.bf16.gmra.mrb[12].mxu1 %v1408_v58  ;;  %v1358_v25 = vadd.f32 1.0, %v2082_v23  ;;  %v1135_v56 = vmul.f32 0.5, %v2811_v63  ;;  %v1136_v59 = vmul.f32 0.5, %v2820_v5 }
 0x277   : > { %v1409_v32 = vpack.c.bf16 %v1388_v51, %v1387_v40  ;;  %v1359_v38 = vadd.f32 1.0, %v2088_v54  ;;  %v1360_v4 = vadd.f32 1.0, %v2092_v39  ;;  %v1389_v31 = vmul.f32 %v1357_v10, %v1133_v57 }
 0x278   : > { %v1390_v55 = vmul.f32 %v1358_v25, %v1134_v11  ;;  %v1137_v28 = vmul.f32 0.5, %v2805_v62  ;;  %v1361_v47 = vadd.f32 1.0, %v2086_v34  ;;  %v1138_v36 = vmul.f32 0.5, %v2816_v53 }
 0x279   : > { %1927 = vmatprep.mubr.bf16.mxu1 %v1409_v32  ;;  %v1391_v41 = vmul.f32 %v1359_v38, %v1135_v56  ;;  %v1392_v50 = vmul.f32 %v1360_v4, %v1136_v59  ;;  %v1362_v9 = vadd.f32 1.0, %v2090_v6  ;;  %v1141_v20 = vmul.f32 0.5, %v2834_v1  ;;  %v3033_v56 = vld [vmem:[#allocation4_spill] sm:$0xff]  ;;  %v3034_v59 = vld [vmem:[#allocation2_spill] sm:$0xff] }
 0x27a   : > { %v1410_v16 = vpack.c.bf16 %v1390_v55, %v1389_v31  ;;  %v1393_v63 = vmul.f32 %v1361_v47, %v1137_v28  ;;  %v1142_v17 = vmul.f32 0.5, %v2845_v48  ;;  %v1139_v49 = vmul.f32 0.5, %v2840_v26 }
 0x27b   : > { %v2094_v23 = vpop.eup %2093  ;;  %v1411_v42 = vpack.c.bf16 %v1392_v50, %v1391_v41  ;;  %v1394_v2 = vmul.f32 %v1362_v9, %v1138_v36  ;;  %v1140_v30 = vmul.f32 0.5, %v2848_v52  ;;  %v3037_v41 = vld [vmem:[#allocation8_spill] sm:$0xff]  ;;  %v3038_v9 = vld [vmem:[#allocation6_spill] sm:$0xff] }
 0x27c   : > { %v1365_v46 = vadd.f32 1.0, %v2094_v23 }
 0x27d   : > { %v1412_v24 = vpack.c.bf16 %v1394_v2, %v1393_v63 }
 0x27e   : > { %v2096_v5 = vpop.eup %2095  ;;  %1928 = vmatmul.mubr.bf16.gmra.mrb[16].mxu1 %v1410_v16  ;;  %v1397_v18 = vmul.f32 %v1365_v46, %v1141_v20  ;;  %v3042_v20 = vld [vmem:[#allocation10_spill] sm:$0xff] }
 0x27f   : > { %v2098_v44 = vpop.eup %2097  ;;  %1931 = vmatprep.mubr.bf16.mxu1 %v1411_v42  ;;  %v1363_v22 = vadd.f32 1.0, %v2096_v5  ;;  %v3039_v42 = vld [vmem:[#allocation9_spill] sm:$0xff] }
 0x280   : > { %v2100_v62 = vpop.eup %2099  ;;  %v1366_v53 = vadd.f32 1.0, %v2098_v44  ;;  %v3041_v44 = vld [vmem:[#allocation12_spill] sm:$0xff] }
 0x281   : > { %v1364_v34 = vadd.f32 1.0, %v2100_v62  ;;  %v1395_v14 = vmul.f32 %v1363_v22, %v1139_v49  ;;  %v3043_v49 = vld [vmem:[#allocation13_spill] sm:$0xff] }
 0x282   : > { %v1398_v0 = vmul.f32 %v1366_v53, %v1142_v17 }
 0x283   : > { %v1396_v60 = vmul.f32 %v1364_v34, %v1140_v30 }
 0x284   : > { %v1414_v54 = vpack.c.bf16 %v1398_v0, %v1397_v18  ;;  %v3044_v18 = vld [vmem:[#allocation11_spill] sm:$0xff] }
 0x285   : > { %v1413_v61 = vpack.c.bf16 %v1396_v60, %v1395_v14  ;;  %v3045_v60 = vld [vmem:[#allocation16_spill] sm:$0xff] }
 0x286   : > { %1932 = vmatmul.mubr.bf16.gmra.mrb[20].mxu1 %v1412_v24  ;;  %v3040_v24 = vld [vmem:[#allocation7_spill] sm:$0xff] }
 0x287   : > { %1935 = vmatprep.mubr.bf16.mxu1 %v1413_v61 }
 0x28e   : > { %1936 = vmatmul.mubr.bf16.gmra.mrb[24].mxu1 %v1414_v54 }
 0x323   : > { %v1909_v1 = vpop.f32.mrb[32].mxu0 }
 0x324   : > { %v1642_v26 = vadd.f32 %v1909_v1, %v2174_v7  ;;  %v1513_v48 = vpop.f32.mrb[33].mxu0  ;;  %v3046_v1 = vld [vmem:[#allocation14_spill] sm:$0xff] }
 0x325   : > { %v1640_v52 = vadd.f32 %v1513_v48, %v2169_v3  ;;  %v1910_v15 = vpop.f32.mrb[34].mxu0 }
 0x326   : > { %1674 = vst.msk [vmem:[%s2885_s11 + $0x10] sm:$0xff] %vm376_vm0, %v1642_v26  ;;  %v1643_v33 = vadd.f32 %v1910_v15, %v2183_v13  ;;  %v1516_v12 = vpop.f32.mrb[35].mxu0 }
 0x327   : > { %1672 = vst.msk [vmem:[%s2885_s11] sm:$0xff] %vm376_vm0, %v1640_v52  ;;  %v1641_v6 = vadd.f32 %v1516_v12, %v2176_v8  ;;  %v3047_v52 = vld [vmem:[#allocation17_spill] sm:$0xff]  ;;  %v3048_v12 = vld [vmem:[#allocation15_spill] sm:$0xff] }
 0x328   : > { %1675 = vst.msk [vmem:[%s2885_s11 + $0x18] sm:$0xff] %vm376_vm0, %v1643_v33 }
 0x329   : > { %1673 = vst.msk [vmem:[%s2885_s11 + $0x8] sm:$0xff] %vm376_vm0, %v1641_v6 }
 0x32c   : > { %v1913_v7 = vpop.f32.mrb[0].mxu1 }
 0x32d   : > { %v1646_v3 = vadd.f32 %v1913_v7, %v2204_v27  ;;  %v1529_v58 = vpop.f32.mrb[1].mxu1 }
 0x32e   : > { %v1644_v57 = vadd.f32 %v1529_v58, %v2192_v19  ;;  %v1914_v40 = vpop.f32.mrb[2].mxu1 }
 0x32f   : > { %1678 = vst.msk [vmem:[%s2885_s11 + $0x30] sm:$0xff] %vm376_vm0, %v1646_v3  ;;  %v1647_v13 = vadd.f32 %v1914_v40, %v2208_v29  ;;  %v1532_v51 = vpop.f32.mrb[3].mxu1  ;;  %v3049_v3 = vld [vmem:[#allocation20_spill] sm:$0xff]  ;;  %v3050_v40 = vld [vmem:[#allocation18_spill] sm:$0xff] }
 0x330   : > { %1676 = vst.msk [vmem:[%s2885_s11 + $0x20] sm:$0xff] %vm376_vm0, %v1644_v57  ;;  %v1645_v8 = vadd.f32 %v1532_v51, %v2196_v21 }
 0x331   : > { %1679 = vst.msk [vmem:[%s2885_s11 + $0x38] sm:$0xff] %vm376_vm0, %v1647_v13 }
 0x332   : > { %1677 = vst.msk [vmem:[%s2885_s11 + $0x28] sm:$0xff] %vm376_vm0, %v1645_v8  ;;  %v3051_v8 = vld [vmem:[#allocation21_spill] sm:$0xff] }
 0x336   : > { %v1917_v27 = vpop.f32.mrb[4].mxu1 }
 0x337   : > { %v1650_v19 = vadd.f32 %v1917_v27, %v2228_v43  ;;  %v1545_v10 = vpop.f32.mrb[5].mxu1 }
 0x338   : > { %v1648_v39 = vadd.f32 %v1545_v10, %v2216_v35  ;;  %v1918_v11 = vpop.f32.mrb[6].mxu1  ;;  %v3052_v10 = vld [vmem:[#allocation19_spill] sm:$0xff] }
 0x339   : > { %1682 = vst.msk [vmem:[%s2885_s11 + $0x50] sm:$0xff] %vm376_vm0, %v1650_v19  ;;  %v1651_v29 = vadd.f32 %v1918_v11, %v2232_v45  ;;  %v1548_v25 = vpop.f32.mrb[7].mxu1  ;;  %v3035_v45 = vld [vmem:[#allocation5_spill] sm:$0xff] }
 0x33a   : > { %1680 = vst.msk [vmem:[%s2885_s11 + $0x40] sm:$0xff] %vm376_vm0, %v1648_v39  ;;  %v1649_v21 = vadd.f32 %v1548_v25, %v2220_v37  ;;  %v3036_v37 = vld [vmem:[#allocation3_spill] sm:$0xff] }
 0x33b   : > { %1683 = vst.msk [vmem:[%s2885_s11 + $0x58] sm:$0xff] %vm376_vm0, %v1651_v29 }
 0x33c   : > { %1681 = vst.msk [vmem:[%s2885_s11 + $0x48] sm:$0xff] %vm376_vm0, %v1649_v21 }
 0x340   : > { %v1921_v43 = vpop.f32.mrb[8].mxu1 }
 0x341   : > { %v1654_v35 = vadd.f32 %v1921_v43, %v3033_v56  ;;  %v1561_v32 = vpop.f32.mrb[9].mxu1 }
 0x342   : > { %v1652_v38 = vadd.f32 %v1561_v32, %v3034_v59  ;;  %v1922_v4 = vpop.f32.mrb[10].mxu1 }
 0x343   : > { %1686 = vst.msk [vmem:[%s2885_s11 + $0x70] sm:$0xff] %vm376_vm0, %v1654_v35  ;;  %v1655_v31 = vadd.f32 %v1922_v4, %v3035_v45  ;;  %v1564_v55 = vpop.f32.mrb[11].mxu1 }
 0x344   : > { %1684 = vst.msk [vmem:[%s2885_s11 + $0x60] sm:$0xff] %vm376_vm0, %v1652_v38  ;;  %v1653_v28 = vadd.f32 %v1564_v55, %v3036_v37 }
 0x345   : > { %1687 = vst.msk [vmem:[%s2885_s11 + $0x78] sm:$0xff] %vm376_vm0, %v1655_v31 }
 0x346   : > { %1685 = vst.msk [vmem:[%s2885_s11 + $0x68] sm:$0xff] %vm376_vm0, %v1653_v28 }
 0x349   : > { %v1925_v47 = vpop.f32.mrb[12].mxu1 }
 0x34a   : > { %v1658_v50 = vadd.f32 %v1925_v47, %v3037_v41  ;;  %v1577_v36 = vpop.f32.mrb[13].mxu1 }
 0x34b   : > { %v1656_v16 = vadd.f32 %v1577_v36, %v3038_v9  ;;  %v1926_v23 = vpop.f32.mrb[14].mxu1 }
 0x34c   : > { %1690 = vst.msk [vmem:[%s2885_s11 + $0x90] sm:$0xff] %vm376_vm0, %v1658_v50  ;;  %v1659_v63 = vadd.f32 %v1926_v23, %v3039_v42  ;;  %v1580_v2 = vpop.f32.mrb[15].mxu1 }
 0x34d   : > { %1688 = vst.msk [vmem:[%s2885_s11 + $0x80] sm:$0xff] %vm376_vm0, %v1656_v16  ;;  %v1657_v5 = vadd.f32 %v1580_v2, %v3040_v24 }
 0x34e   : > { %1691 = vst.msk [vmem:[%s2885_s11 + $0x98] sm:$0xff] %vm376_vm0, %v1659_v63 }
 0x34f   : > { %1689 = vst.msk [vmem:[%s2885_s11 + $0x88] sm:$0xff] %vm376_vm0, %v1657_v5 }
 0x351   : > { %v1929_v46 = vpop.f32.mrb[16].mxu1 }
 0x352   : > { %v1662_v22 = vadd.f32 %v1929_v46, %v3041_v44  ;;  %v1593_v62 = vpop.f32.mrb[17].mxu1 }
 0x353   : > { %v1660_v17 = vadd.f32 %v1593_v62, %v3042_v20  ;;  %v1930_v53 = vpop.f32.mrb[18].mxu1 }
 0x354   : > { %1694 = vst.msk [vmem:[%s2885_s11 + $0xb0] sm:$0xff] %vm376_vm0, %v1662_v22  ;;  %v1663_v30 = vadd.f32 %v1930_v53, %v3043_v49  ;;  %v1596_v34 = vpop.f32.mrb[19].mxu1 }
 0x355   : > { %1692 = vst.msk [vmem:[%s2885_s11 + $0xa0] sm:$0xff] %vm376_vm0, %v1660_v17  ;;  %v1661_v0 = vadd.f32 %v1596_v34, %v3044_v18 }
 0x356   : > { %1695 = vst.msk [vmem:[%s2885_s11 + $0xb8] sm:$0xff] %vm376_vm0, %v1663_v30 }
 0x357   : > { %1693 = vst.msk [vmem:[%s2885_s11 + $0xa8] sm:$0xff] %vm376_vm0, %v1661_v0 }
 0x359   : > { %v1933_v14 = vpop.f32.mrb[20].mxu1 }
 0x35a   : > { %v1666_v54 = vadd.f32 %v1933_v14, %v3045_v60  ;;  %v1609_v61 = vpop.f32.mrb[21].mxu1 }
 0x35b   : > { %v1664_v26 = vadd.f32 %v1609_v61, %v3046_v1  ;;  %v1934_v48 = vpop.f32.mrb[22].mxu1 }
 0x35c   : > { %1698 = vst.msk [vmem:[%s2885_s11 + $0xd0] sm:$0xff] %vm376_vm0, %v1666_v54  ;;  %v1667_v15 = vadd.f32 %v1934_v48, %v3047_v52  ;;  %v1612_v33 = vpop.f32.mrb[23].mxu1 }
 0x35d   : > { %1696 = vst.msk [vmem:[%s2885_s11 + $0xc0] sm:$0xff] %vm376_vm0, %v1664_v26  ;;  %v1665_v6 = vadd.f32 %v1612_v33, %v3048_v12 }
 0x35e   : > { %1699 = vst.msk [vmem:[%s2885_s11 + $0xd8] sm:$0xff] %vm376_vm0, %v1667_v15 }
 0x35f   : > { %1697 = vst.msk [vmem:[%s2885_s11 + $0xc8] sm:$0xff] %vm376_vm0, %v1665_v6 }
 0x361   : > { %v1937_v7 = vpop.f32.mrb[24].mxu1 }
 0x362   : > { %v1670_v58 = vadd.f32 %v1937_v7, %v3049_v3  ;;  %v1625_v57 = vpop.f32.mrb[25].mxu1 }
 0x363   : > { %v1668_v13 = vadd.f32 %v1625_v57, %v3050_v40  ;;  %v1938_v51 = vpop.f32.mrb[26].mxu1 }
 0x364   : > { %1702 = vst.msk [vmem:[%s2885_s11 + $0xf0] sm:$0xff] %vm376_vm0, %v1670_v58  ;;  %v1671_v27 = vadd.f32 %v1938_v51, %v3051_v8  ;;  %v1628_v19 = vpop.f32.mrb[27].mxu1 }
 0x365   : > { %1700 = vst.msk [vmem:[%s2885_s11 + $0xe0] sm:$0xff] %vm376_vm0, %v1668_v13  ;;  %v1669_v39 = vadd.f32 %v1628_v19, %v3052_v10 }
 0x366   : > { %1703 = vst.msk [vmem:[%s2885_s11 + $0xf8] sm:$0xff] %vm376_vm0, %v1671_v27 }
 0x367   : > { %1701 = vst.msk [vmem:[%s2885_s11 + $0xe8] sm:$0xff] %vm376_vm0, %v1669_v39 }
 0x368 PF: > { %s16_s21 = sadd.s32 1, %s2107_s21  }
 0x369   : > { %p13_p4 = scmp.ge.s32.totalorder %s16_s21, 4  }
 0x36b   :  { %15 = sbr.rel (!%p13_p4) target bundleno = 1 (0x1), region = 77 }

// kernel: block_forward.4
= control target key start
LH: loop header
LB: loop body
LE: loop exit
PB: predicated region body
PF: predicated region fallthrough
CT: control target
= control target key end

     0   :  { %s7729_s12 = smov 0   ;;  %s11154_s0 = inlined_call_operand.vmem [shape: bf16[8,64,128], index: 0, kind: input, shape index: {}]   ;;  %s11155_s1 = inlined_call_operand.vmem [shape: f32[4,4,64,64], index: 1, kind: input, shape index: {}]   ;;  %s11156_s2 = inlined_call_operand.vmem [shape: bf16[32,32], index: 2, kind: input, shape index: {}]   ;;  %s11157_s3 = inlined_call_operand.vmem [shape: f32[8,64,32], index: 3, kind: output, shape index: {}]  }
   0x1 LB: > { %s5780_s13 = sadd.s32 4294967295, %s7693_s12   ;;  %p5784_p0 = scmp.ge.s32.totalorder %s7693_s12, 1  ;;  %s7693_s12 = sphi %s7729_s12, %s13_s12  }
   0x2   : > { %p139_p1 = scmp.lt.s32.totalorder %s7693_s12, 3 }
   0x4   : > { %p140_p2 = pnand %p5784_p0, %p139_p1 }
   0x6   : > { %143 = sbr.rel (%p140_p2) target bundleno = 3371 (0xd2b), region = 32 }
   0xd   : > { %s5785_s14 = sshll.u32 %s5780_s13, 2  ;;  %s7695_s19 = smov 96   ;;  %vm368_vm0 = vcmask 64512   ;;  %v214_v60 = vld [vmem:[%s11155_s1 + $0x10] sm:$0xff]  ;;  %v212_v61 = vld [vmem:[%s11155_s1] sm:$0xff]  ;;  %vm809_vm1 = vcmask 523264  }
   0xe   : > { %p166_p3 = scmp.lt.s32.totalorder %s5785_s14, 7  ;;  %s7696_s20 = smov 64   ;;  %vm5382_vm2 = vcmask 130048   ;;  %vm5415_vm3 = vcmask 195584   ;;  %vm5480_vm4 = vcmask 261120  }
   0xf   : > { %s7697_s21 = smov 88   ;;  %s7698_s22 = smov 120  }
  0x10   : > { %s11499_s14 = smov (!%p166_p3, %s5785_s14), 7  ;;  %s7704_s17 = smov 104  }
  0x11   : > { %s5955_s15 = sshll.u32 %s11499_s14, 5  ;;  %s7706_s9 = smov 8  }
  0x12   : > { %s7743_s18 = scalar_lea.vmem %s11154_s0, %s5955_s15  ;;  %s7707_s10 = smov 16  }
  0x13   : > { %v7746_v0 = vld [vmem:[%s7743_s18 + $0x10] sm:$0xff]   ;;  %v7749_v1 = vld [vmem:[%s7743_s18] sm:$0xff]   ;;  %v7754_v2 = vld [vmem:[%s7743_s18 + $0x18] sm:$0xff]   ;;  %s7708_s15 = smov 24  }
  0x14   : > { %364 = vrot.lane.b32.xlu1 %v7746_v0, %s7695_s19  ;;  %360 = vrot.lane.b32.xlu0 %v7749_v1, %s7695_s19  ;;  %v7761_v3 = vld [vmem:[%s7743_s18 + $0x8] sm:$0xff]   ;;  %v7764_v4 = vld [vmem:[%s7743_s18 + $0x40] sm:$0xff]  }
  0x15   : > { %6239 = vmatprep.mubr.msk.bf16.mxu1 %vm368_vm0, %v7749_v1  ;;  %v7769_v5 = vld [vmem:[%s7743_s18 + $0x28] sm:$0xff]   ;;  %v7774_v6 = vld [vmem:[%s7743_s18 + $0x20] sm:$0xff]   ;;  %6271 = vmatprep.mubr.msk.bf16.mxu0 %vm368_vm0, %v7764_v4  ;;  %v7783_v7 = vld [vmem:[%s7743_s18 + $0x30] sm:$0xff]  }
  0x16   : > { %v7788_v8 = vld [vmem:[%s7743_s18 + $0x48] sm:$0xff]   ;;  %v7793_v9 = vld [vmem:[%s7743_s18 + $0x38] sm:$0xff]   ;;  %v7798_v10 = vld [vmem:[%s7743_s18 + $0x60] sm:$0xff]  }
  0x17   : > { %v7803_v11 = vld [vmem:[%s7743_s18 + $0x50] sm:$0xff]   ;;  %v7808_v12 = vld [vmem:[%s7743_s18 + $0x68] sm:$0xff]   ;;  %v7813_v13 = vld [vmem:[%s7743_s18 + $0x58] sm:$0xff]  }
  0x18   : > { %366 = vrot.lane.b32.xlu1 %v7754_v2, %s7695_s19  ;;  %362 = vrot.lane.b32.xlu0 %v7761_v3, %s7695_s19  ;;  %v7818_v14 = vld [vmem:[%s7743_s18 + $0x78] sm:$0xff]   ;;  %v7823_v15 = vld [vmem:[%s7743_s18 + $0x70] sm:$0xff]  }
  0x1c   : > { %480 = vrot.lane.b32.xlu1 %v7769_v5, %s7695_s19  ;;  %478 = vrot.lane.b32.xlu0 %v7774_v6, %s7695_s19 }
  0x20   : > { %595 = vrot.lane.b32.xlu1 %v7764_v4, %s7695_s19  ;;  %482 = vrot.lane.b32.xlu0 %v7783_v7, %s7695_s19 }
  0x24   : > { %597 = vrot.lane.b32.xlu1 %v7788_v8, %s7695_s19  ;;  %484 = vrot.lane.b32.xlu0 %v7793_v9, %s7695_s19 }
  0x28   : > { %712 = vrot.lane.b32.xlu1 %v7798_v10, %s7695_s19  ;;  %599 = vrot.lane.b32.xlu0 %v7803_v11, %s7695_s19 }
  0x2c   : > { %714 = vrot.lane.b32.xlu1 %v7808_v12, %s7695_s19  ;;  %601 = vrot.lane.b32.xlu0 %v7813_v13, %s7695_s19 }
  0x30   : > { %718 = vrot.lane.b32.xlu1 %v7818_v14, %s7695_s19  ;;  %716 = vrot.lane.b32.xlu0 %v7823_v15, %s7695_s19  ;;  %s7701_s19 = smov 112  }
  0x34   : > { %1180 = vrot.lane.b32.xlu0 %v7761_v3, %s7696_s20  ;;  %1178 = vrot.lane.b32.xlu1 %v7749_v1, %s7696_s20 }
  0x38   : > { %1184 = vrot.lane.b32.xlu0 %v7754_v2, %s7696_s20  ;;  %1182 = vrot.lane.b32.xlu1 %v7746_v0, %s7696_s20 }
  0x3c   : > { %1269 = vrot.lane.b32.xlu0 %v7769_v5, %s7696_s20  ;;  %1267 = vrot.lane.b32.xlu1 %v7774_v6, %s7696_s20 }
  0x40   : > { %1358 = vrot.lane.b32.xlu0 %v7788_v8, %s7696_s20  ;;  %1356 = vrot.lane.b32.xlu1 %v7764_v4, %s7696_s20 }
  0x44   : > { %1273 = vrot.lane.b32.xlu0 %v7793_v9, %s7696_s20  ;;  %1271 = vrot.lane.b32.xlu1 %v7783_v7, %s7696_s20 }
  0x48   : > { %1362 = vrot.lane.b32.xlu0 %v7813_v13, %s7696_s20  ;;  %1360 = vrot.lane.b32.xlu1 %v7803_v11, %s7696_s20 }
  0x4c   : > { %1447 = vrot.lane.b32.xlu0 %v7808_v12, %s7696_s20  ;;  %1445 = vrot.lane.b32.xlu1 %v7798_v10, %s7696_s20 }
  0x50   : > { %1542 = vrot.lane.b32.xlu0 %v7749_v1, %s7697_s21  ;;  %1544 = vrot.lane.b32.xlu1 %v7761_v3, %s7697_s21 }
  0x54   : > { %1449 = vrot.lane.b32.xlu0 %v7823_v15, %s7696_s20  ;;  %1647 = vrot.lane.b32.xlu1 %v7774_v6, %s7697_s21 }
  0x58   : > { %1451 = vrot.lane.b32.xlu0 %v7818_v14, %s7696_s20  ;;  %1534 = vrot.lane.b32.xlu1 %v7749_v1, %s7698_s22 }
  0x5c   : > { %1546 = vrot.lane.b32.xlu0 %v7746_v0, %s7697_s21 }
  0x60   : > { %1548 = vrot.lane.b32.xlu0 %v7754_v2, %s7697_s21 }
  0x64   : > { %1649 = vrot.lane.b32.xlu0 %v7769_v5, %s7697_s21 }
  0x68   : > { %1651 = vrot.lane.b32.xlu0 %v7783_v7, %s7697_s21 }
  0x86   : > { %v365_v16 = vpop.permute.xlu1 %364  ;;  %v361_v17 = vpop.permute.xlu0 %360 }
  0x87   : > { %6779 = vmatprep.subr.msk.bf16.mxu1 %vm368_vm0, %v361_v17  ;;  %v382_v18 = vsel %vm368_vm0, %v361_v17, 0  ;;  %v388_v29 = vsel %vm368_vm0, %v365_v16, 0  ;;  %v279_v17 = vld [vmem:[%s11155_s1 + $0x218] sm:$0xff] }
  0x88   : > { %6232 = vmatpush3.bf16.xpose.msra.mxu1 %v382_v18 }
  0x8a   : > { %v367_v19 = vpop.permute.xlu1 %366  ;;  %v363_v20 = vpop.permute.xlu0 %362 }
  0x8b   : > { %6780 = vmatprep.subr.msk.bf16.mxu1 %vm368_vm0, %v363_v20  ;;  %v385_v22 = vsel %vm368_vm0, %v363_v20, 0  ;;  %v391_v32 = vsel %vm368_vm0, %v367_v19, 0 }
  0x8e   : > { %v481_v21 = vpop.permute.xlu1 %480  ;;  %v479_v23 = vpop.permute.xlu0 %478 }
  0x8f   : > { %v499_v35 = vsel %vm368_vm0, %v479_v23, 0  ;;  %v502_v37 = vsel %vm368_vm0, %v481_v21, 0 }
  0x90   : > { %6234 = vmatpush3.bf16.xpose.msra.mxu1 %v385_v22  ;;  %v277_v22 = vld [vmem:[%s11155_s1 + $0x208] sm:$0xff] }
  0x91   : > { %6781 = vmatprep.subr.msk.bf16.mxu1 %vm368_vm0, %v365_v16  ;;  %v276_v16 = vld [vmem:[%s11155_s1 + $0x200] sm:$0xff] }
  0x92   : > { %v596_v24 = vpop.permute.xlu1 %595  ;;  %v483_v26 = vpop.permute.xlu0 %482 }
  0x93   : > { %6787 = vmatprep.subr.msk.bf16.mxu0 %vm368_vm0, %v596_v24  ;;  %v616_v25 = vsel %vm368_vm0, %v596_v24, 0  ;;  %v505_v38 = vsel %vm368_vm0, %v483_v26, 0 }
  0x94   : > { %6264 = vmatpush3.bf16.xpose.msra.mxu0 %v616_v25 }
  0x96   : > { %v598_v27 = vpop.permute.xlu1 %597  ;;  %v485_v28 = vpop.permute.xlu0 %484 }
  0x97   : > { %6788 = vmatprep.subr.msk.bf16.mxu0 %vm368_vm0, %v598_v27  ;;  %v619_v30 = vsel %vm368_vm0, %v598_v27, 0  ;;  %v508_v40 = vsel %vm368_vm0, %v485_v28, 0  ;;  %v213_v27 = vld [vmem:[%s11155_s1 + $0x8] sm:$0xff] }
  0x98   : > { %6236 = vmatpush3.bf16.xpose.msra.mxu1 %v388_v29 }
  0x99   : > { %6782 = vmatprep.subr.msk.bf16.mxu1 %vm368_vm0, %v367_v19 }
  0x9a   : > { %v600_v31 = vpop.permute.xlu0 %599  ;;  %v713_v39 = vpop.permute.xlu1 %712 }
  0x9b   : > { %v622_v33 = vsel %vm368_vm0, %v600_v31, 0  ;;  %v733_v41 = vsel %vm368_vm0, %v713_v39, 0 }
  0x9c   : > { %6266 = vmatpush3.bf16.xpose.msra.mxu0 %v619_v30 }
  0x9d   : > { %6789 = vmatprep.subr.msk.bf16.mxu0 %vm368_vm0, %v600_v31  ;;  %v218_v31 = vld [vmem:[%s11155_s1 + $0x30] sm:$0xff] }
  0x9e   : > { %v602_v34 = vpop.permute.xlu0 %601  ;;  %v715_v42 = vpop.permute.xlu1 %714 }
  0x9f   : > { %v625_v36 = vsel %vm368_vm0, %v602_v34, 0  ;;  %v736_v43 = vsel %vm368_vm0, %v715_v42, 0 }
  0xa0   : > { %6238 = vmatpush3.bf16.xpose.msra.mxu1 %v391_v32 }
  0xa1   : > { %6783 = vmatprep.subr.msk.bf16.mxu1 %vm368_vm0, %v479_v23 }
  0xa2   : > { %v717_v44 = vpop.permute.xlu0 %716  ;;  %v719_v46 = vpop.permute.xlu1 %718 }
  0xa3   : > { %v739_v45 = vsel %vm368_vm0, %v717_v44, 0  ;;  %v742_v47 = vsel %vm368_vm0, %v719_v46, 0 }
  0xa4   : > { %6268 = vmatpush3.bf16.xpose.msra.mxu0 %v622_v33 }
  0xa5   : > { %6790 = vmatprep.subr.msk.bf16.mxu0 %vm368_vm0, %v602_v34 }
  0xa6   : > { %v1179_v48 = vpop.permute.xlu1 %1178  ;;  %v1181_v49 = vpop.permute.xlu0 %1180 }
  0xa7   : > { %6240 = vmatmul.mubr.msk.bf16.vlgmr.msra.gmra.mrb[0].mxu1 %vm368_vm0, %v7761_v3 }
  0xa8   : > { %6248 = vmatpush3.bf16.xpose.msra.mxu1 %v499_v35  ;;  %6243 = vmatprep.mubr.msk.bf16.mxu1 %vm368_vm0, %v7746_v0 }
  0xa9   : > { %6784 = vmatprep.subr.msk.bf16.mxu1 %vm368_vm0, %v481_v21 }
  0xaa   : > { %v1183_v50 = vpop.permute.xlu1 %1182  ;;  %v1185_v52 = vpop.permute.xlu0 %1184 }
  0xac   : > { %6270 = vmatpush3.bf16.xpose.msra.mxu0 %v625_v36  ;;  %v283_v36 = vld [vmem:[%s11155_s1 + $0x238] sm:$0xff] }
  0xad   : > { %6295 = vmatprep.subr.bf16.mxu0 %v1179_v48 }
  0xae   : > { %v1268_v51 = vpop.permute.xlu1 %1267  ;;  %v1270_v54 = vpop.permute.xlu0 %1269 }
  0xaf   : > { %6244 = vmatmul.mubr.msk.bf16.gmra.mrb[4].mxu1 %vm368_vm0, %v7754_v2  ;;  %v215_v2 = vld [vmem:[%s11155_s1 + $0x18] sm:$0xff] }
  0xb0   : > { %6250 = vmatpush3.bf16.xpose.msra.mxu1 %v502_v37  ;;  %6255 = vmatprep.mubr.msk.bf16.mxu1 %vm368_vm0, %v7774_v6 }
  0xb1   : > { %6785 = vmatprep.subr.msk.bf16.mxu1 %vm368_vm0, %v483_v26 }
  0xb2   : > { %v7937_v53 = vpop.permute.xlu1 %1356  ;;  %v7940_v56 = vpop.permute.xlu0 %1358 }
  0xb3   : > { %6272 = vmatmul.mubr.msk.bf16.vlgmr.msra.gmra.mrb[0].mxu0 %vm368_vm0, %v7788_v8 }
  0xb4   : > { %6275 = vmatprep.mubr.msk.bf16.mxu0 %vm368_vm0, %v7803_v11  ;;  %6296 = vmatpush3.bf16.msra.mxu0 %v1179_v48  ;;  %v278_v11 = vld [vmem:[%s11155_s1 + $0x210] sm:$0xff]  ;;  %v217_v48 = vld [vmem:[%s11155_s1 + $0x28] sm:$0xff] }
  0xb5   : > { %6297 = vmatprep.subr.bf16.mxu0 %v1181_v49 }
  0xb6   : > { %v1272_v55 = vpop.permute.xlu1 %1271  ;;  %v1274_v58 = vpop.permute.xlu0 %1273 }
  0xb8   : > { %6252 = vmatpush3.bf16.xpose.msra.mxu1 %v505_v38  ;;  %6298 = vmatpush3.bf16.msra.mxu0 %v1181_v49 }
  0xb9   : > { %6786 = vmatprep.subr.msk.bf16.mxu1 %vm368_vm0, %v485_v28  ;;  %6299 = vmatprep.subr.bf16.mxu0 %v1183_v50  ;;  %v219_v28 = vld [vmem:[%s11155_s1 + $0x38] sm:$0xff] }
  0xba   : > { %v7942_v57 = vpop.permute.xlu1 %1360 }
  0xbb   : > { %6276 = vmatmul.mubr.msk.bf16.gmra.mrb[4].mxu0 %vm368_vm0, %v7813_v13 }
  0xbc   : > { %6300 = vmatpush3.bf16.msra.mxu0 %v1183_v50  ;;  %v216_v50 = vld [vmem:[%s11155_s1 + $0x20] sm:$0xff] }
  0xbd   : > { %6301 = vmatprep.subr.bf16.mxu0 %v1185_v52 }
  0xbe   : > { %v7944_v59 = vpop.permute.xlu1 %1445 }
  0xc0   : > { %6254 = vmatpush3.bf16.xpose.msra.mxu1 %v508_v40  ;;  %6302 = vmatpush3.bf16.msra.mxu0 %v1185_v52  ;;  %v282_v40 = vld [vmem:[%s11155_s1 + $0x230] sm:$0xff] }
  0xc1   : > { %6791 = vmatprep.subr.msk.bf16.mxu1 %vm368_vm0, %v713_v39  ;;  %6327 = vmatprep.subr.bf16.mxu0 %v7937_v53 }
  0xc7   : > { %6256 = vmatmul.mubr.msk.bf16.vlgmr.msra.gmra.mrb[8].mxu1 %vm368_vm0, %v7769_v5 }
  0xc8   : > { %6280 = vmatpush3.bf16.xpose.msra.mxu1 %v733_v41  ;;  %6259 = vmatprep.mubr.msk.bf16.mxu1 %vm368_vm0, %v7783_v7 }
  0xc9   : > { %6792 = vmatprep.subr.msk.bf16.mxu1 %vm368_vm0, %v715_v42 }
  0xcf   : > { %6260 = vmatmul.mubr.msk.bf16.gmra.mrb[12].mxu1 %vm368_vm0, %v7793_v9 }
  0xd0   : > { %6282 = vmatpush3.bf16.xpose.msra.mxu1 %v736_v43  ;;  %6287 = vmatprep.mubr.msk.bf16.mxu1 %vm368_vm0, %v7798_v10 }
  0xd1   : > { %6793 = vmatprep.subr.msk.bf16.mxu1 %vm368_vm0, %v717_v44 }
  0xd8   : > { %6284 = vmatpush3.bf16.xpose.msra.mxu1 %v739_v45 }
  0xd9   : > { %6794 = vmatprep.subr.msk.bf16.mxu1 %vm368_vm0, %v719_v46 }
  0xe0   : > { %6286 = vmatpush3.bf16.xpose.msra.mxu1 %v742_v47 }
  0xe1   : > { %6311 = vmatprep.subr.bf16.mxu1 %v1268_v51 }
  0xe7   : > { %6288 = vmatmul.mubr.msk.bf16.vlgmr.msra.gmra.mrb[16].mxu1 %vm368_vm0, %v7808_v12 }
  0xe8   : > { %6291 = vmatprep.mubr.msk.bf16.mxu1 %vm368_vm0, %v7823_v15  ;;  %6312 = vmatpush3.bf16.msra.mxu1 %v1268_v51 }
  0xe9   : > { %6313 = vmatprep.subr.bf16.mxu1 %v1270_v54 }
  0xec   : > { %6314 = vmatpush3.bf16.msra.mxu1 %v1270_v54  ;;  %v281_v54 = vld [vmem:[%s11155_s1 + $0x228] sm:$0xff] }
  0xed   : > { %6315 = vmatprep.subr.bf16.mxu1 %v1272_v55 }
  0xef   : > { %6292 = vmatmul.mubr.msk.bf16.gmra.mrb[20].mxu1 %vm368_vm0, %v7818_v14 }
  0xf0   : > { %6316 = vmatpush3.bf16.msra.mxu1 %v1272_v55 }
  0xf1   : > { %6317 = vmatprep.subr.bf16.mxu1 %v1274_v58 }
  0xf4   : > { %6318 = vmatpush3.bf16.msra.mxu1 %v1274_v58  ;;  %v280_v58 = vld [vmem:[%s11155_s1 + $0x220] sm:$0xff] }
  0xf5   : > { %6343 = vmatprep.subr.bf16.mxu1 %v7944_v59 }
 0x17a   : > { %v6241_v62 = vpop.f32.mrb[0].mxu1 }
 0x17b   : > { %v7953_v63 = vadd.f32 %v6241_v62, %v214_v60  ;;  %v427_v0 = vpop.f32.mrb[1].mxu1 }
 0x17c   : > { %v7955_v1 = vadd.f32 %v427_v0, %v212_v61  ;;  %v6242_v3 = vpop.f32.mrb[2].mxu1  ;;  %v247_v0 = vld [vmem:[%s11155_s1 + $0x118] sm:$0xff] }
 0x17d   : > { %v816_v5 = vsel %vm809_vm1, %v7953_v63, -inf  ;;  %v430_v6 = vpop.f32.mrb[3].mxu1  ;;  %v7962_v7 = vadd.f32 %v6242_v3, %v215_v2  ;;  %v246_v2 = vld [vmem:[%s11155_s1 + $0x110] sm:$0xff] }
 0x17e   : > { %817 = vmax.xlane.f32.xlu0 %v816_v5  ;;  %v810_v8 = vsel %vm809_vm1, %v7955_v1, -inf  ;;  %v8001_v32 = vadd.f32 %v430_v6, %v213_v27 }
 0x17f   : > { %v819_v12 = vsel %vm809_vm1, %v7962_v7, -inf }
 0x180   : > { %v813_v42 = vsel %vm809_vm1, %v8001_v32, -inf }
 0x182   : > { %811 = vmax.xlane.f32.xlu0 %v810_v8  ;;  %v6245_v10 = vpop.f32.mrb[4].mxu1 }
 0x183   : > { %v443_v13 = vpop.f32.mrb[5].mxu1  ;;  %v8010_v37 = vadd.f32 %v6245_v10, %v218_v31  ;;  %v249_v31 = vld [vmem:[%s11155_s1 + $0x128] sm:$0xff] }
 0x184   : > { %v6246_v14 = vpop.f32.mrb[6].mxu1  ;;  %v8042_v55 = vadd.f32 %v443_v13, %v216_v50 }
 0x185   : > { %v446_v18 = vpop.f32.mrb[7].mxu1  ;;  %v8005_v34 = vadd.f32 %v6246_v14, %v219_v28  ;;  %v828_v47 = vsel %vm809_vm1, %v8010_v37, -inf  ;;  %v245_v14 = vld [vmem:[%s11155_s1 + $0x108] sm:$0xff] }
 0x186   : > { %v6273_v15 = vpop.f32.mrb[0].mxu0  ;;  %820 = vmax.xlane.f32.xlu0 %v819_v12  ;;  %v8035_v51 = vadd.f32 %v446_v18, %v217_v48  ;;  %v822_v6 = vsel %vm809_vm1, %v8042_v55, -inf }
 0x187   : > { %v7977_v19 = vadd.f32 %v6273_v15, %v278_v11  ;;  %v661_v20 = vpop.f32.mrb[1].mxu0  ;;  %v831_v44 = vsel %vm809_vm1, %v8005_v34, -inf }
 0x188   : > { %v6274_v21 = vpop.f32.mrb[2].mxu0  ;;  %v7982_v23 = vadd.f32 %v661_v20, %v276_v16  ;;  %v825_v61 = vsel %vm809_vm1, %v8035_v51, -inf }
 0x189   : > { %v7984_v24 = vadd.f32 %v6274_v21, %v279_v17  ;;  %v664_v25 = vpop.f32.mrb[3].mxu0  ;;  %v864_v26 = vsel %vm809_vm1, %v7977_v19, -inf  ;;  %v244_v17 = vld [vmem:[%s11155_s1 + $0x100] sm:$0xff] }
 0x18a   : > { %865 = vmax.xlane.f32.xlu1 %v864_v26  ;;  %v7994_v29 = vadd.f32 %v664_v25, %v277_v22  ;;  %v858_v33 = vsel %vm809_vm1, %v7982_v23, -inf  ;;  %v251_v22 = vld [vmem:[%s11155_s1 + $0x138] sm:$0xff] }
 0x18b   : > { %v867_v30 = vsel %vm809_vm1, %v7984_v24, -inf }
 0x18c   : > { %868 = vmax.xlane.f32.xlu0 %v867_v30  ;;  %v861_v38 = vsel %vm809_vm1, %v7994_v29, -inf }
 0x18e   : > { %859 = vmax.xlane.f32.xlu1 %v858_v33  ;;  %v6277_v35 = vpop.f32.mrb[4].mxu0 }
 0x18f   : > { %v677_v39 = vpop.f32.mrb[5].mxu0  ;;  %v8023_v46 = vadd.f32 %v6277_v35, %v282_v40 }
 0x190   : > { %862 = vmax.xlane.f32.xlu0 %v861_v38  ;;  %v6278_v41 = vpop.f32.mrb[6].mxu0  ;;  %v8057_v5 = vadd.f32 %v677_v39, %v280_v58 }
 0x191   : > { %v8019_v43 = vadd.f32 %v6278_v41, %v283_v36  ;;  %v680_v45 = vpop.f32.mrb[7].mxu0  ;;  %v876_v52 = vsel %vm809_vm1, %v8023_v46, -inf  ;;  %v311_v41 = vld [vmem:[%s11155_s1 + $0x318] sm:$0xff] }
 0x192   : > { %814 = vmax.xlane.f32.xlu1 %v813_v42  ;;  %v8047_v60 = vadd.f32 %v680_v45, %v281_v54  ;;  %v870_v15 = vsel %vm809_vm1, %v8057_v5, -inf  ;;  %v315_v54 = vld [vmem:[%s11155_s1 + $0x338] sm:$0xff] }
 0x193   : > { %v879_v49 = vsel %vm809_vm1, %v8019_v43, -inf }
 0x194   : > { %832 = vmax.xlane.f32.xlu0 %v831_v44  ;;  %v873_v13 = vsel %vm809_vm1, %v8047_v60, -inf  ;;  %v309_v44 = vld [vmem:[%s11155_s1 + $0x308] sm:$0xff] }
 0x196   : > { %829 = vmax.xlane.f32.xlu1 %v828_v47 }
 0x198   : > { %880 = vmax.xlane.f32.xlu0 %v879_v49 }
 0x19a   : > { %877 = vmax.xlane.f32.xlu1 %v876_v52  ;;  %v6257_v62 = vpop.f32.mrb[8].mxu1 }
 0x19b   : > { %v544_v3 = vpop.f32.mrb[9].mxu1  ;;  %v8063_v12 = vadd.f32 %v6257_v62, %v246_v2 }
 0x19c   : > { %826 = vmax.xlane.f32.xlu0 %v825_v61  ;;  %v6258_v8 = vpop.f32.mrb[10].mxu1  ;;  %v8084_v26 = vadd.f32 %v544_v3, %v244_v17  ;;  %v313_v61 = vld [vmem:[%s11155_s1 + $0x328] sm:$0xff]  ;;  %v310_v17 = vld [vmem:[%s11155_s1 + $0x310] sm:$0xff] }
 0x19d   : > { %v8061_v10 = vadd.f32 %v6258_v8, %v247_v0  ;;  %v547_v11 = vpop.f32.mrb[11].mxu1  ;;  %v840_v21 = vsel %vm809_vm1, %v8063_v12, -inf }
 0x19e   : > { %823 = vmax.xlane.f32.xlu1 %v822_v6  ;;  %v8077_v18 = vadd.f32 %v547_v11, %v245_v14  ;;  %v834_v35 = vsel %vm809_vm1, %v8084_v26, -inf  ;;  %v250_v11 = vld [vmem:[%s11155_s1 + $0x130] sm:$0xff]  ;;  %v8136_v14 = vpop.permute.xlu0 %1362 }
 0x19f   : > { %v843_v16 = vsel %vm809_vm1, %v8061_v10, -inf }
 0x1a0   : > { %874 = vmax.xlane.f32.xlu0 %v873_v13  ;;  %v837_v33 = vsel %vm809_vm1, %v8077_v18, -inf }
 0x1a2   : > { %871 = vmax.xlane.f32.xlu1 %v870_v15  ;;  %v6261_v20 = vpop.f32.mrb[12].mxu1  ;;  %v248_v15 = vld [vmem:[%s11155_s1 + $0x120] sm:$0xff] }
 0x1a3   : > { %v560_v25 = vpop.f32.mrb[13].mxu1  ;;  %v8134_v13 = vadd.f32 %v6261_v20, %v250_v11 }
 0x1a4   : > { %844 = vmax.xlane.f32.xlu0 %v843_v16  ;;  %v6262_v27 = vpop.f32.mrb[14].mxu1 }
 0x1a5   : > { %v8086_v28 = vadd.f32 %v6262_v27, %v251_v22  ;;  %v563_v30 = vpop.f32.mrb[15].mxu1  ;;  %v852_v16 = vsel %vm809_vm1, %v8134_v13, -inf  ;;  %v8148_v22 = vpop.permute.xlu0 %1447 }
 0x1a6   : > { %841 = vmax.xlane.f32.xlu1 %v840_v21  ;;  %v8095_v36 = vadd.f32 %v563_v30, %v249_v31  ;;  %v8146_v21 = vadd.f32 %v560_v25, %v248_v15  ;;  %v308_v30 = vld [vmem:[%s11155_s1 + $0x300] sm:$0xff]  ;;  %v314_v25 = vld [vmem:[%s11155_s1 + $0x330] sm:$0xff] }
 0x1a7   : > { %v855_v38 = vsel %vm809_vm1, %v8086_v28, -inf }
 0x1a8   : > { %838 = vmax.xlane.f32.xlu0 %v837_v33  ;;  %v849_v39 = vsel %vm809_vm1, %v8095_v36, -inf  ;;  %v846_v27 = vsel %vm809_vm1, %v8146_v21, -inf }
 0x1a9   : > { %v8157_v31 = vpop.permute.xlu0 %1542 }
 0x1aa   : > { %835 = vmax.xlane.f32.xlu1 %v834_v35 }
 0x1ac   : > { %856 = vmax.xlane.f32.xlu0 %v855_v38 }
 0x1b0   : > { %850 = vmax.xlane.f32.xlu0 %v849_v39  ;;  %v312_v39 = vld [vmem:[%s11155_s1 + $0x320] sm:$0xff] }
 0x1ba   : > { %v6289_v40 = vpop.f32.mrb[16].mxu1 }
 0x1bb   : > { %1752 = vrot.lane.b32.xlu1 %v7764_v4, %s7697_s21  ;;  %v778_v42 = vpop.f32.mrb[17].mxu1  ;;  %v8150_v20 = vadd.f32 %v6289_v40, %v310_v17  ;;  %v8171_v40 = vpop.permute.xlu0 %1449 }
 0x1bc   : > { %v6290_v45 = vpop.f32.mrb[18].mxu1  ;;  %v8164_v35 = vadd.f32 %v778_v42, %v308_v30 }
 0x1bd   : > { %v8109_v47 = vadd.f32 %v6290_v45, %v311_v41  ;;  %v781_v48 = vpop.f32.mrb[19].mxu1  ;;  %v888_v33 = vsel %vm809_vm1, %v8150_v20, -inf }
 0x1be   : > { %v8111_v49 = vadd.f32 %v781_v48, %v309_v44  ;;  %v882_v41 = vsel %vm809_vm1, %v8164_v35, -inf }
 0x1bf   : > { %v891_v50 = vsel %vm809_vm1, %v8109_v47, -inf  ;;  %v8179_v42 = vpop.permute.xlu0 %1451 }
 0x1c0   : > { %892 = vmax.xlane.f32.xlu0 %v891_v50  ;;  %v885_v4 = vsel %vm809_vm1, %v8111_v49, -inf }
 0x1c2   : > { %v6293_v52 = vpop.f32.mrb[20].mxu1 }
 0x1c3   : > { %v794_v58 = vpop.f32.mrb[21].mxu1  ;;  %v8166_v38 = vadd.f32 %v6293_v52, %v314_v25  ;;  %v8183_v50 = vpop.permute.xlu0 %1546 }
 0x1c4   : > { %v6294_v62 = vpop.f32.mrb[22].mxu1  ;;  %886 = vmax.xlane.f32.xlu0 %v885_v4  ;;  %v8175_v44 = vadd.f32 %v794_v58, %v312_v39 }
 0x1c5   : > { %v8123_v0 = vadd.f32 %v6294_v62, %v315_v54  ;;  %v797_v2 = vpop.f32.mrb[23].mxu1  ;;  %v900_v45 = vsel %vm809_vm1, %v8166_v38, -inf  ;;  %v8189_v54 = vpop.permute.xlu1 %1544 }
 0x1c6   : > { %v8125_v3 = vadd.f32 %v797_v2, %v313_v61  ;;  %v894_v48 = vsel %vm809_vm1, %v8175_v44, -inf }
 0x1c7   : > { %v903_v6 = vsel %vm809_vm1, %v8123_v0, -inf  ;;  %v8185_v4 = vpop.permute.xlu0 %1548 }
 0x1c8   : > { %904 = vmax.xlane.f32.xlu0 %v903_v6  ;;  %v897_v8 = vsel %vm809_vm1, %v8125_v3, -inf }
 0x1c9   : > { %v8193_v62 = vpop.permute.xlu1 %1647 }
 0x1cb   : > { %v8187_v52 = vpop.permute.xlu0 %1649 }
 0x1cc   : > { %898 = vmax.xlane.f32.xlu0 %v897_v8  ;;  %11240 = vst [vmem:[#allocation2_spill] sm:$0xff] %v8187_v52 }
 0x1cd   : > { %v8196_v11 = vpop.permute.xlu1 %1534 }
 0x1cf   : > { %v8191_v58 = vpop.permute.xlu0 %1651 }
 0x1d0   : > { %11241 = vst [vmem:[#allocation3_spill] sm:$0xff] %v8191_v58  ;;  %v8406_v58 = vld [vmem:[%s7743_s18 + $0x50] sm:$0xff]  }
 0x1df   : > { %853 = vmax.xlane.f32.xlu1 %v852_v16 }
 0x1e3   : > { %847 = vmax.xlane.f32.xlu1 %v846_v27 }
 0x1e7   : > { %889 = vmax.xlane.f32.xlu1 %v888_v33 }
 0x1eb   : > { %883 = vmax.xlane.f32.xlu1 %v882_v41 }
 0x1ef   : > { %901 = vmax.xlane.f32.xlu1 %v900_v45 }
 0x1f3   : > { %895 = vmax.xlane.f32.xlu1 %v894_v48 }
 0x20b   : > { %v818_v61 = vpop.xlane.xlu0 %817 }
 0x20c   : > { %v908_v2 = vsub.f32 %v7953_v63, %v818_v61 }
 0x20e   : > { %v942_v6 = vmul.f32 1.442695, %v908_v2 }
 0x20f   : > { %v812_v8 = vpop.xlane.xlu0 %811 }
 0x210   : > { %7123 = vpow2.f32 %v942_v6  ;;  %v906_v16 = vsub.f32 %v7955_v1, %v812_v8 }
 0x212   : > { %v938_v25 = vmul.f32 1.442695, %v906_v16 }
 0x213   : > { %v821_v15 = vpop.xlane.xlu0 %820 }
 0x214   : > { %v909_v30 = vsub.f32 %v7962_v7, %v821_v15 }
 0x216   : > { %v944_v61 = vmul.f32 1.442695, %v909_v30 }
 0x217   : > { %v866_v17 = vpop.xlane.xlu1 %865 }
 0x218   : > { %v924_v27 = vsub.f32 %v7977_v19, %v866_v17 }
 0x219   : > { %v869_v33 = vpop.xlane.xlu0 %868 }
 0x21a   : > { %v974_v39 = vmul.f32 1.442695, %v924_v27  ;;  %v8201_v41 = vpop.eup %7123  ;;  %v925_v19 = vsub.f32 %v7984_v24, %v869_v33 }
 0x21b   : > { %v860_v45 = vpop.xlane.xlu1 %859  ;;  %v1008_v48 = vsel %vm809_vm1, %v8201_v41, 0.0 }
 0x21c   : > { %7125 = vpow2.f32 %v974_v39  ;;  %v922_v63 = vsub.f32 %v7982_v23, %v860_v45  ;;  %1009 = vadd.xlane.f32.xlu1 %v1008_v48  ;;  %v976_v16 = vmul.f32 1.442695, %v925_v19 }
 0x21d   : > { %v863_v1 = vpop.xlane.xlu0 %862  ;;  %7127 = vpow2.f32 %v938_v25 }
 0x21e   : > { %v970_v2 = vmul.f32 1.442695, %v922_v63  ;;  %v923_v7 = vsub.f32 %v7994_v29, %v863_v1 }
 0x21f   : > { %v815_v6 = vpop.xlane.xlu1 %814 }
 0x220   : > { %7129 = vpow2.f32 %v970_v2  ;;  %v972_v8 = vmul.f32 1.442695, %v923_v7  ;;  %v907_v23 = vsub.f32 %v8001_v32, %v815_v6 }
 0x221   : > { %7131 = vpow2.f32 %v944_v61  ;;  %v833_v15 = vpop.xlane.xlu0 %832 }
 0x222   : > { %7133 = vpow2.f32 %v972_v8  ;;  %v940_v25 = vmul.f32 1.442695, %v907_v23  ;;  %v913_v8 = vsub.f32 %v8005_v34, %v833_v15 }
 0x223   : > { %v830_v17 = vpop.xlane.xlu1 %829  ;;  %7135 = vpow2.f32 %v976_v16 }
 0x224   : > { %v912_v24 = vsub.f32 %v8010_v37, %v830_v17  ;;  %7137 = vpow2.f32 %v940_v25  ;;  %v952_v15 = vmul.f32 1.442695, %v913_v8 }
 0x225   : > { %v881_v27 = vpop.xlane.xlu0 %880 }
 0x226   : > { %v8209_v30 = vpop.eup %7125  ;;  %v950_v32 = vmul.f32 1.442695, %v912_v24 }
 0x227   : > { %v878_v33 = vpop.xlane.xlu1 %877  ;;  %v1056_v29 = vsel %vm809_vm1, %v8209_v30, 0.0  ;;  %v8214_v39 = vpop.eup %7127 }
 0x228   : > { %v928_v45 = vsub.f32 %v8023_v46, %v878_v33  ;;  %1057 = vadd.xlane.f32.xlu1 %v1056_v29  ;;  %v1002_v2 = vsel %vm809_vm1, %v8214_v39, 0.0 }
 0x229   : > { %v827_v63 = vpop.xlane.xlu0 %826 }
 0x22a   : > { %v8217_v48 = vpop.eup %7129  ;;  %v982_v61 = vmul.f32 1.442695, %v928_v45  ;;  %v929_v45 = vsub.f32 %v8019_v43, %v881_v27 }
 0x22b   : > { %v8219_v1 = vpop.eup %7131  ;;  %v824_v19 = vpop.xlane.xlu1 %823  ;;  %v1050_v37 = vsel %vm809_vm1, %v8217_v48, 0.0 }
 0x22c   : > { %v8225_v7 = vpop.eup %7133  ;;  %7139 = vpow2.f32 %v982_v61  ;;  %v910_v46 = vsub.f32 %v8042_v55, %v824_v19  ;;  %1051 = vadd.xlane.f32.xlu0 %v1050_v37  ;;  %1003 = vadd.xlane.f32.xlu1 %v1002_v2  ;;  %v1011_v25 = vsel %vm809_vm1, %v8219_v1, 0.0 }
 0x22d   : > { %v875_v6 = vpop.xlane.xlu0 %874  ;;  %7141 = vpow2.f32 %v950_v32  ;;  %v1053_v24 = vsel %vm809_vm1, %v8225_v7, 0.0  ;;  %v8234_v33 = vpop.eup %7135 }
 0x22e   : > { %v946_v16 = vmul.f32 1.442695, %v910_v46  ;;  %v927_v23 = vsub.f32 %v8047_v60, %v875_v6  ;;  %v1059_v61 = vsel %vm809_vm1, %v8234_v33, 0.0  ;;  %v8240_v19 = vpop.eup %7137  ;;  %v984_v6 = vmul.f32 1.442695, %v929_v45 }
 0x22f   : > { %v872_v17 = vpop.xlane.xlu1 %871  ;;  %v1005_v8 = vsel %vm809_vm1, %v8240_v19, 0.0 }
 0x230   : > { %7143 = vpow2.f32 %v946_v16  ;;  %v980_v55 = vmul.f32 1.442695, %v927_v23  ;;  %v926_v29 = vsub.f32 %v8057_v5, %v872_v17  ;;  %1012 = vadd.xlane.f32.xlu0 %v1011_v25  ;;  %1054 = vadd.xlane.f32.xlu1 %v1053_v24  ;;  %v911_v5 = vsub.f32 %v8035_v51, %v827_v63 }
 0x231   : > { %v845_v34 = vpop.xlane.xlu0 %844 }
 0x232   : > { %7145 = vpow2.f32 %v980_v55  ;;  %v978_v60 = vmul.f32 1.442695, %v926_v29 }
 0x233   : > { %v842_v32 = vpop.xlane.xlu1 %841 }
 0x234   : > { %7147 = vpow2.f32 %v978_v60  ;;  %v916_v37 = vsub.f32 %v8063_v12, %v842_v32  ;;  %1060 = vadd.xlane.f32.xlu0 %v1059_v61  ;;  %v948_v12 = vmul.f32 1.442695, %v911_v5  ;;  %v917_v32 = vsub.f32 %v8061_v10, %v845_v34 }
 0x235   : > { %v839_v2 = vpop.xlane.xlu0 %838  ;;  %7149 = vpow2.f32 %v952_v15 }
 0x236   : > { %v8244_v46 = vpop.eup %7139  ;;  %v958_v43 = vmul.f32 1.442695, %v916_v37  ;;  %v915_v10 = vsub.f32 %v8077_v18, %v839_v2 }
 0x237   : > { %v836_v27 = vpop.xlane.xlu1 %835  ;;  %v1068_v16 = vsel %vm809_vm1, %v8244_v46, 0.0  ;;  %v8250_v23 = vpop.eup %7141 }
 0x238   : > { %7151 = vpow2.f32 %v958_v43  ;;  %1006 = vadd.xlane.f32.xlu0 %v1005_v8  ;;  %1069 = vadd.xlane.f32.xlu1 %v1068_v16  ;;  %v914_v51 = vsub.f32 %v8084_v26, %v836_v27  ;;  %v1020_v24 = vsel %vm809_vm1, %v8250_v23, 0.0  ;;  %v960_v27 = vmul.f32 1.442695, %v917_v32 }
 0x239   : > { %v857_v63 = vpop.xlane.xlu0 %856  ;;  %7153 = vpow2.f32 %v984_v6  ;;  %v956_v16 = vmul.f32 1.442695, %v915_v10 }
 0x23a   : > { %v8253_v17 = vpop.eup %7143  ;;  %v921_v25 = vsub.f32 %v8086_v28, %v857_v63  ;;  %7155 = vpow2.f32 %v948_v12  ;;  %v954_v45 = vmul.f32 1.442695, %v914_v51 }
 0x23b   : > { %v1014_v55 = vsel %vm809_vm1, %v8253_v17, 0.0 }
 0x23c   : > { %v8260_v29 = vpop.eup %7145  ;;  %v968_v15 = vmul.f32 1.442695, %v921_v25  ;;  %1021 = vadd.xlane.f32.xlu0 %v1020_v24  ;;  %1015 = vadd.xlane.f32.xlu1 %v1014_v55 }
 0x23d   : > { %v851_v26 = vpop.xlane.xlu0 %850  ;;  %v1065_v37 = vsel %vm809_vm1, %v8260_v29, 0.0 }
 0x23e   : > { %v8262_v60 = vpop.eup %7147  ;;  %7157 = vpow2.f32 %v968_v15  ;;  %v919_v28 = vsub.f32 %v8095_v36, %v851_v26 }
 0x23f   : > { %v1062_v61 = vsel %vm809_vm1, %v8262_v60, 0.0  ;;  %v8270_v5 = vpop.eup %7149  ;;  %7159 = vpow2.f32 %v954_v45 }
 0x240   : > { %v964_v6 = vmul.f32 1.442695, %v919_v28  ;;  %1063 = vadd.xlane.f32.xlu0 %v1062_v61  ;;  %1066 = vadd.xlane.f32.xlu1 %v1065_v37  ;;  %v1023_v36 = vsel %vm809_vm1, %v8270_v5, 0.0 }
 0x242   : > { %v8272_v43 = vpop.eup %7151  ;;  %7161 = vpow2.f32 %v964_v6 }
 0x243   : > { %v1032_v34 = vsel %vm809_vm1, %v8272_v43, 0.0  ;;  %v8279_v8 = vpop.eup %7153  ;;  %7163 = vpow2.f32 %v960_v27 }
 0x244   : > { %1024 = vadd.xlane.f32.xlu0 %v1023_v36  ;;  %1033 = vadd.xlane.f32.xlu1 %v1032_v34  ;;  %v8281_v12 = vpop.eup %7155  ;;  %v1071_v51 = vsel %vm809_vm1, %v8279_v8, 0.0  ;;  %7165 = vpow2.f32 %v956_v16 }
 0x245   : > { %v1017_v25 = vsel %vm809_vm1, %v8281_v12, 0.0 }
 0x248   : > { %v8285_v63 = vpop.eup %7157  ;;  %1072 = vadd.xlane.f32.xlu0 %v1071_v51  ;;  %v8317_v51 = vpop.permute.xlu1 %1752 }
 0x249   : > { %v1047_v18 = vsel %vm809_vm1, %v8285_v63, 0.0  ;;  %v8289_v2 = vpop.eup %7159 }
 0x24a   : > { %1048 = vadd.xlane.f32.xlu1 %v1047_v18  ;;  %v1026_v26 = vsel %vm809_vm1, %v8289_v2, 0.0 }
 0x24c   : > { %v8293_v24 = vpop.eup %7161  ;;  %1018 = vadd.xlane.f32.xlu0 %v1017_v25 }
 0x24d   : > { %v1041_v55 = vsel %vm809_vm1, %v8293_v24, 0.0  ;;  %v893_v15 = vpop.xlane.xlu0 %892  ;;  %v8300_v32 = vpop.eup %7163 }
 0x24e   : > { %1042 = vadd.xlane.f32.xlu1 %v1041_v55  ;;  %v933_v45 = vsub.f32 %v8109_v47, %v893_v15  ;;  %v1035_v6 = vsel %vm809_vm1, %v8300_v32, 0.0  ;;  %v8305_v27 = vpop.eup %7165 }
 0x24f   : > { %v1029_v47 = vsel %vm809_vm1, %v8305_v27, 0.0 }
 0x250   : > { %1027 = vadd.xlane.f32.xlu0 %v1026_v26  ;;  %v992_v28 = vmul.f32 1.442695, %v933_v45 }
 0x251   : > { %v887_v61 = vpop.xlane.xlu0 %886 }
 0x252   : > { %7167 = vpow2.f32 %v992_v28  ;;  %v931_v37 = vsub.f32 %v8111_v49, %v887_v61 }
 0x254   : > { %1036 = vadd.xlane.f32.xlu0 %v1035_v6  ;;  %v988_v10 = vmul.f32 1.442695, %v931_v37 }
 0x256   : > { %7169 = vpow2.f32 %v988_v10  ;;  %v905_v10 = vpop.xlane.xlu0 %904 }
 0x258   : > { %1030 = vadd.xlane.f32.xlu0 %v1029_v47 }
 0x25c   : > { %v8309_v36 = vpop.eup %7167 }
 0x25d   : > { %11242 = vst [vmem:[#allocation4_spill] sm:$0xff] %v8309_v36  ;;  %v1083_v34 = vsel %vm809_vm1, %v8309_v36, 0.0 }
 0x25e   : > { %1084 = vadd.xlane.f32.xlu1 %v1083_v34 }
 0x260   : > { %v8313_v16 = vpop.eup %7169 }
 0x261   : > { %11243 = vst [vmem:[#allocation5_spill] sm:$0xff] %v8313_v16  ;;  %v1077_v49 = vsel %vm809_vm1, %v8313_v16, 0.0 }
 0x262   : > { %1078 = vadd.xlane.f32.xlu1 %v1077_v49 }
 0x26c   : > { %v854_v18 = vpop.xlane.xlu1 %853 }
 0x26d   : > { %v920_v25 = vsub.f32 %v8134_v13, %v854_v18 }
 0x26f   : > { %v966_v55 = vmul.f32 1.442695, %v920_v25 }
 0x270   : > { %v848_v15 = vpop.xlane.xlu1 %847 }
 0x271   : > { %7171 = vpow2.f32 %v966_v55  ;;  %v918_v45 = vsub.f32 %v8146_v21, %v848_v15 }
 0x273   : > { %v962_v26 = vmul.f32 1.442695, %v918_v45  ;;  %1653 = vrot.lane.b32.xlu1 %v7793_v9, %s7697_s21  ;;  %v899_v9 = vpop.xlane.xlu0 %898 }
 0x274   : > { %v890_v28 = vpop.xlane.xlu1 %889  ;;  %v935_v18 = vsub.f32 %v8125_v3, %v899_v9  ;;  %v8359_v9 = vld [vmem:[%s7743_s18 + $0x60] sm:$0xff]  }
 0x275   : > { %7173 = vpow2.f32 %v962_v26  ;;  %v932_v61 = vsub.f32 %v8150_v20, %v890_v28  ;;  %v8347_v28 = vld [vmem:[%s7743_s18 + $0x8] sm:$0xff]   ;;  %11247 = vst [vmem:[#allocation9_spill] sm:$0xff] %v8359_v9 }
 0x276   : > { %v996_v55 = vmul.f32 1.442695, %v935_v18 }
 0x277   : > { %v990_v37 = vmul.f32 1.442695, %v932_v61 }
 0x278   : > { %v884_v6 = vpop.xlane.xlu1 %883 }
 0x279   : > { %7175 = vpow2.f32 %v990_v37  ;;  %v930_v47 = vsub.f32 %v8164_v35, %v884_v6 }
 0x27b   : > { %v8325_v13 = vpop.eup %7171  ;;  %v986_v34 = vmul.f32 1.442695, %v930_v47  ;;  %v8353_v47 = vld [vmem:[%s7743_s18 + $0x20] sm:$0xff]  }
 0x27c   : > { %v1044_v21 = vsel %vm809_vm1, %v8325_v13, 0.0  ;;  %v902_v61 = vpop.xlane.xlu1 %901 }
 0x27d   : > { %7177 = vpow2.f32 %v986_v34  ;;  %1045 = vadd.xlane.f32.xlu0 %v1044_v21  ;;  %v936_v37 = vsub.f32 %v8166_v38, %v902_v61  ;;  %v8365_v38 = vld [vmem:[%s7743_s18 + $0x10] sm:$0xff]  }
 0x27e   : > { %7179 = vpow2.f32 %v996_v55  ;;  %v8370_v55 = vld [vmem:[%s7743_s18 + $0x58] sm:$0xff]  }
 0x27f   : > { %v8329_v49 = vpop.eup %7173  ;;  %v998_v34 = vmul.f32 1.442695, %v936_v37 }
 0x280   : > { %v1038_v20 = vsel %vm809_vm1, %v8329_v49, 0.0  ;;  %v896_v6 = vpop.xlane.xlu1 %895 }
 0x281   : > { %1039 = vadd.xlane.f32.xlu0 %v1038_v20  ;;  %v934_v21 = vsub.f32 %v8175_v44, %v896_v6  ;;  %v937_v20 = vsub.f32 %v8123_v0, %v905_v10  ;;  %7181 = vpow2.f32 %v998_v34  ;;  %v8375_v0 = vld [vmem:[%s7743_s18 + $0x40] sm:$0xff]   ;;  %v8386_v6 = vld [vmem:[%s7743_s18 + $0x70] sm:$0xff]  }
 0x282   : > { %11248 = vst [vmem:[#allocation10_spill] sm:$0xff] %v8375_v0  ;;  %11250 = vst [vmem:[#allocation12_spill] sm:$0xff] %v8386_v6 }
 0x283   : > { %v8334_v25 = vpop.eup %7175  ;;  %v994_v18 = vmul.f32 1.442695, %v934_v21 }
 0x284   : > { %11244 = vst [vmem:[#allocation6_spill] sm:$0xff] %v8334_v25  ;;  %v1080_v35 = vsel %vm809_vm1, %v8334_v25, 0.0 }
 0x285   : > { %1081 = vadd.xlane.f32.xlu0 %v1080_v35  ;;  %v1000_v35 = vmul.f32 1.442695, %v937_v20  ;;  %7183 = vpow2.f32 %v994_v18  ;;  %v8395_v18 = vld [vmem:[%s7743_s18 + $0x38] sm:$0xff]  }
 0x286   : > { %11252 = vst [vmem:[#allocation14_spill] sm:$0xff] %v8395_v18 }
 0x287   : > { %v8338_v15 = vpop.eup %7177  ;;  %7185 = vpow2.f32 %v1000_v35 }
 0x288   : > { %11245 = vst [vmem:[#allocation7_spill] sm:$0xff] %v8338_v15  ;;  %v1074_v45 = vsel %vm809_vm1, %v8338_v15, 0.0  ;;  %v8342_v26 = vpop.eup %7179 }
 0x289   : > { %1075 = vadd.xlane.f32.xlu0 %v1074_v45  ;;  %11246 = vst [vmem:[#allocation8_spill] sm:$0xff] %v8342_v26  ;;  %v1089_v3 = vsel %vm809_vm1, %v8342_v26, 0.0 }
 0x28b   : > { %v8379_v10 = vpop.eup %7181 }
 0x28c   : > { %11249 = vst [vmem:[#allocation11_spill] sm:$0xff] %v8379_v10  ;;  %v1092_v37 = vsel %vm809_vm1, %v8379_v10, 0.0 }
 0x28f   : > { %v8390_v34 = vpop.eup %7183 }
 0x290   : > { %11251 = vst [vmem:[#allocation13_spill] sm:$0xff] %v8390_v34  ;;  %v1086_v20 = vsel %vm809_vm1, %v8390_v34, 0.0 }
 0x291   : > { %v8399_v35 = vpop.eup %7185 }
 0x292   : > { %11253 = vst [vmem:[#allocation15_spill] sm:$0xff] %v8399_v35 }
 0x297   : > { %1090 = vadd.xlane.f32.xlu1 %v1089_v3 }
 0x29f   : > { %1536 = vrot.lane.b32.xlu0 %v8347_v28, %s7698_s22 }
 0x2a8   : > { %1639 = vrot.lane.b32.xlu1 %v8353_v47, %s7698_s22 }
 0x2a9   : > { %v1010_v44 = vpop.xlane.xlu1 %1009 }
 0x2ac   : > { %1857 = vrot.lane.b32.xlu1 %v8359_v9, %s7697_s21 }
 0x2b0   : > { %1538 = vrot.lane.b32.xlu1 %v8365_v38, %s7698_s22 }
 0x2b4   : > { %1758 = vrot.lane.b32.xlu1 %v8370_v55, %s7697_s21 }
 0x2b5   : > { %v8381_v3 = vpop.xlane.xlu1 %1057 }
 0x2b8   : > { %1744 = vrot.lane.b32.xlu1 %v8375_v0, %s7698_s22 }
 0x2b9   : > { %v1052_v45 = vpop.xlane.xlu0 %1051  ;;  %v1004_v10 = vpop.xlane.xlu1 %1003 }
 0x2bc   : > { %1861 = vrot.lane.b32.xlu1 %v8386_v6, %s7697_s21 }
 0x2bd   : > { %v1013_v61 = vpop.xlane.xlu0 %1012  ;;  %v1055_v52 = vpop.xlane.xlu1 %1054 }
 0x2be   : > { %1093 = vadd.xlane.f32.xlu0 %v1092_v37  ;;  %7187 = vrcp.f32 %v1013_v61  ;;  %v1095_v37 = vsel %vm809_vm1, %v8399_v35, 0.0 }
 0x2bf   : > { %7189 = vrcp.f32 %v1004_v10 }
 0x2c0   : > { %1645 = vrot.lane.b32.xlu1 %v8395_v18, %s7698_s22  ;;  %7191 = vrcp.f32 %v1010_v44 }
 0x2c1   : > { %v1061_v21 = vpop.xlane.xlu0 %1060 }
 0x2c2   : > { %1087 = vadd.xlane.f32.xlu0 %v1086_v20 }
 0x2c4   : > { %1849 = vrot.lane.b32.xlu1 %v8359_v9, %s7698_s22 }
 0x2c5   : > { %v1007_v26 = vpop.xlane.xlu0 %1006  ;;  %v8412_v35 = vpop.xlane.xlu1 %1069 }
 0x2c6   : > { %1096 = vadd.xlane.f32.xlu0 %v1095_v37  ;;  %7193 = vrcp.f32 %v1007_v26 }
 0x2c7   : > { %7195 = vrcp.f32 %v1052_v45 }
 0x2c8   : > { %1748 = vrot.lane.b32.xlu1 %v8406_v58, %s7698_s22  ;;  %v7188_v10 = vpop.eup %7187  ;;  %7197 = vrcp.f32 %v1055_v52 }
 0x2c9   : > { %v1022_v34 = vpop.xlane.xlu0 %1021  ;;  %v7190_v61 = vpop.eup %7189  ;;  %v1133_v44 = vmul.f32 %v7188_v10, %v8219_v1  ;;  %v8424_v1 = vld [vmem:[%s7743_s18 + $0x48] sm:$0xff]  }
 0x2ca   : > { %v7192_v18 = vpop.eup %7191  ;;  %v1130_v37 = vmul.f32 %v7190_v61, %v8214_v39  ;;  %v8449_v61 = vld [vmem:[%s7743_s18 + $0x18] sm:$0xff]  }
 0x2cb   : > { %v1132_v16 = vmul.f32 %v7192_v18, %v8201_v41 }
 0x2cc   : > { %1853 = vrot.lane.b32.xlu1 %v8386_v6, %s7698_s22  ;;  %v1016_v6 = vpop.xlane.xlu1 %1015 }
 0x2cd   : > { %v1064_v20 = vpop.xlane.xlu0 %1063  ;;  %v1163_v25 = vpack.c.bf16 %v1133_v44, %v1132_v16 }
 0x2d0   : > { %v7194_v9 = vpop.eup %7193  ;;  %v1067_v41 = vpop.xlane.xlu1 %1066 }
 0x2d1   : > { %v1025_v26 = vpop.xlane.xlu0 %1024  ;;  %v1131_v36 = vmul.f32 %v7194_v9, %v8240_v19  ;;  %v7196_v19 = vpop.eup %7195 }
 0x2d2   : > { %7199 = vrcp.f32 %v1025_v26  ;;  %v1146_v18 = vmul.f32 %v7196_v19, %v8217_v48 }
 0x2d3   : > { %v1162_v15 = vpack.c.bf16 %v1131_v36, %v1130_v37  ;;  %7201 = vrcp.f32 %v1016_v6 }
 0x2d4   : > { %7203 = vrcp.f32 %v1022_v34 }
 0x2d5   : > { %v1073_v0 = vpop.xlane.xlu0 %1072  ;;  %6303 = vmatprep.mubr.msk.bf16.mxu0 %vm809_vm1, %v1162_v15 }
 0x2d6   : > { %6304 = vmatmul.mubr.msk.bf16.vlgmr.msra.gmra.mrb[8].mxu0 %vm809_vm1, %v1163_v25  ;;  %v1034_v25 = vpop.xlane.xlu1 %1033 }
 0x2d7   : > { %6328 = vmatpush3.bf16.msra.mxu0 %v7937_v53  ;;  %v7198_v53 = vpop.eup %7197 }
 0x2d8   : > { %6329 = vmatprep.subr.bf16.mxu0 %v7940_v56 }
 0x2d9   : > { %v1019_v39 = vpop.xlane.xlu0 %1018 }
 0x2da   : > { %7205 = vrcp.f32 %v1019_v39 }
 0x2db   : > { %6330 = vmatpush3.bf16.msra.mxu0 %v7940_v56  ;;  %7207 = vrcp.f32 %v1061_v21  ;;  %v1147_v21 = vmul.f32 %v7198_v53, %v8225_v7 }
 0x2dc   : > { %1754 = vrot.lane.b32.xlu0 %v8424_v1, %s7697_s21  ;;  %6331 = vmatprep.subr.bf16.mxu0 %v7942_v57  ;;  %7209 = vrcp.f32 %v1067_v41  ;;  %v7200_v56 = vpop.eup %7199 }
 0x2dd   : > { %v1028_v52 = vpop.xlane.xlu0 %1027  ;;  %7211 = vrcp.f32 %v1064_v20  ;;  %v7202_v16 = vpop.eup %7201  ;;  %v1137_v45 = vmul.f32 %v7200_v56, %v8270_v5  ;;  %v1170_v7 = vpack.c.bf16 %v1147_v21, %v1146_v18 }
 0x2de   : > { %7213 = vrcp.f32 %v8381_v3  ;;  %v7204_v15 = vpop.eup %7203  ;;  %v1134_v6 = vmul.f32 %v7202_v16, %v8253_v17 }
 0x2df   : > { %6332 = vmatpush3.bf16.msra.mxu0 %v7942_v57  ;;  %v8437_v57 = vld [vmem:[%s7743_s18 + $0x28] sm:$0xff]  }
 0x2e0   : > { %1756 = vrot.lane.b32.xlu0 %v8406_v58, %s7697_s21  ;;  %6333 = vmatprep.subr.bf16.mxu0 %v8136_v14 }
 0x2e1   : > { %v1037_v36 = vpop.xlane.xlu0 %1036 }
 0x2e2   : > { %7215 = vrcp.f32 %v1037_v36 }
 0x2e3   : > { %7217 = vrcp.f32 %v1028_v52  ;;  %6334 = vmatpush3.bf16.msra.mxu0 %v8136_v14  ;;  %v1136_v14 = vmul.f32 %v7204_v15, %v8250_v23  ;;  %v8490_v15 = vld [vmem:[%s7743_s18 + $0x78] sm:$0xff]  }
 0x2e4   : > { %v7206_v9 = vpop.eup %7205  ;;  %1641 = vrot.lane.b32.xlu0 %v8437_v57, %s7698_s22  ;;  %7219 = vrcp.f32 %v1034_v25  ;;  %6795 = vmatprep.subr.msk.bf16.mxu0 %vm368_vm0, %v8157_v31 }
 0x2e5   : > { %v1031_v3 = vpop.xlane.xlu0 %1030  ;;  %v1135_v34 = vmul.f32 %v7206_v9, %v8281_v12  ;;  %v7208_v20 = vpop.eup %7207  ;;  %v1165_v10 = vpack.c.bf16 %v1137_v45, %v1136_v14  ;;  %v8523_v45 = vld [vmem:[%s7743_s18] sm:$0xff]  }
 0x2e6   : > { %7221 = vrcp.f32 %v1031_v3  ;;  %v7210_v17 = vpop.eup %7209  ;;  %v1149_v48 = vmul.f32 %v7208_v20, %v8234_v33 }
 0x2e7   : > { %7223 = vrcp.f32 %v1073_v0  ;;  %v1164_v5 = vpack.c.bf16 %v1135_v34, %v1134_v6  ;;  %v7212_v12 = vpop.eup %7211  ;;  %v8459_v0 = vld [vmem:[%s7743_s18 + $0x68] sm:$0xff]  }
 0x2e8   : > { %1540 = vrot.lane.b32.xlu0 %v8449_v61, %s7698_s22  ;;  %7225 = vrcp.f32 %v8412_v35  ;;  %v7214_v23 = vpop.eup %7213  ;;  %v1150_v26 = vmul.f32 %v7212_v12, %v8262_v60  ;;  %v1151_v35 = vmul.f32 %v7210_v17, %v8260_v29 }
 0x2e9   : > { %6307 = vmatprep.mubr.msk.bf16.mxu0 %vm809_vm1, %v1164_v5  ;;  %v1148_v39 = vmul.f32 %v7214_v23, %v8209_v30  ;;  %v1563_v30 = vsel %vm368_vm0, %v8157_v31, 0 }
 0x2ea   : > { %6308 = vmatmul.mubr.msk.bf16.gmra.mrb[12].mxu0 %vm809_vm1, %v1165_v10  ;;  %v1172_v56 = vpack.c.bf16 %v1151_v35, %v1150_v26  ;;  %v1773_v10 = vsel %vm368_vm0, %v8317_v51, 0  ;;  %v11256_v26 = vld [vmem:[#allocation7_spill] sm:$0xff] }
 0x2eb   : > { %6335 = vmatprep.mubr.msk.bf16.mxu0 %vm809_vm1, %v1170_v7  ;;  %v1171_v19 = vpack.c.bf16 %v1149_v48, %v1148_v39 }
 0x2ec   : > { %1859 = vrot.lane.b32.xlu0 %v8459_v0, %s7697_s21  ;;  %v7216_v44 = vpop.eup %7215 }
 0x2ed   : > { %v7218_v37 = vpop.eup %7217  ;;  %v1141_v53 = vmul.f32 %v7216_v44, %v8300_v32 }
 0x2ee   : > { %v7220_v41 = vpop.eup %7219  ;;  %v1138_v36 = vmul.f32 %v7218_v37, %v8289_v2  ;;  %v11257_v37 = vld [vmem:[#allocation5_spill] sm:$0xff] }
 0x2ef   : > { %v1140_v29 = vmul.f32 %v7220_v41, %v8272_v43  ;;  %v11258_v41 = vld [vmem:[#allocation4_spill] sm:$0xff] }
 0x2f0   : > { %v7222_v52 = vpop.eup %7221  ;;  %1746 = vrot.lane.b32.xlu0 %v8424_v1, %s7698_s22 }
 0x2f1   : > { %v7224_v33 = vpop.eup %7223  ;;  %v1139_v60 = vmul.f32 %v7222_v52, %v8305_v27  ;;  %v1167_v25 = vpack.c.bf16 %v1141_v53, %v1140_v29  ;;  %v8480_v27 = vld [vmem:[%s7743_s18 + $0x30] sm:$0xff]  }
 0x2f2   : > { %6336 = vmatmul.mubr.msk.bf16.vlgmr.msra.gmra.mrb[16].mxu0 %vm809_vm1, %v1171_v19  ;;  %v7226_v16 = vpop.eup %7225  ;;  %v1153_v2 = vmul.f32 %v7224_v33, %v8279_v8  ;;  %v1566_v8 = vsel %vm368_vm0, %v8189_v54, 0 }
 0x2f3   : > { %6360 = vmatpush3.bf16.xpose.msra.mxu0 %v1563_v30  ;;  %6339 = vmatprep.mubr.msk.bf16.mxu0 %vm809_vm1, %v1172_v56  ;;  %v1166_v32 = vpack.c.bf16 %v1139_v60, %v1138_v36  ;;  %v1152_v31 = vmul.f32 %v7226_v16, %v8244_v46  ;;  %v11259_v56 = vld [vmem:[#allocation14_spill] sm:$0xff]  ;;  %v11262_v30 = vld [vmem:[#allocation3_spill] sm:$0xff] }
 0x2f4   : > { %6796 = vmatprep.subr.msk.bf16.mxu0 %vm368_vm0, %v8189_v54  ;;  %1643 = vrot.lane.b32.xlu0 %v8480_v27, %s7698_s22  ;;  %v1572_v54 = vsel %vm368_vm0, %v8185_v4, 0  ;;  %v11260_v36 = vld [vmem:[#allocation2_spill] sm:$0xff] }
 0x2f5   : > { %6319 = vmatprep.mubr.msk.bf16.mxu1 %vm809_vm1, %v1166_v32  ;;  %v1173_v43 = vpack.c.bf16 %v1153_v2, %v1152_v31 }
 0x2f6   : > { %6320 = vmatmul.mubr.msk.bf16.vlgmr.msra.gmra.mrb[24].mxu1 %vm809_vm1, %v1167_v25 }
 0x2f7   : > { %6344 = vmatpush3.bf16.msra.mxu1 %v7944_v59  ;;  %v1049_v59 = vpop.xlane.xlu1 %1048 }
 0x2f8   : > { %6345 = vmatprep.subr.bf16.mxu1 %v8148_v22  ;;  %1863 = vrot.lane.b32.xlu0 %v8490_v15, %s7697_s21  ;;  %s7699_s21 = smov 56  }
 0x2f9   : > { %2324 = vrot.lane.b32.xlu1 %v8347_v28, %s7699_s21 }
 0x2fa   : > { %6340 = vmatmul.mubr.msk.bf16.gmra.mrb[20].mxu0 %vm809_vm1, %v1173_v43 }
 0x2fb   : > { %6346 = vmatpush3.bf16.msra.mxu1 %v8148_v22  ;;  %6362 = vmatpush3.bf16.xpose.msra.mxu0 %v1566_v8  ;;  %v1569_v22 = vsel %vm368_vm0, %v8183_v50, 0  ;;  %v11264_v8 = vld [vmem:[#allocation13_spill] sm:$0xff] }
 0x2fc   : > { %6347 = vmatprep.subr.bf16.mxu1 %v8171_v40  ;;  %6797 = vmatprep.subr.msk.bf16.mxu0 %vm368_vm0, %v8183_v50 }
 0x2fd   : > { %6367 = vmatprep.mubr.msk.bf16.mxu0 %vm368_vm0, %v8196_v11  ;;  %1851 = vrot.lane.b32.xlu0 %v8459_v0, %s7698_s22 }
 0x2fe   : > { %2328 = vrot.lane.b32.xlu1 %v8449_v61, %s7699_s21 }
 0x2ff   : > { %6348 = vmatpush3.bf16.msra.mxu1 %v8171_v40  ;;  %v1043_v40 = vpop.xlane.xlu1 %1042 }
 0x300   : > { %6349 = vmatprep.subr.bf16.mxu1 %v8179_v42 }
 0x301   : > { %1750 = vrot.lane.b32.xlu0 %v8370_v55, %s7698_s22 }
 0x303   : > { %6350 = vmatpush3.bf16.msra.mxu1 %v8179_v42  ;;  %6364 = vmatpush3.bf16.xpose.msra.mxu0 %v1569_v22  ;;  %v1085_v50 = vpop.xlane.xlu1 %1084 }
 0x304   : > { %6798 = vmatprep.subr.msk.bf16.mxu0 %vm368_vm0, %v8185_v4  ;;  %6799 = vmatprep.subr.msk.bf16.mxu1 %vm368_vm0, %v8193_v62 }
 0x305   : > { %1855 = vrot.lane.b32.xlu0 %v8490_v15, %s7698_s22  ;;  %s7700_s22 = smov 80  }
 0x307   : > { %v1079_v46 = vpop.xlane.xlu1 %1078 }
 0x309   : > { %2322 = vrot.lane.b32.xlu0 %v8523_v45, %s7699_s21 }
 0x30a   : > { %v1046_v11 = vpop.xlane.xlu0 %1045 }
 0x30b   : > { %6366 = vmatpush3.bf16.xpose.msra.mxu0 %v1572_v54  ;;  %7227 = vrcp.f32 %v1046_v11  ;;  %v1654_v44 = vpop.permute.xlu1 %1653 }
 0x30c   : > { %6803 = vmatprep.subr.msk.bf16.mxu0 %vm368_vm0, %v8317_v51  ;;  %7229 = vrcp.f32 %v1043_v40  ;;  %v11255_v51 = vld [vmem:[#allocation6_spill] sm:$0xff]  ;;  %v1677_v32 = vsel %vm368_vm0, %v1654_v44, 0 }
 0x30d   : > { %7231 = vrcp.f32 %v1049_v59  ;;  %2326 = vrot.lane.b32.xlu0 %v8365_v38, %s7699_s21  ;;  %v11265_v59 = vld [vmem:[#allocation8_spill] sm:$0xff] }
 0x30e   : > { %v1040_v42 = vpop.xlane.xlu0 %1039 }
 0x30f   : > { %7233 = vrcp.f32 %v1040_v42 }
 0x311   : > { %2411 = vrot.lane.b32.xlu0 %v8353_v47, %s7699_s21 }
 0x312   : > { %v1082_v9 = vpop.xlane.xlu0 %1081 }
 0x313   : > { %7235 = vrcp.f32 %v1082_v9 }
 0x314   : > { %7237 = vrcp.f32 %v1079_v46  ;;  %v11266_v46 = vld [vmem:[#allocation11_spill] sm:$0xff] }
 0x315   : > { %v7228_v4 = vpop.eup %7227  ;;  %7239 = vrcp.f32 %v1085_v50  ;;  %2413 = vrot.lane.b32.xlu0 %v8437_v57, %s7699_s21 }
 0x316   : > { %v1076_v3 = vpop.xlane.xlu0 %1075  ;;  %v7230_v6 = vpop.eup %7229  ;;  %v1144_v14 = vmul.f32 %v7228_v4, %v8325_v13  ;;  %v11254_v13 = vld [vmem:[#allocation10_spill] sm:$0xff] }
 0x317   : > { %7241 = vrcp.f32 %v1076_v3  ;;  %v7232_v34 = vpop.eup %7231  ;;  %v1143_v20 = vmul.f32 %v7230_v6, %v8293_v24  ;;  %2500 = vrot.lane.b32.xlu1 %v11254_v13, %s7699_s21 }
 0x318   : > { %v1145_v17 = vmul.f32 %v7232_v34, %v8285_v63 }
 0x319   : > { %v7234_v21 = vpop.eup %7233  ;;  %2415 = vrot.lane.b32.xlu0 %v8480_v27, %s7699_s21 }
 0x31a   : > { %v1537_v5 = vpop.permute.xlu0 %1536  ;;  %v1142_v18 = vmul.f32 %v7234_v21, %v8329_v49  ;;  %v1169_v12 = vpack.c.bf16 %v1145_v17, %v1144_v14 }
 0x31b   : > { %6368 = vmatmul.mubr.msk.bf16.vlgmr.msra.gmra.mrb[24].mxu0 %vm368_vm0, %v1537_v5  ;;  %2502 = vrot.lane.b32.xlu1 %v8424_v1, %s7699_s21  ;;  %v1668_v1 = vsel %vm368_vm0, %v8193_v62, 0  ;;  %v1671_v62 = vsel %vm368_vm0, %v11260_v36, 0 }
 0x31c   : > { %6392 = vmatpush3.bf16.xpose.msra.mxu0 %v1773_v10  ;;  %v1168_v7 = vpack.c.bf16 %v1143_v20, %v1142_v18 }
 0x31d   : > { %v7236_v23 = vpop.eup %7235  ;;  %2417 = vrot.lane.b32.xlu0 %v11259_v56, %s7699_s21 }
 0x31e   : > { %6323 = vmatprep.mubr.msk.bf16.mxu1 %vm809_vm1, %v1168_v7  ;;  %v7238_v24 = vpop.eup %7237  ;;  %v1156_v48 = vmul.f32 %v7236_v23, %v11255_v51 }
 0x31f   : > { %6324 = vmatmul.mubr.msk.bf16.gmra.mrb[28].mxu1 %vm809_vm1, %v1169_v12  ;;  %v7240_v49 = vpop.eup %7239  ;;  %v1155_v39 = vmul.f32 %v7238_v24, %v11257_v37  ;;  %2504 = vrot.lane.b32.xlu1 %v8406_v58, %s7699_s21  ;;  %v11261_v58 = vld [vmem:[#allocation9_spill] sm:$0xff] }
 0x320   : > { %v1157_v52 = vmul.f32 %v7240_v49, %v11258_v41 }
 0x321   : > { %v7242_v63 = vpop.eup %7241  ;;  %2589 = vrot.lane.b32.xlu0 %v11261_v58, %s7699_s21 }
 0x322   : > { %v1154_v35 = vmul.f32 %v7242_v63, %v11256_v26  ;;  %v1175_v53 = vpack.c.bf16 %v1157_v52, %v1156_v48 }
 0x323   : > { %2506 = vrot.lane.b32.xlu1 %v8370_v55, %s7699_s21  ;;  %v1674_v55 = vsel %vm368_vm0, %v11262_v30, 0 }
 0x324   : > { %v1174_v19 = vpack.c.bf16 %v1155_v39, %v1154_v35  ;;  %v1091_v33 = vpop.xlane.xlu1 %1090 }
 0x325   : > { %2690 = vrot.lane.b32.xlu0 %v8365_v38, %s7700_s22  ;;  %7243 = vrcp.f32 %v1091_v33 }
 0x326   : > { %6351 = vmatprep.mubr.msk.bf16.mxu1 %vm809_vm1, %v1174_v19 }
 0x327   : > { %6352 = vmatmul.mubr.msk.bf16.vlgmr.msra.gmra.mrb[32].mxu1 %vm809_vm1, %v1175_v53  ;;  %2591 = vrot.lane.b32.xlu1 %v8459_v0, %s7699_s21  ;;  %v11263_v0 = vld [vmem:[#allocation12_spill] sm:$0xff] }
 0x328   : > { %6376 = vmatpush3.bf16.xpose.msra.mxu1 %v1668_v1  ;;  %v8566_v60 = vpop.permute.xlu1 %1639 }
 0x329   : > { %6800 = vmatprep.subr.msk.bf16.mxu1 %vm368_vm0, %v11260_v36  ;;  %2791 = vrot.lane.b32.xlu0 %v8353_v47, %s7700_s22 }
 0x32b   : > { %2686 = vrot.lane.b32.xlu1 %v8523_v45, %s7700_s22 }
 0x32c   : > { %v8572_v29 = vpop.permute.xlu1 %1857 }
 0x32d   : > { %2692 = vrot.lane.b32.xlu0 %v8449_v61, %s7700_s22  ;;  %v1878_v20 = vsel %vm368_vm0, %v8572_v29, 0 }
 0x32f   : > { %2593 = vrot.lane.b32.xlu1 %v11263_v0, %s7699_s21  ;;  %v7244_v43 = vpop.eup %7243 }
 0x330   : > { %6378 = vmatpush3.bf16.xpose.msra.mxu1 %v1671_v62  ;;  %v1539_v16 = vpop.permute.xlu1 %1538  ;;  %v1159_v22 = vmul.f32 %v7244_v43, %v11265_v59 }
 0x331   : > { %6801 = vmatprep.subr.msk.bf16.mxu1 %vm368_vm0, %v11262_v30  ;;  %6371 = vmatprep.mubr.msk.bf16.mxu0 %vm368_vm0, %v1539_v16 }
 0x332   : > { %2678 = vrot.lane.b32.xlu0 %v8523_v45, %s7701_s19  ;;  %v11267_v45 = vld [vmem:[#allocation15_spill] sm:$0xff] }
 0x333   : > { %2595 = vrot.lane.b32.xlu1 %v8490_v15, %s7699_s21 }
 0x334   : > { %v1759_v47 = vpop.permute.xlu1 %1758 }
 0x335   : > { %v1782_v14 = vsel %vm368_vm0, %v1759_v47, 0 }
 0x336   : > { %2795 = vrot.lane.b32.xlu0 %v8480_v27, %s7700_s22 }
 0x337   : > { %2688 = vrot.lane.b32.xlu1 %v8347_v28, %s7700_s22 }
 0x338   : > { %6380 = vmatpush3.bf16.xpose.msra.mxu1 %v1674_v55  ;;  %v1745_v2 = vpop.permute.xlu1 %1744 }
 0x339   : > { %6802 = vmatprep.subr.msk.bf16.mxu1 %vm368_vm0, %v1654_v44 }
 0x33a   : > { %2896 = vrot.lane.b32.xlu0 %v11254_v13, %s7700_s22 }
 0x33b   : > { %2793 = vrot.lane.b32.xlu1 %v8437_v57, %s7700_s22 }
 0x33c   : > { %v1862_v54 = vpop.permute.xlu1 %1861 }
 0x33d   : > { %v1884_v24 = vsel %vm368_vm0, %v1862_v54, 0 }
 0x340   : > { %6382 = vmatpush3.bf16.xpose.msra.mxu1 %v1677_v32  ;;  %v1646_v34 = vpop.permute.xlu1 %1645 }
 0x341   : > { %6807 = vmatprep.subr.msk.bf16.mxu1 %vm368_vm0, %v8572_v29 }
 0x344   : > { %v1850_v18 = vpop.permute.xlu1 %1849 }
 0x348   : > { %v1749_v17 = vpop.permute.xlu1 %1748 }
 0x34b   : > { %v1094_v38 = vpop.xlane.xlu0 %1093 }
 0x34c   : > { %v1854_v51 = vpop.permute.xlu1 %1853 }
 0x34f   : > { %v1088_v25 = vpop.xlane.xlu0 %1087 }
 0x350   : > { %7245 = vrcp.f32 %v1088_v25 }
 0x351   : > { %7247 = vrcp.f32 %v1094_v38 }
 0x353   : > { %v1097_v61 = vpop.xlane.xlu0 %1096 }
 0x354   : > { %7249 = vrcp.f32 %v1097_v61 }
 0x357   : > { %v1755_v31 = vpop.permute.xlu0 %1754 }
 0x358   : > { %6804 = vmatprep.subr.msk.bf16.mxu0 %vm368_vm0, %v1755_v31  ;;  %v1776_v28 = vsel %vm368_vm0, %v1755_v31, 0 }
 0x359   : > { %6394 = vmatpush3.bf16.xpose.msra.mxu0 %v1776_v28 }
 0x35a   : > { %v7246_v27 = vpop.eup %7245 }
 0x35b   : > { %v1757_v15 = vpop.permute.xlu0 %1756  ;;  %v1158_v57 = vmul.f32 %v7246_v27, %v11264_v8  ;;  %v7248_v40 = vpop.eup %7247  ;;  %v222_v27 = vld [vmem:[%s11155_s1 + $0x50] sm:$0xff] }
 0x35c   : > { %6805 = vmatprep.subr.msk.bf16.mxu0 %vm368_vm0, %v1757_v15  ;;  %v1160_v9 = vmul.f32 %v7248_v40, %v11266_v46  ;;  %v1779_v3 = vsel %vm368_vm0, %v1757_v15, 0  ;;  %v220_v15 = vld [vmem:[%s11155_s1 + $0x40] sm:$0xff]  ;;  %v221_v40 = vld [vmem:[%s11155_s1 + $0x48] sm:$0xff] }
 0x35d   : > { %v1176_v11 = vpack.c.bf16 %v1159_v22, %v1158_v57  ;;  %v223_v22 = vld [vmem:[%s11155_s1 + $0x58] sm:$0xff] }
 0x35e   : > { %v7250_v50 = vpop.eup %7249 }
 0x35f   : > { %6355 = vmatprep.mubr.msk.bf16.mxu1 %vm809_vm1, %v1176_v11  ;;  %v1642_v42 = vpop.permute.xlu0 %1641  ;;  %v1161_v4 = vmul.f32 %v7250_v50, %v11267_v45 }
 0x361   : > { %6396 = vmatpush3.bf16.xpose.msra.mxu0 %v1779_v3  ;;  %v1177_v6 = vpack.c.bf16 %v1161_v4, %v1160_v9 }
 0x362   : > { %6806 = vmatprep.subr.msk.bf16.mxu0 %vm368_vm0, %v1759_v47 }
 0x363   : > { %6356 = vmatmul.mubr.msk.bf16.gmra.mrb[36].mxu1 %vm809_vm1, %v1177_v6  ;;  %v1541_v21 = vpop.permute.xlu0 %1540 }
 0x364   : > { %6372 = vmatmul.mubr.msk.bf16.gmra.mrb[28].mxu0 %vm368_vm0, %v1541_v21  ;;  %6383 = vmatprep.mubr.msk.bf16.mxu1 %vm368_vm0, %v8566_v60 }
 0x365   : > { %6399 = vmatprep.mubr.msk.bf16.mxu0 %vm368_vm0, %v1745_v2 }
 0x367   : > { %v1860_v5 = vpop.permute.xlu0 %1859 }
 0x368   : > { %v1881_v12 = vsel %vm368_vm0, %v1860_v5, 0 }
 0x369   : > { %6398 = vmatpush3.bf16.xpose.msra.mxu0 %v1782_v14 }
 0x36b   : > { %6384 = vmatmul.mubr.msk.bf16.vlgmr.msra.gmra.mrb[40].mxu1 %vm368_vm0, %v1642_v42  ;;  %v1747_v10 = vpop.permute.xlu0 %1746  ;;  %v2325_v38 = vpop.permute.xlu1 %2324 }
 0x36c   : > { %6408 = vmatpush3.bf16.xpose.msra.mxu1 %v1878_v20 }
 0x36d   : > { %6808 = vmatprep.subr.msk.bf16.mxu1 %vm368_vm0, %v1860_v5 }
 0x36f   : > { %v1644_v7 = vpop.permute.xlu0 %1643 }
 0x370   : > { %6387 = vmatprep.mubr.msk.bf16.mxu1 %vm368_vm0, %v1644_v7  ;;  %6400 = vmatmul.mubr.msk.bf16.vlgmr.msra.gmra.mrb[32].mxu0 %vm368_vm0, %v1747_v10  ;;  %v2329_v47 = vpop.permute.xlu1 %2328 }
 0x371   : > { %6403 = vmatprep.mubr.msk.bf16.mxu0 %vm368_vm0, %v1749_v17  ;;  %v226_v17 = vld [vmem:[%s11155_s1 + $0x70] sm:$0xff] }
 0x373   : > { %6388 = vmatmul.mubr.msk.bf16.gmra.mrb[44].mxu1 %vm368_vm0, %v1646_v34  ;;  %v1864_v13 = vpop.permute.xlu0 %1863 }
 0x374   : > { %6410 = vmatpush3.bf16.xpose.msra.mxu1 %v1881_v12  ;;  %6415 = vmatprep.mubr.msk.bf16.mxu1 %vm368_vm0, %v1850_v18  ;;  %v1887_v63 = vsel %vm368_vm0, %v1864_v13, 0 }
 0x375   : > { %6809 = vmatprep.subr.msk.bf16.mxu1 %vm368_vm0, %v1862_v54 }
 0x377   : > { %v1852_v23 = vpop.permute.xlu0 %1851 }
 0x37b   : > { %v1751_v49 = vpop.permute.xlu0 %1750 }
 0x37c   : > { %6412 = vmatpush3.bf16.xpose.msra.mxu1 %v1884_v24  ;;  %6404 = vmatmul.mubr.msk.bf16.gmra.mrb[36].mxu0 %vm368_vm0, %v1751_v49  ;;  %v227_v24 = vld [vmem:[%s11155_s1 + $0x78] sm:$0xff] }
 0x37d   : > { %6810 = vmatprep.subr.msk.bf16.mxu1 %vm368_vm0, %v1864_v13 }
 0x37f   : > { %v1856_v48 = vpop.permute.xlu0 %1855 }
 0x383   : > { %v2323_v29 = vpop.permute.xlu0 %2322 }
 0x384   : > { %6414 = vmatpush3.bf16.xpose.msra.mxu1 %v1887_v63  ;;  %6423 = vmatprep.subr.bf16.mxu0 %v2323_v29 }
 0x385   : > { %6424 = vmatpush3.bf16.msra.mxu0 %v2323_v29 }
 0x386   : > { %6425 = vmatprep.subr.bf16.mxu0 %v2325_v38 }
 0x387   : > { %v2327_v0 = vpop.permute.xlu0 %2326 }
 0x389   : > { %6426 = vmatpush3.bf16.msra.mxu0 %v2325_v38  ;;  %v8683_v2 = vpop.permute.xlu1 %2500 }
 0x38a   : > { %6427 = vmatprep.subr.bf16.mxu0 %v2327_v0 }
 0x38b   : > { %6416 = vmatmul.mubr.msk.bf16.vlgmr.msra.gmra.mrb[48].mxu1 %vm368_vm0, %v1852_v23  ;;  %v2412_v25 = vpop.permute.xlu0 %2411  ;;  %v224_v23 = vld [vmem:[%s11155_s1 + $0x60] sm:$0xff] }
 0x38c   : > { %6419 = vmatprep.mubr.msk.bf16.mxu1 %vm368_vm0, %v1854_v51  ;;  %6439 = vmatprep.subr.bf16.mxu1 %v2412_v25 }
 0x38d   : > { %6440 = vmatpush3.bf16.msra.mxu1 %v2412_v25  ;;  %6428 = vmatpush3.bf16.msra.mxu0 %v2327_v0  ;;  %v225_v0 = vld [vmem:[%s11155_s1 + $0x68] sm:$0xff] }
 0x38e   : > { %6429 = vmatprep.subr.bf16.mxu0 %v2329_v47 }
 0x38f   : > { %v2414_v61 = vpop.permute.xlu0 %2413 }
 0x390   : > { %6441 = vmatprep.subr.bf16.mxu1 %v2414_v61 }
 0x391   : > { %6442 = vmatpush3.bf16.msra.mxu1 %v2414_v61  ;;  %6430 = vmatpush3.bf16.msra.mxu0 %v2329_v47 }
 0x392   : > { %6455 = vmatprep.subr.bf16.mxu0 %v8683_v2 }
 0x393   : > { %6420 = vmatmul.mubr.msk.bf16.gmra.mrb[52].mxu1 %vm368_vm0, %v1856_v48  ;;  %v2416_v31 = vpop.permute.xlu0 %2415 }
 0x394   : > { %6443 = vmatprep.subr.bf16.mxu1 %v2416_v31 }
 0x395   : > { %6444 = vmatpush3.bf16.msra.mxu1 %v2416_v31 }
 0x397   : > { %v2418_v43 = vpop.permute.xlu0 %2417 }
 0x398   : > { %6445 = vmatprep.subr.bf16.mxu1 %v2418_v43 }
 0x399   : > { %6446 = vmatpush3.bf16.msra.mxu1 %v2418_v43 }
 0x39b   : > { %v8686_v28 = vpop.permute.xlu0 %2589 }
 0x39c   : > { %6471 = vmatprep.subr.bf16.mxu1 %v8686_v28 }
 0x3a9   : > { %v8643_v44 = vpop.f32.mrb[8].mxu0 }
 0x3aa   : > { %11268 = vst [vmem:[#allocation10_spill] sm:$0xff] %v8643_v44  ;;  %v8645_v26 = vpop.f32.mrb[9].mxu0 }
 0x3ab   : > { %11269 = vst [vmem:[#allocation6_spill] sm:$0xff] %v8645_v26  ;;  %v8647_v35 = vpop.f32.mrb[10].mxu0 }
 0x3ac   : > { %11270 = vst [vmem:[#allocation7_spill] sm:$0xff] %v8647_v35  ;;  %v8649_v37 = vpop.f32.mrb[11].mxu0 }
 0x3ad   : > { %11271 = vst [vmem:[#allocation5_spill] sm:$0xff] %v8649_v37 }
 0x3bd   : > { %v8651_v39 = vpop.f32.mrb[12].mxu0 }
 0x3be   : > { %11272 = vst [vmem:[#allocation4_spill] sm:$0xff] %v8651_v39  ;;  %v8653_v41 = vpop.f32.mrb[13].mxu0 }
 0x3bf   : > { %11273 = vst [vmem:[#allocation14_spill] sm:$0xff] %v8653_v41  ;;  %v8655_v52 = vpop.f32.mrb[14].mxu0 }
 0x3c0   : > { %11274 = vst [vmem:[#allocation2_spill] sm:$0xff] %v8655_v52  ;;  %v8657_v19 = vpop.f32.mrb[15].mxu0 }
 0x3c1   : > { %11275 = vst [vmem:[#allocation9_spill] sm:$0xff] %v8657_v19 }
 0x3c5   : > { %v8659_v53 = vpop.f32.mrb[16].mxu0 }
 0x3c6   : > { %11276 = vst [vmem:[#allocation3_spill] sm:$0xff] %v8659_v53  ;;  %v8661_v33 = vpop.f32.mrb[17].mxu0 }
 0x3c7   : > { %11277 = vst [vmem:[#allocation12_spill] sm:$0xff] %v8661_v33  ;;  %v8663_v1 = vpop.f32.mrb[18].mxu0 }
 0x3c8   : > { %11278 = vst [vmem:[#allocation13_spill] sm:$0xff] %v8663_v1  ;;  %v8665_v56 = vpop.f32.mrb[19].mxu0 }
 0x3c9   : > { %11279 = vst [vmem:[#allocation8_spill] sm:$0xff] %v8665_v56  ;;  %v8667_v36 = vpop.f32.mrb[24].mxu1 }
 0x3ca   : > { %11280 = vst [vmem:[#allocation11_spill] sm:$0xff] %v8667_v36  ;;  %v8669_v60 = vpop.f32.mrb[25].mxu1 }
 0x3cb   : > { %11281 = vst [vmem:[#allocation15_spill] sm:$0xff] %v8669_v60  ;;  %v8671_v58 = vpop.f32.mrb[26].mxu1 }
 0x3cc   : > { %11282 = vst [vmem:[#allocation16_spill] sm:$0xff] %v8671_v58  ;;  %v8673_v62 = vpop.f32.mrb[27].mxu1 }
 0x3cd   : > { %11283 = vst [vmem:[#allocation17_spill] sm:$0xff] %v8673_v62  ;;  %v8675_v30 = vpop.f32.mrb[20].mxu0 }
 0x3ce   : > { %11284 = vst [vmem:[#allocation18_spill] sm:$0xff] %v8675_v30  ;;  %v8677_v16 = vpop.f32.mrb[21].mxu0 }
 0x3cf   : > { %11285 = vst [vmem:[#allocation19_spill] sm:$0xff] %v8677_v16  ;;  %v8679_v55 = vpop.f32.mrb[22].mxu0 }
 0x3d0   : > { %11286 = vst [vmem:[#allocation20_spill] sm:$0xff] %v8679_v55  ;;  %v8681_v32 = vpop.f32.mrb[23].mxu0 }
 0x3d1   : > { %11287 = vst [vmem:[#allocation21_spill] sm:$0xff] %v8681_v32 }
 0x3ee   : > { %v6369_v8 = vpop.f32.mrb[24].mxu0 }
 0x3ef   : > { %v8695_v57 = vadd.f32 %v6369_v8, %v222_v27  ;;  %v1608_v59 = vpop.f32.mrb[25].mxu0 }
 0x3f0   : > { %v8703_v54 = vadd.f32 %v1608_v59, %v220_v15  ;;  %v6370_v11 = vpop.f32.mrb[26].mxu0 }
 0x3f1   : > { %v1611_v50 = vpop.f32.mrb[27].mxu0  ;;  %v1960_v42 = vsel %vm809_vm1, %v8695_v57, -inf  ;;  %v8707_v46 = vadd.f32 %v6370_v11, %v223_v22  ;;  %v286_v11 = vld [vmem:[%s11155_s1 + $0x250] sm:$0xff] }
 0x3f2   : > { %v8709_v9 = vadd.f32 %v1611_v50, %v221_v40  ;;  %v8711_v45 = vpop.f32.mrb[28].mxu1  ;;  %1961 = vmax.xlane.f32.xlu0 %v1960_v42  ;;  %v1954_v4 = vsel %vm809_vm1, %v8703_v54, -inf  ;;  %v284_v42 = vld [vmem:[%s11155_s1 + $0x240] sm:$0xff] }
 0x3f3   : > { %11288 = vst [vmem:[#allocation22_spill] sm:$0xff] %v8711_v45  ;;  %v8715_v3 = vpop.f32.mrb[29].mxu1  ;;  %1955 = vmax.xlane.f32.xlu1 %v1954_v4  ;;  %v1963_v14 = vsel %vm809_vm1, %v8707_v46, -inf  ;;  %v287_v4 = vld [vmem:[%s11155_s1 + $0x258] sm:$0xff] }
 0x3f4   : > { %11289 = vst [vmem:[#allocation23_spill] sm:$0xff] %v8715_v3  ;;  %v8717_v6 = vpop.f32.mrb[30].mxu1  ;;  %v1957_v34 = vsel %vm809_vm1, %v8709_v9, -inf }
 0x3f5   : > { %11290 = vst [vmem:[#allocation24_spill] sm:$0xff] %v8717_v6  ;;  %v8721_v21 = vpop.f32.mrb[31].mxu1 }
 0x3f6   : > { %11291 = vst [vmem:[#allocation25_spill] sm:$0xff] %v8721_v21  ;;  %1958 = vmax.xlane.f32.xlu0 %v1957_v34 }
 0x3f7   : > { %1964 = vmax.xlane.f32.xlu1 %v1963_v14 }
 0x3fa   : > { %v8725_v5 = vpop.f32.mrb[32].mxu1 }
 0x3fb   : > { %11292 = vst [vmem:[#allocation26_spill] sm:$0xff] %v8725_v5  ;;  %v8727_v18 = vpop.f32.mrb[33].mxu1 }
 0x3fc   : > { %11293 = vst [vmem:[#allocation27_spill] sm:$0xff] %v8727_v18  ;;  %v8729_v20 = vpop.f32.mrb[34].mxu1 }
 0x3fd   : > { %11294 = vst [vmem:[#allocation28_spill] sm:$0xff] %v8729_v20  ;;  %v8731_v10 = vpop.f32.mrb[35].mxu1 }
 0x3fe   : > { %11295 = vst [vmem:[#allocation29_spill] sm:$0xff] %v8731_v10  ;;  %v258_v10 = vld [vmem:[%s11155_s1 + $0x170] sm:$0xff] }
 0x436   : > { %v8736_v7 = vpop.f32.mrb[36].mxu1 }
 0x437   : > { %11296 = vst [vmem:[#allocation30_spill] sm:$0xff] %v8736_v7  ;;  %v8738_v12 = vpop.f32.mrb[37].mxu1  ;;  %v6373_v13 = vpop.f32.mrb[28].mxu0 }
 0x438   : > { %11297 = vst [vmem:[#allocation31_spill] sm:$0xff] %v8738_v12  ;;  %v8746_v49 = vadd.f32 %v6373_v13, %v226_v17  ;;  %v8748_v63 = vpop.f32.mrb[38].mxu1  ;;  %v1624_v51 = vpop.f32.mrb[29].mxu0  ;;  %v285_v13 = vld [vmem:[%s11155_s1 + $0x248] sm:$0xff] }
 0x439   : > { %11298 = vst [vmem:[#allocation32_spill] sm:$0xff] %v8748_v63  ;;  %v8750_v48 = vpop.f32.mrb[39].mxu1  ;;  %v6374_v29 = vpop.f32.mrb[30].mxu0  ;;  %v8755_v38 = vadd.f32 %v1624_v51, %v224_v23 }
 0x43a   : > { %11299 = vst [vmem:[#allocation33_spill] sm:$0xff] %v8750_v48  ;;  %v8757_v25 = vadd.f32 %v6374_v29, %v227_v24  ;;  %v1627_v47 = vpop.f32.mrb[31].mxu0  ;;  %v1972_v61 = vsel %vm809_vm1, %v8746_v49, -inf }
 0x43b   : > { %1973 = vmax.xlane.f32.xlu0 %v1972_v61  ;;  %v8761_v31 = vadd.f32 %v1627_v47, %v225_v0  ;;  %v1966_v15 = vsel %vm809_vm1, %v8755_v38, -inf }
 0x43c   : > { %v1975_v43 = vsel %vm809_vm1, %v8757_v25, -inf }
 0x43d   : > { %1976 = vmax.xlane.f32.xlu1 %v1975_v43  ;;  %v1969_v22 = vsel %vm809_vm1, %v8761_v31, -inf }
 0x43e   : > { %v6385_v27 = vpop.f32.mrb[40].mxu1 }
 0x43f   : > { %v1713_v8 = vpop.f32.mrb[41].mxu1  ;;  %1967 = vmax.xlane.f32.xlu0 %v1966_v15 }
 0x440   : > { %v6386_v59 = vpop.f32.mrb[42].mxu1 }
 0x441   : > { %v1716_v40 = vpop.f32.mrb[43].mxu1  ;;  %1970 = vmax.xlane.f32.xlu1 %v1969_v22 }
 0x443   : > { %v6401_v50 = vpop.f32.mrb[32].mxu0 }
 0x444   : > { %v8778_v34 = vadd.f32 %v6401_v50, %v286_v11  ;;  %v1818_v14 = vpop.f32.mrb[33].mxu0  ;;  %v8795_v50 = vpop.permute.xlu1 %2502 }
 0x445   : > { %v6402_v17 = vpop.f32.mrb[34].mxu0  ;;  %v8783_v23 = vadd.f32 %v1818_v14, %v284_v42 }
 0x446   : > { %v8785_v24 = vadd.f32 %v6402_v17, %v287_v4  ;;  %v6389_v51 = vpop.f32.mrb[44].mxu1  ;;  %v1821_v29 = vpop.f32.mrb[35].mxu0  ;;  %v2008_v0 = vsel %vm809_vm1, %v8778_v34, -inf  ;;  %v290_v4 = vld [vmem:[%s11155_s1 + $0x270] sm:$0xff]  ;;  %v288_v17 = vld [vmem:[%s11155_s1 + $0x260] sm:$0xff] }
 0x447   : > { %2009 = vmax.xlane.f32.xlu0 %v2008_v0  ;;  %v1729_v47 = vpop.f32.mrb[45].mxu1  ;;  %v8789_v61 = vadd.f32 %v1821_v29, %v285_v13  ;;  %v2002_v11 = vsel %vm809_vm1, %v8783_v23, -inf  ;;  %v291_v13 = vld [vmem:[%s11155_s1 + $0x278] sm:$0xff] }
 0x448   : > { %v6390_v43 = vpop.f32.mrb[46].mxu1  ;;  %v2011_v15 = vsel %vm809_vm1, %v8785_v24, -inf }
 0x449   : > { %2012 = vmax.xlane.f32.xlu1 %v2011_v15  ;;  %v1732_v22 = vpop.f32.mrb[47].mxu1  ;;  %v2005_v42 = vsel %vm809_vm1, %v8789_v61, -inf  ;;  %v8810_v15 = vpop.permute.xlu1 %2504 }
 0x44b   : > { %2003 = vmax.xlane.f32.xlu0 %v2002_v11 }
 0x44d   : > { %2006 = vmax.xlane.f32.xlu1 %v2005_v42  ;;  %v289_v42 = vld [vmem:[%s11155_s1 + $0x268] sm:$0xff] }
 0x44f   : > { %v6405_v14 = vpop.f32.mrb[36].mxu0 }
 0x450   : > { %v8808_v29 = vadd.f32 %v6405_v14, %v290_v4  ;;  %v1834_v0 = vpop.f32.mrb[37].mxu0  ;;  %v254_v4 = vld [vmem:[%s11155_s1 + $0x150] sm:$0xff] }
 0x451   : > { %v6406_v11 = vpop.f32.mrb[38].mxu0  ;;  %v8815_v12 = vadd.f32 %v1834_v0, %v288_v17  ;;  %v255_v17 = vld [vmem:[%s11155_s1 + $0x158] sm:$0xff] }
 0x452   : > { %v8817_v48 = vadd.f32 %v6406_v11, %v291_v13  ;;  %v1837_v7 = vpop.f32.mrb[39].mxu0  ;;  %v2020_v63 = vsel %vm809_vm1, %v8808_v29, -inf  ;;  %v8831_v13 = vadd.f32 %v6385_v27, %v254_v4  ;;  %v8835_v11 = vpop.permute.xlu1 %2506 }
 0x453   : > { %2021 = vmax.xlane.f32.xlu0 %v2020_v63  ;;  %v8824_v14 = vadd.f32 %v1837_v7, %v289_v42  ;;  %v2014_v0 = vsel %vm809_vm1, %v8815_v12, -inf  ;;  %v252_v7 = vld [vmem:[%s11155_s1 + $0x140] sm:$0xff]  ;;  %v8840_v63 = vadd.f32 %v6386_v59, %v255_v17  ;;  %v8854_v59 = vpop.permute.xlu0 %2690 }
 0x454   : > { %v2023_v18 = vsel %vm809_vm1, %v8817_v48, -inf  ;;  %v8847_v27 = vadd.f32 %v1713_v8, %v252_v7  ;;  %v1984_v4 = vsel %vm809_vm1, %v8831_v13, -inf  ;;  %v259_v8 = vld [vmem:[%s11155_s1 + $0x178] sm:$0xff]  ;;  %v8865_v7 = vadd.f32 %v6389_v51, %v258_v10  ;;  %v257_v10 = vld [vmem:[%s11155_s1 + $0x168] sm:$0xff] }
 0x455   : > { %2024 = vmax.xlane.f32.xlu1 %v2023_v18  ;;  %v2017_v42 = vsel %vm809_vm1, %v8824_v14, -inf  ;;  %v253_v18 = vld [vmem:[%s11155_s1 + $0x148] sm:$0xff]  ;;  %v8872_v20 = vadd.f32 %v6390_v43, %v259_v8  ;;  %v318_v43 = vld [vmem:[%s11155_s1 + $0x350] sm:$0xff]  ;;  %v8890_v8 = vadd.f32 %v1732_v22, %v257_v10 }
 0x456   : > { %v8856_v17 = vadd.f32 %v1716_v40, %v253_v18  ;;  %v8860_v5 = vpop.permute.xlu1 %2591  ;;  %v256_v40 = vld [vmem:[%s11155_s1 + $0x160] sm:$0xff]  ;;  %v1996_v55 = vsel %vm809_vm1, %v8865_v7, -inf }
 0x457   : > { %2015 = vmax.xlane.f32.xlu0 %v2014_v0  ;;  %v1987_v0 = vsel %vm809_vm1, %v8840_v63, -inf  ;;  %v8881_v30 = vadd.f32 %v1729_v47, %v256_v40  ;;  %v1999_v41 = vsel %vm809_vm1, %v8872_v20, -inf  ;;  %v1993_v52 = vsel %vm809_vm1, %v8890_v8, -inf }
 0x458   : > { %v1981_v32 = vsel %vm809_vm1, %v8856_v17, -inf }
 0x459   : > { %2018 = vmax.xlane.f32.xlu1 %v2017_v42  ;;  %v1990_v40 = vsel %vm809_vm1, %v8881_v30, -inf }
 0x45b   : > { %1985 = vmax.xlane.f32.xlu0 %v1984_v4  ;;  %v1978_v4 = vsel %vm809_vm1, %v8847_v27, -inf }
 0x45d   : > { %1988 = vmax.xlane.f32.xlu1 %v1987_v0  ;;  %v8879_v0 = vpop.permute.xlu0 %2791 }
 0x45e   : > { %v6417_v42 = vpop.f32.mrb[48].mxu1  ;;  %11300 = vst [vmem:[#allocation34_spill] sm:$0xff] %v8879_v0 }
 0x45f   : > { %v1923_v18 = vpop.f32.mrb[49].mxu1  ;;  %1979 = vmax.xlane.f32.xlu0 %v1978_v4  ;;  %v8885_v4 = vpop.permute.xlu1 %2686  ;;  %v8897_v47 = vadd.f32 %v6417_v42, %v318_v43  ;;  %v317_v43 = vld [vmem:[%s11155_s1 + $0x348] sm:$0xff] }
 0x460   : > { %v6418_v16 = vpop.f32.mrb[50].mxu1 }
 0x461   : > { %v1926_v51 = vpop.f32.mrb[51].mxu1  ;;  %1982 = vmax.xlane.f32.xlu1 %v1981_v32  ;;  %v319_v32 = vld [vmem:[%s11155_s1 + $0x358] sm:$0xff]  ;;  %v8904_v22 = vpop.permute.xlu0 %2692 }
 0x462   : > { %v8906_v39 = vadd.f32 %v6418_v16, %v319_v32  ;;  %v2032_v16 = vsel %vm809_vm1, %v8897_v47, -inf  ;;  %v323_v32 = vld [vmem:[%s11155_s1 + $0x378] sm:$0xff]  ;;  %v8925_v53 = vadd.f32 %v1926_v51, %v317_v43 }
 0x463   : > { %1997 = vmax.xlane.f32.xlu0 %v1996_v55  ;;  %v316_v55 = vld [vmem:[%s11155_s1 + $0x340] sm:$0xff] }
 0x464   : > { %v8918_v56 = vadd.f32 %v1923_v18, %v316_v55  ;;  %v320_v18 = vld [vmem:[%s11155_s1 + $0x360] sm:$0xff]  ;;  %v2029_v43 = vsel %vm809_vm1, %v8925_v53, -inf }
 0x465   : > { %2000 = vmax.xlane.f32.xlu1 %v1999_v41  ;;  %v8910_v41 = vpop.permute.xlu1 %2593  ;;  %v8934_v55 = vpop.permute.xlu0 %2678 }
 0x466   : > { %v6421_v19 = vpop.f32.mrb[52].mxu1 }
 0x467   : > { %1991 = vmax.xlane.f32.xlu0 %v1990_v40  ;;  %v1939_v10 = vpop.f32.mrb[53].mxu1  ;;  %v322_v40 = vld [vmem:[%s11155_s1 + $0x370] sm:$0xff] }
 0x468   : > { %v6422_v42 = vpop.f32.mrb[54].mxu1  ;;  %v8929_v1 = vadd.f32 %v6421_v19, %v322_v40  ;;  %v321_v19 = vld [vmem:[%s11155_s1 + $0x368] sm:$0xff]  ;;  %v8945_v51 = vadd.f32 %v1939_v10, %v320_v18 }
 0x469   : > { %1994 = vmax.xlane.f32.xlu1 %v1993_v52  ;;  %v1942_v33 = vpop.f32.mrb[55].mxu1  ;;  %v2035_v52 = vsel %vm809_vm1, %v8906_v39, -inf  ;;  %v8938_v26 = vadd.f32 %v6422_v42, %v323_v32  ;;  %v8940_v37 = vpop.permute.xlu1 %2595 }
 0x46a   : > { %v2044_v40 = vsel %vm809_vm1, %v8929_v1, -inf  ;;  %v8953_v32 = vadd.f32 %v1942_v33, %v321_v19 }
 0x46b   : > { %2033 = vmax.xlane.f32.xlu0 %v2032_v16  ;;  %v2026_v16 = vsel %vm809_vm1, %v8918_v56, -inf  ;;  %v2047_v42 = vsel %vm809_vm1, %v8938_v26, -inf }
 0x46c   : > { %v2041_v18 = vsel %vm809_vm1, %v8953_v32, -inf }
 0x46d   : > { %2036 = vmax.xlane.f32.xlu1 %v2035_v52  ;;  %v8955_v52 = vpop.permute.xlu0 %2795  ;;  %v8959_v10 = vpop.permute.xlu1 %2688 }
 0x46e   : > { %11301 = vst [vmem:[#allocation35_spill] sm:$0xff] %v8955_v52 }
 0x46f   : > { %2027 = vmax.xlane.f32.xlu0 %v2026_v16  ;;  %v2038_v16 = vsel %vm809_vm1, %v8945_v51, -inf }
 0x471   : > { %2030 = vmax.xlane.f32.xlu1 %v2029_v43  ;;  %v8963_v43 = vpop.permute.xlu0 %2896  ;;  %v8965_v44 = vpop.permute.xlu1 %2793 }
 0x472   : > { %11302 = vst [vmem:[#allocation36_spill] sm:$0xff] %v8965_v44 }
 0x473   : > { %2045 = vmax.xlane.f32.xlu0 %v2044_v40 }
 0x475   : > { %2048 = vmax.xlane.f32.xlu1 %v2047_v42 }
 0x477   : > { %2039 = vmax.xlane.f32.xlu0 %v2038_v16 }
 0x479   : > { %2042 = vmax.xlane.f32.xlu1 %v2041_v18 }
 0x47f   : > { %v1962_v33 = vpop.xlane.xlu0 %1961 }
 0x480   : > { %v2052_v19 = vsub.f32 %v8695_v57, %v1962_v33  ;;  %v1956_v40 = vpop.xlane.xlu1 %1955 }
 0x481   : > { %v2050_v35 = vsub.f32 %v8703_v54, %v1956_v40 }
 0x482   : > { %v2086_v3 = vmul.f32 1.442695, %v2052_v19 }
 0x483   : > { %v2082_v21 = vmul.f32 1.442695, %v2050_v35  ;;  %v1959_v45 = vpop.xlane.xlu0 %1958 }
 0x484   : > { %7251 = vpow2.f32 %v2086_v3  ;;  %v2051_v42 = vsub.f32 %v8709_v9, %v1959_v45  ;;  %v1965_v6 = vpop.xlane.xlu1 %1964 }
 0x485   : > { %v2053_v16 = vsub.f32 %v8707_v46, %v1965_v6  ;;  %7253 = vpow2.f32 %v2082_v21 }
 0x486   : > { %v2084_v18 = vmul.f32 1.442695, %v2051_v42 }
 0x487   : > { %v2088_v60 = vmul.f32 1.442695, %v2053_v16 }
 0x489   : > { %7255 = vpow2.f32 %v2088_v60 }
 0x48a   : > { %7257 = vpow2.f32 %v2084_v18 }
 0x48e   : > { %v8971_v62 = vpop.eup %7251 }
 0x48f   : > { %v2152_v57 = vsel %vm809_vm1, %v8971_v62, 0.0  ;;  %v8975_v54 = vpop.eup %7253 }
 0x490   : > { %2153 = vadd.xlane.f32.xlu0 %v2152_v57  ;;  %v2146_v9 = vsel %vm809_vm1, %v8975_v54, 0.0 }
 0x493   : > { %v8977_v35 = vpop.eup %7255 }
 0x494   : > { %2147 = vadd.xlane.f32.xlu0 %v2146_v9  ;;  %v2155_v46 = vsel %vm809_vm1, %v8977_v35, 0.0  ;;  %v8983_v45 = vpop.eup %7257 }
 0x495   : > { %2156 = vadd.xlane.f32.xlu1 %v2155_v46  ;;  %v2149_v60 = vsel %vm809_vm1, %v8983_v45, 0.0 }
 0x499   : > { %2150 = vadd.xlane.f32.xlu1 %v2149_v60 }
 0x4c8   : > { %v1974_v3 = vpop.xlane.xlu0 %1973 }
 0x4c9   : > { %v2056_v6 = vsub.f32 %v8746_v49, %v1974_v3 }
 0x4ca   : > { %v1977_v21 = vpop.xlane.xlu1 %1976 }
 0x4cb   : > { %v2094_v33 = vmul.f32 1.442695, %v2056_v6  ;;  %v2057_v19 = vsub.f32 %v8757_v25, %v1977_v21 }
 0x4cc   : > { %v1968_v40 = vpop.xlane.xlu0 %1967 }
 0x4cd   : > { %7259 = vpow2.f32 %v2094_v33  ;;  %v2096_v42 = vmul.f32 1.442695, %v2057_v19  ;;  %v2054_v16 = vsub.f32 %v8755_v38, %v1968_v40 }
 0x4ce   : > { %v1971_v18 = vpop.xlane.xlu1 %1970 }
 0x4cf   : > { %7261 = vpow2.f32 %v2096_v42  ;;  %v2090_v57 = vmul.f32 1.442695, %v2054_v16  ;;  %v2055_v9 = vsub.f32 %v8761_v31, %v1971_v18 }
 0x4d1   : > { %7263 = vpow2.f32 %v2090_v57  ;;  %v2092_v46 = vmul.f32 1.442695, %v2055_v9 }
 0x4d3   : > { %7265 = vpow2.f32 %v2092_v46 }
 0x4d4   : > { %v2010_v60 = vpop.xlane.xlu0 %2009 }
 0x4d5   : > { %v2068_v49 = vsub.f32 %v8778_v34, %v2010_v60 }
 0x4d6   : > { %v2013_v3 = vpop.xlane.xlu1 %2012 }
 0x4d7   : > { %v8992_v6 = vpop.eup %7259  ;;  %v2118_v25 = vmul.f32 1.442695, %v2068_v49  ;;  %v2069_v21 = vsub.f32 %v8785_v24, %v2013_v3 }
 0x4d8   : > { %v2004_v33 = vpop.xlane.xlu0 %2003  ;;  %v2164_v38 = vsel %vm809_vm1, %v8992_v6, 0.0 }
 0x4d9   : > { %v8997_v19 = vpop.eup %7261  ;;  %7267 = vpow2.f32 %v2118_v25  ;;  %v2120_v31 = vmul.f32 1.442695, %v2069_v21  ;;  %v2066_v40 = vsub.f32 %v8783_v23, %v2004_v33  ;;  %2165 = vadd.xlane.f32.xlu1 %v2164_v38 }
 0x4da   : > { %v2007_v42 = vpop.xlane.xlu1 %2006  ;;  %v2167_v24 = vsel %vm809_vm1, %v8997_v19, 0.0 }
 0x4db   : > { %v9000_v16 = vpop.eup %7263  ;;  %7269 = vpow2.f32 %v2120_v31  ;;  %v2114_v34 = vmul.f32 1.442695, %v2066_v40  ;;  %v2067_v18 = vsub.f32 %v8789_v61, %v2007_v42 }
 0x4dc   : > { %v2158_v57 = vsel %vm809_vm1, %v9000_v16, 0.0 }
 0x4dd   : > { %v9007_v9 = vpop.eup %7265  ;;  %7271 = vpow2.f32 %v2114_v34  ;;  %v2116_v46 = vmul.f32 1.442695, %v2067_v18  ;;  %2168 = vadd.xlane.f32.xlu1 %v2167_v24  ;;  %2159 = vadd.xlane.f32.xlu0 %v2158_v57 }
 0x4de   : > { %v2161_v60 = vsel %vm809_vm1, %v9007_v9, 0.0 }
 0x4df   : > { %7273 = vpow2.f32 %v2116_v46 }
 0x4e0   : > { %v2022_v23 = vpop.xlane.xlu0 %2021 }
 0x4e1   : > { %v2072_v49 = vsub.f32 %v8808_v29, %v2022_v23  ;;  %2162 = vadd.xlane.f32.xlu1 %v2161_v60 }
 0x4e2   : > { %v2025_v61 = vpop.xlane.xlu1 %2024 }
 0x4e3   : > { %v9012_v3 = vpop.eup %7267  ;;  %v2126_v25 = vmul.f32 1.442695, %v2072_v49  ;;  %v2073_v21 = vsub.f32 %v8817_v48, %v2025_v61 }
 0x4e4   : > { %v2016_v33 = vpop.xlane.xlu0 %2015  ;;  %v2200_v38 = vsel %vm809_vm1, %v9012_v3, 0.0 }
 0x4e5   : > { %v9017_v31 = vpop.eup %7269  ;;  %7275 = vpow2.f32 %v2126_v25  ;;  %v2070_v40 = vsub.f32 %v8815_v12, %v2016_v33  ;;  %2201 = vadd.xlane.f32.xlu1 %v2200_v38  ;;  %v2128_v18 = vmul.f32 1.442695, %v2073_v21 }
 0x4e6   : > { %v2019_v42 = vpop.xlane.xlu1 %2018  ;;  %v2203_v29 = vsel %vm809_vm1, %v9017_v31, 0.0 }
 0x4e7   : > { %v9022_v34 = vpop.eup %7271  ;;  %v2122_v24 = vmul.f32 1.442695, %v2070_v40  ;;  %v2071_v48 = vsub.f32 %v8824_v14, %v2019_v42  ;;  %2204 = vadd.xlane.f32.xlu0 %v2203_v29 }
 0x4e8   : > { %v1986_v57 = vpop.xlane.xlu0 %1985  ;;  %v2194_v46 = vsel %vm809_vm1, %v9022_v34, 0.0 }
 0x4e9   : > { %v9027_v23 = vpop.eup %7273  ;;  %7277 = vpow2.f32 %v2122_v24  ;;  %v2060_v12 = vsub.f32 %v8831_v13, %v1986_v57  ;;  %2195 = vadd.xlane.f32.xlu1 %v2194_v46  ;;  %v2124_v60 = vmul.f32 1.442695, %v2071_v48 }
 0x4ea   : > { %v1989_v49 = vpop.xlane.xlu1 %1988  ;;  %v2197_v61 = vsel %vm809_vm1, %v9027_v23, 0.0  ;;  %7279 = vpow2.f32 %v2128_v18 }
 0x4eb   : > { %v2102_v25 = vmul.f32 1.442695, %v2060_v12  ;;  %v2061_v14 = vsub.f32 %v8840_v63, %v1989_v49  ;;  %2198 = vadd.xlane.f32.xlu0 %v2197_v61 }
 0x4ec   : > { %v1980_v21 = vpop.xlane.xlu0 %1979 }
 0x4ed   : > { %7281 = vpow2.f32 %v2102_v25  ;;  %v2104_v33 = vmul.f32 1.442695, %v2061_v14  ;;  %v2058_v38 = vsub.f32 %v8847_v27, %v1980_v21 }
 0x4ee   : > { %7283 = vpow2.f32 %v2124_v60  ;;  %v1983_v40 = vpop.xlane.xlu1 %1982 }
 0x4ef   : > { %v9034_v42 = vpop.eup %7275  ;;  %7285 = vpow2.f32 %v2104_v33  ;;  %v2098_v13 = vmul.f32 1.442695, %v2058_v38  ;;  %v2059_v29 = vsub.f32 %v8856_v17, %v1983_v40 }
 0x4f0   : > { %v1998_v24 = vpop.xlane.xlu0 %1997  ;;  %v2212_v18 = vsel %vm809_vm1, %v9034_v42, 0.0 }
 0x4f1   : > { %v2064_v63 = vsub.f32 %v8865_v7, %v1998_v24  ;;  %2213 = vadd.xlane.f32.xlu1 %v2212_v18  ;;  %7287 = vpow2.f32 %v2098_v13  ;;  %v2100_v27 = vmul.f32 1.442695, %v2059_v29 }
 0x4f2   : > { %v2001_v48 = vpop.xlane.xlu1 %2000 }
 0x4f3   : > { %v9040_v57 = vpop.eup %7277  ;;  %v2110_v46 = vmul.f32 1.442695, %v2064_v63  ;;  %v2065_v7 = vsub.f32 %v8872_v20, %v2001_v48 }
 0x4f4   : > { %v1992_v12 = vpop.xlane.xlu0 %1991  ;;  %v2206_v60 = vsel %vm809_vm1, %v9040_v57, 0.0  ;;  %v9044_v49 = vpop.eup %7279 }
 0x4f5   : > { %7289 = vpow2.f32 %v2110_v46  ;;  %v2062_v17 = vsub.f32 %v8881_v30, %v1992_v12  ;;  %2207 = vadd.xlane.f32.xlu0 %v2206_v60  ;;  %v2215_v40 = vsel %vm809_vm1, %v9044_v49, 0.0  ;;  %v2112_v18 = vmul.f32 1.442695, %v2065_v7 }
 0x4f6   : > { %v1995_v61 = vpop.xlane.xlu1 %1994  ;;  %7291 = vpow2.f32 %v2100_v27 }
 0x4f7   : > { %v9047_v25 = vpop.eup %7281  ;;  %v2106_v14 = vmul.f32 1.442695, %v2062_v17  ;;  %v2063_v21 = vsub.f32 %v8890_v8, %v1995_v61 }
 0x4f8   : > { %v9051_v33 = vpop.eup %7283  ;;  %v2034_v38 = vpop.xlane.xlu0 %2033  ;;  %v2176_v13 = vsel %vm809_vm1, %v9047_v25, 0.0 }
 0x4f9   : > { %v9057_v30 = vpop.eup %7285  ;;  %v2108_v29 = vmul.f32 1.442695, %v2063_v21  ;;  %v2076_v24 = vsub.f32 %v8897_v47, %v2034_v38  ;;  %2216 = vadd.xlane.f32.xlu0 %v2215_v40  ;;  %2177 = vadd.xlane.f32.xlu1 %v2176_v13  ;;  %7293 = vpow2.f32 %v2106_v14  ;;  %v2209_v46 = vsel %vm809_vm1, %v9051_v33, 0.0 }
 0x4fa   : > { %v2037_v20 = vpop.xlane.xlu1 %2036  ;;  %v2179_v27 = vsel %vm809_vm1, %v9057_v30, 0.0 }
 0x4fb   : > { %7295 = vpow2.f32 %v2108_v29  ;;  %v2134_v8 = vmul.f32 1.442695, %v2076_v24  ;;  %v2077_v63 = vsub.f32 %v8906_v39, %v2037_v20  ;;  %v9065_v12 = vpop.eup %7287 }
 0x4fc   : > { %v2028_v48 = vpop.xlane.xlu0 %2027  ;;  %v2170_v14 = vsel %vm809_vm1, %v9065_v12, 0.0 }
 0x4fd   : > { %7297 = vpow2.f32 %v2134_v8  ;;  %v2074_v47 = vsub.f32 %v8918_v56, %v2028_v48  ;;  %2180 = vadd.xlane.f32.xlu0 %v2179_v27  ;;  %2210 = vadd.xlane.f32.xlu1 %v2209_v46  ;;  %v2136_v61 = vmul.f32 1.442695, %v2077_v63 }
 0x4fe   : > { %v2031_v60 = vpop.xlane.xlu1 %2030  ;;  %7299 = vpow2.f32 %v2112_v18 }
 0x4ff   : > { %v9068_v17 = vpop.eup %7289  ;;  %v2130_v39 = vmul.f32 1.442695, %v2074_v47  ;;  %v2075_v7 = vsub.f32 %v8925_v53, %v2031_v60 }
 0x500   : > { %v2188_v21 = vsel %vm809_vm1, %v9068_v17, 0.0  ;;  %v9075_v38 = vpop.eup %7291 }
 0x501   : > { %7301 = vpow2.f32 %v2130_v39  ;;  %2171 = vadd.xlane.f32.xlu1 %v2170_v14  ;;  %2189 = vadd.xlane.f32.xlu0 %v2188_v21  ;;  %v2132_v56 = vmul.f32 1.442695, %v2075_v7  ;;  %v2173_v13 = vsel %vm809_vm1, %v9075_v38, 0.0 }
 0x502   : > { %7303 = vpow2.f32 %v2136_v61  ;;  %v2046_v61 = vpop.xlane.xlu0 %2045  ;;  %v2049_v7 = vpop.xlane.xlu1 %2048 }
 0x503   : > { %v9077_v40 = vpop.eup %7293  ;;  %7305 = vpow2.f32 %v2132_v56 }
 0x504   : > { %v2182_v20 = vsel %vm809_vm1, %v9077_v40, 0.0 }
 0x505   : > { %v9081_v29 = vpop.eup %7295  ;;  %2174 = vadd.xlane.f32.xlu1 %v2173_v13 }
 0x506   : > { %v2185_v53 = vsel %vm809_vm1, %v9081_v29, 0.0  ;;  %v2040_v14 = vpop.xlane.xlu0 %2039  ;;  %v2043_v56 = vpop.xlane.xlu1 %2042 }
 0x507   : > { %v9085_v24 = vpop.eup %7297  ;;  %2186 = vadd.xlane.f32.xlu0 %v2185_v53  ;;  %v2078_v52 = vsub.f32 %v8945_v51, %v2040_v14  ;;  %v9183_v14 = vld [vmem:[%s7743_s18 + $0x28] sm:$0xff]  }
 0x508   : > { %11303 = vst [vmem:[#allocation37_spill] sm:$0xff] %v9085_v24  ;;  %v9089_v18 = vpop.eup %7299  ;;  %v2224_v8 = vsel %vm809_vm1, %v9085_v24, 0.0  ;;  %v2079_v24 = vsub.f32 %v8953_v32, %v2043_v56  ;;  %v9163_v32 = vld [vmem:[%s7743_s18 + $0x48] sm:$0xff]   ;;  %v9188_v56 = vld [vmem:[%s7743_s18 + $0x40] sm:$0xff]  }
 0x509   : > { %2183 = vadd.xlane.f32.xlu1 %v2182_v20  ;;  %v2191_v48 = vsel %vm809_vm1, %v9089_v18, 0.0  ;;  %v9108_v20 = vld [vmem:[%s7743_s18 + $0x8] sm:$0xff]  }
 0x50b   : > { %v9093_v63 = vpop.eup %7301  ;;  %2225 = vadd.xlane.f32.xlu0 %v2224_v8 }
 0x50c   : > { %v9097_v27 = vpop.eup %7303  ;;  %v2218_v46 = vsel %vm809_vm1, %v9093_v63, 0.0 }
 0x50d   : > { %2192 = vadd.xlane.f32.xlu1 %v2191_v48  ;;  %v2227_v47 = vsel %vm809_vm1, %v9097_v27, 0.0  ;;  %v9103_v60 = vpop.eup %7305  ;;  %v9113_v48 = vld [vmem:[%s7743_s18 + $0x38] sm:$0xff]  }
 0x50e   : > { %11304 = vst [vmem:[#allocation38_spill] sm:$0xff] %v9103_v60  ;;  %v2221_v39 = vsel %vm809_vm1, %v9103_v60, 0.0 }
 0x50f   : > { %2219 = vadd.xlane.f32.xlu0 %v2218_v46 }
 0x511   : > { %2228 = vadd.xlane.f32.xlu1 %v2227_v47  ;;  %v2080_v47 = vsub.f32 %v8929_v1, %v2046_v61  ;;  %v2081_v1 = vsub.f32 %v8938_v26, %v2049_v7  ;;  %v2138_v61 = vmul.f32 1.442695, %v2078_v52  ;;  %v9168_v52 = vld [vmem:[%s7743_s18 + $0x10] sm:$0xff]  }
 0x513   : > { %v2142_v58 = vmul.f32 1.442695, %v2080_v47  ;;  %v2144_v51 = vmul.f32 1.442695, %v2081_v1  ;;  %v9193_v47 = vld [vmem:[%s7743_s18 + $0x18] sm:$0xff]  }
 0x515   : > { %2222 = vadd.xlane.f32.xlu1 %v2221_v39 }
 0x51d   : > { %v2154_v21 = vpop.xlane.xlu0 %2153 }
 0x521   : > { %v2148_v13 = vpop.xlane.xlu0 %2147 }
 0x522   : > { %v2157_v53 = vpop.xlane.xlu1 %2156 }
 0x523   : > { %7307 = vrcp.f32 %v2157_v53 }
 0x524   : > { %7309 = vrcp.f32 %v2148_v13 }
 0x525   : > { %2680 = vrot.lane.b32.xlu0 %v9108_v20, %s7701_s19  ;;  %7311 = vrcp.f32 %v2154_v21 }
 0x526   : > { %v2151_v8 = vpop.xlane.xlu1 %2150  ;;  %2797 = vrot.lane.b32.xlu1 %v9113_v48, %s7700_s22 }
 0x527   : > { %7313 = vrcp.f32 %v2151_v8 }
 0x528   : > { %7315 = vpow2.f32 %v2142_v58 }
 0x529   : > { %7317 = vpow2.f32 %v2138_v61 }
 0x52d   : > { %v7308_v46 = vpop.eup %7307 }
 0x52e   : > { %v7310_v39 = vpop.eup %7309  ;;  %v2277_v13 = vmul.f32 %v7308_v46, %v8977_v35  ;;  %v2140_v35 = vmul.f32 1.442695, %v2079_v24  ;;  %v9178_v24 = vld [vmem:[%s7743_s18 + $0x58] sm:$0xff]  }
 0x52f   : > { %v7312_v36 = vpop.eup %7311  ;;  %v2274_v21 = vmul.f32 %v7310_v39, %v8975_v54  ;;  %v9198_v39 = vld [vmem:[%s7743_s18 + $0x70] sm:$0xff]  }
 0x530   : > { %v2276_v0 = vmul.f32 %v7312_v36, %v8971_v62  ;;  %7319 = vpow2.f32 %v2140_v35 }
 0x531   : > { %v7314_v53 = vpop.eup %7313  ;;  %7321 = vpow2.f32 %v2144_v51 }
 0x532   : > { %v2275_v44 = vmul.f32 %v7314_v53, %v8983_v45  ;;  %v2307_v60 = vpack.c.bf16 %v2277_v13, %v2276_v0  ;;  %v9158_v0 = vld [vmem:[%s7743_s18 + $0x60] sm:$0xff]   ;;  %v9173_v45 = vld [vmem:[%s7743_s18 + $0x50] sm:$0xff]   ;;  %v9203_v13 = vld [vmem:[%s7743_s18 + $0x68] sm:$0xff]  }
 0x534   : > { %v2306_v8 = vpack.c.bf16 %v2275_v44, %v2274_v21  ;;  %v9131_v44 = vpop.eup %7315 }
 0x535   : > { %v2236_v26 = vsel %vm809_vm1, %v9131_v44, 0.0  ;;  %v9137_v36 = vpop.eup %7317 }
 0x536   : > { %6431 = vmatprep.mubr.msk.bf16.mxu0 %vm809_vm1, %v2306_v8  ;;  %v2230_v62 = vsel %vm809_vm1, %v9137_v36, 0.0 }
 0x537   : > { %6432 = vmatmul.mubr.msk.bf16.vlgmr.msra.gmra.mrb[40].mxu0 %vm809_vm1, %v2307_v60 }
 0x538   : > { %6456 = vmatpush3.bf16.msra.mxu0 %v8683_v2 }
 0x539   : > { %6457 = vmatprep.subr.bf16.mxu0 %v8795_v50 }
 0x53a   : > { %v9142_v58 = vpop.eup %7319 }
 0x53b   : > { %v9146_v2 = vpop.eup %7321 }
 0x53c   : > { %6458 = vmatpush3.bf16.msra.mxu0 %v8795_v50  ;;  %v2233_v50 = vsel %vm809_vm1, %v9142_v58, 0.0 }
 0x53d   : > { %6459 = vmatprep.subr.bf16.mxu0 %v8810_v15 }
 0x540   : > { %6460 = vmatpush3.bf16.msra.mxu0 %v8810_v15  ;;  %v2239_v15 = vsel %vm809_vm1, %v9146_v2, 0.0 }
 0x541   : > { %6461 = vmatprep.subr.bf16.mxu0 %v8835_v11 }
 0x544   : > { %6462 = vmatpush3.bf16.msra.mxu0 %v8835_v11  ;;  %2237 = vadd.xlane.f32.xlu0 %v2236_v26  ;;  %v9153_v11 = vld [vmem:[%s7743_s18 + $0x20] sm:$0xff]  }
 0x545   : > { %6811 = vmatprep.subr.msk.bf16.mxu0 %vm368_vm0, %v8885_v4 }
 0x548   : > { %2231 = vadd.xlane.f32.xlu0 %v2230_v62 }
 0x54a   : > { %2234 = vadd.xlane.f32.xlu1 %v2233_v50 }
 0x54c   : > { %2240 = vadd.xlane.f32.xlu0 %v2239_v15 }
 0x55b   : > { %2783 = vrot.lane.b32.xlu1 %v9153_v11, %s7701_s19 }
 0x55f   : > { %3001 = vrot.lane.b32.xlu1 %v9158_v0, %s7700_s22 }
 0x562   : > { %2898 = vrot.lane.b32.xlu0 %v9163_v32, %s7700_s22 }
 0x563   : > { %2682 = vrot.lane.b32.xlu1 %v9168_v52, %s7701_s19 }
 0x566   : > { %v2166_v54 = vpop.xlane.xlu1 %2165  ;;  %2900 = vrot.lane.b32.xlu0 %v9173_v45, %s7700_s22 }
 0x567   : > { %2902 = vrot.lane.b32.xlu1 %v9178_v24, %s7700_s22 }
 0x56a   : > { %v2169_v60 = vpop.xlane.xlu1 %2168  ;;  %v2160_v7 = vpop.xlane.xlu0 %2159  ;;  %2785 = vrot.lane.b32.xlu0 %v9183_v14, %s7701_s19 }
 0x56b   : > { %2888 = vrot.lane.b32.xlu1 %v9188_v56, %s7701_s19  ;;  %7323 = vrcp.f32 %v2169_v60 }
 0x56c   : > { %7325 = vrcp.f32 %v2160_v7 }
 0x56d   : > { %7327 = vrcp.f32 %v2166_v54  ;;  %v9217_v54 = vld [vmem:[%s7743_s18 + $0x30] sm:$0xff]  }
 0x56e   : > { %v2163_v46 = vpop.xlane.xlu1 %2162  ;;  %2684 = vrot.lane.b32.xlu0 %v9193_v47, %s7701_s19 }
 0x56f   : > { %7329 = vrcp.f32 %v2163_v46  ;;  %3005 = vrot.lane.b32.xlu1 %v9198_v39, %s7700_s22 }
 0x572   : > { %v2202_v53 = vpop.xlane.xlu1 %2201  ;;  %3003 = vrot.lane.b32.xlu0 %v9203_v13, %s7700_s22 }
 0x573   : > { %2789 = vrot.lane.b32.xlu1 %v9113_v48, %s7701_s19 }
 0x574   : > { %v2205_v21 = vpop.xlane.xlu0 %2204 }
 0x575   : > { %v7324_v8 = vpop.eup %7323  ;;  %7331 = vrcp.f32 %v2205_v21 }
 0x576   : > { %v2196_v1 = vpop.xlane.xlu1 %2195  ;;  %2890 = vrot.lane.b32.xlu0 %v9163_v32, %s7701_s19  ;;  %v7326_v61 = vpop.eup %7325  ;;  %v2281_v62 = vmul.f32 %v7324_v8, %v8997_v19 }
 0x577   : > { %7333 = vrcp.f32 %v2196_v1  ;;  %2993 = vrot.lane.b32.xlu1 %v9158_v0, %s7701_s19  ;;  %v7328_v35 = vpop.eup %7327  ;;  %v2278_v50 = vmul.f32 %v7326_v61, %v9000_v16 }
 0x578   : > { %7335 = vrcp.f32 %v2202_v53  ;;  %v2199_v51 = vpop.xlane.xlu0 %2198  ;;  %v2280_v60 = vmul.f32 %v7328_v35, %v8992_v6  ;;  %v9226_v53 = vld [vmem:[%s7743_s18 + $0x78] sm:$0xff]  }
 0x579   : > { %v7330_v26 = vpop.eup %7329  ;;  %7337 = vrcp.f32 %v2199_v51 }
 0x57a   : > { %v2279_v15 = vmul.f32 %v7330_v26, %v9007_v9  ;;  %2787 = vrot.lane.b32.xlu0 %v9217_v54, %s7701_s19  ;;  %v2309_v46 = vpack.c.bf16 %v2281_v62, %v2280_v60 }
 0x57b   : > { %2892 = vrot.lane.b32.xlu1 %v9173_v45, %s7701_s19 }
 0x57c   : > { %v2308_v7 = vpack.c.bf16 %v2279_v15, %v2278_v50 }
 0x57e   : > { %6435 = vmatprep.mubr.msk.bf16.mxu0 %vm809_vm1, %v2308_v7  ;;  %3007 = vrot.lane.b32.xlu0 %v9226_v53, %s7700_s22  ;;  %v2214_v9 = vpop.xlane.xlu1 %2213  ;;  %v2710_v7 = vsel %vm368_vm0, %v8959_v10, 0  ;;  %s7702_s22 = smov 48  }
 0x57f   : > { %6436 = vmatmul.mubr.msk.bf16.gmra.mrb[44].mxu0 %vm809_vm1, %v2309_v46  ;;  %2997 = vrot.lane.b32.xlu1 %v9198_v39, %s7701_s19  ;;  %v7332_v19 = vpop.eup %7331 }
 0x580   : > { %v2293_v1 = vmul.f32 %v7332_v19, %v9017_v31  ;;  %v2707_v31 = vsel %vm368_vm0, %v8885_v4, 0 }
 0x581   : > { %v7334_v16 = vpop.eup %7333 }
 0x582   : > { %v7336_v6 = vpop.eup %7335  ;;  %v2208_v21 = vpop.xlane.xlu0 %2207  ;;  %2995 = vrot.lane.b32.xlu0 %v9203_v13, %s7701_s19  ;;  %v2290_v61 = vmul.f32 %v7334_v16, %v9022_v34 }
 0x583   : > { %v7338_v8 = vpop.eup %7337  ;;  %v2292_v51 = vmul.f32 %v7336_v6, %v9012_v3  ;;  %3468 = vrot.lane.b32.xlu1 %v9108_v20, %s7702_s22 }
 0x584   : > { %v2291_v35 = vmul.f32 %v7338_v8, %v9027_v23 }
 0x585   : > { %v2315_v15 = vpack.c.bf16 %v2293_v1, %v2292_v51 }
 0x586   : > { %v2178_v26 = vpop.xlane.xlu1 %2177  ;;  %v2217_v62 = vpop.xlane.xlu0 %2216  ;;  %v2314_v50 = vpack.c.bf16 %v2291_v35, %v2290_v61  ;;  %2894 = vrot.lane.b32.xlu0 %v9178_v24, %s7701_s19 }
 0x587   : > { %7339 = vrcp.f32 %v2217_v62  ;;  %3472 = vrot.lane.b32.xlu1 %v9193_v47, %s7702_s22 }
 0x588   : > { %6463 = vmatprep.mubr.msk.bf16.mxu0 %vm809_vm1, %v2314_v50  ;;  %7341 = vrcp.f32 %v2208_v21 }
 0x589   : > { %6464 = vmatmul.mubr.msk.bf16.vlgmr.msra.gmra.mrb[48].mxu0 %vm809_vm1, %v2315_v15  ;;  %7343 = vrcp.f32 %v2214_v9 }
 0x58a   : > { %6488 = vmatpush3.bf16.xpose.msra.mxu0 %v2707_v31  ;;  %v2211_v34 = vpop.xlane.xlu1 %2210  ;;  %v2181_v3 = vpop.xlane.xlu0 %2180  ;;  %2999 = vrot.lane.b32.xlu0 %v9226_v53, %s7701_s19  ;;  %s7703_s19 = smov 72  }
 0x58b   : > { %7345 = vrcp.f32 %v2211_v34  ;;  %6812 = vmatprep.subr.msk.bf16.mxu0 %vm368_vm0, %v8959_v10  ;;  %3644 = vrot.lane.b32.xlu1 %v9188_v56, %s7702_s22 }
 0x58c   : > { %7347 = vrcp.f32 %v2181_v3 }
 0x58e   : > { %v2172_v23 = vpop.xlane.xlu1 %2171  ;;  %v2190_v60 = vpop.xlane.xlu0 %2189 }
 0x58f   : > { %7349 = vrcp.f32 %v2172_v23  ;;  %3646 = vrot.lane.b32.xlu1 %v9163_v32, %s7702_s22 }
 0x590   : > { %7351 = vrcp.f32 %v2178_v26  ;;  %v2713_v26 = vsel %vm368_vm0, %v8854_v59, 0 }
 0x591   : > { %v7340_v46 = vpop.eup %7339 }
 0x592   : > { %6490 = vmatpush3.bf16.xpose.msra.mxu0 %v2710_v7  ;;  %v2175_v4 = vpop.xlane.xlu1 %2174  ;;  %v7342_v19 = vpop.eup %7341  ;;  %v2297_v21 = vmul.f32 %v7340_v46, %v9044_v49 }
 0x593   : > { %7353 = vrcp.f32 %v2175_v4  ;;  %6813 = vmatprep.subr.msk.bf16.mxu0 %vm368_vm0, %v8854_v59  ;;  %v7344_v16 = vpop.eup %7343  ;;  %v2294_v1 = vmul.f32 %v7342_v19, %v9040_v57  ;;  %v2716_v4 = vsel %vm368_vm0, %v8904_v22, 0  ;;  %3648 = vrot.lane.b32.xlu1 %v9173_v45, %s7702_s22 }
 0x594   : > { %v2187_v6 = vpop.xlane.xlu0 %2186  ;;  %v2296_v61 = vmul.f32 %v7344_v16, %v9034_v42 }
 0x595   : > { %v7346_v9 = vpop.eup %7345  ;;  %7355 = vrcp.f32 %v2187_v6 }
 0x596   : > { %v2184_v8 = vpop.xlane.xlu1 %2183  ;;  %v2295_v10 = vmul.f32 %v7346_v9, %v9051_v33  ;;  %v2317_v62 = vpack.c.bf16 %v2297_v21, %v2296_v61  ;;  %v7348_v50 = vpop.eup %7347  ;;  %v9269_v33 = vld [vmem:[%s7743_s18] sm:$0xff]   ;;  %v2917_v9 = vsel %vm368_vm0, %v8963_v43, 0 }
 0x597   : > { %7357 = vrcp.f32 %v2184_v8  ;;  %v2285_v57 = vmul.f32 %v7348_v50, %v9057_v30  ;;  %3466 = vrot.lane.b32.xlu0 %v9269_v33, %s7702_s22  ;;  %v11305_v8 = vld [vmem:[#allocation38_spill] sm:$0xff]  ;;  %3650 = vrot.lane.b32.xlu1 %v9178_v24, %s7702_s22 }
 0x598   : > { %v2226_v35 = vpop.xlane.xlu0 %2225  ;;  %v2316_v51 = vpack.c.bf16 %v2295_v10, %v2294_v1  ;;  %7359 = vrcp.f32 %v2190_v60  ;;  %v11306_v10 = vld [vmem:[#allocation37_spill] sm:$0xff] }
 0x599   : > { %v7350_v49 = vpop.eup %7349 }
 0x59a   : > { %6492 = vmatpush3.bf16.xpose.msra.mxu0 %v2713_v26  ;;  %v2193_v15 = vpop.xlane.xlu1 %2192  ;;  %6467 = vmatprep.mubr.msk.bf16.mxu0 %vm809_vm1, %v2316_v51  ;;  %v7352_v42 = vpop.eup %7351  ;;  %v2282_v3 = vmul.f32 %v7350_v49, %v9065_v12 }
 0x59b   : > { %7361 = vrcp.f32 %v2193_v15  ;;  %6814 = vmatprep.subr.msk.bf16.mxu0 %vm368_vm0, %v8904_v22  ;;  %6468 = vmatmul.mubr.msk.bf16.gmra.mrb[52].mxu0 %vm809_vm1, %v2317_v62 }
 0x59c   : > { %6495 = vmatprep.mubr.msk.bf16.mxu0 %vm368_vm0, %v8934_v55  ;;  %v2220_v31 = vpop.xlane.xlu0 %2219  ;;  %v2284_v55 = vmul.f32 %v7352_v42, %v9047_v25  ;;  %3470 = vrot.lane.b32.xlu0 %v9168_v52, %s7702_s22 }
 0x59d   : > { %v7354_v59 = vpop.eup %7353  ;;  %3735 = vrot.lane.b32.xlu1 %v9203_v13, %s7702_s22 }
 0x59e   : > { %v2229_v34 = vpop.xlane.xlu1 %2228  ;;  %v2283_v23 = vmul.f32 %v7354_v59, %v9075_v38  ;;  %v2311_v46 = vpack.c.bf16 %v2285_v57, %v2284_v55 }
 0x59f   : > { %v7356_v60 = vpop.eup %7355  ;;  %7363 = vrcp.f32 %v2229_v34 }
 0x5a0   : > { %v2310_v7 = vpack.c.bf16 %v2283_v23, %v2282_v3  ;;  %7365 = vrcp.f32 %v2220_v31  ;;  %v2287_v38 = vmul.f32 %v7356_v60, %v9081_v29  ;;  %3555 = vrot.lane.b32.xlu0 %v9153_v11, %s7702_s22  ;;  %v2681_v6 = vpop.permute.xlu0 %2680 }
 0x5a1   : > { %v7358_v30 = vpop.eup %7357  ;;  %7367 = vrcp.f32 %v2226_v35  ;;  %v11307_v35 = vld [vmem:[#allocation34_spill] sm:$0xff]  ;;  %3739 = vrot.lane.b32.xlu1 %v9226_v53, %s7702_s22 }
 0x5a2   : > { %6494 = vmatpush3.bf16.xpose.msra.mxu0 %v2716_v4  ;;  %6447 = vmatprep.mubr.msk.bf16.mxu1 %vm809_vm1, %v2310_v7  ;;  %v2223_v12 = vpop.xlane.xlu1 %2222  ;;  %v2286_v25 = vmul.f32 %v7358_v30, %v9077_v40  ;;  %v7360_v19 = vpop.eup %7359 }
 0x5a3   : > { %7369 = vrcp.f32 %v2223_v12  ;;  %6819 = vmatprep.subr.msk.bf16.mxu0 %vm368_vm0, %v8963_v43  ;;  %6448 = vmatmul.mubr.msk.bf16.vlgmr.msra.gmra.mrb[56].mxu1 %vm809_vm1, %v2311_v46  ;;  %v2288_v40 = vmul.f32 %v7360_v19, %v9068_v17 }
 0x5a4   : > { %6472 = vmatpush3.bf16.msra.mxu1 %v8686_v28  ;;  %v2312_v22 = vpack.c.bf16 %v2287_v38, %v2286_v25  ;;  %3557 = vrot.lane.b32.xlu0 %v9183_v14, %s7702_s22 }
 0x5a5   : > { %v7362_v16 = vpop.eup %7361  ;;  %6473 = vmatprep.subr.bf16.mxu1 %v8860_v5  ;;  %3935 = vrot.lane.b32.xlu1 %v9153_v11, %s7703_s19 }
 0x5a6   : > { %6451 = vmatprep.mubr.msk.bf16.mxu1 %vm809_vm1, %v2312_v22  ;;  %v2289_v29 = vmul.f32 %v7362_v16, %v9089_v18 }
 0x5a8   : > { %6474 = vmatpush3.bf16.msra.mxu1 %v8860_v5  ;;  %v2313_v28 = vpack.c.bf16 %v2289_v29, %v2288_v40  ;;  %3559 = vrot.lane.b32.xlu0 %v9217_v54, %s7702_s22 }
 0x5a9   : > { %6475 = vmatprep.subr.bf16.mxu1 %v8910_v41  ;;  %6496 = vmatmul.mubr.msk.bf16.vlgmr.msra.gmra.mrb[56].mxu0 %vm368_vm0, %v2681_v6  ;;  %v7364_v21 = vpop.eup %7363 }
 0x5aa   : > { %6520 = vmatpush3.bf16.xpose.msra.mxu0 %v2917_v9  ;;  %v7366_v17 = vpop.eup %7365  ;;  %v2301_v32 = vmul.f32 %v7364_v21, %v9097_v27  ;;  %3836 = vrot.lane.b32.xlu1 %v9193_v47, %s7703_s19 }
 0x5ab   : > { %6452 = vmatmul.mubr.msk.bf16.gmra.mrb[60].mxu1 %vm809_vm1, %v2313_v28  ;;  %v7368_v5 = vpop.eup %7367  ;;  %v2298_v43 = vmul.f32 %v7366_v17, %v9093_v63  ;;  %v11308_v63 = vld [vmem:[#allocation36_spill] sm:$0xff] }
 0x5ac   : > { %6476 = vmatpush3.bf16.msra.mxu1 %v8910_v41  ;;  %v2300_v61 = vmul.f32 %v7368_v5, %v11306_v10  ;;  %3561 = vrot.lane.b32.xlu0 %v9113_v48, %s7702_s22  ;;  %v2815_v27 = vsel %vm368_vm0, %v11308_v63, 0  ;;  %v11309_v48 = vld [vmem:[#allocation35_spill] sm:$0xff] }
 0x5ad   : > { %v7370_v18 = vpop.eup %7369  ;;  %6477 = vmatprep.subr.bf16.mxu1 %v8940_v37  ;;  %v2818_v11 = vsel %vm368_vm0, %v11309_v48, 0 }
 0x5ae   : > { %v2299_v1 = vmul.f32 %v7370_v18, %v11305_v8  ;;  %v2319_v45 = vpack.c.bf16 %v2301_v32, %v2300_v61  ;;  %3822 = vrot.lane.b32.xlu1 %v9269_v33, %s7704_s17 }
 0x5b0   : > { %6478 = vmatpush3.bf16.msra.mxu1 %v8940_v37  ;;  %v2318_v41 = vpack.c.bf16 %v2299_v1, %v2298_v43  ;;  %3733 = vrot.lane.b32.xlu0 %v9158_v0, %s7702_s22  ;;  %v2812_v37 = vsel %vm368_vm0, %v11307_v35, 0  ;;  %v2798_v0 = vpop.permute.xlu1 %2797 }
 0x5b1   : > { %6815 = vmatprep.subr.msk.bf16.mxu1 %vm368_vm0, %v11307_v35  ;;  %v2821_v24 = vsel %vm368_vm0, %v2798_v0, 0 }
 0x5b2   : > { %6479 = vmatprep.mubr.msk.bf16.mxu1 %vm809_vm1, %v2318_v41  ;;  %3939 = vrot.lane.b32.xlu1 %v9217_v54, %s7703_s19 }
 0x5b3   : > { %6480 = vmatmul.mubr.msk.bf16.vlgmr.msra.gmra.mrb[64].mxu1 %vm809_vm1, %v2319_v45 }
 0x5b4   : > { %3830 = vrot.lane.b32.xlu0 %v9269_v33, %s7703_s19 }
 0x5b6   : > { %3826 = vrot.lane.b32.xlu1 %v9168_v52, %s7704_s17 }
 0x5b8   : > { %3737 = vrot.lane.b32.xlu0 %v9198_v39, %s7702_s22 }
 0x5b9   : > { %6504 = vmatpush3.bf16.xpose.msra.mxu1 %v2812_v37 }
 0x5ba   : > { %6816 = vmatprep.subr.msk.bf16.mxu1 %vm368_vm0, %v11308_v63 }
 0x5bc   : > { %3832 = vrot.lane.b32.xlu0 %v9108_v20, %s7703_s19 }
 0x5c0   : > { %3834 = vrot.lane.b32.xlu0 %v9168_v52, %s7703_s19 }
 0x5c1   : > { %6506 = vmatpush3.bf16.xpose.msra.mxu1 %v2815_v27 }
 0x5c2   : > { %6817 = vmatprep.subr.msk.bf16.mxu1 %vm368_vm0, %v11309_v48 }
 0x5c4   : > { %3937 = vrot.lane.b32.xlu0 %v9183_v14, %s7703_s19 }
 0x5c8   : > { %3824 = vrot.lane.b32.xlu0 %v9108_v20, %s7704_s17 }
 0x5c9   : > { %6508 = vmatpush3.bf16.xpose.msra.mxu1 %v2818_v11 }
 0x5ca   : > { %6818 = vmatprep.subr.msk.bf16.mxu1 %vm368_vm0, %v2798_v0 }
 0x5cc   : > { %4040 = vrot.lane.b32.xlu0 %v9188_v56, %s7703_s19 }
 0x5d1   : > { %6510 = vmatpush3.bf16.xpose.msra.mxu1 %v2821_v24  ;;  %v2238_v47 = vpop.xlane.xlu0 %2237 }
 0x5d5   : > { %v2232_v39 = vpop.xlane.xlu0 %2231 }
 0x5d6   : > { %7371 = vrcp.f32 %v2232_v39 }
 0x5d7   : > { %7373 = vrcp.f32 %v2238_v47  ;;  %v2235_v13 = vpop.xlane.xlu1 %2234 }
 0x5d8   : > { %7375 = vrcp.f32 %v2235_v13 }
 0x5d9   : > { %v2241_v14 = vpop.xlane.xlu0 %2240 }
 0x5da   : > { %7377 = vrcp.f32 %v2241_v14 }
 0x5db   : > { %v2784_v53 = vpop.permute.xlu1 %2783 }
 0x5dd   : > { %v2899_v51 = vpop.permute.xlu0 %2898 }
 0x5de   : > { %6820 = vmatprep.subr.msk.bf16.mxu0 %vm368_vm0, %v2899_v51  ;;  %v2920_v20 = vsel %vm368_vm0, %v2899_v51, 0 }
 0x5df   : > { %6522 = vmatpush3.bf16.xpose.msra.mxu0 %v2920_v20  ;;  %v3002_v26 = vpop.permute.xlu1 %3001 }
 0x5e0   : > { %v7372_v62 = vpop.eup %7371  ;;  %6823 = vmatprep.subr.msk.bf16.mxu1 %vm368_vm0, %v3002_v26  ;;  %v3022_v55 = vsel %vm368_vm0, %v3002_v26, 0 }
 0x5e1   : > { %v7374_v54 = vpop.eup %7373  ;;  %v2901_v50 = vpop.permute.xlu0 %2900  ;;  %v2302_v56 = vmul.f32 %v7372_v62, %v9137_v36 }
 0x5e2   : > { %v7376_v15 = vpop.eup %7375  ;;  %6821 = vmatprep.subr.msk.bf16.mxu0 %vm368_vm0, %v2901_v50  ;;  %v2304_v33 = vmul.f32 %v7374_v54, %v9131_v44  ;;  %v2923_v34 = vsel %vm368_vm0, %v2901_v50, 0 }
 0x5e3   : > { %v2303_v49 = vmul.f32 %v7376_v15, %v9142_v58  ;;  %v2683_v52 = vpop.permute.xlu1 %2682 }
 0x5e4   : > { %v7378_v42 = vpop.eup %7377  ;;  %6499 = vmatprep.mubr.msk.bf16.mxu0 %vm368_vm0, %v2683_v52 }
 0x5e5   : > { %v2786_v59 = vpop.permute.xlu0 %2785  ;;  %v2320_v57 = vpack.c.bf16 %v2303_v49, %v2302_v56  ;;  %v2305_v31 = vmul.f32 %v7378_v42, %v9146_v2 }
 0x5e7   : > { %6483 = vmatprep.mubr.msk.bf16.mxu1 %vm809_vm1, %v2320_v57  ;;  %6524 = vmatpush3.bf16.xpose.msra.mxu0 %v2923_v34  ;;  %v2321_v3 = vpack.c.bf16 %v2305_v31, %v2304_v33  ;;  %v2903_v23 = vpop.permute.xlu1 %2902  ;;  %v230_v33 = vld [vmem:[%s11155_s1 + $0x90] sm:$0xff]  ;;  %v228_v31 = vld [vmem:[%s11155_s1 + $0x80] sm:$0xff] }
 0x5e8   : > { %6822 = vmatprep.subr.msk.bf16.mxu0 %vm368_vm0, %v2903_v23  ;;  %v2926_v44 = vsel %vm368_vm0, %v2903_v23, 0 }
 0x5e9   : > { %6484 = vmatmul.mubr.msk.bf16.gmra.mrb[68].mxu1 %vm809_vm1, %v2321_v3  ;;  %v2685_v36 = vpop.permute.xlu0 %2684 }
 0x5ea   : > { %6500 = vmatmul.mubr.msk.bf16.gmra.mrb[60].mxu0 %vm368_vm0, %v2685_v36  ;;  %6511 = vmatprep.mubr.msk.bf16.mxu1 %vm368_vm0, %v2784_v53  ;;  %v231_v36 = vld [vmem:[%s11155_s1 + $0x98] sm:$0xff] }
 0x5eb   : > { %v2889_v58 = vpop.permute.xlu1 %2888 }
 0x5ec   : > { %6527 = vmatprep.mubr.msk.bf16.mxu0 %vm368_vm0, %v2889_v58  ;;  %v229_v58 = vld [vmem:[%s11155_s1 + $0x88] sm:$0xff] }
 0x5ed   : > { %v3004_v2 = vpop.permute.xlu0 %3003 }
 0x5ee   : > { %v3025_v12 = vsel %vm368_vm0, %v3004_v2, 0 }
 0x5ef   : > { %6526 = vmatpush3.bf16.xpose.msra.mxu0 %v2926_v44  ;;  %v3006_v60 = vpop.permute.xlu1 %3005 }
 0x5f0   : > { %v3028_v22 = vsel %vm368_vm0, %v3006_v60, 0 }
 0x5f1   : > { %6512 = vmatmul.mubr.msk.bf16.vlgmr.msra.gmra.mrb[72].mxu1 %vm368_vm0, %v2786_v59  ;;  %v2891_v7 = vpop.permute.xlu0 %2890 }
 0x5f2   : > { %6536 = vmatpush3.bf16.xpose.msra.mxu1 %v3022_v55 }
 0x5f3   : > { %6824 = vmatprep.subr.msk.bf16.mxu1 %vm368_vm0, %v3004_v2  ;;  %v2790_v30 = vpop.permute.xlu1 %2789 }
 0x5f5   : > { %v2788_v46 = vpop.permute.xlu0 %2787 }
 0x5f6   : > { %6515 = vmatprep.mubr.msk.bf16.mxu1 %vm368_vm0, %v2788_v46  ;;  %6528 = vmatmul.mubr.msk.bf16.vlgmr.msra.gmra.mrb[64].mxu0 %vm368_vm0, %v2891_v7 }
 0x5f7   : > { %v2994_v4 = vpop.permute.xlu1 %2993 }
 0x5f9   : > { %6516 = vmatmul.mubr.msk.bf16.gmra.mrb[76].mxu1 %vm368_vm0, %v2790_v30  ;;  %v3008_v25 = vpop.permute.xlu0 %3007 }
 0x5fa   : > { %6538 = vmatpush3.bf16.xpose.msra.mxu1 %v3025_v12  ;;  %6543 = vmatprep.mubr.msk.bf16.mxu1 %vm368_vm0, %v2994_v4  ;;  %v3031_v40 = vsel %vm368_vm0, %v3008_v25, 0 }
 0x5fb   : > { %6825 = vmatprep.subr.msk.bf16.mxu1 %vm368_vm0, %v3006_v60  ;;  %v2893_v38 = vpop.permute.xlu1 %2892 }
 0x5fc   : > { %6531 = vmatprep.mubr.msk.bf16.mxu0 %vm368_vm0, %v2893_v38 }
 0x5fd   : > { %v2996_v19 = vpop.permute.xlu0 %2995 }
 0x5ff   : > { %v2998_v5 = vpop.permute.xlu1 %2997 }
 0x601   : > { %v2895_v16 = vpop.permute.xlu0 %2894 }
 0x602   : > { %6540 = vmatpush3.bf16.xpose.msra.mxu1 %v3028_v22  ;;  %6532 = vmatmul.mubr.msk.bf16.gmra.mrb[68].mxu0 %vm368_vm0, %v2895_v16 }
 0x603   : > { %6826 = vmatprep.subr.msk.bf16.mxu1 %vm368_vm0, %v3008_v25  ;;  %v3469_v35 = vpop.permute.xlu1 %3468 }
 0x605   : > { %v3000_v18 = vpop.permute.xlu0 %2999 }
 0x607   : > { %v3473_v11 = vpop.permute.xlu1 %3472 }
 0x609   : > { %v3467_v8 = vpop.permute.xlu0 %3466 }
 0x60a   : > { %6542 = vmatpush3.bf16.xpose.msra.mxu1 %v3031_v40  ;;  %v9399_v29 = vpop.f32.mrb[40].mxu0  ;;  %6551 = vmatprep.subr.bf16.mxu0 %v3467_v8 }
 0x60b   : > { %11310 = vst [vmem:[#allocation38_spill] sm:$0xff] %v9399_v29  ;;  %v9401_v6 = vpop.f32.mrb[41].mxu0  ;;  %6552 = vmatpush3.bf16.msra.mxu0 %v3467_v8  ;;  %v9438_v13 = vpop.permute.xlu1 %3644 }
 0x60c   : > { %11311 = vst [vmem:[#allocation37_spill] sm:$0xff] %v9401_v6  ;;  %v9403_v28 = vpop.f32.mrb[42].mxu0  ;;  %6553 = vmatprep.subr.bf16.mxu0 %v3469_v35 }
 0x60d   : > { %11312 = vst [vmem:[#allocation34_spill] sm:$0xff] %v9403_v28  ;;  %v9407_v21 = vpop.f32.mrb[43].mxu0 }
 0x60e   : > { %11313 = vst [vmem:[#allocation36_spill] sm:$0xff] %v9407_v21  ;;  %v3471_v45 = vpop.permute.xlu0 %3470 }
 0x60f   : > { %6554 = vmatpush3.bf16.msra.mxu0 %v3469_v35 }
 0x610   : > { %6555 = vmatprep.subr.bf16.mxu0 %v3471_v45 }
 0x611   : > { %6544 = vmatmul.mubr.msk.bf16.vlgmr.msra.gmra.mrb[80].mxu1 %vm368_vm0, %v2996_v19 }
 0x612   : > { %6547 = vmatprep.mubr.msk.bf16.mxu1 %vm368_vm0, %v2998_v5  ;;  %v3556_v27 = vpop.permute.xlu0 %3555 }
 0x613   : > { %6567 = vmatprep.subr.bf16.mxu1 %v3556_v27  ;;  %6556 = vmatpush3.bf16.msra.mxu0 %v3471_v45 }
 0x614   : > { %6568 = vmatpush3.bf16.msra.mxu1 %v3556_v27  ;;  %6557 = vmatprep.subr.bf16.mxu0 %v3473_v11 }
 0x616   : > { %v3558_v39 = vpop.permute.xlu0 %3557 }
 0x617   : > { %6569 = vmatprep.subr.bf16.mxu1 %v3558_v39  ;;  %6558 = vmatpush3.bf16.msra.mxu0 %v3473_v11  ;;  %v234_v11 = vld [vmem:[%s11155_s1 + $0xb0] sm:$0xff] }
 0x618   : > { %6570 = vmatpush3.bf16.msra.mxu1 %v3558_v39  ;;  %6583 = vmatprep.subr.bf16.mxu0 %v9438_v13 }
 0x619   : > { %6548 = vmatmul.mubr.msk.bf16.gmra.mrb[84].mxu1 %vm368_vm0, %v3000_v18 }
 0x61a   : > { %v3560_v14 = vpop.permute.xlu0 %3559 }
 0x61b   : > { %6571 = vmatprep.subr.bf16.mxu1 %v3560_v14 }
 0x61c   : > { %6572 = vmatpush3.bf16.msra.mxu1 %v3560_v14 }
 0x61e   : > { %v3562_v53 = vpop.permute.xlu0 %3561 }
 0x61f   : > { %6573 = vmatprep.subr.bf16.mxu1 %v3562_v53 }
 0x620   : > { %6574 = vmatpush3.bf16.msra.mxu1 %v3562_v53 }
 0x622   : > { %v9443_v20 = vpop.permute.xlu0 %3733 }
 0x623   : > { %6599 = vmatprep.subr.bf16.mxu1 %v9443_v20 }
 0x652   : > { %v9414_v32 = vpop.f32.mrb[44].mxu0 }
 0x653   : > { %11314 = vst [vmem:[#allocation35_spill] sm:$0xff] %v9414_v32  ;;  %v9416_v43 = vpop.f32.mrb[45].mxu0 }
 0x654   : > { %11315 = vst [vmem:[#allocation39_spill] sm:$0xff] %v9416_v43  ;;  %v9418_v1 = vpop.f32.mrb[46].mxu0 }
 0x655   : > { %11316 = vst [vmem:[#allocation40_spill] sm:$0xff] %v9418_v1  ;;  %v9422_v61 = vpop.f32.mrb[47].mxu0 }
 0x656   : > { %11317 = vst [vmem:[#allocation41_spill] sm:$0xff] %v9422_v61 }
 0x65c   : > { %v9426_v37 = vpop.f32.mrb[48].mxu0 }
 0x65d   : > { %11318 = vst [vmem:[#allocation42_spill] sm:$0xff] %v9426_v37  ;;  %v9428_v63 = vpop.f32.mrb[49].mxu0 }
 0x65e   : > { %11319 = vst [vmem:[#allocation43_spill] sm:$0xff] %v9428_v63  ;;  %v9430_v48 = vpop.f32.mrb[50].mxu0 }
 0x65f   : > { %11320 = vst [vmem:[#allocation44_spill] sm:$0xff] %v9430_v48  ;;  %v9434_v24 = vpop.f32.mrb[51].mxu0 }
 0x660   : > { %11321 = vst [vmem:[#allocation45_spill] sm:$0xff] %v9434_v24 }
 0x66e   : > { %v9441_v51 = vpop.f32.mrb[52].mxu0 }
 0x66f   : > { %11322 = vst [vmem:[#allocation46_spill] sm:$0xff] %v9441_v51  ;;  %v9445_v26 = vpop.f32.mrb[53].mxu0 }
 0x670   : > { %11323 = vst [vmem:[#allocation47_spill] sm:$0xff] %v9445_v26  ;;  %v9448_v62 = vpop.f32.mrb[54].mxu0 }
 0x671   : > { %11324 = vst [vmem:[#allocation48_spill] sm:$0xff] %v9448_v62  ;;  %v9452_v50 = vpop.f32.mrb[55].mxu0 }
 0x672   : > { %11325 = vst [vmem:[#allocation49_spill] sm:$0xff] %v9452_v50 }
 0x676   : > { %v9456_v56 = vpop.f32.mrb[56].mxu1 }
 0x677   : > { %11326 = vst [vmem:[#allocation50_spill] sm:$0xff] %v9456_v56  ;;  %v9458_v49 = vpop.f32.mrb[57].mxu1 }
 0x678   : > { %11327 = vst [vmem:[#allocation51_spill] sm:$0xff] %v9458_v49  ;;  %v9460_v52 = vpop.f32.mrb[58].mxu1 }
 0x679   : > { %11328 = vst [vmem:[#allocation52_spill] sm:$0xff] %v9460_v52  ;;  %v9464_v59 = vpop.f32.mrb[59].mxu1 }
 0x67a   : > { %11329 = vst [vmem:[#allocation53_spill] sm:$0xff] %v9464_v59 }
 0x67c   : > { %v6497_v34 = vpop.f32.mrb[56].mxu0 }
 0x67d   : > { %v9474_v3 = vadd.f32 %v6497_v34, %v230_v33  ;;  %v2752_v23 = vpop.f32.mrb[57].mxu0  ;;  %v232_v33 = vld [vmem:[%s11155_s1 + $0xa0] sm:$0xff] }
 0x67e   : > { %v9482_v44 = vadd.f32 %v2752_v23, %v228_v31  ;;  %v6498_v2 = vpop.f32.mrb[58].mxu0  ;;  %v9484_v60 = vpop.f32.mrb[60].mxu1  ;;  %v235_v31 = vld [vmem:[%s11155_s1 + $0xb8] sm:$0xff] }
 0x67f   : > { %11330 = vst [vmem:[#allocation54_spill] sm:$0xff] %v9484_v60  ;;  %v2755_v55 = vpop.f32.mrb[59].mxu0  ;;  %v9486_v7 = vpop.f32.mrb[61].mxu1  ;;  %v3104_v30 = vsel %vm809_vm1, %v9474_v3, -inf  ;;  %v9490_v46 = vadd.f32 %v6498_v2, %v231_v36 }
 0x680   : > { %11331 = vst [vmem:[#allocation55_spill] sm:$0xff] %v9486_v7  ;;  %v9492_v4 = vadd.f32 %v2755_v55, %v229_v58  ;;  %3105 = vmax.xlane.f32.xlu0 %v3104_v30  ;;  %v9494_v12 = vpop.f32.mrb[62].mxu1  ;;  %v3098_v25 = vsel %vm809_vm1, %v9482_v44, -inf  ;;  %v233_v30 = vld [vmem:[%s11155_s1 + $0xa8] sm:$0xff] }
 0x681   : > { %11332 = vst [vmem:[#allocation56_spill] sm:$0xff] %v9494_v12  ;;  %3099 = vmax.xlane.f32.xlu1 %v3098_v25  ;;  %v9500_v19 = vpop.f32.mrb[63].mxu1  ;;  %v3107_v40 = vsel %vm809_vm1, %v9490_v46, -inf  ;;  %v331_v12 = vld [vmem:[%s11155_s1 + $0x3b8] sm:$0xff] }
 0x682   : > { %11333 = vst [vmem:[#allocation57_spill] sm:$0xff] %v9500_v19  ;;  %v3101_v16 = vsel %vm809_vm1, %v9492_v4, -inf }
 0x684   : > { %3102 = vmax.xlane.f32.xlu0 %v3101_v16 }
 0x685   : > { %3108 = vmax.xlane.f32.xlu1 %v3107_v40 }
 0x686   : > { %v9508_v5 = vpop.f32.mrb[64].mxu1 }
 0x687   : > { %11334 = vst [vmem:[#allocation58_spill] sm:$0xff] %v9508_v5  ;;  %v9510_v18 = vpop.f32.mrb[65].mxu1 }
 0x688   : > { %11335 = vst [vmem:[#allocation59_spill] sm:$0xff] %v9510_v18  ;;  %v9512_v8 = vpop.f32.mrb[66].mxu1 }
 0x689   : > { %11336 = vst [vmem:[#allocation60_spill] sm:$0xff] %v9512_v8  ;;  %v9516_v35 = vpop.f32.mrb[67].mxu1 }
 0x68a   : > { %11337 = vst [vmem:[#allocation61_spill] sm:$0xff] %v9516_v35  ;;  %v267_v35 = vld [vmem:[%s11155_s1 + $0x1b8] sm:$0xff] }
 0x6bc   : > { %v9523_v39 = vpop.f32.mrb[68].mxu1 }
 0x6bd   : > { %11338 = vst [vmem:[#allocation62_spill] sm:$0xff] %v9523_v39  ;;  %v9525_v14 = vpop.f32.mrb[69].mxu1  ;;  %v6501_v53 = vpop.f32.mrb[60].mxu0 }
 0x6be   : > { %11339 = vst [vmem:[#allocation63_spill] sm:$0xff] %v9525_v14  ;;  %v9533_v34 = vadd.f32 %v6501_v53, %v234_v11  ;;  %v9535_v23 = vpop.f32.mrb[70].mxu1  ;;  %v2768_v36 = vpop.f32.mrb[61].mxu0 }
 0x6bf   : > { %11340 = vst [vmem:[#allocation64_spill] sm:$0xff] %v9535_v23  ;;  %v9539_v2 = vpop.f32.mrb[71].mxu1  ;;  %v6502_v55 = vpop.f32.mrb[62].mxu0  ;;  %v9544_v25 = vadd.f32 %v2768_v36, %v232_v33 }
 0x6c0   : > { %11341 = vst [vmem:[#allocation65_spill] sm:$0xff] %v9539_v2  ;;  %v9548_v40 = vadd.f32 %v6502_v55, %v235_v31  ;;  %v2771_v11 = vpop.f32.mrb[63].mxu0  ;;  %v3116_v53 = vsel %vm809_vm1, %v9533_v34, -inf }
 0x6c1   : > { %3117 = vmax.xlane.f32.xlu0 %v3116_v53  ;;  %v9552_v58 = vadd.f32 %v2771_v11, %v233_v30  ;;  %v3110_v33 = vsel %vm809_vm1, %v9544_v25, -inf  ;;  %v294_v30 = vld [vmem:[%s11155_s1 + $0x290] sm:$0xff]  ;;  %v295_v53 = vld [vmem:[%s11155_s1 + $0x298] sm:$0xff] }
 0x6c2   : > { %v3119_v27 = vsel %vm809_vm1, %v9548_v40, -inf }
 0x6c3   : > { %3120 = vmax.xlane.f32.xlu1 %v3119_v27  ;;  %v3113_v31 = vsel %vm809_vm1, %v9552_v58, -inf  ;;  %v292_v27 = vld [vmem:[%s11155_s1 + $0x280] sm:$0xff] }
 0x6c4   : > { %v6513_v45 = vpop.f32.mrb[72].mxu1 }
 0x6c5   : > { %v2857_v36 = vpop.f32.mrb[73].mxu1  ;;  %3111 = vmax.xlane.f32.xlu0 %v3110_v33 }
 0x6c6   : > { %v6514_v16 = vpop.f32.mrb[74].mxu1 }
 0x6c7   : > { %v2860_v55 = vpop.f32.mrb[75].mxu1  ;;  %3114 = vmax.xlane.f32.xlu1 %v3113_v31  ;;  %v293_v31 = vld [vmem:[%s11155_s1 + $0x288] sm:$0xff] }
 0x6c9   : > { %v6529_v11 = vpop.f32.mrb[64].mxu0 }
 0x6ca   : > { %v9569_v33 = vadd.f32 %v6529_v11, %v294_v30  ;;  %v2962_v15 = vpop.f32.mrb[65].mxu0 }
 0x6cb   : > { %v6530_v54 = vpop.f32.mrb[66].mxu0  ;;  %v9574_v0 = vadd.f32 %v2962_v15, %v292_v27  ;;  %v9588_v27 = vpop.permute.xlu1 %3646 }
 0x6cc   : > { %v9576_v47 = vadd.f32 %v6530_v54, %v295_v53  ;;  %v6517_v38 = vpop.f32.mrb[76].mxu1  ;;  %v2965_v22 = vpop.f32.mrb[67].mxu0  ;;  %v3152_v42 = vsel %vm809_vm1, %v9569_v33, -inf  ;;  %v296_v53 = vld [vmem:[%s11155_s1 + $0x2a0] sm:$0xff] }
 0x6cd   : > { %3153 = vmax.xlane.f32.xlu0 %v3152_v42  ;;  %v2873_v57 = vpop.f32.mrb[77].mxu1  ;;  %v9580_v10 = vadd.f32 %v2965_v22, %v293_v31  ;;  %v3146_v15 = vsel %vm809_vm1, %v9574_v0, -inf  ;;  %v298_v42 = vld [vmem:[%s11155_s1 + $0x2b0] sm:$0xff]  ;;  %v299_v31 = vld [vmem:[%s11155_s1 + $0x2b8] sm:$0xff] }
 0x6ce   : > { %v6518_v30 = vpop.f32.mrb[78].mxu1  ;;  %v3155_v11 = vsel %vm809_vm1, %v9576_v47, -inf }
 0x6cf   : > { %3156 = vmax.xlane.f32.xlu1 %v3155_v11  ;;  %v2876_v41 = vpop.f32.mrb[79].mxu1  ;;  %v3149_v54 = vsel %vm809_vm1, %v9580_v10, -inf  ;;  %v9610_v23 = vpop.permute.xlu1 %3648 }
 0x6d1   : > { %3147 = vmax.xlane.f32.xlu0 %v3146_v15 }
 0x6d3   : > { %3150 = vmax.xlane.f32.xlu1 %v3149_v54  ;;  %v297_v54 = vld [vmem:[%s11155_s1 + $0x2a8] sm:$0xff] }
 0x6d5   : > { %v6533_v22 = vpop.f32.mrb[68].mxu0 }
 0x6d6   : > { %v9599_v11 = vadd.f32 %v6533_v22, %v298_v42  ;;  %v2978_v15 = vpop.f32.mrb[69].mxu0  ;;  %v262_v42 = vld [vmem:[%s11155_s1 + $0x190] sm:$0xff] }
 0x6d7   : > { %v6534_v9 = vpop.f32.mrb[70].mxu0  ;;  %v9604_v17 = vadd.f32 %v2978_v15, %v296_v53  ;;  %v9622_v53 = vadd.f32 %v6513_v45, %v262_v42  ;;  %v260_v15 = vld [vmem:[%s11155_s1 + $0x180] sm:$0xff] }
 0x6d8   : > { %v9606_v14 = vadd.f32 %v6534_v9, %v299_v31  ;;  %v2981_v2 = vpop.f32.mrb[71].mxu0  ;;  %v3164_v39 = vsel %vm809_vm1, %v9599_v11, -inf  ;;  %v263_v9 = vld [vmem:[%s11155_s1 + $0x198] sm:$0xff]  ;;  %v9638_v45 = vadd.f32 %v2857_v36, %v260_v15  ;;  %v9652_v36 = vpop.permute.xlu0 %3830 }
 0x6d9   : > { %3165 = vmax.xlane.f32.xlu0 %v3164_v39  ;;  %v9615_v22 = vadd.f32 %v2981_v2, %v297_v54  ;;  %v3158_v31 = vsel %vm809_vm1, %v9604_v17, -inf  ;;  %v9629_v39 = vadd.f32 %v6514_v16, %v263_v9  ;;  %v9633_v54 = vpop.permute.xlu1 %3650  ;;  %v3128_v42 = vsel %vm809_vm1, %v9622_v53, -inf  ;;  %v266_v16 = vld [vmem:[%s11155_s1 + $0x1b0] sm:$0xff] }
 0x6da   : > { %v3167_v18 = vsel %vm809_vm1, %v9606_v14, -inf  ;;  %v9654_v15 = vadd.f32 %v6517_v38, %v266_v16  ;;  %v3122_v5 = vsel %vm809_vm1, %v9638_v45, -inf  ;;  %v265_v38 = vld [vmem:[%s11155_s1 + $0x1a8] sm:$0xff] }
 0x6db   : > { %3168 = vmax.xlane.f32.xlu1 %v3167_v18  ;;  %v3161_v2 = vsel %vm809_vm1, %v9615_v22, -inf  ;;  %v261_v18 = vld [vmem:[%s11155_s1 + $0x188] sm:$0xff] }
 0x6dc   : > { %v9645_v9 = vadd.f32 %v2860_v55, %v261_v18  ;;  %v264_v55 = vld [vmem:[%s11155_s1 + $0x1a0] sm:$0xff]  ;;  %v3140_v51 = vsel %vm809_vm1, %v9654_v15, -inf }
 0x6dd   : > { %3159 = vmax.xlane.f32.xlu0 %v3158_v31  ;;  %v3131_v31 = vsel %vm809_vm1, %v9629_v39, -inf  ;;  %v9658_v8 = vpop.permute.xlu1 %3735  ;;  %v9670_v50 = vadd.f32 %v2873_v57, %v264_v55  ;;  %v327_v57 = vld [vmem:[%s11155_s1 + $0x398] sm:$0xff] }
 0x6df   : > { %3162 = vmax.xlane.f32.xlu1 %v3161_v2 }
 0x6e1   : > { %3129 = vmax.xlane.f32.xlu0 %v3128_v42  ;;  %v9663_v42 = vadd.f32 %v6518_v30, %v267_v35  ;;  %v9677_v35 = vpop.permute.xlu0 %3737  ;;  %v9679_v30 = vadd.f32 %v2876_v41, %v265_v38  ;;  %v9683_v37 = vpop.permute.xlu1 %3739  ;;  %v324_v41 = vld [vmem:[%s11155_s1 + $0x380] sm:$0xff] }
 0x6e2   : > { %11342 = vst [vmem:[#allocation66_spill] sm:$0xff] %v9683_v37 }
 0x6e3   : > { %3132 = vmax.xlane.f32.xlu1 %v3131_v31  ;;  %v3125_v31 = vsel %vm809_vm1, %v9645_v9, -inf  ;;  %v3143_v62 = vsel %vm809_vm1, %v9663_v42, -inf  ;;  %v3137_v63 = vsel %vm809_vm1, %v9679_v30, -inf }
 0x6e4   : > { %v6545_v2 = vpop.f32.mrb[80].mxu1 }
 0x6e5   : > { %v3067_v18 = vpop.f32.mrb[81].mxu1  ;;  %3123 = vmax.xlane.f32.xlu0 %v3122_v5  ;;  %v326_v5 = vld [vmem:[%s11155_s1 + $0x390] sm:$0xff] }
 0x6e6   : > { %v6546_v26 = vpop.f32.mrb[82].mxu1  ;;  %v9688_v55 = vadd.f32 %v6545_v2, %v326_v5  ;;  %v330_v2 = vld [vmem:[%s11155_s1 + $0x3b0] sm:$0xff]  ;;  %v9705_v5 = vpop.permute.xlu0 %3832 }
 0x6e7   : > { %v3070_v16 = vpop.f32.mrb[83].mxu1  ;;  %3126 = vmax.xlane.f32.xlu1 %v3125_v31  ;;  %v3134_v31 = vsel %vm809_vm1, %v9670_v50, -inf  ;;  %v9695_v48 = vadd.f32 %v6546_v26, %v327_v57  ;;  %v9711_v57 = vpop.permute.xlu1 %3935 }
 0x6e8   : > { %v3176_v26 = vsel %vm809_vm1, %v9688_v55, -inf  ;;  %11343 = vst [vmem:[#allocation67_spill] sm:$0xff] %v9711_v57 }
 0x6e9   : > { %3141 = vmax.xlane.f32.xlu0 %v3140_v51  ;;  %v3179_v7 = vsel %vm809_vm1, %v9695_v48, -inf }
 0x6eb   : > { %3144 = vmax.xlane.f32.xlu1 %v3143_v62  ;;  %v325_v62 = vld [vmem:[%s11155_s1 + $0x388] sm:$0xff] }
 0x6ec   : > { %v6549_v51 = vpop.f32.mrb[84].mxu1 }
 0x6ed   : > { %3135 = vmax.xlane.f32.xlu0 %v3134_v31  ;;  %v3083_v38 = vpop.f32.mrb[85].mxu1  ;;  %v9707_v31 = vadd.f32 %v3067_v18, %v324_v41  ;;  %v9720_v19 = vadd.f32 %v6549_v51, %v330_v2  ;;  %v328_v18 = vld [vmem:[%s11155_s1 + $0x3a0] sm:$0xff]  ;;  %v9740_v2 = vpop.permute.xlu1 %3836 }
 0x6ee   : > { %v6550_v24 = vpop.f32.mrb[86].mxu1  ;;  %v9734_v56 = vadd.f32 %v3083_v38, %v328_v18 }
 0x6ef   : > { %3138 = vmax.xlane.f32.xlu1 %v3137_v63  ;;  %v3086_v60 = vpop.f32.mrb[87].mxu1  ;;  %v9716_v63 = vadd.f32 %v3070_v16, %v325_v62  ;;  %v3170_v41 = vsel %vm809_vm1, %v9707_v31, -inf  ;;  %v329_v16 = vld [vmem:[%s11155_s1 + $0x3a8] sm:$0xff]  ;;  %v9732_v62 = vpop.permute.xlu0 %3834  ;;  %v3188_v51 = vsel %vm809_vm1, %v9720_v19, -inf }
 0x6f1   : > { %3177 = vmax.xlane.f32.xlu0 %v3176_v26  ;;  %v9727_v26 = vadd.f32 %v6550_v24, %v331_v12  ;;  %v9744_v12 = vadd.f32 %v3086_v60, %v329_v16  ;;  %v9752_v52 = vpop.permute.xlu1 %3822 }
 0x6f3   : > { %3180 = vmax.xlane.f32.xlu1 %v3179_v7  ;;  %v3173_v7 = vsel %vm809_vm1, %v9716_v63, -inf  ;;  %v3191_v24 = vsel %vm809_vm1, %v9727_v26, -inf  ;;  %v9748_v38 = vpop.permute.xlu0 %3937  ;;  %v3185_v18 = vsel %vm809_vm1, %v9744_v12, -inf }
 0x6f4   : > { %11344 = vst [vmem:[#allocation68_spill] sm:$0xff] %v9748_v38 }
 0x6f5   : > { %3171 = vmax.xlane.f32.xlu0 %v3170_v41  ;;  %v3182_v41 = vsel %vm809_vm1, %v9734_v56, -inf  ;;  %v9756_v49 = vpop.permute.xlu1 %3939 }
 0x6f6   : > { %11345 = vst [vmem:[#allocation69_spill] sm:$0xff] %v9756_v49 }
 0x6f7   : > { %3174 = vmax.xlane.f32.xlu1 %v3173_v7  ;;  %v9754_v7 = vpop.permute.xlu0 %3824 }
 0x6f9   : > { %3189 = vmax.xlane.f32.xlu0 %v3188_v51  ;;  %v9760_v16 = vpop.permute.xlu1 %3826 }
 0x6fb   : > { %3192 = vmax.xlane.f32.xlu1 %v3191_v24  ;;  %v9758_v60 = vpop.permute.xlu0 %4040 }
 0x6fd   : > { %3183 = vmax.xlane.f32.xlu0 %v3182_v41 }
 0x6ff   : > { %3186 = vmax.xlane.f32.xlu1 %v3185_v18 }
 0x70d   : > { %v3106_v51 = vpop.xlane.xlu0 %3105 }
 0x70e   : > { %v3196_v24 = vsub.f32 %v9474_v3, %v3106_v51  ;;  %v3100_v59 = vpop.xlane.xlu1 %3099 }
 0x70f   : > { %v3194_v32 = vsub.f32 %v9482_v44, %v3100_v59 }
 0x710   : > { %v3230_v1 = vmul.f32 1.442695, %v3196_v24 }
 0x711   : > { %v3226_v43 = vmul.f32 1.442695, %v3194_v32  ;;  %v3103_v61 = vpop.xlane.xlu0 %3102 }
 0x712   : > { %7379 = vpow2.f32 %v3230_v1  ;;  %v3195_v41 = vsub.f32 %v9492_v4, %v3103_v61  ;;  %v3109_v18 = vpop.xlane.xlu1 %3108 }
 0x713   : > { %v3197_v29 = vsub.f32 %v9490_v46, %v3109_v18  ;;  %7381 = vpow2.f32 %v3226_v43 }
 0x714   : > { %v3228_v28 = vmul.f32 1.442695, %v3195_v41 }
 0x715   : > { %v3232_v6 = vmul.f32 1.442695, %v3197_v29 }
 0x717   : > { %7383 = vpow2.f32 %v3232_v6 }
 0x718   : > { %7385 = vpow2.f32 %v3228_v28 }
 0x71c   : > { %v9766_v21 = vpop.eup %7379 }
 0x71d   : > { %v3296_v3 = vsel %vm809_vm1, %v9766_v21, 0.0  ;;  %v9770_v59 = vpop.eup %7381 }
 0x71e   : > { %3297 = vadd.xlane.f32.xlu0 %v3296_v3  ;;  %v3290_v1 = vsel %vm809_vm1, %v9770_v59, 0.0 }
 0x721   : > { %v9772_v32 = vpop.eup %7383 }
 0x722   : > { %3291 = vadd.xlane.f32.xlu0 %v3290_v1  ;;  %v3299_v43 = vsel %vm809_vm1, %v9772_v32, 0.0  ;;  %v9778_v29 = vpop.eup %7385 }
 0x723   : > { %3300 = vadd.xlane.f32.xlu1 %v3299_v43  ;;  %v3293_v6 = vsel %vm809_vm1, %v9778_v29, 0.0 }
 0x727   : > { %3294 = vadd.xlane.f32.xlu1 %v3293_v6 }
 0x74e   : > { %v3118_v28 = vpop.xlane.xlu0 %3117 }
 0x74f   : > { %v3200_v61 = vsub.f32 %v9533_v34, %v3118_v28 }
 0x750   : > { %v3121_v44 = vpop.xlane.xlu1 %3120 }
 0x751   : > { %v3238_v46 = vmul.f32 1.442695, %v3200_v61  ;;  %v3201_v4 = vsub.f32 %v9548_v40, %v3121_v44 }
 0x752   : > { %v3112_v51 = vpop.xlane.xlu0 %3111 }
 0x753   : > { %7387 = vpow2.f32 %v3238_v46  ;;  %v3240_v24 = vmul.f32 1.442695, %v3201_v4  ;;  %v3198_v41 = vsub.f32 %v9544_v25, %v3112_v51 }
 0x754   : > { %v3115_v18 = vpop.xlane.xlu1 %3114 }
 0x755   : > { %7389 = vpow2.f32 %v3240_v24  ;;  %v3234_v3 = vmul.f32 1.442695, %v3198_v41  ;;  %v3199_v1 = vsub.f32 %v9552_v58, %v3115_v18 }
 0x757   : > { %7391 = vpow2.f32 %v3234_v3  ;;  %v3236_v43 = vmul.f32 1.442695, %v3199_v1 }
 0x759   : > { %7393 = vpow2.f32 %v3236_v43 }
 0x75a   : > { %v3154_v6 = vpop.xlane.xlu0 %3153 }
 0x75b   : > { %v3212_v34 = vsub.f32 %v9569_v33, %v3154_v6 }
 0x75c   : > { %v3157_v28 = vpop.xlane.xlu1 %3156 }
 0x75d   : > { %v9787_v61 = vpop.eup %7387  ;;  %v3262_v40 = vmul.f32 1.442695, %v3212_v34  ;;  %v3213_v44 = vsub.f32 %v9576_v47, %v3157_v28 }
 0x75e   : > { %v3148_v46 = vpop.xlane.xlu0 %3147  ;;  %v3308_v25 = vsel %vm809_vm1, %v9787_v61, 0.0 }
 0x75f   : > { %v9792_v4 = vpop.eup %7389  ;;  %7395 = vpow2.f32 %v3262_v40  ;;  %v3264_v58 = vmul.f32 1.442695, %v3213_v44  ;;  %v3210_v51 = vsub.f32 %v9574_v0, %v3148_v46  ;;  %3309 = vadd.xlane.f32.xlu1 %v3308_v25 }
 0x760   : > { %v3151_v24 = vpop.xlane.xlu1 %3150  ;;  %v3311_v47 = vsel %vm809_vm1, %v9792_v4, 0.0 }
 0x761   : > { %v9795_v41 = vpop.eup %7391  ;;  %7397 = vpow2.f32 %v3264_v58  ;;  %v3258_v33 = vmul.f32 1.442695, %v3210_v51  ;;  %v3211_v18 = vsub.f32 %v9580_v10, %v3151_v24 }
 0x762   : > { %v3302_v3 = vsel %vm809_vm1, %v9795_v41, 0.0 }
 0x763   : > { %v9802_v1 = vpop.eup %7393  ;;  %7399 = vpow2.f32 %v3258_v33  ;;  %v3260_v43 = vmul.f32 1.442695, %v3211_v18  ;;  %3312 = vadd.xlane.f32.xlu1 %v3311_v47  ;;  %3303 = vadd.xlane.f32.xlu0 %v3302_v3 }
 0x764   : > { %v3305_v6 = vsel %vm809_vm1, %v9802_v1, 0.0 }
 0x765   : > { %7401 = vpow2.f32 %v3260_v43 }
 0x766   : > { %v3166_v0 = vpop.xlane.xlu0 %3165 }
 0x767   : > { %v3216_v34 = vsub.f32 %v9599_v11, %v3166_v0  ;;  %3306 = vadd.xlane.f32.xlu1 %v3305_v6 }
 0x768   : > { %v3169_v10 = vpop.xlane.xlu1 %3168 }
 0x769   : > { %v9807_v28 = vpop.eup %7395  ;;  %v3270_v40 = vmul.f32 1.442695, %v3216_v34  ;;  %v3217_v44 = vsub.f32 %v9606_v14, %v3169_v10 }
 0x76a   : > { %v3160_v46 = vpop.xlane.xlu0 %3159  ;;  %v3344_v25 = vsel %vm809_vm1, %v9807_v28, 0.0 }
 0x76b   : > { %v9812_v58 = vpop.eup %7397  ;;  %7403 = vpow2.f32 %v3270_v40  ;;  %v3214_v51 = vsub.f32 %v9604_v17, %v3160_v46  ;;  %3345 = vadd.xlane.f32.xlu1 %v3344_v25  ;;  %v3272_v18 = vmul.f32 1.442695, %v3217_v44 }
 0x76c   : > { %v3163_v24 = vpop.xlane.xlu1 %3162  ;;  %v3347_v11 = vsel %vm809_vm1, %v9812_v58, 0.0 }
 0x76d   : > { %v9817_v33 = vpop.eup %7399  ;;  %v3266_v47 = vmul.f32 1.442695, %v3214_v51  ;;  %v3215_v14 = vsub.f32 %v9615_v22, %v3163_v24  ;;  %3348 = vadd.xlane.f32.xlu0 %v3347_v11 }
 0x76e   : > { %v3130_v3 = vpop.xlane.xlu0 %3129  ;;  %v3338_v43 = vsel %vm809_vm1, %v9817_v33, 0.0 }
 0x76f   : > { %v9822_v0 = vpop.eup %7401  ;;  %7405 = vpow2.f32 %v3266_v47  ;;  %v3204_v17 = vsub.f32 %v9622_v53, %v3130_v3  ;;  %3339 = vadd.xlane.f32.xlu1 %v3338_v43  ;;  %v3268_v6 = vmul.f32 1.442695, %v3215_v14 }
 0x770   : > { %v3133_v34 = vpop.xlane.xlu1 %3132  ;;  %v3341_v10 = vsel %vm809_vm1, %v9822_v0, 0.0  ;;  %7407 = vpow2.f32 %v3272_v18 }
 0x771   : > { %v3246_v40 = vmul.f32 1.442695, %v3204_v17  ;;  %v3205_v22 = vsub.f32 %v9629_v39, %v3133_v34  ;;  %3342 = vadd.xlane.f32.xlu0 %v3341_v10 }
 0x772   : > { %v3124_v44 = vpop.xlane.xlu0 %3123 }
 0x773   : > { %7409 = vpow2.f32 %v3246_v40  ;;  %v3248_v46 = vmul.f32 1.442695, %v3205_v22  ;;  %v3202_v25 = vsub.f32 %v9638_v45, %v3124_v44 }
 0x774   : > { %7411 = vpow2.f32 %v3268_v6  ;;  %v3127_v51 = vpop.xlane.xlu1 %3126 }
 0x775   : > { %v9829_v24 = vpop.eup %7403  ;;  %7413 = vpow2.f32 %v3248_v46  ;;  %v3242_v53 = vmul.f32 1.442695, %v3202_v25  ;;  %v3203_v11 = vsub.f32 %v9645_v9, %v3127_v51 }
 0x776   : > { %v3142_v47 = vpop.xlane.xlu0 %3141  ;;  %v3356_v18 = vsel %vm809_vm1, %v9829_v24, 0.0 }
 0x777   : > { %v3208_v39 = vsub.f32 %v9654_v15, %v3142_v47  ;;  %3357 = vadd.xlane.f32.xlu0 %v3356_v18  ;;  %7415 = vpow2.f32 %v3242_v53  ;;  %v3244_v45 = vmul.f32 1.442695, %v3203_v11 }
 0x778   : > { %v3145_v14 = vpop.xlane.xlu1 %3144 }
 0x779   : > { %v9835_v3 = vpop.eup %7405  ;;  %v3254_v43 = vmul.f32 1.442695, %v3208_v39  ;;  %v3209_v15 = vsub.f32 %v9663_v42, %v3145_v14 }
 0x77a   : > { %v3136_v17 = vpop.xlane.xlu0 %3135  ;;  %v3350_v6 = vsel %vm809_vm1, %v9835_v3, 0.0  ;;  %v9839_v34 = vpop.eup %7407 }
 0x77b   : > { %7417 = vpow2.f32 %v3254_v43  ;;  %v3206_v9 = vsub.f32 %v9670_v50, %v3136_v17  ;;  %3351 = vadd.xlane.f32.xlu0 %v3350_v6  ;;  %v3359_v51 = vsel %vm809_vm1, %v9839_v34, 0.0  ;;  %v3256_v18 = vmul.f32 1.442695, %v3209_v15 }
 0x77c   : > { %v3139_v10 = vpop.xlane.xlu1 %3138  ;;  %7419 = vpow2.f32 %v3244_v45 }
 0x77d   : > { %v9842_v40 = vpop.eup %7409  ;;  %v3250_v22 = vmul.f32 1.442695, %v3206_v9  ;;  %v3207_v44 = vsub.f32 %v9679_v30, %v3139_v10 }
 0x77e   : > { %v9846_v46 = vpop.eup %7411  ;;  %v3178_v25 = vpop.xlane.xlu0 %3177  ;;  %v3320_v53 = vsel %vm809_vm1, %v9842_v40, 0.0 }
 0x77f   : > { %v9852_v50 = vpop.eup %7413  ;;  %v3252_v11 = vmul.f32 1.442695, %v3207_v44  ;;  %v3220_v47 = vsub.f32 %v9688_v55, %v3178_v25  ;;  %3360 = vadd.xlane.f32.xlu0 %v3359_v51  ;;  %3321 = vadd.xlane.f32.xlu1 %v3320_v53  ;;  %7421 = vpow2.f32 %v3250_v22  ;;  %v3353_v43 = vsel %vm809_vm1, %v9846_v46, 0.0 }
 0x780   : > { %v3181_v42 = vpop.xlane.xlu1 %3180  ;;  %v3323_v45 = vsel %vm809_vm1, %v9852_v50, 0.0 }
 0x781   : > { %7423 = vpow2.f32 %v3252_v11  ;;  %v3278_v30 = vmul.f32 1.442695, %v3220_v47  ;;  %v3221_v39 = vsub.f32 %v9695_v48, %v3181_v42  ;;  %v9860_v17 = vpop.eup %7415 }
 0x782   : > { %v3172_v14 = vpop.xlane.xlu0 %3171  ;;  %v3314_v22 = vsel %vm809_vm1, %v9860_v17, 0.0 }
 0x783   : > { %7425 = vpow2.f32 %v3278_v30  ;;  %v3218_v55 = vsub.f32 %v9707_v31, %v3172_v14  ;;  %3324 = vadd.xlane.f32.xlu0 %v3323_v45  ;;  %3354 = vadd.xlane.f32.xlu1 %v3353_v43  ;;  %v3280_v10 = vmul.f32 1.442695, %v3221_v39 }
 0x784   : > { %v3175_v6 = vpop.xlane.xlu1 %3174  ;;  %7427 = vpow2.f32 %v3256_v18 }
 0x785   : > { %v9863_v9 = vpop.eup %7417  ;;  %v3274_v48 = vmul.f32 1.442695, %v3218_v55  ;;  %v3219_v15 = vsub.f32 %v9716_v63, %v3175_v6 }
 0x786   : > { %v3332_v44 = vsel %vm809_vm1, %v9863_v9, 0.0  ;;  %v9870_v25 = vpop.eup %7419 }
 0x787   : > { %7429 = vpow2.f32 %v3274_v48  ;;  %3315 = vadd.xlane.f32.xlu1 %v3314_v22  ;;  %3333 = vadd.xlane.f32.xlu0 %v3332_v44  ;;  %v3276_v31 = vmul.f32 1.442695, %v3219_v15  ;;  %v3317_v53 = vsel %vm809_vm1, %v9870_v25, 0.0  ;;  %v3190_v48 = vpop.xlane.xlu0 %3189 }
 0x788   : > { %7431 = vpow2.f32 %v3280_v10  ;;  %v3193_v15 = vpop.xlane.xlu1 %3192 }
 0x789   : > { %v9872_v51 = vpop.eup %7421  ;;  %7433 = vpow2.f32 %v3276_v31  ;;  %v9903_v31 = vld [vmem:[%s7743_s18 + $0x18] sm:$0xff]  }
 0x78a   : > { %v3326_v42 = vsel %vm809_vm1, %v9872_v51, 0.0 }
 0x78b   : > { %v9876_v11 = vpop.eup %7423  ;;  %3318 = vadd.xlane.f32.xlu1 %v3317_v53  ;;  %v3184_v22 = vpop.xlane.xlu0 %3183 }
 0x78c   : > { %v3329_v63 = vsel %vm809_vm1, %v9876_v11, 0.0  ;;  %v3187_v53 = vpop.xlane.xlu1 %3186  ;;  %v3222_v49 = vsub.f32 %v9734_v56, %v3184_v22 }
 0x78d   : > { %v9880_v47 = vpop.eup %7425  ;;  %3330 = vadd.xlane.f32.xlu0 %v3329_v63  ;;  %v9908_v63 = vld [vmem:[%s7743_s18 + $0x38] sm:$0xff]  }
 0x78e   : > { %11346 = vst [vmem:[#allocation70_spill] sm:$0xff] %v9880_v47  ;;  %v9884_v18 = vpop.eup %7427  ;;  %v3368_v30 = vsel %vm809_vm1, %v9880_v47, 0.0  ;;  %v3282_v37 = vmul.f32 1.442695, %v3222_v49 }
 0x78f   : > { %3327 = vadd.xlane.f32.xlu1 %v3326_v42  ;;  %v3335_v14 = vsel %vm809_vm1, %v9884_v18, 0.0 }
 0x791   : > { %v9888_v39 = vpop.eup %7429  ;;  %3369 = vadd.xlane.f32.xlu0 %v3368_v30 }
 0x792   : > { %11347 = vst [vmem:[#allocation71_spill] sm:$0xff] %v9888_v39  ;;  %v9892_v45 = vpop.eup %7431  ;;  %v3362_v43 = vsel %vm809_vm1, %v9888_v39, 0.0  ;;  %v3225_v39 = vsub.f32 %v9727_v26, %v3193_v15 }
 0x793   : > { %3336 = vadd.xlane.f32.xlu1 %v3335_v14  ;;  %v3371_v55 = vsel %vm809_vm1, %v9892_v45, 0.0  ;;  %v9898_v6 = vpop.eup %7433  ;;  %v3224_v14 = vsub.f32 %v9720_v19, %v3190_v48 }
 0x794   : > { %11348 = vst [vmem:[#allocation72_spill] sm:$0xff] %v9898_v6  ;;  %v3365_v10 = vsel %vm809_vm1, %v9898_v6, 0.0 }
 0x795   : > { %3363 = vadd.xlane.f32.xlu0 %v3362_v43 }
 0x797   : > { %3372 = vadd.xlane.f32.xlu1 %v3371_v55  ;;  %v3286_v55 = vmul.f32 1.442695, %v3224_v14 }
 0x79b   : > { %3366 = vadd.xlane.f32.xlu1 %v3365_v10  ;;  %v3223_v10 = vsub.f32 %v9744_v12, %v3187_v53  ;;  %v9977_v53 = vld [vmem:[%s7743_s18 + $0x58] sm:$0xff]  }
 0x79d   : > { %v3284_v57 = vmul.f32 1.442695, %v3223_v10 }
 0x7ab   : > { %v3298_v44 = vpop.xlane.xlu0 %3297  ;;  %3828 = vrot.lane.b32.xlu0 %v9903_v31, %s7704_s17 }
 0x7ac   : > { %3941 = vrot.lane.b32.xlu1 %v9908_v63, %s7703_s19 }
 0x7af   : > { %v3292_v42 = vpop.xlane.xlu0 %3291 }
 0x7b0   : > { %v3301_v30 = vpop.xlane.xlu1 %3300 }
 0x7b1   : > { %7435 = vrcp.f32 %v3301_v30 }
 0x7b2   : > { %7437 = vrcp.f32 %v3292_v42 }
 0x7b3   : > { %7439 = vrcp.f32 %v3298_v44  ;;  %v3288_v44 = vmul.f32 1.442695, %v3225_v39  ;;  %v9970_v39 = vld [vmem:[%s7743_s18 + $0x30] sm:$0xff]  }
 0x7b4   : > { %v3295_v43 = vpop.xlane.xlu1 %3294 }
 0x7b5   : > { %7441 = vrcp.f32 %v3295_v43  ;;  %v7676_v43 = vld [vmem:[%s7743_s18 + $0x68] sm:$0xff]  }
 0x7b6   : > { %7443 = vpow2.f32 %v3286_v55  ;;  %v9984_v55 = vld [vmem:[%s7743_s18 + $0x40] sm:$0xff]  }
 0x7b7   : > { %7445 = vpow2.f32 %v3284_v57 }
 0x7b8   : > { %7447 = vpow2.f32 %v3282_v37 }
 0x7b9   : > { %7449 = vpow2.f32 %v3288_v44 }
 0x7bb   : > { %v7436_v38 = vpop.eup %7435 }
 0x7bc   : > { %v7438_v47 = vpop.eup %7437  ;;  %v3421_v42 = vmul.f32 %v7436_v38, %v9772_v32  ;;  %v9948_v38 = vld [vmem:[%s7743_s18 + $0x48] sm:$0xff]  }
 0x7bd   : > { %v7440_v6 = vpop.eup %7439  ;;  %v3418_v19 = vmul.f32 %v7438_v47, %v9770_v59  ;;  %v9953_v59 = vld [vmem:[%s7743_s18 + $0x20] sm:$0xff]   ;;  %v9958_v32 = vld [vmem:[%s7743_s18 + $0x28] sm:$0xff]  }
 0x7be   : > { %v3420_v12 = vmul.f32 %v7440_v6, %v9766_v21  ;;  %v7673_v47 = vld [vmem:[%s7743_s18 + $0x60] sm:$0xff]  }
 0x7bf   : > { %v7442_v30 = vpop.eup %7441 }
 0x7c0   : > { %v3419_v48 = vmul.f32 %v7442_v30, %v9778_v29  ;;  %v3451_v22 = vpack.c.bf16 %v3421_v42, %v3420_v12  ;;  %v9922_v26 = vpop.eup %7443  ;;  %v7678_v30 = vld [vmem:[%s7743_s18 + $0x70] sm:$0xff]  }
 0x7c1   : > { %v3380_v49 = vsel %vm809_vm1, %v9922_v26, 0.0  ;;  %v9928_v57 = vpop.eup %7445 }
 0x7c2   : > { %v3450_v56 = vpack.c.bf16 %v3419_v48, %v3418_v19  ;;  %v9932_v21 = vpop.eup %7447  ;;  %v3377_v37 = vsel %vm809_vm1, %v9928_v57, 0.0 }
 0x7c4   : > { %6559 = vmatprep.mubr.msk.bf16.mxu0 %vm809_vm1, %v3450_v56 }
 0x7c5   : > { %6560 = vmatmul.mubr.msk.bf16.vlgmr.msra.gmra.mrb[72].mxu0 %vm809_vm1, %v3451_v22 }
 0x7c6   : > { %6584 = vmatpush3.bf16.msra.mxu0 %v9438_v13  ;;  %v3374_v13 = vsel %vm809_vm1, %v9932_v21, 0.0 }
 0x7c7   : > { %6585 = vmatprep.subr.bf16.mxu0 %v9588_v27 }
 0x7ca   : > { %6586 = vmatpush3.bf16.msra.mxu0 %v9588_v27  ;;  %3381 = vadd.xlane.f32.xlu0 %v3380_v49  ;;  %v9940_v27 = vpop.eup %7449 }
 0x7cb   : > { %6587 = vmatprep.subr.bf16.mxu0 %v9610_v23 }
 0x7ce   : > { %6588 = vmatpush3.bf16.msra.mxu0 %v9610_v23  ;;  %3378 = vadd.xlane.f32.xlu0 %v3377_v37  ;;  %v3383_v23 = vsel %vm809_vm1, %v9940_v27, 0.0 }
 0x7cf   : > { %6589 = vmatprep.subr.bf16.mxu0 %v9633_v54 }
 0x7d0   : > { %3375 = vadd.xlane.f32.xlu1 %v3374_v13 }
 0x7d2   : > { %6590 = vmatpush3.bf16.msra.mxu0 %v9633_v54  ;;  %v9963_v54 = vld [vmem:[%s7743_s18 + $0x50] sm:$0xff]  }
 0x7d3   : > { %6827 = vmatprep.subr.msk.bf16.mxu0 %vm368_vm0, %v9652_v36 }
 0x7d4   : > { %3384 = vadd.xlane.f32.xlu1 %v3383_v23  ;;  %v7679_v23 = vld [vmem:[%s7743_s18 + $0x78] sm:$0xff]  }
 0x7e4   : > { %4042 = vrot.lane.b32.xlu0 %v9948_v38, %s7703_s19 }
 0x7e5   : > { %3927 = vrot.lane.b32.xlu1 %v9953_v59, %s7704_s17 }
 0x7e8   : > { %3929 = vrot.lane.b32.xlu0 %v9958_v32, %s7704_s17 }
 0x7e9   : > { %4044 = vrot.lane.b32.xlu1 %v9963_v54, %s7703_s19 }
 0x7ec   : > { %v3310_v29 = vpop.xlane.xlu1 %3309  ;;  %4145 = vrot.lane.b32.xlu0 %v7673_v47, %s7703_s19 }
 0x7ed   : > { %3931 = vrot.lane.b32.xlu1 %v9970_v39, %s7704_s17 }
 0x7f0   : > { %v3313_v6 = vpop.xlane.xlu1 %3312  ;;  %v3304_v15 = vpop.xlane.xlu0 %3303  ;;  %3933 = vrot.lane.b32.xlu0 %v9908_v63, %s7704_s17 }
 0x7f1   : > { %4046 = vrot.lane.b32.xlu1 %v9977_v53, %s7703_s19  ;;  %7451 = vrcp.f32 %v3313_v6 }
 0x7f2   : > { %7453 = vrcp.f32 %v3304_v15 }
 0x7f3   : > { %7455 = vrcp.f32 %v3310_v29 }
 0x7f4   : > { %v3307_v14 = vpop.xlane.xlu1 %3306  ;;  %4147 = vrot.lane.b32.xlu0 %v7676_v43, %s7703_s19 }
 0x7f5   : > { %7457 = vrcp.f32 %v3307_v14  ;;  %4032 = vrot.lane.b32.xlu1 %v9984_v55, %s7704_s17 }
 0x7f8   : > { %v3346_v10 = vpop.xlane.xlu1 %3345  ;;  %4034 = vrot.lane.b32.xlu0 %v9948_v38, %s7704_s17 }
 0x7f9   : > { %4149 = vrot.lane.b32.xlu1 %v7678_v30, %s7703_s19 }
 0x7fa   : > { %v3349_v42 = vpop.xlane.xlu0 %3348 }
 0x7fb   : > { %v7452_v19 = vpop.eup %7451  ;;  %7459 = vrcp.f32 %v3349_v42 }
 0x7fc   : > { %v3340_v48 = vpop.xlane.xlu1 %3339  ;;  %4036 = vrot.lane.b32.xlu0 %v9963_v54, %s7704_s17  ;;  %v7454_v12 = vpop.eup %7453  ;;  %v3425_v49 = vmul.f32 %v7452_v19, %v9792_v4 }
 0x7fd   : > { %7461 = vrcp.f32 %v3340_v48  ;;  %4038 = vrot.lane.b32.xlu1 %v9977_v53, %s7704_s17  ;;  %v7456_v44 = vpop.eup %7455  ;;  %v3422_v37 = vmul.f32 %v7454_v12, %v9795_v41 }
 0x7fe   : > { %7463 = vrcp.f32 %v3346_v10  ;;  %v3343_v56 = vpop.xlane.xlu0 %3342  ;;  %v3424_v29 = vmul.f32 %v7456_v44, %v9787_v61 }
 0x7ff   : > { %v7458_v22 = vpop.eup %7457  ;;  %7465 = vrcp.f32 %v3343_v56 }
 0x800   : > { %v3423_v13 = vmul.f32 %v7458_v22, %v9802_v1  ;;  %4151 = vrot.lane.b32.xlu0 %v7679_v23, %s7703_s19  ;;  %v3453_v15 = vpack.c.bf16 %v3425_v49, %v3424_v29  ;;  %v3854_v22 = vsel %vm368_vm0, %v9705_v5, 0  ;;  %s7705_s19 = smov 40  }
 0x801   : > { %4137 = vrot.lane.b32.xlu1 %v7673_v47, %s7704_s17 }
 0x802   : > { %v3452_v6 = vpack.c.bf16 %v3423_v13, %v3422_v37 }
 0x804   : > { %6563 = vmatprep.mubr.msk.bf16.mxu0 %vm809_vm1, %v3452_v6  ;;  %v3358_v14 = vpop.xlane.xlu0 %3357  ;;  %4139 = vrot.lane.b32.xlu0 %v7676_v43, %s7704_s17 }
 0x805   : > { %6564 = vmatmul.mubr.msk.bf16.gmra.mrb[76].mxu0 %vm809_vm1, %v3453_v15  ;;  %4141 = vrot.lane.b32.xlu1 %v7678_v30, %s7704_s17  ;;  %v7460_v4 = vpop.eup %7459  ;;  %v3851_v30 = vsel %vm368_vm0, %v9652_v36, 0 }
 0x806   : > { %v3437_v47 = vmul.f32 %v7460_v4, %v9812_v58 }
 0x807   : > { %v7462_v41 = vpop.eup %7461 }
 0x808   : > { %v7464_v1 = vpop.eup %7463  ;;  %v3352_v10 = vpop.xlane.xlu0 %3351  ;;  %4143 = vrot.lane.b32.xlu0 %v7679_v23, %s7704_s17  ;;  %v3434_v42 = vmul.f32 %v7462_v41, %v9817_v33  ;;  %s5956_s17 = sshll.u32 %s11499_s14, 6 }
 0x809   : > { %v7466_v61 = vpop.eup %7465  ;;  %v3436_v48 = vmul.f32 %v7464_v1, %v9807_v28  ;;  %s11085_s21 = scalar_lea.vmem %s11157_s3, %s5956_s17 }
 0x80a   : > { %v3435_v19 = vmul.f32 %v7466_v61, %v9822_v0 }
 0x80b   : > { %v3459_v56 = vpack.c.bf16 %v3437_v47, %v3436_v48 }
 0x80c   : > { %v3322_v43 = vpop.xlane.xlu1 %3321  ;;  %v3361_v12 = vpop.xlane.xlu0 %3360  ;;  %v3458_v44 = vpack.c.bf16 %v3435_v19, %v3434_v42  ;;  %v7681_v19 = vld [vmem:[%s7743_s18] sm:$0xff]  }
 0x80d   : > { %7467 = vrcp.f32 %v3361_v12  ;;  %4610 = vrot.lane.b32.xlu0 %v7681_v19, %s7705_s19 }
 0x80e   : > { %6591 = vmatprep.mubr.msk.bf16.mxu0 %vm809_vm1, %v3458_v44  ;;  %7469 = vrcp.f32 %v3352_v10  ;;  %v3857_v10 = vsel %vm368_vm0, %v9732_v62, 0 }
 0x80f   : > { %6592 = vmatmul.mubr.msk.bf16.vlgmr.msra.gmra.mrb[80].mxu0 %vm809_vm1, %v3459_v56  ;;  %7471 = vrcp.f32 %v3358_v14 }
 0x810   : > { %6616 = vmatpush3.bf16.xpose.msra.mxu0 %v3851_v30  ;;  %v3355_v58 = vpop.xlane.xlu1 %3354  ;;  %v3325_v33 = vpop.xlane.xlu0 %3324 }
 0x811   : > { %7473 = vrcp.f32 %v3355_v58  ;;  %6828 = vmatprep.subr.msk.bf16.mxu0 %vm368_vm0, %v9705_v5 }
 0x812   : > { %7475 = vrcp.f32 %v3325_v33  ;;  %v3860_v33 = vsel %vm368_vm0, %v9740_v2, 0 }
 0x814   : > { %v3316_v28 = vpop.xlane.xlu1 %3315  ;;  %v3334_v0 = vpop.xlane.xlu0 %3333 }
 0x815   : > { %7477 = vrcp.f32 %v3316_v28  ;;  %v7682_v28 = vld [vmem:[%s7743_s18 + $0x10] sm:$0xff]  }
 0x816   : > { %7479 = vrcp.f32 %v3322_v43  ;;  %4614 = vrot.lane.b32.xlu0 %v7682_v28, %s7705_s19 }
 0x817   : > { %v7468_v49 = vpop.eup %7467 }
 0x818   : > { %6618 = vmatpush3.bf16.xpose.msra.mxu0 %v3854_v22  ;;  %v3319_v37 = vpop.xlane.xlu1 %3318  ;;  %v7470_v36 = vpop.eup %7469  ;;  %v3441_v6 = vmul.f32 %v7468_v49, %v9839_v34 }
 0x819   : > { %7481 = vrcp.f32 %v3319_v37  ;;  %6829 = vmatprep.subr.msk.bf16.mxu0 %vm368_vm0, %v9732_v62  ;;  %v7472_v13 = vpop.eup %7471  ;;  %v3438_v14 = vmul.f32 %v7470_v36, %v9835_v3  ;;  %v11352_v37 = vld [vmem:[#allocation70_spill] sm:$0xff] }
 0x81a   : > { %v3331_v23 = vpop.xlane.xlu0 %3330  ;;  %v3440_v4 = vmul.f32 %v7472_v13, %v9829_v24  ;;  %4616 = vrot.lane.b32.xlu0 %v9903_v31, %s7705_s19  ;;  %v11354_v13 = vld [vmem:[#allocation68_spill] sm:$0xff] }
 0x81b   : > { %v7474_v29 = vpop.eup %7473  ;;  %7483 = vrcp.f32 %v3331_v23  ;;  %v11355_v23 = vld [vmem:[#allocation69_spill] sm:$0xff] }
 0x81c   : > { %v3328_v15 = vpop.xlane.xlu1 %3327  ;;  %v3439_v5 = vmul.f32 %v7474_v29, %v9846_v46  ;;  %v3461_v61 = vpack.c.bf16 %v3441_v6, %v3440_v4  ;;  %v7476_v47 = vpop.eup %7475  ;;  %v7680_v46 = vld [vmem:[%s7743_s18 + $0x8] sm:$0xff]   ;;  %v3962_v29 = vsel %vm368_vm0, %v11355_v23, 0 }
 0x81d   : > { %7485 = vrcp.f32 %v3328_v15  ;;  %4612 = vrot.lane.b32.xlu1 %v7680_v46, %s7705_s19  ;;  %v3429_v42 = vmul.f32 %v7476_v47, %v9852_v50 }
 0x81e   : > { %v3370_v41 = vpop.xlane.xlu0 %3369  ;;  %v3460_v1 = vpack.c.bf16 %v3439_v5, %v3438_v14  ;;  %7487 = vrcp.f32 %v3334_v0  ;;  %4703 = vrot.lane.b32.xlu0 %v9970_v39, %s7705_s19 }
 0x81f   : > { %v7478_v3 = vpop.eup %7477 }
 0x820   : > { %6620 = vmatpush3.bf16.xpose.msra.mxu0 %v3857_v10  ;;  %v3337_v34 = vpop.xlane.xlu1 %3336  ;;  %6595 = vmatprep.mubr.msk.bf16.mxu0 %vm809_vm1, %v3460_v1  ;;  %v7480_v24 = vpop.eup %7479  ;;  %v3426_v12 = vmul.f32 %v7478_v3, %v9860_v17 }
 0x821   : > { %7489 = vrcp.f32 %v3337_v34  ;;  %6830 = vmatprep.subr.msk.bf16.mxu0 %vm368_vm0, %v9740_v2  ;;  %6596 = vmatmul.mubr.msk.bf16.gmra.mrb[84].mxu0 %vm809_vm1, %v3461_v61 }
 0x822   : > { %6623 = vmatprep.mubr.msk.bf16.mxu0 %vm368_vm0, %v9752_v52  ;;  %v3364_v48 = vpop.xlane.xlu0 %3363  ;;  %v3428_v52 = vmul.f32 %v7480_v24, %v9842_v40  ;;  %4699 = vrot.lane.b32.xlu1 %v9953_v59, %s7705_s19 }
 0x823   : > { %v7482_v62 = vpop.eup %7481  ;;  %4788 = vrot.lane.b32.xlu0 %v9984_v55, %s7705_s19 }
 0x824   : > { %v3373_v43 = vpop.xlane.xlu1 %3372  ;;  %v3427_v44 = vmul.f32 %v7482_v62, %v9870_v25  ;;  %v3455_v50 = vpack.c.bf16 %v3429_v42, %v3428_v52 }
 0x825   : > { %v7484_v56 = vpop.eup %7483  ;;  %7491 = vrcp.f32 %v3373_v43 }
 0x826   : > { %v3454_v30 = vpack.c.bf16 %v3427_v44, %v3426_v12  ;;  %7493 = vrcp.f32 %v3364_v48  ;;  %v3431_v25 = vmul.f32 %v7484_v56, %v9876_v11  ;;  %4701 = vrot.lane.b32.xlu1 %v9958_v32, %s7705_s19  ;;  %v11351_v32 = vld [vmem:[#allocation72_spill] sm:$0xff]  ;;  %v3829_v39 = vpop.permute.xlu0 %3828 }
 0x827   : > { %v7486_v58 = vpop.eup %7485  ;;  %7495 = vrcp.f32 %v3370_v41  ;;  %4792 = vrot.lane.b32.xlu0 %v9963_v54, %s7705_s19 }
 0x828   : > { %6622 = vmatpush3.bf16.xpose.msra.mxu0 %v3860_v33  ;;  %6575 = vmatprep.mubr.msk.bf16.mxu1 %vm809_vm1, %v3454_v30  ;;  %v3367_v17 = vpop.xlane.xlu1 %3366  ;;  %v3430_v40 = vmul.f32 %v7486_v58, %v9872_v51  ;;  %v7488_v0 = vpop.eup %7487 }
 0x829   : > { %7497 = vrcp.f32 %v3367_v17  ;;  %6835 = vmatprep.subr.msk.bf16.mxu0 %vm368_vm0, %v9758_v60  ;;  %6576 = vmatmul.mubr.msk.bf16.vlgmr.msra.gmra.mrb[88].mxu1 %vm809_vm1, %v3455_v50  ;;  %v3432_v51 = vmul.f32 %v7488_v0, %v9863_v9 }
 0x82a   : > { %6600 = vmatpush3.bf16.msra.mxu1 %v9443_v20  ;;  %v3456_v2 = vpack.c.bf16 %v3431_v25, %v3430_v40  ;;  %4705 = vrot.lane.b32.xlu1 %v9908_v63, %s7705_s19  ;;  %v4061_v20 = vsel %vm368_vm0, %v9758_v60, 0  ;;  %v11350_v63 = vld [vmem:[#allocation71_spill] sm:$0xff] }
 0x82b   : > { %v7490_v59 = vpop.eup %7489  ;;  %6601 = vmatprep.subr.bf16.mxu1 %v9658_v8 }
 0x82c   : > { %6579 = vmatprep.mubr.msk.bf16.mxu1 %vm809_vm1, %v3456_v2  ;;  %v3433_v11 = vmul.f32 %v7490_v59, %v9884_v18  ;;  %v11349_v18 = vld [vmem:[#allocation66_spill] sm:$0xff]  ;;  %v3942_v6 = vpop.permute.xlu1 %3941 }
 0x82d   : > { %v3965_v54 = vsel %vm368_vm0, %v3942_v6, 0 }
 0x82e   : > { %6602 = vmatpush3.bf16.msra.mxu1 %v9658_v8  ;;  %v3457_v22 = vpack.c.bf16 %v3433_v11, %v3432_v51  ;;  %4790 = vrot.lane.b32.xlu1 %v9948_v38, %s7705_s19 }
 0x82f   : > { %6603 = vmatprep.subr.bf16.mxu1 %v9677_v35  ;;  %6624 = vmatmul.mubr.msk.bf16.vlgmr.msra.gmra.mrb[88].mxu0 %vm368_vm0, %v9754_v7  ;;  %v7492_v31 = vpop.eup %7491 }
 0x830   : > { %6627 = vmatprep.mubr.msk.bf16.mxu0 %vm368_vm0, %v9760_v16  ;;  %6648 = vmatpush3.bf16.xpose.msra.mxu0 %v4061_v20  ;;  %v7494_v9 = vpop.eup %7493  ;;  %v3445_v60 = vmul.f32 %v7492_v31, %v9892_v45  ;;  %v11353_v45 = vld [vmem:[#allocation67_spill] sm:$0xff] }
 0x831   : > { %6580 = vmatmul.mubr.msk.bf16.gmra.mrb[92].mxu1 %vm809_vm1, %v3457_v22  ;;  %v7496_v8 = vpop.eup %7495  ;;  %v3442_v16 = vmul.f32 %v7494_v9, %v11350_v63  ;;  %v3956_v55 = vsel %vm368_vm0, %v11353_v45, 0 }
 0x832   : > { %6604 = vmatpush3.bf16.msra.mxu1 %v9677_v35  ;;  %v3444_v36 = vmul.f32 %v7496_v8, %v11352_v37  ;;  %4794 = vrot.lane.b32.xlu1 %v9977_v53, %s7705_s19  ;;  %v3959_v53 = vsel %vm368_vm0, %v11354_v13, 0 }
 0x833   : > { %v7498_v7 = vpop.eup %7497  ;;  %6605 = vmatprep.subr.bf16.mxu1 %v11349_v18 }
 0x834   : > { %v3443_v49 = vmul.f32 %v7498_v7, %v11351_v32  ;;  %v3463_v38 = vpack.c.bf16 %v3445_v60, %v3444_v36 }
 0x836   : > { %6606 = vmatpush3.bf16.msra.mxu1 %v11349_v18  ;;  %v3462_v35 = vpack.c.bf16 %v3443_v49, %v3442_v16 }
 0x837   : > { %6628 = vmatmul.mubr.msk.bf16.gmra.mrb[92].mxu0 %vm368_vm0, %v3829_v39  ;;  %6831 = vmatprep.subr.msk.bf16.mxu1 %vm368_vm0, %v11353_v45 }
 0x838   : > { %6607 = vmatprep.mubr.msk.bf16.mxu1 %vm809_vm1, %v3462_v35 }
 0x839   : > { %6608 = vmatmul.mubr.msk.bf16.vlgmr.msra.gmra.mrb[96].mxu1 %vm809_vm1, %v3463_v38 }
 0x83f   : > { %6632 = vmatpush3.bf16.xpose.msra.mxu1 %v3956_v55 }
 0x840   : > { %6832 = vmatprep.subr.msk.bf16.mxu1 %vm368_vm0, %v11354_v13 }
 0x847   : > { %6634 = vmatpush3.bf16.xpose.msra.mxu1 %v3959_v53 }
 0x848   : > { %6833 = vmatprep.subr.msk.bf16.mxu1 %vm368_vm0, %v11355_v23 }
 0x84f   : > { %6636 = vmatpush3.bf16.xpose.msra.mxu1 %v3962_v29 }
 0x850   : > { %6834 = vmatprep.subr.msk.bf16.mxu1 %vm368_vm0, %v3942_v6 }
 0x857   : > { %6638 = vmatpush3.bf16.xpose.msra.mxu1 %v3965_v54  ;;  %v3382_v15 = vpop.xlane.xlu0 %3381  ;;  %v301_v54 = vld [vmem:[%s11155_s1 + $0x2c8] sm:$0xff] }
 0x85b   : > { %v3379_v14 = vpop.xlane.xlu0 %3378 }
 0x85c   : > { %7499 = vrcp.f32 %v3379_v14 }
 0x85d   : > { %v3376_v5 = vpop.xlane.xlu1 %3375 }
 0x85e   : > { %7501 = vrcp.f32 %v3376_v5 }
 0x85f   : > { %v4043_v4 = vpop.permute.xlu0 %4042  ;;  %7503 = vrcp.f32 %v3382_v15 }
 0x860   : > { %6836 = vmatprep.subr.msk.bf16.mxu0 %vm368_vm0, %v4043_v4  ;;  %v4064_v41 = vsel %vm368_vm0, %v4043_v4, 0 }
 0x861   : > { %v3385_v1 = vpop.xlane.xlu1 %3384  ;;  %6650 = vmatpush3.bf16.xpose.msra.mxu0 %v4064_v41 }
 0x862   : > { %7505 = vrcp.f32 %v3385_v1 }
 0x863   : > { %v3930_v10 = vpop.permute.xlu0 %3929 }
 0x865   : > { %v3928_v61 = vpop.permute.xlu1 %3927 }
 0x866   : > { %v7500_v47 = vpop.eup %7499 }
 0x867   : > { %v4146_v34 = vpop.permute.xlu0 %4145  ;;  %v3447_v62 = vmul.f32 %v7500_v47, %v9928_v57 }
 0x868   : > { %v7502_v3 = vpop.eup %7501  ;;  %6839 = vmatprep.subr.msk.bf16.mxu1 %vm368_vm0, %v4146_v34 }
 0x869   : > { %v4045_v24 = vpop.permute.xlu1 %4044  ;;  %v3446_v46 = vmul.f32 %v7502_v3, %v9932_v21  ;;  %v7504_v42 = vpop.eup %7503  ;;  %v238_v3 = vld [vmem:[%s11155_s1 + $0xd0] sm:$0xff] }
 0x86a   : > { %6837 = vmatprep.subr.msk.bf16.mxu0 %vm368_vm0, %v4045_v24  ;;  %v4067_v19 = vsel %vm368_vm0, %v4045_v24, 0  ;;  %v3448_v56 = vmul.f32 %v7504_v42, %v9922_v26  ;;  %v4166_v26 = vsel %vm368_vm0, %v4146_v34, 0 }
 0x86b   : > { %6652 = vmatpush3.bf16.xpose.msra.mxu0 %v4067_v19  ;;  %v3464_v48 = vpack.c.bf16 %v3447_v62, %v3446_v46  ;;  %v3934_v43 = vpop.permute.xlu0 %3933  ;;  %v236_v46 = vld [vmem:[%s11155_s1 + $0xc0] sm:$0xff] }
 0x86c   : > { %v7506_v12 = vpop.eup %7505 }
 0x86d   : > { %v3932_v44 = vpop.permute.xlu1 %3931  ;;  %6611 = vmatprep.mubr.msk.bf16.mxu1 %vm809_vm1, %v3464_v48  ;;  %v3449_v52 = vmul.f32 %v7506_v12, %v9940_v27  ;;  %v237_v12 = vld [vmem:[%s11155_s1 + $0xc8] sm:$0xff] }
 0x86f   : > { %v3465_v30 = vpack.c.bf16 %v3449_v52, %v3448_v56  ;;  %v4148_v21 = vpop.permute.xlu0 %4147 }
 0x870   : > { %v4169_v40 = vsel %vm368_vm0, %v4148_v21, 0 }
 0x871   : > { %v4047_v58 = vpop.permute.xlu1 %4046  ;;  %6612 = vmatmul.mubr.msk.bf16.gmra.mrb[100].mxu1 %vm809_vm1, %v3465_v30 }
 0x872   : > { %6639 = vmatprep.mubr.msk.bf16.mxu1 %vm368_vm0, %v3928_v61  ;;  %6838 = vmatprep.subr.msk.bf16.mxu0 %vm368_vm0, %v4047_v58  ;;  %v4070_v57 = vsel %vm368_vm0, %v4047_v58, 0  ;;  %v306_v61 = vld [vmem:[%s11155_s1 + $0x2f0] sm:$0xff] }
 0x873   : > { %6654 = vmatpush3.bf16.xpose.msra.mxu0 %v4070_v57  ;;  %v4035_v33 = vpop.permute.xlu0 %4034 }
 0x875   : > { %v4033_v50 = vpop.permute.xlu1 %4032 }
 0x876   : > { %6655 = vmatprep.mubr.msk.bf16.mxu0 %vm368_vm0, %v4033_v50 }
 0x877   : > { %v4037_v28 = vpop.permute.xlu0 %4036 }
 0x879   : > { %6640 = vmatmul.mubr.msk.bf16.vlgmr.msra.gmra.mrb[104].mxu1 %vm368_vm0, %v3930_v10  ;;  %v4150_v27 = vpop.permute.xlu1 %4149 }
 0x87a   : > { %6664 = vmatpush3.bf16.xpose.msra.mxu1 %v4166_v26  ;;  %6643 = vmatprep.mubr.msk.bf16.mxu1 %vm368_vm0, %v3932_v44  ;;  %v4172_v2 = vsel %vm368_vm0, %v4150_v27, 0 }
 0x87b   : > { %6656 = vmatmul.mubr.msk.bf16.vlgmr.msra.gmra.mrb[96].mxu0 %vm368_vm0, %v4035_v33  ;;  %6840 = vmatprep.subr.msk.bf16.mxu1 %vm368_vm0, %v4148_v21  ;;  %v4152_v0 = vpop.permute.xlu0 %4151 }
 0x87c   : > { %6659 = vmatprep.mubr.msk.bf16.mxu0 %vm368_vm0, %v4037_v28  ;;  %v4175_v59 = vsel %vm368_vm0, %v4152_v0, 0 }
 0x87d   : > { %v4039_v17 = vpop.permute.xlu1 %4038 }
 0x87f   : > { %v4140_v51 = vpop.permute.xlu0 %4139 }
 0x881   : > { %6644 = vmatmul.mubr.msk.bf16.gmra.mrb[108].mxu1 %vm368_vm0, %v3934_v43  ;;  %v4138_v25 = vpop.permute.xlu1 %4137  ;;  %v239_v43 = vld [vmem:[%s11155_s1 + $0xd8] sm:$0xff] }
 0x882   : > { %6666 = vmatpush3.bf16.xpose.msra.mxu1 %v4169_v40  ;;  %6671 = vmatprep.mubr.msk.bf16.mxu1 %vm368_vm0, %v4138_v25 }
 0x883   : > { %6660 = vmatmul.mubr.msk.bf16.gmra.mrb[100].mxu0 %vm368_vm0, %v4039_v17  ;;  %6841 = vmatprep.subr.msk.bf16.mxu1 %vm368_vm0, %v4150_v27  ;;  %v4144_v60 = vpop.permute.xlu0 %4143 }
 0x885   : > { %v4142_v11 = vpop.permute.xlu1 %4141 }
 0x887   : > { %v4611_v14 = vpop.permute.xlu0 %4610 }
 0x888   : > { %6679 = vmatprep.subr.bf16.mxu0 %v4611_v14 }
 0x889   : > { %6680 = vmatpush3.bf16.msra.mxu0 %v4611_v14 }
 0x88a   : > { %6668 = vmatpush3.bf16.xpose.msra.mxu1 %v4172_v2  ;;  %v242_v2 = vld [vmem:[%s11155_s1 + $0xf0] sm:$0xff] }
 0x88b   : > { %6842 = vmatprep.subr.msk.bf16.mxu1 %vm368_vm0, %v4152_v0  ;;  %v4615_v1 = vpop.permute.xlu0 %4614 }
 0x88f   : > { %v4613_v15 = vpop.permute.xlu1 %4612  ;;  %v4617_v62 = vpop.permute.xlu0 %4616 }
 0x890   : > { %6681 = vmatprep.subr.bf16.mxu0 %v4613_v15 }
 0x891   : > { %6682 = vmatpush3.bf16.msra.mxu0 %v4613_v15 }
 0x892   : > { %6670 = vmatpush3.bf16.xpose.msra.mxu1 %v4175_v59  ;;  %6683 = vmatprep.subr.bf16.mxu0 %v4615_v1 }
 0x893   : > { %v4704_v27 = vpop.permute.xlu0 %4703 }
 0x894   : > { %v4700_v4 = vpop.permute.xlu1 %4699 }
 0x895   : > { %6695 = vmatprep.subr.bf16.mxu1 %v4700_v4  ;;  %6684 = vmatpush3.bf16.msra.mxu0 %v4615_v1 }
 0x896   : > { %6685 = vmatprep.subr.bf16.mxu0 %v4617_v62 }
 0x897   : > { %v10249_v15 = vpop.permute.xlu0 %4788 }
 0x898   : > { %v10137_v22 = vpop.f32.mrb[72].mxu0  ;;  %v4702_v24 = vpop.permute.xlu1 %4701 }
 0x899   : > { %v10139_v20 = vpop.f32.mrb[73].mxu0  ;;  %6672 = vmatmul.mubr.msk.bf16.vlgmr.msra.gmra.mrb[112].mxu1 %vm368_vm0, %v4140_v51  ;;  %6686 = vmatpush3.bf16.msra.mxu0 %v4617_v62 }
 0x89a   : > { %v10142_v31 = vpop.f32.mrb[74].mxu0  ;;  %6675 = vmatprep.mubr.msk.bf16.mxu1 %vm368_vm0, %v4142_v11  ;;  %6696 = vmatpush3.bf16.msra.mxu1 %v4700_v4  ;;  %v240_v11 = vld [vmem:[%s11155_s1 + $0xe0] sm:$0xff] }
 0x89b   : > { %v10147_v8 = vpop.f32.mrb[75].mxu0  ;;  %6697 = vmatprep.subr.bf16.mxu1 %v4702_v24  ;;  %6711 = vmatprep.subr.bf16.mxu0 %v10249_v15 }
 0x89c   : > { %v4706_v40 = vpop.permute.xlu1 %4705 }
 0x89e   : > { %6698 = vmatpush3.bf16.msra.mxu1 %v4702_v24  ;;  %v241_v24 = vld [vmem:[%s11155_s1 + $0xe8] sm:$0xff] }
 0x89f   : > { %6699 = vmatprep.subr.bf16.mxu1 %v4704_v27 }
 0x8a1   : > { %6676 = vmatmul.mubr.msk.bf16.gmra.mrb[116].mxu1 %vm368_vm0, %v4144_v60  ;;  %v243_v60 = vld [vmem:[%s11155_s1 + $0xf8] sm:$0xff] }
 0x8a2   : > { %6700 = vmatpush3.bf16.msra.mxu1 %v4704_v27 }
 0x8a3   : > { %6701 = vmatprep.subr.bf16.mxu1 %v4706_v40 }
 0x8a6   : > { %6702 = vmatpush3.bf16.msra.mxu1 %v4706_v40 }
 0x8d8   : > { %v10152_v18 = vpop.f32.mrb[76].mxu0 }
 0x8d9   : > { %v10154_v63 = vpop.f32.mrb[77].mxu0 }
 0x8da   : > { %v10156_v16 = vpop.f32.mrb[78].mxu0 }
 0x8db   : > { %v10160_v49 = vpop.f32.mrb[79].mxu0 }
 0x8e2   : > { %v10164_v36 = vpop.f32.mrb[80].mxu0 }
 0x8e3   : > { %11356 = vst [vmem:[#allocation66_spill] sm:$0xff] %v10164_v36  ;;  %v10166_v39 = vpop.f32.mrb[81].mxu0 }
 0x8e4   : > { %11357 = vst [vmem:[#allocation71_spill] sm:$0xff] %v10166_v39  ;;  %v10168_v35 = vpop.f32.mrb[82].mxu0 }
 0x8e5   : > { %11358 = vst [vmem:[#allocation72_spill] sm:$0xff] %v10168_v35  ;;  %v10172_v45 = vpop.f32.mrb[83].mxu0 }
 0x8e6   : > { %11359 = vst [vmem:[#allocation70_spill] sm:$0xff] %v10172_v45 }
 0x8f4   : > { %v10176_v13 = vpop.f32.mrb[84].mxu0 }
 0x8f5   : > { %11360 = vst [vmem:[#allocation67_spill] sm:$0xff] %v10176_v13  ;;  %v10178_v53 = vpop.f32.mrb[85].mxu0 }
 0x8f6   : > { %11361 = vst [vmem:[#allocation68_spill] sm:$0xff] %v10178_v53  ;;  %v10180_v23 = vpop.f32.mrb[86].mxu0 }
 0x8f7   : > { %11362 = vst [vmem:[#allocation69_spill] sm:$0xff] %v10180_v23  ;;  %v10184_v6 = vpop.f32.mrb[87].mxu0 }
 0x8f8   : > { %11363 = vst [vmem:[#allocation73_spill] sm:$0xff] %v10184_v6 }
 0x8fc   : > { %v10188_v5 = vpop.f32.mrb[88].mxu1 }
 0x8fd   : > { %v10190_v41 = vpop.f32.mrb[89].mxu1 }
 0x8fe   : > { %v10192_v10 = vpop.f32.mrb[90].mxu1 }
 0x8ff   : > { %v10196_v47 = vpop.f32.mrb[91].mxu1 }
 0x902   : > { %v6625_v42 = vpop.f32.mrb[88].mxu0 }
 0x903   : > { %v10206_v19 = vadd.f32 %v6625_v42, %v238_v3  ;;  %v3896_v48 = vpop.f32.mrb[89].mxu0 }
 0x904   : > { %v10214_v44 = vadd.f32 %v3896_v48, %v236_v46  ;;  %v6626_v56 = vpop.f32.mrb[90].mxu0  ;;  %v10216_v52 = vpop.f32.mrb[92].mxu1 }
 0x905   : > { %11364 = vst [vmem:[#allocation74_spill] sm:$0xff] %v10216_v52  ;;  %v3899_v30 = vpop.f32.mrb[91].mxu0  ;;  %v4248_v21 = vsel %vm809_vm1, %v10206_v19, -inf  ;;  %v10220_v58 = vpop.f32.mrb[93].mxu1  ;;  %v10222_v57 = vadd.f32 %v6626_v56, %v239_v43 }
 0x906   : > { %v10224_v50 = vadd.f32 %v3899_v30, %v237_v12  ;;  %4249 = vmax.xlane.f32.xlu0 %v4248_v21  ;;  %v4242_v33 = vsel %vm809_vm1, %v10214_v44, -inf  ;;  %v10228_v26 = vpop.f32.mrb[94].mxu1 }
 0x907   : > { %11365 = vst [vmem:[#allocation75_spill] sm:$0xff] %v10228_v26  ;;  %4243 = vmax.xlane.f32.xlu1 %v4242_v33  ;;  %v10232_v17 = vpop.f32.mrb[95].mxu1  ;;  %v4251_v51 = vsel %vm809_vm1, %v10222_v57, -inf }
 0x908   : > { %v4245_v0 = vsel %vm809_vm1, %v10224_v50, -inf }
 0x90a   : > { %4246 = vmax.xlane.f32.xlu0 %v4245_v0  ;;  %v6629_v59 = vpop.f32.mrb[92].mxu0 }
 0x90b   : > { %v10251_v14 = vadd.f32 %v6629_v59, %v242_v2  ;;  %4252 = vmax.xlane.f32.xlu1 %v4251_v51  ;;  %v3912_v4 = vpop.f32.mrb[93].mxu0 }
 0x90c   : > { %v6630_v1 = vpop.f32.mrb[94].mxu0  ;;  %v10254_v3 = vpop.f32.mrb[96].mxu1  ;;  %v10259_v46 = vadd.f32 %v3912_v4, %v240_v11 }
 0x90d   : > { %11366 = vst [vmem:[#allocation76_spill] sm:$0xff] %v10254_v3  ;;  %v10261_v62 = vadd.f32 %v6630_v1, %v243_v60  ;;  %v3915_v42 = vpop.f32.mrb[95].mxu0  ;;  %v10263_v48 = vpop.f32.mrb[97].mxu1  ;;  %v4260_v43 = vsel %vm809_vm1, %v10251_v14, -inf }
 0x90e   : > { %11367 = vst [vmem:[#allocation77_spill] sm:$0xff] %v10263_v48  ;;  %4261 = vmax.xlane.f32.xlu0 %v4260_v43  ;;  %v10267_v12 = vpop.f32.mrb[98].mxu1  ;;  %v10269_v56 = vadd.f32 %v3915_v42, %v241_v24  ;;  %v4254_v40 = vsel %vm809_vm1, %v10259_v46, -inf  ;;  %v302_v24 = vld [vmem:[%s11155_s1 + $0x2d0] sm:$0xff] }
 0x90f   : > { %11368 = vst [vmem:[#allocation78_spill] sm:$0xff] %v10267_v12  ;;  %v10273_v21 = vpop.f32.mrb[99].mxu1  ;;  %v4263_v33 = vsel %vm809_vm1, %v10261_v62, -inf }
 0x910   : > { %11369 = vst [vmem:[#allocation79_spill] sm:$0xff] %v10273_v21  ;;  %4264 = vmax.xlane.f32.xlu1 %v4263_v33  ;;  %v4257_v0 = vsel %vm809_vm1, %v10269_v56, -inf }
 0x912   : > { %4255 = vmax.xlane.f32.xlu0 %v4254_v40  ;;  %v300_v40 = vld [vmem:[%s11155_s1 + $0x2c0] sm:$0xff] }
 0x914   : > { %4258 = vmax.xlane.f32.xlu1 %v4257_v0  ;;  %v303_v0 = vld [vmem:[%s11155_s1 + $0x2d8] sm:$0xff] }
 0x944   : > { %v10283_v2 = vpop.f32.mrb[100].mxu1 }
 0x945   : > { %11370 = vst [vmem:[#allocation80_spill] sm:$0xff] %v10283_v2  ;;  %v10285_v59 = vpop.f32.mrb[101].mxu1 }
 0x946   : > { %11371 = vst [vmem:[#allocation81_spill] sm:$0xff] %v10285_v59  ;;  %v10287_v51 = vpop.f32.mrb[102].mxu1 }
 0x947   : > { %11372 = vst [vmem:[#allocation82_spill] sm:$0xff] %v10287_v51  ;;  %v10291_v60 = vpop.f32.mrb[103].mxu1 }
 0x948   : > { %11373 = vst [vmem:[#allocation83_spill] sm:$0xff] %v10291_v60 }
 0x94c   : > { %v6641_v1 = vpop.f32.mrb[104].mxu1 }
 0x94d   : > { %v4001_v42 = vpop.f32.mrb[105].mxu1 }
 0x94e   : > { %v6657_v43 = vpop.f32.mrb[96].mxu0  ;;  %v6642_v33 = vpop.f32.mrb[106].mxu1 }
 0x94f   : > { %v10304_v11 = vadd.f32 %v6657_v43, %v302_v24  ;;  %v4106_v27 = vpop.f32.mrb[97].mxu0  ;;  %v4004_v4 = vpop.f32.mrb[107].mxu1 }
 0x950   : > { %v6658_v30 = vpop.f32.mrb[98].mxu0  ;;  %v10309_v29 = vadd.f32 %v4106_v27, %v300_v40 }
 0x951   : > { %v10311_v55 = vadd.f32 %v6658_v30, %v303_v0  ;;  %v4109_v38 = vpop.f32.mrb[99].mxu0  ;;  %v4296_v28 = vsel %vm809_vm1, %v10304_v11, -inf }
 0x952   : > { %4297 = vmax.xlane.f32.xlu0 %v4296_v28  ;;  %v10315_v25 = vadd.f32 %v4109_v38, %v301_v54  ;;  %v4290_v30 = vsel %vm809_vm1, %v10309_v29, -inf  ;;  %v304_v38 = vld [vmem:[%s11155_s1 + $0x2e0] sm:$0xff]  ;;  %v307_v54 = vld [vmem:[%s11155_s1 + $0x2f8] sm:$0xff] }
 0x953   : > { %v4299_v24 = vsel %vm809_vm1, %v10311_v55, -inf }
 0x954   : > { %4300 = vmax.xlane.f32.xlu1 %v4299_v24  ;;  %v6645_v43 = vpop.f32.mrb[108].mxu1  ;;  %v4293_v32 = vsel %vm809_vm1, %v10315_v25, -inf }
 0x955   : > { %v4017_v27 = vpop.f32.mrb[109].mxu1 }
 0x956   : > { %4291 = vmax.xlane.f32.xlu0 %v4290_v30  ;;  %v6661_v40 = vpop.f32.mrb[100].mxu0  ;;  %v6646_v0 = vpop.f32.mrb[110].mxu1  ;;  %v305_v30 = vld [vmem:[%s11155_s1 + $0x2e8] sm:$0xff] }
 0x957   : > { %v10330_v28 = vadd.f32 %v6661_v40, %v306_v61  ;;  %v4122_v24 = vpop.f32.mrb[101].mxu0  ;;  %v4020_v34 = vpop.f32.mrb[111].mxu1  ;;  %v270_v40 = vld [vmem:[%s11155_s1 + $0x1d0] sm:$0xff] }
 0x958   : > { %4294 = vmax.xlane.f32.xlu1 %v4293_v32  ;;  %v6662_v37 = vpop.f32.mrb[102].mxu0  ;;  %v10337_v9 = vadd.f32 %v4122_v24, %v304_v38  ;;  %v271_v38 = vld [vmem:[%s11155_s1 + $0x1d8] sm:$0xff]  ;;  %v268_v24 = vld [vmem:[%s11155_s1 + $0x1c0] sm:$0xff] }
 0x959   : > { %v10339_v7 = vadd.f32 %v6662_v37, %v307_v54  ;;  %v4125_v59 = vpop.f32.mrb[103].mxu0  ;;  %v4308_v61 = vsel %vm809_vm1, %v10330_v28, -inf  ;;  %v10353_v37 = vadd.f32 %v6641_v1, %v270_v40  ;;  %v10367_v1 = vadd.f32 %v4001_v42, %v268_v24 }
 0x95a   : > { %4309 = vmax.xlane.f32.xlu0 %v4308_v61  ;;  %v10346_v60 = vadd.f32 %v4125_v59, %v305_v30  ;;  %v4302_v54 = vsel %vm809_vm1, %v10337_v9, -inf  ;;  %v10360_v59 = vadd.f32 %v6642_v33, %v271_v38  ;;  %v269_v61 = vld [vmem:[%s11155_s1 + $0x1c8] sm:$0xff] }
 0x95b   : > { %v4311_v32 = vsel %vm809_vm1, %v10339_v7, -inf  ;;  %v4272_v40 = vsel %vm809_vm1, %v10353_v37, -inf  ;;  %v10374_v33 = vadd.f32 %v4004_v4, %v269_v61  ;;  %v4266_v24 = vsel %vm809_vm1, %v10367_v1, -inf }
 0x95c   : > { %4312 = vmax.xlane.f32.xlu1 %v4311_v32  ;;  %v4305_v30 = vsel %vm809_vm1, %v10346_v60, -inf  ;;  %v274_v32 = vld [vmem:[%s11155_s1 + $0x1f0] sm:$0xff]  ;;  %v4275_v38 = vsel %vm809_vm1, %v10360_v59, -inf }
 0x95d   : > { %v10381_v42 = vadd.f32 %v6645_v43, %v274_v32  ;;  %v4269_v61 = vsel %vm809_vm1, %v10374_v33, -inf }
 0x95e   : > { %4303 = vmax.xlane.f32.xlu0 %v4302_v54  ;;  %v275_v54 = vld [vmem:[%s11155_s1 + $0x1f8] sm:$0xff] }
 0x95f   : > { %v10388_v4 = vadd.f32 %v6646_v0, %v275_v54  ;;  %v4284_v32 = vsel %vm809_vm1, %v10381_v42, -inf }
 0x960   : > { %4306 = vmax.xlane.f32.xlu1 %v4305_v30  ;;  %v272_v30 = vld [vmem:[%s11155_s1 + $0x1e0] sm:$0xff] }
 0x961   : > { %v10395_v43 = vadd.f32 %v4017_v27, %v272_v30  ;;  %v4287_v54 = vsel %vm809_vm1, %v10388_v4, -inf  ;;  %v332_v27 = vld [vmem:[%s11155_s1 + $0x3c0] sm:$0xff]  ;;  %v335_v30 = vld [vmem:[%s11155_s1 + $0x3d8] sm:$0xff] }
 0x962   : > { %4273 = vmax.xlane.f32.xlu0 %v4272_v40  ;;  %v273_v40 = vld [vmem:[%s11155_s1 + $0x1e8] sm:$0xff] }
 0x963   : > { %v10402_v0 = vadd.f32 %v4020_v34, %v273_v40 }
 0x964   : > { %4276 = vmax.xlane.f32.xlu1 %v4275_v38  ;;  %v334_v38 = vld [vmem:[%s11155_s1 + $0x3d0] sm:$0xff] }
 0x965   : > { %v4281_v51 = vsel %vm809_vm1, %v10402_v0, -inf }
 0x966   : > { %4267 = vmax.xlane.f32.xlu0 %v4266_v24 }
 0x968   : > { %4270 = vmax.xlane.f32.xlu1 %v4269_v61  ;;  %v4278_v61 = vsel %vm809_vm1, %v10395_v43, -inf }
 0x96a   : > { %4285 = vmax.xlane.f32.xlu0 %v4284_v32 }
 0x96c   : > { %4288 = vmax.xlane.f32.xlu1 %v4287_v54  ;;  %v6673_v24 = vpop.f32.mrb[112].mxu1  ;;  %v333_v54 = vld [vmem:[%s11155_s1 + $0x3c8] sm:$0xff] }
 0x96d   : > { %v10414_v32 = vadd.f32 %v6673_v24, %v334_v38  ;;  %v4211_v34 = vpop.f32.mrb[113].mxu1 }
 0x96e   : > { %4279 = vmax.xlane.f32.xlu0 %v4278_v61  ;;  %v6674_v40 = vpop.f32.mrb[114].mxu1  ;;  %v10419_v2 = vadd.f32 %v4211_v34, %v332_v27  ;;  %v338_v27 = vld [vmem:[%s11155_s1 + $0x3f0] sm:$0xff]  ;;  %v336_v34 = vld [vmem:[%s11155_s1 + $0x3e0] sm:$0xff] }
 0x96f   : > { %v10423_v48 = vadd.f32 %v6674_v40, %v335_v30  ;;  %v4320_v21 = vsel %vm809_vm1, %v10414_v32, -inf  ;;  %v4214_v3 = vpop.f32.mrb[115].mxu1 }
 0x970   : > { %4282 = vmax.xlane.f32.xlu1 %v4281_v51  ;;  %v10429_v24 = vadd.f32 %v4214_v3, %v333_v54  ;;  %v4314_v61 = vsel %vm809_vm1, %v10419_v2, -inf  ;;  %v339_v51 = vld [vmem:[%s11155_s1 + $0x3f8] sm:$0xff] }
 0x971   : > { %v4323_v38 = vsel %vm809_vm1, %v10423_v48, -inf }
 0x972   : > { %4321 = vmax.xlane.f32.xlu0 %v4320_v21  ;;  %v4317_v40 = vsel %vm809_vm1, %v10429_v24, -inf }
 0x974   : > { %4324 = vmax.xlane.f32.xlu1 %v4323_v38  ;;  %v6677_v30 = vpop.f32.mrb[116].mxu1  ;;  %v337_v38 = vld [vmem:[%s11155_s1 + $0x3e8] sm:$0xff] }
 0x975   : > { %v10442_v3 = vadd.f32 %v6677_v30, %v338_v27  ;;  %v4227_v21 = vpop.f32.mrb[117].mxu1 }
 0x976   : > { %4315 = vmax.xlane.f32.xlu0 %v4314_v61  ;;  %v6678_v54 = vpop.f32.mrb[118].mxu1  ;;  %v10449_v12 = vadd.f32 %v4227_v21, %v336_v34  ;;  %v10465_v21 = vpop.permute.xlu0 %4792 }
 0x977   : > { %v10451_v53 = vadd.f32 %v6678_v54, %v339_v51  ;;  %v4332_v6 = vsel %vm809_vm1, %v10442_v3, -inf  ;;  %v4230_v13 = vpop.f32.mrb[119].mxu1  ;;  %v10463_v51 = vpop.permute.xlu1 %4790 }
 0x978   : > { %4318 = vmax.xlane.f32.xlu1 %v4317_v40  ;;  %v10457_v30 = vadd.f32 %v4230_v13, %v337_v38  ;;  %v4326_v61 = vsel %vm809_vm1, %v10449_v12, -inf }
 0x979   : > { %v4335_v27 = vsel %vm809_vm1, %v10451_v53, -inf }
 0x97a   : > { %4333 = vmax.xlane.f32.xlu0 %v4332_v6  ;;  %v4329_v34 = vsel %vm809_vm1, %v10457_v30, -inf }
 0x97b   : > { %v10467_v40 = vpop.permute.xlu1 %4794 }
 0x97c   : > { %4336 = vmax.xlane.f32.xlu1 %v4335_v27 }
 0x97e   : > { %4327 = vmax.xlane.f32.xlu0 %v4326_v61 }
 0x980   : > { %4330 = vmax.xlane.f32.xlu1 %v4329_v34 }
 0x993   : > { %v4250_v54 = vpop.xlane.xlu0 %4249 }
 0x994   : > { %v4340_v13 = vsub.f32 %v10206_v19, %v4250_v54  ;;  %v4244_v38 = vpop.xlane.xlu1 %4243 }
 0x995   : > { %v4338_v6 = vsub.f32 %v10214_v44, %v4244_v38 }
 0x996   : > { %v4374_v23 = vmul.f32 1.442695, %v4340_v13 }
 0x997   : > { %v4370_v39 = vmul.f32 1.442695, %v4338_v6  ;;  %v4247_v27 = vpop.xlane.xlu0 %4246 }
 0x998   : > { %7507 = vpow2.f32 %v4374_v23  ;;  %v4339_v45 = vsub.f32 %v10224_v50, %v4247_v27  ;;  %v4253_v61 = vpop.xlane.xlu1 %4252 }
 0x999   : > { %v4341_v34 = vsub.f32 %v10222_v57, %v4253_v61  ;;  %7509 = vpow2.f32 %v4370_v39 }
 0x99a   : > { %v4372_v36 = vmul.f32 1.442695, %v4339_v45 }
 0x99b   : > { %v4376_v35 = vmul.f32 1.442695, %v4341_v34  ;;  %v4262_v52 = vpop.xlane.xlu0 %4261 }
 0x99c   : > { %v4344_v26 = vsub.f32 %v10251_v14, %v4262_v52 }
 0x99d   : > { %7511 = vpow2.f32 %v4376_v35  ;;  %v4265_v19 = vpop.xlane.xlu1 %4264 }
 0x99e   : > { %v4382_v54 = vmul.f32 1.442695, %v4344_v26  ;;  %v4345_v44 = vsub.f32 %v10261_v62, %v4265_v19  ;;  %7513 = vpow2.f32 %v4372_v36 }
 0x99f   : > { %v4256_v13 = vpop.xlane.xlu0 %4255 }
 0x9a0   : > { %7515 = vpow2.f32 %v4382_v54  ;;  %v4384_v23 = vmul.f32 1.442695, %v4345_v44  ;;  %v4342_v50 = vsub.f32 %v10259_v46, %v4256_v13 }
 0x9a1   : > { %v4259_v38 = vpop.xlane.xlu1 %4258 }
 0x9a2   : > { %v10476_v6 = vpop.eup %7507  ;;  %v4378_v39 = vmul.f32 1.442695, %v4342_v50  ;;  %v4343_v45 = vsub.f32 %v10269_v56, %v4259_v38  ;;  %7517 = vpow2.f32 %v4384_v23 }
 0x9a3   : > { %v4440_v35 = vsel %vm809_vm1, %v10476_v6, 0.0  ;;  %v10481_v52 = vpop.eup %7509 }
 0x9a4   : > { %7519 = vpow2.f32 %v4378_v39  ;;  %v4380_v57 = vmul.f32 1.442695, %v4343_v45  ;;  %4441 = vadd.xlane.f32.xlu0 %v4440_v35  ;;  %v4434_v26 = vsel %vm809_vm1, %v10481_v52, 0.0 }
 0x9a6   : > { %7521 = vpow2.f32 %v4380_v57 }
 0x9a7   : > { %v10483_v36 = vpop.eup %7511 }
 0x9a8   : > { %4435 = vadd.xlane.f32.xlu0 %v4434_v26  ;;  %v4443_v14 = vsel %vm809_vm1, %v10483_v36, 0.0  ;;  %v10489_v46 = vpop.eup %7513 }
 0x9a9   : > { %4444 = vadd.xlane.f32.xlu1 %v4443_v14  ;;  %v4437_v27 = vsel %vm809_vm1, %v10489_v46, 0.0 }
 0x9aa   : > { %v10491_v62 = vpop.eup %7515 }
 0x9ab   : > { %v4452_v56 = vsel %vm809_vm1, %v10491_v62, 0.0 }
 0x9ac   : > { %4453 = vadd.xlane.f32.xlu0 %v4452_v56  ;;  %v10497_v61 = vpop.eup %7517 }
 0x9ad   : > { %4438 = vadd.xlane.f32.xlu1 %v4437_v27  ;;  %v4455_v54 = vsel %vm809_vm1, %v10497_v61, 0.0 }
 0x9ae   : > { %v10499_v34 = vpop.eup %7519 }
 0x9af   : > { %v4446_v19 = vsel %vm809_vm1, %v10499_v34, 0.0 }
 0x9b0   : > { %4447 = vadd.xlane.f32.xlu0 %v4446_v19  ;;  %v10505_v44 = vpop.eup %7521 }
 0x9b1   : > { %4456 = vadd.xlane.f32.xlu1 %v4455_v54  ;;  %v4449_v13 = vsel %vm809_vm1, %v10505_v44, 0.0 }
 0x9b5   : > { %4450 = vadd.xlane.f32.xlu1 %v4449_v13 }
 0x9df   : > { %v4298_v23 = vpop.xlane.xlu0 %4297 }
 0x9e0   : > { %v4356_v50 = vsub.f32 %v10304_v11, %v4298_v23 }
 0x9e1   : > { %v4301_v38 = vpop.xlane.xlu1 %4300 }
 0x9e2   : > { %v4406_v39 = vmul.f32 1.442695, %v4356_v50  ;;  %v4357_v45 = vsub.f32 %v10311_v55, %v4301_v38 }
 0x9e3   : > { %v4292_v35 = vpop.xlane.xlu0 %4291 }
 0x9e4   : > { %7523 = vpow2.f32 %v4406_v39  ;;  %v4354_v57 = vsub.f32 %v10309_v29, %v4292_v35  ;;  %v4408_v26 = vmul.f32 1.442695, %v4357_v45 }
 0x9e5   : > { %v4295_v14 = vpop.xlane.xlu1 %4294 }
 0x9e6   : > { %v4402_v56 = vmul.f32 1.442695, %v4354_v57  ;;  %v4355_v27 = vsub.f32 %v10315_v25, %v4295_v14 }
 0x9e7   : > { %v4310_v19 = vpop.xlane.xlu0 %4309 }
 0x9e8   : > { %7525 = vpow2.f32 %v4402_v56  ;;  %v4404_v54 = vmul.f32 1.442695, %v4355_v27  ;;  %v4360_v13 = vsub.f32 %v10330_v28, %v4310_v19 }
 0x9e9   : > { %7527 = vpow2.f32 %v4408_v26  ;;  %v4313_v11 = vpop.xlane.xlu1 %4312 }
 0x9ea   : > { %7529 = vpow2.f32 %v4404_v54  ;;  %v4414_v23 = vmul.f32 1.442695, %v4360_v13  ;;  %v4361_v55 = vsub.f32 %v10339_v7, %v4313_v11 }
 0x9eb   : > { %v4304_v50 = vpop.xlane.xlu0 %4303 }
 0x9ec   : > { %7531 = vpow2.f32 %v4414_v23  ;;  %v4416_v38 = vmul.f32 1.442695, %v4361_v55  ;;  %v4358_v29 = vsub.f32 %v10337_v9, %v4304_v50 }
 0x9ed   : > { %v4307_v39 = vpop.xlane.xlu1 %4306 }
 0x9ee   : > { %v10516_v45 = vpop.eup %7523  ;;  %7533 = vpow2.f32 %v4416_v38  ;;  %v4410_v25 = vmul.f32 1.442695, %v4358_v29  ;;  %v4359_v35 = vsub.f32 %v10346_v60, %v4307_v39 }
 0x9ef   : > { %v4274_v57 = vpop.xlane.xlu0 %4273  ;;  %v4488_v28 = vsel %vm809_vm1, %v10516_v45, 0.0 }
 0x9f0   : > { %7535 = vpow2.f32 %v4410_v25  ;;  %v4412_v26 = vmul.f32 1.442695, %v4359_v35  ;;  %v4348_v7 = vsub.f32 %v10353_v37, %v4274_v57  ;;  %4489 = vadd.xlane.f32.xlu0 %v4488_v28 }
 0x9f1   : > { %v4277_v14 = vpop.xlane.xlu1 %4276 }
 0x9f2   : > { %v10522_v56 = vpop.eup %7525  ;;  %7537 = vpow2.f32 %v4412_v26  ;;  %v4390_v9 = vmul.f32 1.442695, %v4348_v7  ;;  %v4349_v19 = vsub.f32 %v10360_v59, %v4277_v14 }
 0x9f3   : > { %v10524_v27 = vpop.eup %7527  ;;  %v4268_v54 = vpop.xlane.xlu0 %4267  ;;  %v4482_v60 = vsel %vm809_vm1, %v10522_v56, 0.0 }
 0x9f4   : > { %v10529_v13 = vpop.eup %7529  ;;  %7539 = vpow2.f32 %v4390_v9  ;;  %v4346_v11 = vsub.f32 %v10367_v1, %v4268_v54  ;;  %4483 = vadd.xlane.f32.xlu0 %v4482_v60  ;;  %v4392_v38 = vmul.f32 1.442695, %v4349_v19  ;;  %v4491_v39 = vsel %vm809_vm1, %v10524_v27, 0.0 }
 0x9f5   : > { %v4271_v37 = vpop.xlane.xlu1 %4270  ;;  %v4485_v23 = vsel %vm809_vm1, %v10529_v13, 0.0 }
 0x9f6   : > { %v10534_v55 = vpop.eup %7531  ;;  %v4386_v50 = vmul.f32 1.442695, %v4346_v11  ;;  %4486 = vadd.xlane.f32.xlu1 %v4485_v23  ;;  %v4347_v59 = vsub.f32 %v10374_v33, %v4271_v37 }
 0x9f7   : > { %v4286_v29 = vpop.xlane.xlu0 %4285  ;;  %v4500_v57 = vsel %vm809_vm1, %v10534_v55, 0.0 }
 0x9f8   : > { %v10539_v25 = vpop.eup %7533  ;;  %7541 = vpow2.f32 %v4386_v50  ;;  %v4352_v1 = vsub.f32 %v10381_v42, %v4286_v29  ;;  %4492 = vadd.xlane.f32.xlu0 %v4491_v39  ;;  %v4388_v33 = vmul.f32 1.442695, %v4347_v59 }
 0x9f9   : > { %v4289_v35 = vpop.xlane.xlu1 %4288  ;;  %7543 = vpow2.f32 %v4392_v38  ;;  %v4503_v9 = vsel %vm809_vm1, %v10539_v25, 0.0 }
 0x9fa   : > { %v10544_v28 = vpop.eup %7535  ;;  %v4398_v26 = vmul.f32 1.442695, %v4352_v1  ;;  %v4353_v7 = vsub.f32 %v10388_v4, %v4289_v35  ;;  %4501 = vadd.xlane.f32.xlu1 %v4500_v57 }
 0x9fb   : > { %v4280_v14 = vpop.xlane.xlu0 %4279  ;;  %v4494_v54 = vsel %vm809_vm1, %v10544_v28, 0.0 }
 0x9fc   : > { %v10549_v19 = vpop.eup %7537  ;;  %7545 = vpow2.f32 %v4398_v26  ;;  %v4350_v42 = vsub.f32 %v10395_v43, %v4280_v14  ;;  %4504 = vadd.xlane.f32.xlu0 %v4503_v9  ;;  %v4400_v11 = vmul.f32 1.442695, %v4353_v7 }
 0x9fd   : > { %7547 = vpow2.f32 %v4388_v33  ;;  %v4497_v37 = vsel %vm809_vm1, %v10549_v19, 0.0  ;;  %v4283_v14 = vpop.xlane.xlu1 %4282 }
 0x9fe   : > { %v10554_v60 = vpop.eup %7539  ;;  %v4394_v4 = vmul.f32 1.442695, %v4350_v42  ;;  %4495 = vadd.xlane.f32.xlu1 %v4494_v54  ;;  %v7683_v42 = vld [vmem:[%s7743_s18 + $0x68] sm:$0xff]  }
 0x9ff   : > { %11374 = vst [vmem:[#allocation84_spill] sm:$0xff] %v10554_v60  ;;  %v4464_v23 = vsel %vm809_vm1, %v10554_v60, 0.0  ;;  %v4322_v9 = vpop.xlane.xlu0 %4321 }
 0xa00   : > { %7549 = vpow2.f32 %v4394_v4  ;;  %4498 = vadd.xlane.f32.xlu0 %v4497_v37  ;;  %v7684_v37 = vld [vmem:[%s7743_s18 + $0x60] sm:$0xff]  }
 0xa01   : > { %7551 = vpow2.f32 %v4400_v11  ;;  %v4325_v54 = vpop.xlane.xlu1 %4324 }
 0xa02   : > { %v10560_v50 = vpop.eup %7541  ;;  %4465 = vadd.xlane.f32.xlu1 %v4464_v23 }
 0xa03   : > { %v10562_v43 = vpop.eup %7543  ;;  %v4458_v38 = vsel %vm809_vm1, %v10560_v50, 0.0  ;;  %v4316_v11 = vpop.xlane.xlu0 %4315 }
 0xa04   : > { %v4467_v1 = vsel %vm809_vm1, %v10562_v43, 0.0 }
 0xa05   : > { %v4319_v4 = vpop.xlane.xlu1 %4318 }
 0xa06   : > { %v10566_v59 = vpop.eup %7545  ;;  %4459 = vadd.xlane.f32.xlu1 %v4458_v38  ;;  %v4351_v38 = vsub.f32 %v10402_v0, %v4283_v14 }
 0xa07   : > { %11375 = vst [vmem:[#allocation85_spill] sm:$0xff] %v10566_v59  ;;  %v4476_v29 = vsel %vm809_vm1, %v10566_v59, 0.0  ;;  %v10570_v39 = vpop.eup %7547  ;;  %v4334_v23 = vpop.xlane.xlu0 %4333 }
 0xa08   : > { %4477 = vadd.xlane.f32.xlu0 %v4476_v29  ;;  %11376 = vst [vmem:[#allocation86_spill] sm:$0xff] %v10570_v39  ;;  %v4461_v7 = vsel %vm809_vm1, %v10570_v39, 0.0  ;;  %v4396_v59 = vmul.f32 1.442695, %v4351_v38  ;;  %v4368_v0 = vsub.f32 %v10442_v3, %v4334_v23 }
 0xa09   : > { %v4337_v29 = vpop.xlane.xlu1 %4336 }
 0xa0a   : > { %v10574_v35 = vpop.eup %7549  ;;  %4468 = vadd.xlane.f32.xlu1 %v4467_v1  ;;  %v4364_v1 = vsub.f32 %v10414_v32, %v4322_v9  ;;  %7553 = vpow2.f32 %v4396_v59  ;;  %v4369_v32 = vsub.f32 %v10451_v53, %v4337_v29 }
 0xa0b   : > { %11377 = vst [vmem:[#allocation87_spill] sm:$0xff] %v10574_v35  ;;  %v4470_v57 = vsel %vm809_vm1, %v10574_v35, 0.0  ;;  %v10578_v26 = vpop.eup %7551 }
 0xa0c   : > { %11378 = vst [vmem:[#allocation88_spill] sm:$0xff] %v10578_v26  ;;  %4471 = vadd.xlane.f32.xlu0 %v4470_v57  ;;  %v4479_v33 = vsel %vm809_vm1, %v10578_v26, 0.0  ;;  %v4328_v57 = vpop.xlane.xlu0 %4327  ;;  %v4422_v35 = vmul.f32 1.442695, %v4364_v1  ;;  %v4432_v38 = vmul.f32 1.442695, %v4369_v32 }
 0xa0d   : > { %v4331_v60 = vpop.xlane.xlu1 %4330  ;;  %v4366_v3 = vsub.f32 %v10449_v12, %v4328_v57 }
 0xa0e   : > { %4462 = vadd.xlane.f32.xlu1 %v4461_v7  ;;  %v4365_v7 = vsub.f32 %v10423_v48, %v4325_v54  ;;  %7555 = vpow2.f32 %v4422_v35  ;;  %v4367_v48 = vsub.f32 %v10457_v30, %v4331_v60  ;;  %v4430_v54 = vmul.f32 1.442695, %v4368_v0 }
 0xa10   : > { %4480 = vadd.xlane.f32.xlu0 %v4479_v33  ;;  %v4363_v33 = vsub.f32 %v10429_v24, %v4319_v4  ;;  %v4424_v26 = vmul.f32 1.442695, %v4365_v7 }
 0xa12   : > { %v4420_v39 = vmul.f32 1.442695, %v4363_v33  ;;  %7557 = vpow2.f32 %v4424_v26 }
 0xa14   : > { %7559 = vpow2.f32 %v4420_v39  ;;  %v10597_v35 = vpop.eup %7553 }
 0xa15   : > { %v4473_v12 = vsel %vm809_vm1, %v10597_v35, 0.0 }
 0xa18   : > { %v10599_v30 = vpop.eup %7555 }
 0xa19   : > { %v4512_v0 = vsel %vm809_vm1, %v10599_v30, 0.0 }
 0xa1c   : > { %v10601_v60 = vpop.eup %7557 }
 0xa1d   : > { %v4515_v7 = vsel %vm809_vm1, %v10601_v60, 0.0 }
 0xa1e   : > { %v10603_v26 = vpop.eup %7559 }
 0xa1f   : > { %4879 = vrot.lane.b32.xlu1 %v7683_v42, %s7705_s19 }
 0xa26   : > { %4877 = vrot.lane.b32.xlu0 %v7684_v37, %s7705_s19  ;;  %v4362_v37 = vsub.f32 %v10419_v2, %v4316_v11  ;;  %v4428_v2 = vmul.f32 1.442695, %v4367_v48  ;;  %v4426_v11 = vmul.f32 1.442695, %v4366_v3 }
 0xa28   : > { %v4418_v24 = vmul.f32 1.442695, %v4362_v37 }
 0xa31   : > { %v4442_v42 = vpop.xlane.xlu0 %4441 }
 0xa35   : > { %v4436_v14 = vpop.xlane.xlu0 %4435 }
 0xa36   : > { %v4445_v9 = vpop.xlane.xlu1 %4444 }
 0xa37   : > { %7561 = vrcp.f32 %v4445_v9 }
 0xa38   : > { %7563 = vrcp.f32 %v4436_v14 }
 0xa39   : > { %v4454_v4 = vpop.xlane.xlu0 %4453  ;;  %7565 = vrcp.f32 %v4442_v42 }
 0xa3a   : > { %v4439_v59 = vpop.xlane.xlu1 %4438 }
 0xa3b   : > { %7567 = vrcp.f32 %v4439_v59 }
 0xa3c   : > { %7569 = vpow2.f32 %v4418_v24 }
 0xa3d   : > { %7571 = vpow2.f32 %v4430_v54  ;;  %v4448_v53 = vpop.xlane.xlu0 %4447 }
 0xa3e   : > { %7573 = vpow2.f32 %v4432_v38  ;;  %v4457_v39 = vpop.xlane.xlu1 %4456 }
 0xa3f   : > { %7575 = vpow2.f32 %v4428_v2 }
 0xa40   : > { %7577 = vrcp.f32 %v4457_v39 }
 0xa41   : > { %7579 = vrcp.f32 %v4448_v53  ;;  %v7562_v23 = vpop.eup %7561 }
 0xa42   : > { %7581 = vrcp.f32 %v4454_v4  ;;  %v4451_v29 = vpop.xlane.xlu1 %4450  ;;  %v7564_v1 = vpop.eup %7563  ;;  %v4565_v42 = vmul.f32 %v7562_v23, %v10483_v36  ;;  %v4509_v36 = vsel %vm809_vm1, %v10603_v26, 0.0 }
 0xa43   : > { %7583 = vrcp.f32 %v4451_v29  ;;  %4474 = vadd.xlane.f32.xlu1 %v4473_v12  ;;  %v7566_v57 = vpop.eup %7565  ;;  %v4562_v14 = vmul.f32 %v7564_v1, %v10481_v52 }
 0xa44   : > { %7585 = vpow2.f32 %v4426_v11  ;;  %v4564_v48 = vmul.f32 %v7566_v57, %v10476_v6  ;;  %v11380_v57 = vld [vmem:[#allocation37_spill] sm:$0xff] }
 0xa45   : > { %v7568_v33 = vpop.eup %7567  ;;  %4516 = vadd.xlane.f32.xlu0 %v4515_v7 }
 0xa46   : > { %v10610_v37 = vpop.eup %7569  ;;  %v4563_v32 = vmul.f32 %v7568_v33, %v10489_v46  ;;  %v4595_v38 = vpack.c.bf16 %v4565_v42, %v4564_v48  ;;  %v11382_v33 = vld [vmem:[#allocation34_spill] sm:$0xff] }
 0xa47   : > { %v10616_v9 = vpop.eup %7571  ;;  %4513 = vadd.xlane.f32.xlu1 %v4512_v0  ;;  %v4506_v52 = vsel %vm809_vm1, %v10610_v37, 0.0  ;;  %v11383_v42 = vld [vmem:[#allocation38_spill] sm:$0xff]  ;;  %v11386_v0 = vpack.i.bf16 %v10142_v31, %v10137_v22  ;;  %v11394_v22 = vpack.i.bf16 %v10156_v16, %v10152_v18  ;;  %v11395_v31 = vld [vmem:[#allocation53_spill] sm:$0xff]  ;;  %v11402_v18 = vpack.i.bf16 %v10192_v10, %v10188_v5 }
 0xa48   : > { %v10619_v24 = vpop.eup %7573  ;;  %v4594_v54 = vpack.c.bf16 %v4563_v32, %v4562_v14  ;;  %v4524_v39 = vsel %vm809_vm1, %v10616_v9, 0.0  ;;  %v11387_v14 = vld [vmem:[#allocation41_spill] sm:$0xff]  ;;  %v11388_v32 = vld [vmem:[#allocation39_spill] sm:$0xff]  ;;  %v11409_v5 = vpack.i.bf16 %v10232_v17, %v10220_v58  ;;  %v11417_v58 = vld [vmem:[#allocation42_spill] sm:$0xff] }
 0xa49   : > { %v10623_v4 = vpop.eup %7575  ;;  %4510 = vadd.xlane.f32.xlu0 %v4509_v36  ;;  %v4527_v2 = vsel %vm809_vm1, %v10619_v24, 0.0  ;;  %v11389_v48 = vpack.i.bf16 %v11387_v14, %v11388_v32  ;;  %v11390_v36 = vld [vmem:[#allocation40_spill] sm:$0xff]  ;;  %v11403_v16 = vld [vmem:[#allocation57_spill] sm:$0xff] }
 0xa4a   : > { %v7578_v59 = vpop.eup %7577  ;;  %6687 = vmatprep.mubr.msk.bf16.mxu0 %vm809_vm1, %v4594_v54  ;;  %v4521_v12 = vsel %vm809_vm1, %v10623_v4, 0.0  ;;  %v11391_v54 = vld [vmem:[#allocation35_spill] sm:$0xff] }
 0xa4b   : > { %v7580_v46 = vpop.eup %7579  ;;  %4507 = vadd.xlane.f32.xlu1 %v4506_v52  ;;  %6688 = vmatmul.mubr.msk.bf16.vlgmr.msra.gmra.mrb[104].mxu0 %vm809_vm1, %v4595_v38  ;;  %v4569_v53 = vmul.f32 %v7578_v59, %v10497_v61  ;;  %v11392_v38 = vpack.i.bf16 %v11390_v36, %v11391_v54  ;;  %v11398_v52 = vld [vmem:[#allocation52_spill] sm:$0xff] }
 0xa4c   : > { %v7582_v6 = vpop.eup %7581  ;;  %6712 = vmatpush3.bf16.msra.mxu0 %v10249_v15  ;;  %v4566_v11 = vmul.f32 %v7580_v46, %v10499_v34  ;;  %v11399_v46 = vld [vmem:[#allocation50_spill] sm:$0xff] }
 0xa4d   : > { %v7584_v3 = vpop.eup %7583  ;;  %6713 = vmatprep.subr.bf16.mxu0 %v10463_v51  ;;  %4528 = vadd.xlane.f32.xlu0 %v4527_v2  ;;  %v4568_v15 = vmul.f32 %v7582_v6, %v10491_v62  ;;  %v7686_v62 = vld [vmem:[%s7743_s18 + $0x78] sm:$0xff]   ;;  %v11400_v6 = vpack.i.bf16 %v11398_v52, %v11399_v46  ;;  %v11404_v2 = vld [vmem:[#allocation55_spill] sm:$0xff] }
 0xa4e   : > { %v4567_v23 = vmul.f32 %v7584_v3, %v10505_v44  ;;  %v10638_v29 = vpop.eup %7585  ;;  %v11379_v44 = vld [vmem:[#allocation36_spill] sm:$0xff]  ;;  %v11405_v3 = vpack.i.bf16 %v11403_v16, %v11404_v2 }
 0xa4f   : > { %4525 = vadd.xlane.f32.xlu1 %v4524_v39  ;;  %v4597_v1 = vpack.c.bf16 %v4569_v53, %v4568_v15  ;;  %v4518_v34 = vsel %vm809_vm1, %v10638_v29, 0.0  ;;  %v11381_v7 = vpack.i.bf16 %v11379_v44, %v11380_v57  ;;  %v11410_v15 = vld [vmem:[#allocation75_spill] sm:$0xff]  ;;  %v11416_v57 = vld [vmem:[#allocation44_spill] sm:$0xff] }
 0xa50   : > { %6714 = vmatpush3.bf16.msra.mxu0 %v10463_v51  ;;  %v4596_v61 = vpack.c.bf16 %v4567_v23, %v4566_v11  ;;  %v7685_v51 = vld [vmem:[%s7743_s18 + $0x70] sm:$0xff]   ;;  %v11407_v23 = vld [vmem:[#allocation54_spill] sm:$0xff]  ;;  %v11418_v17 = vpack.i.bf16 %v11416_v57, %v11417_v58 }
 0xa51   : > { %6715 = vmatprep.subr.bf16.mxu0 %v10465_v21  ;;  %4522 = vadd.xlane.f32.xlu0 %v4521_v12  ;;  %v11406_v11 = vld [vmem:[#allocation56_spill] sm:$0xff]  ;;  %v11411_v12 = vld [vmem:[#allocation74_spill] sm:$0xff] }
 0xa52   : > { %6691 = vmatprep.mubr.msk.bf16.mxu0 %vm809_vm1, %v4596_v61  ;;  %v11412_v61 = vpack.i.bf16 %v11410_v15, %v11411_v12  ;;  %v11421_v57 = vld [vmem:[#allocation88_spill] sm:$0xff] }
 0xa53   : > { %4519 = vadd.xlane.f32.xlu1 %v4518_v34  ;;  %6692 = vmatmul.mubr.msk.bf16.gmra.mrb[108].mxu0 %vm809_vm1, %v4597_v1  ;;  %v11413_v1 = vld [vmem:[#allocation45_spill] sm:$0xff]  ;;  %v11414_v34 = vld [vmem:[#allocation43_spill] sm:$0xff] }
 0xa54   : > { %6716 = vmatpush3.bf16.msra.mxu0 %v10465_v21  ;;  %v11384_v21 = vpack.i.bf16 %v11382_v33, %v11383_v42 }
 0xa55   : > { %6717 = vmatprep.subr.bf16.mxu0 %v10467_v40 }
 0xa58   : > { %6718 = vmatpush3.bf16.msra.mxu0 %v10467_v40  ;;  %v11385_v40 = vpack.i.bf16 %v10147_v8, %v10139_v20  ;;  %v11393_v20 = vpack.i.bf16 %v10160_v49, %v10154_v63  ;;  %v11396_v8 = vld [vmem:[#allocation51_spill] sm:$0xff]  ;;  %v11401_v63 = vpack.i.bf16 %v10196_v47, %v10190_v41  ;;  %v11408_v41 = vpack.i.bf16 %v11406_v11, %v11407_v23  ;;  %v11420_v23 = vld [vmem:[#allocation84_spill] sm:$0xff] }
 0xa59   : > { %v11397_v59 = vpack.i.bf16 %v11395_v31, %v11396_v8 }
 0xa64   : > { %4881 = vrot.lane.b32.xlu1 %v7685_v51, %s7705_s19  ;;  %v11415_v51 = vpack.i.bf16 %v11413_v1, %v11414_v34 }
 0xa67   : > { %4883 = vrot.lane.b32.xlu0 %v7686_v62, %s7705_s19 }
 0xa68   : > { %6866 = vrot.lane.b32.xlu1 %v11381_v7, %s7706_s9 }
 0xa6b   : > { %6871 = vrot.lane.b32.xlu0 %v11384_v21, %s7706_s9 }
 0xa6c   : > { %6876 = vrot.lane.b32.xlu1 %v11385_v40, %s7707_s10 }
 0xa6f   : > { %6881 = vrot.lane.b32.xlu0 %v11386_v0, %s7707_s10 }
 0xa70   : > { %6886 = vrot.lane.b32.xlu1 %v11389_v48, %s7706_s9 }
 0xa73   : > { %6891 = vrot.lane.b32.xlu0 %v11392_v38, %s7706_s9 }
 0xa74   : > { %6896 = vrot.lane.b32.xlu1 %v11393_v20, %s7707_s10 }
 0xa77   : > { %6901 = vrot.lane.b32.xlu0 %v11394_v22, %s7707_s10 }
 0xa78   : > { %6906 = vrot.lane.b32.xlu1 %v11397_v59, %s7706_s9 }
 0xa7b   : > { %6911 = vrot.lane.b32.xlu0 %v11400_v6, %s7706_s9 }
 0xa7c   : > { %6916 = vrot.lane.b32.xlu1 %v11401_v63, %s7707_s10 }
 0xa7d   : > { %v4490_v49 = vpop.xlane.xlu0 %4489 }
 0xa7f   : > { %6921 = vrot.lane.b32.xlu0 %v11402_v18, %s7707_s10 }
 0xa80   : > { %6926 = vrot.lane.b32.xlu1 %v11405_v3, %s7706_s9 }
 0xa81   : > { %v4484_v53 = vpop.xlane.xlu0 %4483 }
 0xa82   : > { %7587 = vrcp.f32 %v4484_v53 }
 0xa83   : > { %7589 = vrcp.f32 %v4490_v49  ;;  %v4487_v39 = vpop.xlane.xlu1 %4486  ;;  %6931 = vrot.lane.b32.xlu0 %v11408_v41, %s7706_s9 }
 0xa84   : > { %7591 = vrcp.f32 %v4487_v39  ;;  %6936 = vrot.lane.b32.xlu1 %v11409_v5, %s7707_s10  ;;  %v11419_v39 = vld [vmem:[#allocation86_spill] sm:$0xff] }
 0xa85   : > { %v4493_v10 = vpop.xlane.xlu0 %4492 }
 0xa86   : > { %7593 = vrcp.f32 %v4493_v10 }
 0xa87   : > { %v4502_v47 = vpop.xlane.xlu1 %4501  ;;  %6941 = vrot.lane.b32.xlu0 %v11412_v61, %s7707_s10 }
 0xa88   : > { %6946 = vrot.lane.b32.xlu1 %v11415_v51, %s7706_s9 }
 0xa89   : > { %v4505_v62 = vpop.xlane.xlu0 %4504 }
 0xa8a   : > { %7595 = vrcp.f32 %v4505_v62 }
 0xa8b   : > { %v4496_v44 = vpop.xlane.xlu1 %4495  ;;  %6951 = vrot.lane.b32.xlu0 %v11418_v17, %s7706_s9 }
 0xa8c   : > { %v7588_v7 = vpop.eup %7587  ;;  %7597 = vrcp.f32 %v4496_v44 }
 0xa8d   : > { %v7590_v33 = vpop.eup %7589  ;;  %7599 = vrcp.f32 %v4502_v47  ;;  %v4499_v42 = vpop.xlane.xlu0 %4498  ;;  %v4578_v0 = vmul.f32 %v7588_v7, %v10522_v56  ;;  %v11422_v7 = vld [vmem:[#allocation87_spill] sm:$0xff] }
 0xa8e   : > { %v7592_v21 = vpop.eup %7591  ;;  %7601 = vrcp.f32 %v4499_v42  ;;  %v4580_v48 = vmul.f32 %v7590_v33, %v10516_v45 }
 0xa8f   : > { %v4466_v40 = vpop.xlane.xlu1 %4465  ;;  %v4579_v14 = vmul.f32 %v7592_v21, %v10529_v13  ;;  %v11423_v21 = vld [vmem:[#allocation85_spill] sm:$0xff] }
 0xa90   : > { %v7594_v32 = vpop.eup %7593 }
 0xa91   : > { %v4581_v36 = vmul.f32 %v7594_v32, %v10524_v27  ;;  %v4602_v54 = vpack.c.bf16 %v4579_v14, %v4578_v0 }
 0xa93   : > { %v4603_v38 = vpack.c.bf16 %v4581_v36, %v4580_v48  ;;  %v4460_v20 = vpop.xlane.xlu1 %4459  ;;  %6719 = vmatprep.mubr.msk.bf16.mxu0 %vm809_vm1, %v4602_v54 }
 0xa94   : > { %v7596_v22 = vpop.eup %7595 }
 0xa95   : > { %6720 = vmatmul.mubr.msk.bf16.vlgmr.msra.gmra.mrb[112].mxu0 %vm809_vm1, %v4603_v38  ;;  %v4478_v31 = vpop.xlane.xlu0 %4477  ;;  %v4585_v13 = vmul.f32 %v7596_v22, %v10539_v25 }
 0xa96   : > { %v7598_v8 = vpop.eup %7597 }
 0xa97   : > { %v7600_v59 = vpop.eup %7599  ;;  %v4469_v52 = vpop.xlane.xlu1 %4468  ;;  %v4582_v45 = vmul.f32 %v7598_v8, %v10544_v28 }
 0xa98   : > { %v7602_v56 = vpop.eup %7601  ;;  %7603 = vrcp.f32 %v4469_v52  ;;  %v4584_v6 = vmul.f32 %v7600_v59, %v10534_v55 }
 0xa99   : > { %v4472_v46 = vpop.xlane.xlu0 %4471  ;;  %v4583_v27 = vmul.f32 %v7602_v56, %v10549_v19  ;;  %7605 = vrcp.f32 %v4460_v20 }
 0xa9a   : > { %7607 = vrcp.f32 %v4466_v40  ;;  %v4605_v18 = vpack.c.bf16 %v4585_v13, %v4584_v6 }
 0xa9b   : > { %v4463_v63 = vpop.xlane.xlu1 %4462  ;;  %v4604_v49 = vpack.c.bf16 %v4583_v27, %v4582_v45 }
 0xa9c   : > { %7609 = vrcp.f32 %v4463_v63 }
 0xa9d   : > { %6723 = vmatprep.mubr.msk.bf16.mxu0 %vm809_vm1, %v4604_v49  ;;  %v4481_v16 = vpop.xlane.xlu0 %4480 }
 0xa9e   : > { %6724 = vmatmul.mubr.msk.bf16.gmra.mrb[116].mxu0 %vm809_vm1, %v4605_v18  ;;  %7611 = vrcp.f32 %v4481_v16 }
 0xa9f   : > { %v4880_v47 = vpop.permute.xlu1 %4879  ;;  %7613 = vrcp.f32 %v4472_v46 }
 0xaa0   : > { %7615 = vrcp.f32 %v4478_v31 }
 0xaa1   : > { %v4878_v25 = vpop.permute.xlu0 %4877 }
 0xaa2   : > { %6727 = vmatprep.subr.bf16.mxu1 %v4878_v25  ;;  %v7604_v2 = vpop.eup %7603 }
 0xaa3   : > { %v7606_v3 = vpop.eup %7605  ;;  %v4573_v19 = vmul.f32 %v7604_v2, %v10562_v43 }
 0xaa4   : > { %v7608_v28 = vpop.eup %7607  ;;  %v4570_v55 = vmul.f32 %v7606_v3, %v10560_v50 }
 0xaa5   : > { %v4572_v41 = vmul.f32 %v7608_v28, %v11420_v23  ;;  %v11425_v23 = vld [vmem:[#allocation11_spill] sm:$0xff] }
 0xaa6   : > { %v7610_v53 = vpop.eup %7609 }
 0xaa7   : > { %v4571_v11 = vmul.f32 %v7610_v53, %v11419_v39  ;;  %v4599_v10 = vpack.c.bf16 %v4573_v19, %v4572_v41 }
 0xaa8   : > { %v7612_v61 = vpop.eup %7611 }
 0xaa9   : > { %v4598_v5 = vpack.c.bf16 %v4571_v11, %v4570_v55  ;;  %v7614_v34 = vpop.eup %7613  ;;  %v4577_v58 = vmul.f32 %v7612_v61, %v11421_v57  ;;  %v11424_v11 = vld [vmem:[#allocation16_spill] sm:$0xff] }
 0xaaa   : > { %v7616_v51 = vpop.eup %7615  ;;  %v4574_v33 = vmul.f32 %v7614_v34, %v11422_v7 }
 0xaab   : > { %6703 = vmatprep.mubr.msk.bf16.mxu1 %vm809_vm1, %v4598_v5  ;;  %v4576_v40 = vmul.f32 %v7616_v51, %v11423_v21  ;;  %v11428_v21 = vld [vmem:[#allocation24_spill] sm:$0xff] }
 0xaac   : > { %6704 = vmatmul.mubr.msk.bf16.vlgmr.msra.gmra.mrb[120].mxu1 %vm809_vm1, %v4599_v10 }
 0xaad   : > { %6728 = vmatpush3.bf16.msra.mxu1 %v4878_v25  ;;  %v4601_v32 = vpack.c.bf16 %v4577_v58, %v4576_v40 }
 0xaae   : > { %6729 = vmatprep.subr.bf16.mxu1 %v4880_v47 }
 0xab1   : > { %6730 = vmatpush3.bf16.msra.mxu1 %v4880_v47  ;;  %v11426_v47 = vld [vmem:[#allocation17_spill] sm:$0xff] }
 0xad0   : > { %v4475_v43 = vpop.xlane.xlu1 %4474 }
 0xad1   : > { %7617 = vrcp.f32 %v4475_v43 }
 0xad2   : > { %v4517_v50 = vpop.xlane.xlu0 %4516 }
 0xad4   : > { %v4514_v15 = vpop.xlane.xlu1 %4513 }
 0xad6   : > { %v4511_v12 = vpop.xlane.xlu0 %4510 }
 0xad7   : > { %7619 = vrcp.f32 %v4511_v12 }
 0xad8   : > { %v4508_v1 = vpop.xlane.xlu1 %4507 }
 0xad9   : > { %7621 = vrcp.f32 %v4508_v1 }
 0xada   : > { %7623 = vrcp.f32 %v4514_v15  ;;  %v4529_v62 = vpop.xlane.xlu0 %4528 }
 0xadb   : > { %v7618_v44 = vpop.eup %7617  ;;  %7625 = vrcp.f32 %v4517_v50  ;;  %v11427_v50 = vld [vmem:[#allocation15_spill] sm:$0xff] }
 0xadc   : > { %v4526_v17 = vpop.xlane.xlu1 %4525  ;;  %v4575_v42 = vmul.f32 %v7618_v44, %v10597_v35 }
 0xade   : > { %v4523_v0 = vpop.xlane.xlu0 %4522  ;;  %v4600_v14 = vpack.c.bf16 %v4575_v42, %v4574_v33 }
 0xadf   : > { %7627 = vrcp.f32 %v4523_v0  ;;  %v11429_v0 = vld [vmem:[#allocation22_spill] sm:$0xff] }
 0xae0   : > { %v4520_v48 = vpop.xlane.xlu1 %4519  ;;  %6707 = vmatprep.mubr.msk.bf16.mxu1 %vm809_vm1, %v4600_v14 }
 0xae1   : > { %v7620_v36 = vpop.eup %7619  ;;  %7629 = vrcp.f32 %v4520_v48  ;;  %6708 = vmatmul.mubr.msk.bf16.gmra.mrb[124].mxu1 %vm809_vm1, %v4601_v32 }
 0xae2   : > { %7631 = vrcp.f32 %v4526_v17  ;;  %v4884_v54 = vpop.permute.xlu0 %4883  ;;  %v4587_v31 = vmul.f32 %v7620_v36, %v10603_v26 }
 0xae3   : > { %v7622_v38 = vpop.eup %7621  ;;  %7633 = vrcp.f32 %v4529_v62 }
 0xae4   : > { %v7624_v20 = vpop.eup %7623  ;;  %v4882_v22 = vpop.permute.xlu1 %4881  ;;  %v4586_v35 = vmul.f32 %v7622_v38, %v10610_v37 }
 0xae5   : > { %6731 = vmatprep.subr.bf16.mxu1 %v4882_v22  ;;  %v7626_v8 = vpop.eup %7625  ;;  %v4588_v56 = vmul.f32 %v7624_v20, %v10599_v30  ;;  %v11431_v20 = vld [vmem:[#allocation23_spill] sm:$0xff] }
 0xae6   : > { %6732 = vmatpush3.bf16.msra.mxu1 %v4882_v22  ;;  %v10754_v59 = vpop.permute.xlu0 %6871  ;;  %v4606_v52 = vpack.c.bf16 %v4587_v31, %v4586_v35  ;;  %v4589_v45 = vmul.f32 %v7626_v8, %v10601_v60 }
 0xae7   : > { %6733 = vmatprep.subr.bf16.mxu1 %v4884_v54 }
 0xae8   : > { %v10757_v13 = vpop.permute.xlu1 %6866  ;;  %6735 = vmatprep.mubr.msk.bf16.mxu1 %vm809_vm1, %v4606_v52  ;;  %v4607_v27 = vpack.c.bf16 %v4589_v45, %v4588_v56 }
 0xae9   : > { %v7628_v46 = vpop.eup %7627 }
 0xaea   : > { %6734 = vmatpush3.bf16.msra.mxu1 %v4884_v54  ;;  %v10761_v37 = vpop.permute.xlu0 %6881  ;;  %v4591_v30 = vmul.f32 %v7628_v46, %v10623_v4  ;;  %v11430_v54 = vld [vmem:[#allocation25_spill] sm:$0xff] }
 0xaeb   : > { %v7630_v26 = vpop.eup %7629 }
 0xaec   : > { %v7632_v6 = vpop.eup %7631  ;;  %v10763_v63 = vpop.permute.xlu1 %6876  ;;  %v4590_v49 = vmul.f32 %v7630_v26, %v10638_v29 }
 0xaed   : > { %6736 = vmatmul.mubr.msk.bf16.vlgmr.msra.gmra.mrb[128].mxu1 %vm809_vm1, %v4607_v27  ;;  %v7634_v18 = vpop.eup %7633  ;;  %v4592_v60 = vmul.f32 %v7632_v6, %v10616_v9  ;;  %v7121_v6 = vld [vmem:[%s11156_s2] sm:$0xff]  }
 0xaee   : > { %v10768_v16 = vpop.permute.xlu0 %6891  ;;  %v4608_v25 = vpack.c.bf16 %v4591_v30, %v4590_v49  ;;  %v4593_v3 = vmul.f32 %v7634_v18, %v10619_v24  ;;  %6743 = vmatprep.subr.bf16.mxu0 %v7121_v6  ;;  %v7122_v49 = vld [vmem:[%s11156_s2 + $0x8] sm:$0xff]  }
 0xaef   : > { %6744 = vmatpush3.bf16.msra.mxu0 %v7121_v6  ;;  %v6884_v6 = vunpack.i.h.bf16 %v10761_v37 }
 0xaf0   : > { %v10771_v2 = vpop.permute.xlu1 %6886  ;;  %6739 = vmatprep.mubr.msk.bf16.mxu1 %vm809_vm1, %v4608_v25  ;;  %v4609_v53 = vpack.c.bf16 %v4593_v3, %v4592_v60  ;;  %6745 = vmatprep.subr.bf16.mxu0 %v7122_v49 }
 0xaf2   : > { %v10775_v28 = vpop.permute.xlu0 %6901 }
 0xaf3   : > { %6746 = vmatpush3.bf16.msra.mxu0 %v7122_v49  ;;  %v6883_v49 = vunpack.i.l.bf16 %v10761_v37 }
 0xaf4   : > { %v10777_v29 = vpop.permute.xlu1 %6896 }
 0xaf5   : > { %6740 = vmatmul.mubr.msk.bf16.gmra.mrb[132].mxu1 %vm809_vm1, %v4609_v53 }
 0xaf6   : > { %v6912_v4 = vpop.permute.xlu0 %6911 }
 0xaf7   : > { %v6914_v19 = vunpack.i.h.bf16 %v6912_v4  ;;  %v6913_v55 = vunpack.i.l.bf16 %v6912_v4 }
 0xaf8   : > { %v6907_v39 = vpop.permute.xlu1 %6906 }
 0xaf9   : > { %v5361_v9 = vsel %vm368_vm0, %v11424_v11, %v6914_v19  ;;  %v5360_v41 = vsel %vm368_vm0, %v11425_v23, %v6913_v55  ;;  %v6909_v5 = vunpack.i.h.bf16 %v6907_v39  ;;  %v6908_v10 = vunpack.i.l.bf16 %v6907_v39  ;;  %v11432_v19 = vld [vmem:[#allocation72_spill] sm:$0xff]  ;;  %v11433_v55 = vld [vmem:[#allocation66_spill] sm:$0xff]  ;;  %v11436_v23 = vld [vmem:[#allocation71_spill] sm:$0xff] }
 0xafa   : > { %v6922_v24 = vpop.permute.xlu0 %6921  ;;  %v11434_v39 = vpack.i.bf16 %v11432_v19, %v11433_v55  ;;  %v11446_v19 = vld [vmem:[#allocation5_spill] sm:$0xff] }
 0xafb   : > { %v5359_v43 = vsel %vm368_vm0, %v11426_v47, %v6909_v5  ;;  %v5358_v15 = vsel %vm368_vm0, %v11427_v50, %v6908_v10  ;;  %v6924_v12 = vunpack.i.h.bf16 %v6922_v24  ;;  %v6923_v61 = vunpack.i.l.bf16 %v6922_v24 }
 0xafc   : > { %v6917_v1 = vpop.permute.xlu1 %6916 }
 0xafd   : > { %v10789_v34 = vsel %vm5382_vm2, %v5360_v41, %v6923_v61  ;;  %v10792_v51 = vsel %vm5382_vm2, %v5361_v9, %v6924_v12  ;;  %v6919_v62 = vunpack.i.h.bf16 %v6917_v1  ;;  %v6918_v44 = vunpack.i.l.bf16 %v6917_v1  ;;  %v11435_v9 = vld [vmem:[#allocation70_spill] sm:$0xff] }
 0xafe   : > { %v6932_v57 = vpop.permute.xlu0 %6931  ;;  %v11437_v41 = vpack.i.bf16 %v11435_v9, %v11436_v23  ;;  %v6894_v23 = vunpack.i.h.bf16 %v10768_v16 }
 0xaff   : > { %v10795_v58 = vsel %vm5382_vm2, %v5358_v15, %v6918_v44  ;;  %v10798_v17 = vsel %vm5382_vm2, %v5359_v43, %v6919_v62  ;;  %v6934_v7 = vunpack.i.h.bf16 %v6932_v57  ;;  %v6933_v33 = vunpack.i.l.bf16 %v6932_v57 }
 0xb00   : > { %v6927_v42 = vpop.permute.xlu1 %6926 }
 0xb01   : > { %v5365_v40 = vsel %vm368_vm0, %v11428_v21, %v6934_v7  ;;  %v5364_v14 = vsel %vm368_vm0, %v11429_v0, %v6933_v33  ;;  %v6929_v32 = vunpack.i.h.bf16 %v6927_v42  ;;  %v6928_v48 = vunpack.i.l.bf16 %v6927_v42 }
 0xb02   : > { %v6942_v36 = vpop.permute.xlu0 %6941 }
 0xb03   : > { %v5363_v38 = vsel %vm368_vm0, %v11430_v54, %v6929_v32  ;;  %v5362_v22 = vsel %vm368_vm0, %v11431_v20, %v6928_v48  ;;  %v6944_v35 = vunpack.i.h.bf16 %v6942_v36  ;;  %v6943_v31 = vunpack.i.l.bf16 %v6942_v36  ;;  %v11438_v36 = vld [vmem:[#allocation48_spill] sm:$0xff]  ;;  %v11439_v54 = vld [vmem:[#allocation46_spill] sm:$0xff]  ;;  %v11441_v20 = vld [vmem:[#allocation49_spill] sm:$0xff] }
 0xb04   : > { %v6937_v8 = vpop.permute.xlu1 %6936 }
 0xb05   : > { %v10809_v52 = vsel %vm5382_vm2, %v5364_v14, %v6943_v31  ;;  %v10812_v56 = vsel %vm5382_vm2, %v5365_v40, %v6944_v35  ;;  %v6939_v46 = vunpack.i.h.bf16 %v6937_v8  ;;  %v6938_v45 = vunpack.i.l.bf16 %v6937_v8 }
 0xb06   : > { %v6874_v31 = vunpack.i.h.bf16 %v10754_v59  ;;  %v6873_v8 = vunpack.i.l.bf16 %v10754_v59 }
 0xb07   : > { %v10815_v26 = vsel %vm5382_vm2, %v5362_v22, %v6938_v45  ;;  %v10818_v27 = vsel %vm5382_vm2, %v5363_v38, %v6939_v46  ;;  %v11440_v38 = vpack.i.bf16 %v11438_v36, %v11439_v54  ;;  %v11442_v22 = vld [vmem:[#allocation47_spill] sm:$0xff]  ;;  %v6869_v46 = vunpack.i.h.bf16 %v10757_v13 }
 0xb08   : > { %v11443_v35 = vpack.i.bf16 %v11441_v20, %v11442_v22  ;;  %v6868_v45 = vunpack.i.l.bf16 %v10757_v13  ;;  %v6947_v59 = vpop.permute.xlu1 %6946  ;;  %v11447_v13 = vld [vmem:[#allocation6_spill] sm:$0xff] }
 0xb09   : > { %v5351_v55 = vsel %vm368_vm0, %v11446_v19, %v6869_v46  ;;  %v11453_v19 = vld [vmem:[#allocation4_spill] sm:$0xff] }
 0xb1e   : > { %v6689_v30 = vpop.f32.mrb[104].mxu0 }
 0xb1f   : > { %v4668_v18 = vpop.f32.mrb[105].mxu0 }
 0xb20   : > { %v6690_v25 = vpop.f32.mrb[106].mxu0 }
 0xb21   : > { %v6955_v60 = vpack.i.bf16 %v6690_v25, %v6689_v30  ;;  %v4671_v3 = vpop.f32.mrb[107].mxu0  ;;  %v6879_v30 = vunpack.i.h.bf16 %v10763_v63  ;;  %v6952_v25 = vpop.permute.xlu0 %6951 }
 0xb22   : > { %v6960_v53 = vpack.i.bf16 %v4671_v3, %v4668_v18  ;;  %v6878_v18 = vunpack.i.l.bf16 %v10763_v63 }
 0xb23   : > { %6956 = vrot.lane.b32.xlu0 %v6955_v60, %s7708_s15  ;;  %v11444_v60 = vld [vmem:[#allocation7_spill] sm:$0xff]  ;;  %v5384_v9 = vsel %vm5382_vm2, %v5351_v55, %v6879_v30 }
 0xb24   : > { %6961 = vrot.lane.b32.xlu1 %v6960_v53, %s7708_s15  ;;  %v5353_v3 = vsel %vm368_vm0, %v11444_v60, %v6874_v31  ;;  %v11445_v53 = vld [vmem:[#allocation10_spill] sm:$0xff]  ;;  %v11451_v60 = vld [vmem:[#allocation12_spill] sm:$0xff] }
 0xb26   : > { %v6693_v4 = vpop.f32.mrb[108].mxu0 }
 0xb27   : > { %6971 = vrot.lane.b32.xlu0 %v11434_v39, %s7707_s10  ;;  %v4684_v11 = vpop.f32.mrb[109].mxu0  ;;  %v5350_v39 = vsel %vm368_vm0, %v11447_v13, %v6868_v45  ;;  %v11449_v45 = vld [vmem:[#allocation3_spill] sm:$0xff] }
 0xb28   : > { %6966 = vrot.lane.b32.xlu1 %v11437_v41, %s7707_s10  ;;  %v6694_v5 = vpop.f32.mrb[110].mxu0  ;;  %v5383_v63 = vsel %vm5382_vm2, %v5350_v39, %v6878_v18  ;;  %v6893_v41 = vunpack.i.l.bf16 %v10768_v16  ;;  %v6949_v16 = vunpack.i.h.bf16 %v6947_v59  ;;  %v11450_v18 = vld [vmem:[#allocation8_spill] sm:$0xff] }
 0xb29   : > { %v6975_v10 = vpack.i.bf16 %v6694_v5, %v6693_v4  ;;  %v4687_v24 = vpop.f32.mrb[111].mxu0  ;;  %v5352_v4 = vsel %vm368_vm0, %v11445_v53, %v6873_v8  ;;  %v6889_v5 = vunpack.i.h.bf16 %v10771_v2  ;;  %v11448_v8 = vld [vmem:[#allocation13_spill] sm:$0xff] }
 0xb2a   : > { %v6980_v47 = vpack.i.bf16 %v4687_v24, %v4684_v11  ;;  %v5385_v37 = vsel %vm5382_vm2, %v5352_v4, %v6883_v49  ;;  %v5386_v11 = vsel %vm5382_vm2, %v5353_v3, %v6884_v6  ;;  %v6904_v24 = vunpack.i.h.bf16 %v10775_v28  ;;  %v11452_v4 = vld [vmem:[#allocation2_spill] sm:$0xff] }
 0xb2b   : > { %6976 = vrot.lane.b32.xlu0 %v6975_v10, %s7708_s15  ;;  %v6888_v10 = vunpack.i.l.bf16 %v10771_v2  ;;  %v5356_v55 = vsel %vm368_vm0, %v11453_v19, %v6893_v41  ;;  %v11472_v19 = vld [vmem:[#allocation77_spill] sm:$0xff] }
 0xb2c   : > { %6981 = vrot.lane.b32.xlu1 %v6980_v47, %s7708_s15 }
 0xb68   : > { %v6721_v43 = vpop.f32.mrb[112].mxu0 }
 0xb69   : > { %v4846_v50 = vpop.f32.mrb[113].mxu0 }
 0xb6a   : > { %v6722_v15 = vpop.f32.mrb[114].mxu0 }
 0xb6b   : > { %v6985_v12 = vpack.i.bf16 %v6722_v15, %v6721_v43  ;;  %v4849_v61 = vpop.f32.mrb[115].mxu0  ;;  %v6903_v43 = vunpack.i.l.bf16 %v10775_v28 }
 0xb6c   : > { %v6990_v1 = vpack.i.bf16 %v4849_v61, %v4846_v50  ;;  %v6899_v50 = vunpack.i.h.bf16 %v10777_v29 }
 0xb6d   : > { %6986 = vrot.lane.b32.xlu0 %v6985_v12, %s7708_s15  ;;  %v5389_v41 = vsel %vm5382_vm2, %v5356_v55, %v6903_v43 }
 0xb6e   : > { %6991 = vrot.lane.b32.xlu1 %v6990_v1, %s7708_s15  ;;  %v6954_v1 = vunpack.i.h.bf16 %v6952_v25 }
 0xb70   : > { %v5369_v46 = vsel %vm368_vm0, %v11448_v8, %v6954_v1 }
 0xb71   : > { %v10840_v62 = vpop.f32.mrb[116].mxu0 }
 0xb72   : > { %v10842_v44 = vpop.f32.mrb[117].mxu0 }
 0xb73   : > { %v10844_v57 = vpop.f32.mrb[118].mxu0 }
 0xb74   : > { %v7040_v7 = vpack.i.bf16 %v10844_v57, %v10840_v62  ;;  %v10848_v33 = vpop.f32.mrb[119].mxu0 }
 0xb75   : > { %v7035_v42 = vpack.i.bf16 %v10848_v33, %v10842_v44 }
 0xb7f   : > { %v6705_v21 = vpop.f32.mrb[120].mxu1 }
 0xb80   : > { %v4757_v40 = vpop.f32.mrb[121].mxu1 }
 0xb81   : > { %v6706_v0 = vpop.f32.mrb[122].mxu1 }
 0xb82   : > { %v6995_v14 = vpack.i.bf16 %v6706_v0, %v6705_v21  ;;  %v4760_v32 = vpop.f32.mrb[123].mxu1  ;;  %v6953_v21 = vunpack.i.l.bf16 %v6952_v25  ;;  %v5367_v25 = vsel %vm368_vm0, %v11450_v18, %v6949_v16  ;;  %v11462_v18 = vld [vmem:[#allocation60_spill] sm:$0xff] }
 0xb83   : > { %v7000_v48 = vpack.i.bf16 %v4760_v32, %v4757_v40 }
 0xb84   : > { %6996 = vrot.lane.b32.xlu0 %v6995_v14, %s7708_s15  ;;  %v6948_v14 = vunpack.i.l.bf16 %v6947_v59  ;;  %v5368_v6 = vsel %vm368_vm0, %v11449_v45, %v6953_v21  ;;  %v5357_v59 = vsel %vm368_vm0, %v11452_v4, %v6894_v23  ;;  %v11466_v4 = vld [vmem:[#allocation59_spill] sm:$0xff] }
 0xb85   : > { %7001 = vrot.lane.b32.xlu1 %v7000_v48, %s7708_s15 }
 0xb86   : > { %v5366_v3 = vsel %vm368_vm0, %v11451_v60, %v6948_v14 }
 0xb88   : > { %7011 = vrot.lane.b32.xlu0 %v11440_v38, %s7706_s9  ;;  %v6898_v38 = vunpack.i.l.bf16 %v10777_v29 }
 0xb89   : > { %7006 = vrot.lane.b32.xlu1 %v11443_v35, %s7706_s9 }
 0xb95   : > { %v6957_v47 = vpop.permute.xlu0 %6956 }
 0xb96   : > { %v6959_v15 = vunpack.i.h.bf16 %v6957_v47  ;;  %v6958_v12 = vunpack.i.l.bf16 %v6957_v47  ;;  %v6962_v61 = vpop.permute.xlu1 %6961 }
 0xb97   : > { %v6964_v40 = vunpack.i.h.bf16 %v6962_v61  ;;  %v6963_v0 = vunpack.i.l.bf16 %v6962_v61  ;;  %v5390_v61 = vsel %vm5382_vm2, %v5357_v59, %v6904_v24  ;;  %v11469_v59 = vld [vmem:[#allocation76_spill] sm:$0xff] }
 0xb98   : > { %v5418_v32 = vsel %vm5415_vm3, %v5385_v37, %v6958_v12  ;;  %v5419_v2 = vsel %vm5415_vm3, %v5386_v11, %v6959_v15  ;;  %v11454_v11 = vld [vmem:[#allocation9_spill] sm:$0xff] }
 0xb99   : > { %v5449_v48 = vpack.c.bf16 %v5419_v2, %v5418_v32  ;;  %v5417_v36 = vsel %vm5415_vm3, %v5384_v9, %v6964_v40  ;;  %v5416_v28 = vsel %vm5415_vm3, %v5383_v63, %v6963_v0  ;;  %v6972_v54 = vpop.permute.xlu0 %6971  ;;  %v5355_v63 = vsel %vm368_vm0, %v11454_v11, %v6889_v5  ;;  %v11455_v9 = vld [vmem:[#allocation14_spill] sm:$0xff] }
 0xb9a   : > { %v5448_v20 = vpack.c.bf16 %v5417_v36, %v5416_v28  ;;  %v6974_v22 = vunpack.i.h.bf16 %v6972_v54  ;;  %v6973_v35 = vunpack.i.l.bf16 %v6972_v54  ;;  %v6967_v31 = vpop.permute.xlu1 %6966  ;;  %v5354_v47 = vsel %vm368_vm0, %v11455_v9, %v6888_v10  ;;  %v11456_v54 = vld [vmem:[#allocation69_spill] sm:$0xff] }
 0xb9b   : > { %v6969_v49 = vunpack.i.h.bf16 %v6967_v31  ;;  %v6968_v30 = vunpack.i.l.bf16 %v6967_v31  ;;  %v5387_v40 = vsel %vm5382_vm2, %v5354_v47, %v6898_v38  ;;  %v5388_v0 = vsel %vm5382_vm2, %v5355_v63, %v6899_v50  ;;  %v11457_v38 = vld [vmem:[#allocation67_spill] sm:$0xff]  ;;  %v11474_v47 = vld [vmem:[#allocation64_spill] sm:$0xff] }
 0xb9c   : > { %v10903_v29 = vsel %vm5382_vm2, %v5368_v6, %v6973_v35  ;;  %v10906_v53 = vsel %vm5382_vm2, %v5369_v46, %v6974_v22  ;;  %6747 = vmatprep.mubr.msk.bf16.mxu0 %vm5480_vm4, %v5448_v20  ;;  %v11458_v20 = vpack.i.bf16 %v11456_v54, %v11457_v38  ;;  %v11459_v22 = vld [vmem:[#allocation73_spill] sm:$0xff]  ;;  %v11460_v35 = vld [vmem:[#allocation68_spill] sm:$0xff] }
 0xb9d   : > { %v10914_v13 = vsel %vm5382_vm2, %v5367_v25, %v6969_v49  ;;  %v10917_v39 = vsel %vm5382_vm2, %v5366_v3, %v6968_v30  ;;  %v6977_v37 = vpop.permute.xlu0 %6976  ;;  %6748 = vmatmul.mubr.msk.bf16.vlgmr.msra.gmra.mrb[120].mxu0 %vm5480_vm4, %v5449_v48  ;;  %v11461_v31 = vpack.i.bf16 %v11459_v22, %v11460_v35  ;;  %v11463_v25 = vld [vmem:[#allocation58_spill] sm:$0xff]  ;;  %v11465_v3 = vld [vmem:[#allocation61_spill] sm:$0xff] }
 0xb9e   : > { %v6979_v15 = vunpack.i.h.bf16 %v6977_v37  ;;  %v6978_v23 = vunpack.i.l.bf16 %v6977_v37  ;;  %v6982_v12 = vpop.permute.xlu1 %6981  ;;  %v11464_v60 = vpack.i.bf16 %v11462_v18, %v11463_v25  ;;  %v11467_v62 = vpack.i.bf16 %v11465_v3, %v11466_v4 }
 0xb9f   : > { %v6984_v1 = vunpack.i.h.bf16 %v6982_v12  ;;  %v6983_v21 = vunpack.i.l.bf16 %v6982_v12  ;;  %v11477_v12 = vld [vmem:[#allocation65_spill] sm:$0xff] }
 0xba0   : > { %v5422_v16 = vsel %vm5415_vm3, %v5389_v41, %v6978_v23  ;;  %v5423_v5 = vsel %vm5415_vm3, %v5390_v61, %v6979_v15  ;;  %v11475_v15 = vld [vmem:[#allocation62_spill] sm:$0xff]  ;;  %v11478_v41 = vld [vmem:[#allocation63_spill] sm:$0xff] }
 0xba1   : > { %v5451_v14 = vpack.c.bf16 %v5423_v5, %v5422_v16  ;;  %v5421_v10 = vsel %vm5415_vm3, %v5388_v0, %v6984_v1  ;;  %v5420_v32 = vsel %vm5415_vm3, %v5387_v40, %v6983_v21  ;;  %v11476_v23 = vpack.i.bf16 %v11474_v47, %v11475_v15  ;;  %v11480_v1 = vld [vmem:[#allocation82_spill] sm:$0xff]  ;;  %v11481_v21 = vld [vmem:[#allocation80_spill] sm:$0xff]  ;;  %v11483_v0 = vld [vmem:[#allocation83_spill] sm:$0xff] }
 0xba2   : > { %v5450_v2 = vpack.c.bf16 %v5421_v10, %v5420_v32  ;;  %v11479_v61 = vpack.i.bf16 %v11477_v12, %v11478_v41  ;;  %v11482_v40 = vpack.i.bf16 %v11480_v1, %v11481_v21  ;;  %v11484_v16 = vld [vmem:[#allocation81_spill] sm:$0xff]  ;;  %v11487_v47 = vld [vmem:[#allocation18_spill] sm:$0xff]  ;;  %v11489_v12 = vld [vmem:[#allocation19_spill] sm:$0xff] }
 0xba3   : > { %v11485_v5 = vpack.i.bf16 %v11483_v0, %v11484_v16 }
 0xba4   : > { %6751 = vmatprep.mubr.msk.bf16.mxu0 %vm5480_vm4, %v5450_v2 }
 0xba5   : > { %6752 = vmatmul.mubr.msk.bf16.gmra.mrb[124].mxu0 %vm5480_vm4, %v5451_v14 }
 0xbb4   : > { %v6709_v24 = vpop.f32.mrb[124].mxu1 }
 0xbb5   : > { %v4773_v43 = vpop.f32.mrb[125].mxu1 }
 0xbb6   : > { %v6710_v48 = vpop.f32.mrb[126].mxu1 }
 0xbb7   : > { %v7015_v36 = vpack.i.bf16 %v6710_v48, %v6709_v24  ;;  %v4776_v28 = vpop.f32.mrb[127].mxu1 }
 0xbb8   : > { %v7020_v50 = vpack.i.bf16 %v4776_v28, %v4773_v43 }
 0xbb9   : > { %7016 = vrot.lane.b32.xlu0 %v7015_v36, %s7708_s15 }
 0xbba   : > { %7021 = vrot.lane.b32.xlu1 %v7020_v50, %s7708_s15 }
 0xbbd   : > { %7031 = vrot.lane.b32.xlu0 %v11458_v20, %s7707_s10 }
 0xbbe   : > { %7026 = vrot.lane.b32.xlu1 %v11461_v31, %s7707_s10 }
 0xbc0   : > { %v6737_v8 = vpop.f32.mrb[128].mxu1 }
 0xbc1   : > { %7041 = vrot.lane.b32.xlu0 %v7040_v7, %s7708_s15  ;;  %v4935_v46 = vpop.f32.mrb[129].mxu1  ;;  %v11468_v7 = vld [vmem:[#allocation78_spill] sm:$0xff] }
 0xbc2   : > { %7036 = vrot.lane.b32.xlu1 %v7035_v42, %s7708_s15  ;;  %v6738_v45 = vpop.f32.mrb[130].mxu1  ;;  %v11470_v44 = vpack.i.bf16 %v11468_v7, %v11469_v59  ;;  %v11471_v42 = vld [vmem:[#allocation79_spill] sm:$0xff] }
 0xbc3   : > { %v7075_v6 = vpack.i.bf16 %v6738_v45, %v6737_v8  ;;  %v4938_v49 = vpop.f32.mrb[131].mxu1  ;;  %v11473_v55 = vpack.i.bf16 %v11471_v42, %v11472_v19 }
 0xbc4   : > { %v7080_v30 = vpack.i.bf16 %v4938_v49, %v4935_v46 }
 0xbc5   : > { %7051 = vrot.lane.b32.xlu0 %v11464_v60, %s7706_s9 }
 0xbc6   : > { %7046 = vrot.lane.b32.xlu1 %v11467_v62, %s7706_s9 }
 0xbc8   : > { %v6741_v57 = vpop.f32.mrb[132].mxu1 }
 0xbc9   : > { %7061 = vrot.lane.b32.xlu0 %v11470_v44, %s7707_s10  ;;  %v4951_v33 = vpop.f32.mrb[133].mxu1 }
 0xbca   : > { %7056 = vrot.lane.b32.xlu1 %v11473_v55, %s7707_s10  ;;  %v6742_v37 = vpop.f32.mrb[134].mxu1 }
 0xbcb   : > { %v7100_v11 = vpack.i.bf16 %v6742_v37, %v6741_v57  ;;  %v4954_v63 = vpop.f32.mrb[135].mxu1 }
 0xbcc   : > { %v7095_v9 = vpack.i.bf16 %v4954_v63, %v4951_v33 }
 0xbcd   : > { %7071 = vrot.lane.b32.xlu0 %v11476_v23, %s7706_s9 }
 0xbce   : > { %7066 = vrot.lane.b32.xlu1 %v11479_v61, %s7706_s9 }
 0xbd1   : > { %7076 = vrot.lane.b32.xlu0 %v7075_v6, %s7708_s15 }
 0xbd2   : > { %7081 = vrot.lane.b32.xlu1 %v7080_v30, %s7708_s15 }
 0xbd5   : > { %7091 = vrot.lane.b32.xlu0 %v11482_v40, %s7707_s10 }
 0xbd6   : > { %7086 = vrot.lane.b32.xlu1 %v11485_v5, %s7707_s10 }
 0xbd9   : > { %7101 = vrot.lane.b32.xlu0 %v7100_v11, %s7708_s15 }
 0xbda   : > { %7096 = vrot.lane.b32.xlu1 %v7095_v9, %s7708_s15 }
 0xbdf   : > { %v6987_v14 = vpop.permute.xlu0 %6986 }
 0xbe0   : > { %v6989_v10 = vunpack.i.h.bf16 %v6987_v14  ;;  %v6988_v32 = vunpack.i.l.bf16 %v6987_v14  ;;  %v6992_v2 = vpop.permute.xlu1 %6991 }
 0xbe1   : > { %v6994_v24 = vunpack.i.h.bf16 %v6992_v2  ;;  %v6993_v43 = vunpack.i.l.bf16 %v6992_v2 }
 0xbe2   : > { %v10990_v48 = vsel %vm5415_vm3, %v10903_v29, %v6988_v32  ;;  %v10994_v36 = vsel %vm5415_vm3, %v10906_v53, %v6989_v10 }
 0xbe3   : > { %v5457_v28 = vpack.c.bf16 %v10994_v36, %v10990_v48  ;;  %v5433_v50 = vsel %vm5415_vm3, %v10914_v13, %v6994_v24  ;;  %v5432_v54 = vsel %vm5415_vm3, %v10917_v39, %v6993_v43  ;;  %v11492_v36 = vld [vmem:[#allocation29_spill] sm:$0xff] }
 0xbe4   : > { %v5456_v38 = vpack.c.bf16 %v5433_v50, %v5432_v54 }
 0xbf6   : > { %v6997_v20 = vpop.permute.xlu0 %6996 }
 0xbf7   : > { %v6999_v22 = vunpack.i.h.bf16 %v6997_v20  ;;  %v6998_v35 = vunpack.i.l.bf16 %v6997_v20  ;;  %v7002_v31 = vpop.permute.xlu1 %7001 }
 0xbf8   : > { %v7004_v29 = vunpack.i.h.bf16 %v7002_v31  ;;  %v7003_v8 = vunpack.i.l.bf16 %v7002_v31 }
 0xbf9   : > { %v5426_v53 = vsel %vm5415_vm3, %v10789_v34, %v6998_v35  ;;  %v5427_v46 = vsel %vm5415_vm3, %v10792_v51, %v6999_v22 }
 0xbfa   : > { %v5453_v45 = vpack.c.bf16 %v5427_v46, %v5426_v53  ;;  %v5425_v13 = vsel %vm5415_vm3, %v10798_v17, %v7004_v29  ;;  %v5424_v39 = vsel %vm5415_vm3, %v10795_v58, %v7003_v8  ;;  %v7012_v49 = vpop.permute.xlu0 %7011 }
 0xbfb   : > { %v5452_v6 = vpack.c.bf16 %v5425_v13, %v5424_v39  ;;  %v7007_v30 = vpop.permute.xlu1 %7006  ;;  %v7014_v4 = vunpack.i.h.bf16 %v7012_v49  ;;  %v7013_v62 = vunpack.i.l.bf16 %v7012_v49 }
 0xbfc   : > { %v7009_v33 = vunpack.i.h.bf16 %v7007_v30  ;;  %v7008_v42 = vunpack.i.l.bf16 %v7007_v30  ;;  %v11490_v30 = vld [vmem:[#allocation28_spill] sm:$0xff] }
 0xbfd   : > { %6755 = vmatprep.mubr.msk.bf16.mxu0 %vm5480_vm4, %v5452_v6 }
 0xbfe   : > { %6756 = vmatmul.mubr.msk.bf16.gmra.mrb[128].mxu0 %vm5480_vm4, %v5453_v45  ;;  %v5370_v41 = vsel %vm368_vm0, %v11489_v12, %v7008_v42 }
 0xc2b   : > { %v7017_v18 = vpop.permute.xlu0 %7016 }
 0xc2c   : > { %v7019_v25 = vunpack.i.h.bf16 %v7017_v18  ;;  %v7018_v34 = vunpack.i.l.bf16 %v7017_v18  ;;  %v7022_v60 = vpop.permute.xlu1 %7021 }
 0xc2d   : > { %v7024_v3 = vunpack.i.h.bf16 %v7022_v60  ;;  %v7023_v51 = vunpack.i.l.bf16 %v7022_v60  ;;  %v11493_v60 = vld [vmem:[#allocation27_spill] sm:$0xff] }
 0xc2e   : > { %v5430_v17 = vsel %vm5415_vm3, %v10809_v52, %v7018_v34  ;;  %v5431_v58 = vsel %vm5415_vm3, %v10812_v56, %v7019_v25  ;;  %v11486_v56 = vld [vmem:[#allocation20_spill] sm:$0xff]  ;;  %v11491_v25 = vld [vmem:[#allocation26_spill] sm:$0xff] }
 0xc2f   : > { %v5455_v57 = vpack.c.bf16 %v5431_v58, %v5430_v17  ;;  %v5429_v7 = vsel %vm5415_vm3, %v10818_v27, %v7024_v3  ;;  %v5428_v59 = vsel %vm5415_vm3, %v10815_v26, %v7023_v51  ;;  %v7032_v44 = vpop.permute.xlu0 %7031  ;;  %v5373_v9 = vsel %vm368_vm0, %v11486_v56, %v7014_v4  ;;  %v11488_v26 = vld [vmem:[#allocation21_spill] sm:$0xff] }
 0xc30   : > { %v5454_v19 = vpack.c.bf16 %v5429_v7, %v5428_v59  ;;  %v7027_v55 = vpop.permute.xlu1 %7026  ;;  %v7034_v37 = vunpack.i.h.bf16 %v7032_v44  ;;  %v7033_v11 = vunpack.i.l.bf16 %v7032_v44  ;;  %v5372_v27 = vsel %vm368_vm0, %v11487_v47, %v7013_v62 }
 0xc31   : > { %v7029_v63 = vunpack.i.h.bf16 %v7027_v55  ;;  %v7028_v52 = vunpack.i.l.bf16 %v7027_v55  ;;  %v5371_v23 = vsel %vm368_vm0, %v11488_v26, %v7009_v33 }
 0xc32   : > { %6759 = vmatprep.mubr.msk.bf16.mxu0 %vm5480_vm4, %v5454_v19  ;;  %v5405_v40 = vsel %vm5382_vm2, %v5372_v27, %v7033_v11  ;;  %v5406_v0 = vsel %vm5382_vm2, %v5373_v9, %v7034_v37 }
 0xc33   : > { %v7042_v15 = vpop.permute.xlu0 %7041  ;;  %6760 = vmatmul.mubr.msk.bf16.gmra.mrb[132].mxu0 %vm5480_vm4, %v5455_v57  ;;  %v5404_v14 = vsel %vm5382_vm2, %v5371_v23, %v7029_v63  ;;  %v5403_v10 = vsel %vm5382_vm2, %v5370_v41, %v7028_v52  ;;  %v11494_v41 = vld [vmem:[#allocation32_spill] sm:$0xff] }
 0xc34   : > { %v7044_v61 = vunpack.i.h.bf16 %v7042_v15  ;;  %v7043_v1 = vunpack.i.l.bf16 %v7042_v15  ;;  %v7037_v21 = vpop.permute.xlu1 %7036  ;;  %6763 = vmatprep.mubr.msk.bf16.mxu0 %vm5480_vm4, %v5456_v38 }
 0xc35   : > { %v7039_v16 = vunpack.i.h.bf16 %v7037_v21  ;;  %v7038_v5 = vunpack.i.l.bf16 %v7037_v21 }
 0xc36   : > { %v5438_v32 = vsel %vm5415_vm3, %v5405_v40, %v7043_v1  ;;  %v5439_v2 = vsel %vm5415_vm3, %v5406_v0, %v7044_v61  ;;  %v11495_v1 = vld [vmem:[#allocation30_spill] sm:$0xff]  ;;  %v11496_v0 = vld [vmem:[#allocation33_spill] sm:$0xff] }
 0xc37   : > { %v5459_v24 = vpack.c.bf16 %v5439_v2, %v5438_v32  ;;  %v5436_v43 = vsel %vm5415_vm3, %v5403_v10, %v7038_v5  ;;  %v5437_v50 = vsel %vm5415_vm3, %v5404_v14, %v7039_v16  ;;  %v7052_v54 = vpop.permute.xlu0 %7051  ;;  %v11497_v5 = vld [vmem:[#allocation31_spill] sm:$0xff] }
 0xc38   : > { %v5458_v38 = vpack.c.bf16 %v5437_v50, %v5436_v43  ;;  %v7047_v20 = vpop.permute.xlu1 %7046  ;;  %v7054_v31 = vunpack.i.h.bf16 %v7052_v54  ;;  %v7053_v29 = vunpack.i.l.bf16 %v7052_v54 }
 0xc39   : > { %v7049_v8 = vunpack.i.h.bf16 %v7047_v20  ;;  %v7048_v46 = vunpack.i.l.bf16 %v7047_v20 }
 0xc3a   : > { %v5377_v18 = vsel %vm368_vm0, %v11490_v30, %v7054_v31  ;;  %v5376_v48 = vsel %vm368_vm0, %v11491_v25, %v7053_v29 }
 0xc3b   : > { %v7062_v22 = vpop.permute.xlu0 %7061  ;;  %6764 = vmatmul.mubr.msk.bf16.gmra.mrb[136].mxu0 %vm5480_vm4, %v5457_v28  ;;  %v5375_v28 = vsel %vm368_vm0, %v11492_v36, %v7049_v8  ;;  %v5374_v3 = vsel %vm368_vm0, %v11493_v60, %v7048_v46 }
 0xc3c   : > { %v7057_v35 = vpop.permute.xlu1 %7056  ;;  %6767 = vmatprep.mubr.msk.bf16.mxu0 %vm5480_vm4, %v5458_v38  ;;  %v7063_v45 = vunpack.i.l.bf16 %v7062_v22  ;;  %v7064_v39 = vunpack.i.h.bf16 %v7062_v22 }
 0xc3d   : > { %v7058_v6 = vunpack.i.l.bf16 %v7057_v35  ;;  %v7059_v49 = vunpack.i.h.bf16 %v7057_v35 }
 0xc3e   : > { %v5409_v51 = vsel %vm5382_vm2, %v5376_v48, %v7063_v45  ;;  %v5410_v62 = vsel %vm5382_vm2, %v5377_v18, %v7064_v39 }
 0xc3f   : > { %v7072_v53 = vpop.permute.xlu0 %7071  ;;  %v5407_v57 = vsel %vm5382_vm2, %v5374_v3, %v7058_v6  ;;  %v5408_v44 = vsel %vm5382_vm2, %v5375_v28, %v7059_v49 }
 0xc40   : > { %v7067_v13 = vpop.permute.xlu1 %7066  ;;  %v7074_v33 = vunpack.i.h.bf16 %v7072_v53  ;;  %v7073_v55 = vunpack.i.l.bf16 %v7072_v53 }
 0xc41   : > { %v7069_v56 = vunpack.i.h.bf16 %v7067_v13  ;;  %v7068_v9 = vunpack.i.l.bf16 %v7067_v13 }
 0xc42   : > { %v5381_v61 = vsel %vm368_vm0, %v11494_v41, %v7074_v33  ;;  %v5380_v21 = vsel %vm368_vm0, %v11495_v1, %v7073_v55 }
 0xc43   : > { %v7077_v34 = vpop.permute.xlu0 %7076  ;;  %6768 = vmatmul.mubr.msk.bf16.gmra.mrb[140].mxu0 %vm5480_vm4, %v5459_v24  ;;  %v5379_v16 = vsel %vm368_vm0, %v11496_v0, %v7069_v56  ;;  %v5378_v14 = vsel %vm368_vm0, %v11497_v5, %v7068_v9 }
 0xc44   : > { %v7079_v4 = vunpack.i.h.bf16 %v7077_v34  ;;  %v7078_v17 = vunpack.i.l.bf16 %v7077_v34  ;;  %v7082_v58 = vpop.permute.xlu1 %7081 }
 0xc45   : > { %v7084_v7 = vunpack.i.h.bf16 %v7082_v58  ;;  %v7083_v59 = vunpack.i.l.bf16 %v7082_v58 }
 0xc46   : > { %v5442_v42 = vsel %vm5415_vm3, %v5409_v51, %v7078_v17  ;;  %v5443_v19 = vsel %vm5415_vm3, %v5410_v62, %v7079_v4 }
 0xc47   : > { %v5461_v37 = vpack.c.bf16 %v5443_v19, %v5442_v42  ;;  %v5441_v11 = vsel %vm5415_vm3, %v5408_v44, %v7084_v7  ;;  %v5440_v63 = vsel %vm5415_vm3, %v5407_v57, %v7083_v59  ;;  %v7092_v52 = vpop.permute.xlu0 %7091 }
 0xc48   : > { %v5460_v47 = vpack.c.bf16 %v5441_v11, %v5440_v63  ;;  %v7087_v27 = vpop.permute.xlu1 %7086  ;;  %v7094_v15 = vunpack.i.h.bf16 %v7092_v52  ;;  %v7093_v26 = vunpack.i.l.bf16 %v7092_v52 }
 0xc49   : > { %v7089_v23 = vunpack.i.h.bf16 %v7087_v27  ;;  %v7088_v12 = vunpack.i.l.bf16 %v7087_v27 }
 0xc4a   : > { %6771 = vmatprep.mubr.msk.bf16.mxu0 %vm5480_vm4, %v5460_v47  ;;  %v5413_v24 = vsel %vm5382_vm2, %v5380_v21, %v7093_v26  ;;  %v5414_v43 = vsel %vm5382_vm2, %v5381_v61, %v7094_v15 }
 0xc4b   : > { %v7102_v40 = vpop.permute.xlu0 %7101  ;;  %6772 = vmatmul.mubr.msk.bf16.gmra.mrb[144].mxu0 %vm5480_vm4, %v5461_v37  ;;  %v5412_v38 = vsel %vm5382_vm2, %v5379_v16, %v7089_v23  ;;  %v5411_v20 = vsel %vm5382_vm2, %v5378_v14, %v7088_v12 }
 0xc4c   : > { %v7104_v10 = vunpack.i.h.bf16 %v7102_v40  ;;  %v7103_v32 = vunpack.i.l.bf16 %v7102_v40  ;;  %v7097_v2 = vpop.permute.xlu1 %7096 }
 0xc4d   : > { %v7099_v50 = vunpack.i.h.bf16 %v7097_v2  ;;  %v7098_v54 = vunpack.i.l.bf16 %v7097_v2 }
 0xc4e   : > { %v5446_v22 = vsel %vm5415_vm3, %v5413_v24, %v7103_v32  ;;  %v5447_v35 = vsel %vm5415_vm3, %v5414_v43, %v7104_v10 }
 0xc4f   : > { %v5463_v31 = vpack.c.bf16 %v5447_v35, %v5446_v22  ;;  %v5445_v29 = vsel %vm5415_vm3, %v5412_v38, %v7099_v50  ;;  %v5444_v8 = vsel %vm5415_vm3, %v5411_v20, %v7098_v54 }
 0xc50   : > { %v5462_v53 = vpack.c.bf16 %v5445_v29, %v5444_v8 }
 0xc52   : > { %6775 = vmatprep.mubr.msk.bf16.mxu0 %vm5480_vm4, %v5462_v53 }
 0xc53   : > { %6776 = vmatmul.mubr.msk.bf16.gmra.mrb[148].mxu0 %vm5480_vm4, %v5463_v31 }
 0xc70   : > { %v6749_v46 = vpop.f32.mrb[120].mxu0 }
 0xc71   : > { %5692 = vst.msk [vmem:[%s11085_s21 + $0x10] sm:$0xff] %vm5480_vm4, %v6749_v46  ;;  %v5563_v45 = vpop.f32.mrb[121].mxu0 }
 0xc72   : > { %5690 = vst.msk [vmem:[%s11085_s21] sm:$0xff] %vm5480_vm4, %v5563_v45  ;;  %v6750_v13 = vpop.f32.mrb[122].mxu0 }
 0xc73   : > { %5693 = vst.msk [vmem:[%s11085_s21 + $0x18] sm:$0xff] %vm5480_vm4, %v6750_v13  ;;  %v5566_v39 = vpop.f32.mrb[123].mxu0 }
 0xc74   : > { %5691 = vst.msk [vmem:[%s11085_s21 + $0x8] sm:$0xff] %vm5480_vm4, %v5566_v39 }
 0xc78   : > { %v6753_v6 = vpop.f32.mrb[124].mxu0 }
 0xc79   : > { %5696 = vst.msk [vmem:[%s11085_s21 + $0x30] sm:$0xff] %vm5480_vm4, %v6753_v6  ;;  %v5579_v49 = vpop.f32.mrb[125].mxu0 }
 0xc7a   : > { %5694 = vst.msk [vmem:[%s11085_s21 + $0x20] sm:$0xff] %vm5480_vm4, %v5579_v49  ;;  %v6754_v30 = vpop.f32.mrb[126].mxu0 }
 0xc7b   : > { %5697 = vst.msk [vmem:[%s11085_s21 + $0x38] sm:$0xff] %vm5480_vm4, %v6754_v30  ;;  %v5582_v18 = vpop.f32.mrb[127].mxu0 }
 0xc7c   : > { %5695 = vst.msk [vmem:[%s11085_s21 + $0x28] sm:$0xff] %vm5480_vm4, %v5582_v18 }
 0xcd1   : > { %v6757_v25 = vpop.f32.mrb[128].mxu0 }
 0xcd2   : > { %5700 = vst.msk [vmem:[%s11085_s21 + $0x50] sm:$0xff] %vm5480_vm4, %v6757_v25  ;;  %v5595_v48 = vpop.f32.mrb[129].mxu0 }
 0xcd3   : > { %5698 = vst.msk [vmem:[%s11085_s21 + $0x40] sm:$0xff] %vm5480_vm4, %v5595_v48  ;;  %v6758_v36 = vpop.f32.mrb[130].mxu0 }
 0xcd4   : > { %5701 = vst.msk [vmem:[%s11085_s21 + $0x58] sm:$0xff] %vm5480_vm4, %v6758_v36  ;;  %v5598_v28 = vpop.f32.mrb[131].mxu0 }
 0xcd5   : > { %5699 = vst.msk [vmem:[%s11085_s21 + $0x48] sm:$0xff] %vm5480_vm4, %v5598_v28 }
 0xd06   : > { %v6761_v34 = vpop.f32.mrb[132].mxu0 }
 0xd07   : > { %5704 = vst.msk [vmem:[%s11085_s21 + $0x70] sm:$0xff] %vm5480_vm4, %v6761_v34  ;;  %v5611_v60 = vpop.f32.mrb[133].mxu0 }
 0xd08   : > { %5702 = vst.msk [vmem:[%s11085_s21 + $0x60] sm:$0xff] %vm5480_vm4, %v5611_v60  ;;  %v6762_v3 = vpop.f32.mrb[134].mxu0 }
 0xd09   : > { %5705 = vst.msk [vmem:[%s11085_s21 + $0x78] sm:$0xff] %vm5480_vm4, %v6762_v3  ;;  %v5614_v51 = vpop.f32.mrb[135].mxu0 }
 0xd0a   : > { %5703 = vst.msk [vmem:[%s11085_s21 + $0x68] sm:$0xff] %vm5480_vm4, %v5614_v51 }
 0xd0e   : > { %v6765_v4 = vpop.f32.mrb[136].mxu0 }
 0xd0f   : > { %5708 = vst.msk [vmem:[%s11085_s21 + $0x90] sm:$0xff] %vm5480_vm4, %v6765_v4  ;;  %v5627_v17 = vpop.f32.mrb[137].mxu0 }
 0xd10   : > { %5706 = vst.msk [vmem:[%s11085_s21 + $0x80] sm:$0xff] %vm5480_vm4, %v5627_v17  ;;  %v6766_v58 = vpop.f32.mrb[138].mxu0 }
 0xd11   : > { %5709 = vst.msk [vmem:[%s11085_s21 + $0x98] sm:$0xff] %vm5480_vm4, %v6766_v58  ;;  %v5630_v62 = vpop.f32.mrb[139].mxu0 }
 0xd12   : > { %5707 = vst.msk [vmem:[%s11085_s21 + $0x88] sm:$0xff] %vm5480_vm4, %v5630_v62 }
 0xd16   : > { %v6769_v57 = vpop.f32.mrb[140].mxu0 }
 0xd17   : > { %5712 = vst.msk [vmem:[%s11085_s21 + $0xb0] sm:$0xff] %vm5480_vm4, %v6769_v57  ;;  %v5643_v7 = vpop.f32.mrb[141].mxu0 }
 0xd18   : > { %5710 = vst.msk [vmem:[%s11085_s21 + $0xa0] sm:$0xff] %vm5480_vm4, %v5643_v7  ;;  %v6770_v59 = vpop.f32.mrb[142].mxu0 }
 0xd19   : > { %5713 = vst.msk [vmem:[%s11085_s21 + $0xb8] sm:$0xff] %vm5480_vm4, %v6770_v59  ;;  %v5646_v44 = vpop.f32.mrb[143].mxu0 }
 0xd1a   : > { %5711 = vst.msk [vmem:[%s11085_s21 + $0xa8] sm:$0xff] %vm5480_vm4, %v5646_v44 }
 0xd1e   : > { %v6773_v33 = vpop.f32.mrb[144].mxu0 }
 0xd1f   : > { %5716 = vst.msk [vmem:[%s11085_s21 + $0xd0] sm:$0xff] %vm5480_vm4, %v6773_v33  ;;  %v5659_v42 = vpop.f32.mrb[145].mxu0 }
 0xd20   : > { %5714 = vst.msk [vmem:[%s11085_s21 + $0xc0] sm:$0xff] %vm5480_vm4, %v5659_v42  ;;  %v6774_v19 = vpop.f32.mrb[146].mxu0 }
 0xd21   : > { %5717 = vst.msk [vmem:[%s11085_s21 + $0xd8] sm:$0xff] %vm5480_vm4, %v6774_v19  ;;  %v5662_v55 = vpop.f32.mrb[147].mxu0 }
 0xd22   : > { %5715 = vst.msk [vmem:[%s11085_s21 + $0xc8] sm:$0xff] %vm5480_vm4, %v5662_v55 }
 0xd26   : > { %v6777_v37 = vpop.f32.mrb[148].mxu0 }
 0xd27   : > { %5720 = vst.msk [vmem:[%s11085_s21 + $0xf0] sm:$0xff] %vm5480_vm4, %v6777_v37  ;;  %v5675_v11 = vpop.f32.mrb[149].mxu0 }
 0xd28   : > { %5718 = vst.msk [vmem:[%s11085_s21 + $0xe0] sm:$0xff] %vm5480_vm4, %v5675_v11  ;;  %v6778_v63 = vpop.f32.mrb[150].mxu0 }
 0xd29   : > { %5721 = vst.msk [vmem:[%s11085_s21 + $0xf8] sm:$0xff] %vm5480_vm4, %v6778_v63  ;;  %v5678_v52 = vpop.f32.mrb[151].mxu0 }
 0xd2a   : > { %5719 = vst.msk [vmem:[%s11085_s21 + $0xe8] sm:$0xff] %vm5480_vm4, %v5678_v52 }
 0xd2b PF: > { %s13_s12 = sadd.s32 1, %s7693_s12  }
 0xd2c   : > { %p10_p4 = scmp.ge.s32.totalorder %s13_s12, 4  }
 0xd2e   :  { %12 = sbr.rel (!%p10_p4) target bundleno = 1 (0x1), region = 62 }

</bundles_post_ra>
